<compile_context>
chip_gen: v5e
topology: v5e:2x2
jax: 0.10.0
libtpu: 0.0.40
codegen_flags: <defaults>
</compile_context>

<pallas_src>
import functools

import jax
import jax.numpy as jnp
from jax import lax
from jax.experimental import pallas as pl
from jax.experimental.pallas import tpu as pltpu


# ----------------------------------------------------------------------------
# Generation-aware VMEM budget (v7x: 64 MiB/TC, v5e/v6e: 128 MiB)
# ----------------------------------------------------------------------------
def _query_vmem_capacity_bytes():
    try:
        cap = int(pltpu.get_tpu_info().vmem_capacity_bytes)
        if 16 * 2**20 <= cap <= 2**31:
            return cap
    except Exception:
        pass
    return 64 * 2**20                       # conservative default = v7x per-core VMEM


_VMEM_CAP = _query_vmem_capacity_bytes()
_VMEM_LIMIT = min(int(_VMEM_CAP * 3 // 4), 96 * 2**20)   # leave headroom


def _pick_col_tile(C, bytes_per_col, resident_bytes=0):
    """Largest column tile that (a) divides C, (b) is a multiple of 128 (or the
    full C), and (c) keeps the per-step double-buffered VMEM under budget."""
    if C <= 128:
        return C
    budget = _VMEM_LIMIT - resident_bytes - (2 << 20)     # 2 MiB slack
    t_budget = max(budget // max(bytes_per_col, 1), 128)
    t = int(min(C, 2048, t_budget))
    t -= t % 128
    t = max(t, 128)
    if t >= C and (C // 2) % 128 == 0:
        t = C // 2        # guarantee >=2 tiles -> pipelining + 2-TensorCore sharding
    while C % t:
        t -= 128
        if t < 128:
            return C      # fall back: single full-width block (always legal)
    return t


# ----------------------------------------------------------------------------
# Pallas kernel 1: fused  y = act( BN( x @ w [+ bias] ) ),  column-tiled over C
# ----------------------------------------------------------------------------
def _matmul_bn_act_kernel(*refs, use_bn, has_bias, act, eps):
    it = iter(refs)
    x_ref, w_ref = next(it), next(it)
    b_ref = next(it) if has_bias else None
    g_ref = next(it) if use_bn else None
    be_ref = next(it) if use_bn else None
    o_ref = next(it)

    # bf16 x bf16 -> f32 accumulation on the MXU.
    y = jnp.dot(x_ref[...], w_ref[...], preferred_element_type=jnp.float32)
    if has_bias:
        y = y + b_ref[...].astype(jnp.float32)
    if use_bn:
        # Per-column (== per-feature) batch statistics, one pass, clamped variance.
        mean = jnp.mean(y, axis=0, keepdims=True)
        var = jnp.maximum(jnp.mean(y * y, axis=0, keepdims=True) - mean * mean, 0.0)
        y = (y - mean) * lax.rsqrt(var + eps) * g_ref[...].astype(jnp.float32) \
            + be_ref[...].astype(jnp.float32)
    if act == "relu":
        y = jnp.maximum(y, 0.0)
    elif act == "tanh":
        y = jnp.tanh(y)
    o_ref[...] = y.astype(o_ref.dtype)


def matmul_bn_act(x, w, *, bias=None, gamma=None, beta=None, use_bn=False,
                  act="none", out_dtype=jnp.bfloat16, eps=1e-5):
    """x:[N,K], w:[K,C] -> [N,C].  Only the C axis is tiled (BN is per-column)."""
    N, K = x.shape
    K2, C = w.shape
    assert K == K2
    has_bias = (bias is not None) and (not use_bn)   # BN mean-sub cancels a bias

    x_in = x.astype(jnp.bfloat16)
    w_in = w.astype(jnp.bfloat16)

    out_b = jnp.dtype(out_dtype).itemsize
    tile_c = _pick_col_tile(C, 2 * (K * 2 + N * out_b + 3 * 4),
                            resident_bytes=N * K * 2)

    in_specs = [pl.BlockSpec((N, K), lambda j: (0, 0)),        # resident across tiles
                pl.BlockSpec((K, tile_c), lambda j: (0, j))]
    operands = [x_in, w_in]
    if has_bias:
        in_specs.append(pl.BlockSpec((1, tile_c), lambda j: (0, j)))
        operands.append(bias.reshape(1, C).astype(jnp.float32))
    if use_bn:
        in_specs += [pl.BlockSpec((1, tile_c), lambda j: (0, j)),
                     pl.BlockSpec((1, tile_c), lambda j: (0, j))]
        operands += [gamma.reshape(1, C).astype(jnp.float32),
                     beta.reshape(1, C).astype(jnp.float32)]

    kernel = functools.partial(_matmul_bn_act_kernel, use_bn=use_bn,
                               has_bias=has_bias, act=act, eps=eps)
    return pl.pallas_call(
        kernel,
        out_shape=jax.ShapeDtypeStruct((N, C), out_dtype),
        grid=(C // tile_c,),
        in_specs=in_specs,
        out_specs=pl.BlockSpec((N, tile_c), lambda j: (0, j)),
        compiler_params=pltpu.CompilerParams(
            dimension_semantics=("parallel",),
            vmem_limit_bytes=_VMEM_LIMIT),
    )(*operands)


# ----------------------------------------------------------------------------
# Pallas kernel 2: fused  y = act( BN( x [+ bias] ) )  on a [rows, C] layout
# (BN reduces over rows == over N,H,W for a per-channel BatchNorm2d)
# ----------------------------------------------------------------------------
def _rows_bn_act_kernel(*refs, use_bn, has_bias, act, eps):
    it = iter(refs)
    x_ref = next(it)
    b_ref = next(it) if has_bias else None
    g_ref = next(it) if use_bn else None
    be_ref = next(it) if use_bn else None
    o_ref = next(it)

    y = x_ref[...].astype(jnp.float32)
    if has_bias:
        y = y + b_ref[...].astype(jnp.float32)
    if use_bn:
        mean = jnp.mean(y, axis=0, keepdims=True)
        var = jnp.maximum(jnp.mean(y * y, axis=0, keepdims=True) - mean * mean, 0.0)
        y = (y - mean) * lax.rsqrt(var + eps) * g_ref[...].astype(jnp.float32) \
            + be_ref[...].astype(jnp.float32)
    if act == "relu":
        y = jnp.maximum(y, 0.0)
    elif act == "tanh":
        y = jnp.tanh(y)
    o_ref[...] = y.astype(o_ref.dtype)


def rows_bn_act(x, *, bias=None, gamma=None, beta=None, use_bn=False,
                act="none", out_dtype=jnp.bfloat16, eps=1e-5):
    R, C = x.shape
    has_bias = (bias is not None) and (not use_bn)
    in_b = jnp.dtype(x.dtype).itemsize
    out_b = jnp.dtype(out_dtype).itemsize
    tile_c = _pick_col_tile(C, 2 * (R * in_b + R * out_b + 3 * 4))

    in_specs = [pl.BlockSpec((R, tile_c), lambda j: (0, j))]
    operands = [x]
    if has_bias:
        in_specs.append(pl.BlockSpec((1, tile_c), lambda j: (0, j)))
        operands.append(bias.reshape(1, C).astype(jnp.float32))
    if use_bn:
        in_specs += [pl.BlockSpec((1, tile_c), lambda j: (0, j)),
                     pl.BlockSpec((1, tile_c), lambda j: (0, j))]
        operands += [gamma.reshape(1, C).astype(jnp.float32),
                     beta.reshape(1, C).astype(jnp.float32)]

    kernel = functools.partial(_rows_bn_act_kernel, use_bn=use_bn,
                               has_bias=has_bias, act=act, eps=eps)
    return pl.pallas_call(
        kernel,
        out_shape=jax.ShapeDtypeStruct((R, C), out_dtype),
        grid=(C // tile_c,),
        in_specs=in_specs,
        out_specs=pl.BlockSpec((R, tile_c), lambda j: (0, j)),
        compiler_params=pltpu.CompilerParams(
            dimension_semantics=("parallel",),
            vmem_limit_bytes=_VMEM_LIMIT),
    )(*operands)


# ----------------------------------------------------------------------------
# ConvTranspose2d(k=4, s=2, p=1) via the sub-pixel (phase) decomposition:
# dense matmul on the non-upsampled input -> overlap-add (glue) -> BN/bias + act.
# ----------------------------------------------------------------------------
def _overlap_add_2x(y):
    """y: [B,H,W,C,4,4] with y[b,i,j,c,kh,kw] = sum_ci x[b,i,j,ci]*w[ci,c,kh,kw].
    Returns out[b, 2i+kh-1, 2j+kw-1, c] (+=), i.e. the k=4/s=2/p=1 transposed conv."""
    B, H, W, C, _, _ = y.shape
    yp = jnp.pad(y, ((0, 0), (1, 1), (1, 1), (0, 0), (0, 0), (0, 0)))
    # output phase p -> (input shift, kernel tap) pairs along that axis
    taps = {0: ((0, 1), (-1, 3)), 1: ((0, 2), (1, 0))}
    ph_rows = []
    for ph in (0, 1):
        pw_cols = []
        for pw in (0, 1):
            acc = None
            for di, kh in taps[ph]:
                for dj, kw in taps[pw]:
                    t = yp[:, 1 + di:1 + di + H, 1 + dj:1 + dj + W, :, kh, kw]
                    acc = t if acc is None else acc + t
            pw_cols.append(acc)                          # [B,H,W,C]
        ph_rows.append(jnp.stack(pw_cols, axis=3))       # [B,H,W,2,C]
    out = jnp.stack(ph_rows, axis=2)                     # [B,H,2,W,2,C]
    return out.reshape(B, 2 * H, 2 * W, C)


def deconv4x4_s2_p1(x_nhwc, w_t, bias, *, gamma=None, beta=None, use_bn,
                    act, out_dtype=jnp.bfloat16):
    """w_t: PyTorch ConvTranspose2d weight [C_in, C_out, 4, 4]."""
    B, H, W, C_in = x_nhwc.shape
    C_in2, C_out, kH, kW = w_t.shape
    assert C_in == C_in2 and (kH, kW) == (4, 4)
    w_mat = w_t.reshape(C_in, C_out * kH * kW)           # columns = (c_out, kh, kw)
    y = matmul_bn_act(x_nhwc.reshape(B * H * W, C_in), w_mat,
                      use_bn=False, act="none", out_dtype=jnp.bfloat16)
    y = y.reshape(B, H, W, C_out, kH, kW)
    out = _overlap_add_2x(y)                             # [B, 2H, 2W, C_out]  (glue)
    Ho, Wo = 2 * H, 2 * W

    if use_bn:
        # BN2d: per-channel stats over (B,Ho,Wo) == rows of [B*Ho*Wo, C_out].
        # Conv bias is cancelled by the BN mean subtraction -> skipped.
        out = rows_bn_act(out.reshape(B * Ho * Wo, C_out),
                          gamma=gamma, beta=beta, use_bn=True, act=act,
                          out_dtype=out_dtype)
        return out.reshape(B, Ho, Wo, C_out)

    # No BN: bias + activation on a lane-dense [B*Ho, Wo*C_out] slab (the natural
    # [..., C_out] layout would be 1-lane wide for C_out == 1).
    slab = out.reshape(B * Ho, Wo * C_out)
    bias_row = jnp.tile(bias.astype(jnp.float32), Wo)    # matches (w, c) flattening
    out = rows_bn_act(slab, bias=bias_row, use_bn=False, act=act,
                      out_dtype=out_dtype)
    return out.reshape(B, Ho, Wo, C_out)


# ----------------------------------------------------------------------------
# Generator forward (mirrors the PyTorch module)
# ----------------------------------------------------------------------------
def generator_forward(params, z, label, input_size):
    x = jnp.concatenate([z, label], axis=1)                                  # glue
    # fc biases are followed by BatchNorm1d -> cancelled exactly -> not passed.
    x = matmul_bn_act(x, params["fc1_w"], gamma=params["bn1_g"],
                      beta=params["bn1_b"], use_bn=True, act="relu",
                      out_dtype=jnp.bfloat16)
    x = matmul_bn_act(x, params["fc2_w"], gamma=params["bn2_g"],
                      beta=params["bn2_b"], use_bn=True, act="relu",
                      out_dtype=jnp.bfloat16)
    s4 = input_size // 4
    B = x.shape[0]
    # PyTorch's .view(-1,128,s4,s4) is channel-major; go to NHWC for the matmul
    # deconv path (small layout shuffle in glue, activations stay bf16).
    x = x.reshape(B, 128, s4, s4).transpose(0, 2, 3, 1)                      # [B,s4,s4,128]
    x = deconv4x4_s2_p1(x, params["dc1_w"], params["dc1_b"],
                        gamma=params["bn3_g"], beta=params["bn3_b"],
                        use_bn=True, act="relu", out_dtype=jnp.bfloat16)
    x = deconv4x4_s2_p1(x, params["dc2_w"], params["dc2_b"],
                        use_bn=False, act="tanh", out_dtype=jnp.float32)
    return x.transpose(0, 3, 1, 2)                                           # NHWC -> NCHW


# ----------------------------------------------------------------------------
# Pure-JAX f32 reference (independent check of the Pallas pipeline)
# ----------------------------------------------------------------------------
def reference_forward(params, z, label, input_size, eps=1e-5):
    def bn(y, g, b, axes):
        m = jnp.mean(y, axis=axes, keepdims=True)
        v = jnp.mean(jnp.square(y - m), axis=axes, keepdims=True)
        return (y - m) * lax.rsqrt(v + eps) * g + b

    def convT(x, w_t, b):
        c_out = w_t.shape[1]
        rhs = jnp.flip(w_t, (2, 3)).transpose(1, 0, 2, 3)            # OIHW
        y = lax.conv_general_dilated(x, rhs, window_strides=(1, 1),
                                     padding=[(2, 2), (2, 2)], lhs_dilation=(2, 2),
                                     dimension_numbers=("NCHW", "OIHW", "NCHW"))
        return y + b.reshape(1, c_out, 1, 1)

    x = jnp.concatenate([z, label], axis=1)
    x = jnp.maximum(bn(x @ params["fc1_w"] + params["fc1_b"],
                       params["bn1_g"], params["bn1_b"], (0,)), 0.0)
    x = jnp.maximum(bn(x @ params["fc2_w"] + params["fc2_b"],
                       params["bn2_g"], params["bn2_b"], (0,)), 0.0)
    s4 = input_size // 4
    x = x.reshape(-1, 128, s4, s4)
    x = convT(x, params["dc1_w"], params["dc1_b"])
    x = jnp.maximum(bn(x, params["bn3_g"].reshape(1, -1, 1, 1),
                       params["bn3_b"].reshape(1, -1, 1, 1), (0, 2, 3)), 0.0)
    return jnp.tanh(convT(x, params["dc2_w"], params["dc2_b"]))


# ----------------------------------------------------------------------------
def init_params(key, input_dim, class_num, input_size, output_dim):
    s4 = input_size // 4
    fc2_out = 128 * s4 * s4
    ks = jax.random.split(key, 8)
    n = lambda k, s: 0.02 * jax.random.normal(k, s, jnp.float32)     # ~ normal(0, 0.02)
    return {
        "fc1_w": n(ks[0], (input_dim + class_num, 1024)),
        "fc1_b": jnp.zeros((1024,), jnp.float32),
        "bn1_g": 1.0 + n(ks[1], (1024,)),
        "bn1_b": jnp.zeros((1024,), jnp.float32),
        "fc2_w": n(ks[2], (1024, fc2_out)),
        "fc2_b": jnp.zeros((fc2_out,), jnp.float32),
        "bn2_g": 1.0 + n(ks[3], (fc2_out,)),
        "bn2_b": jnp.zeros((fc2_out,), jnp.float32),
        "dc1_w": n(ks[4], (128, 64, 4, 4)),                          # [C_in, C_out, kH, kW]
        "dc1_b": jnp.zeros((64,), jnp.float32),
        "bn3_g": 1.0 + n(ks[5], (64,)),
        "bn3_b": jnp.zeros((64,), jnp.float32),
        "dc2_w": n(ks[6], (64, output_dim, 4, 4)),
        "dc2_b": jnp.zeros((output_dim,), jnp.float32),
    }


if __name__ == "__main__":
    # small but forward-consistent config
    B, INPUT_DIM, CLASS_NUM, INPUT_SIZE, OUTPUT_DIM = 4, 32, 8, 16, 1

    key = jax.random.PRNGKey(0)
    kp, kz, kl = jax.random.split(key, 3)
    params = init_params(kp, INPUT_DIM, CLASS_NUM, INPUT_SIZE, OUTPUT_DIM)

    z = jax.random.normal(kz, (B, INPUT_DIM), jnp.float32)
    label = jax.nn.one_hot(jax.random.randint(kl, (B,), 0, CLASS_NUM),
                           CLASS_NUM, dtype=jnp.float32)

    fwd = jax.jit(generator_forward, static_argnums=3)
    out = jax.block_until_ready(fwd(params, z, label, INPUT_SIZE))
    assert out.shape == (B, OUTPUT_DIM, INPUT_SIZE, INPUT_SIZE), out.shape
    assert bool(jnp.all(jnp.isfinite(out)))

    # Reference is full f32; the Pallas path uses bf16 MXU inputs + bf16 activations,
    # so validate with a mean/max error budget (structural bugs give O(0.1-1) errors).
    ref = jax.block_until_ready(reference_forward(params, z, label, INPUT_SIZE))
    err = jnp.abs(out - ref)
    mean_err, max_err = float(jnp.mean(err)), float(jnp.max(err))
    assert mean_err < 2.5e-2 and max_err < 1.5e-1, (mean_err, max_err)

    print("KERNEL_OK")
</pallas_src>

<mosaic_0001>
module attributes {stable_mosaic.version = 11 : i64} {
  func.func @_matmul_bn_act_kernel(%arg0: i32, %arg1: memref<4x40xbf16, #tpu.memory_space<vmem>>, %arg2: memref<40x512xbf16, #tpu.memory_space<vmem>>, %arg3: memref<1x512xf32, #tpu.memory_space<vmem>>, %arg4: memref<1x512xf32, #tpu.memory_space<vmem>>, %arg5: memref<4x512xbf16, #tpu.memory_space<vmem>>) attributes {dimension_semantics = [#tpu.dimension_semantics<parallel>], iteration_bounds = array<i64: 2>, scalar_prefetch = 0 : i64, scratch_operands = 0 : i64, tpu.core_type = #tpu.core_type<tc>, window_params = [{pipeline_mode = #tpu.pipeline_mode<synchronous>, transform_indices = @transform_0, window_bounds = array<i64: 4, 40>}, {transform_indices = @transform_1, window_bounds = array<i64: 40, 512>}, {transform_indices = @transform_2, window_bounds = array<i64: 1, 512>}, {transform_indices = @transform_3, window_bounds = array<i64: 1, 512>}, {transform_indices = @transform_4, window_bounds = array<i64: 4, 512>}]} {
    %c0 = arith.constant 0 : index
    %c0_0 = arith.constant 0 : index
    %0 = vector.load %arg1[%c0, %c0_0] : memref<4x40xbf16, #tpu.memory_space<vmem>>, vector<4x40xbf16>
    %c0_1 = arith.constant 0 : index
    %c0_2 = arith.constant 0 : index
    %1 = vector.load %arg2[%c0_1, %c0_2] : memref<40x512xbf16, #tpu.memory_space<vmem>>, vector<40x512xbf16>
    %cst = arith.constant dense<0.000000e+00> : vector<4x512xf32>
    %2 = tpu.matmul %0, %1, %cst {dimension_numbers = #tpu.dot_dimension_numbers<[1], [0], [0], [1], [0, 0, 1, 1], [], []>} : vector<4x40xbf16>, vector<40x512xbf16>, vector<4x512xf32> -> vector<4x512xf32>
    %cst_3 = arith.constant dense<0.000000e+00> : vector<512xf32>
    %3 = vector.multi_reduction <add>, %2, %cst_3 [0] : vector<4x512xf32> to vector<512xf32>
    %4 = vector.shape_cast %3 : vector<512xf32> to vector<1x512xf32>
    %cst_4 = arith.constant 4.000000e+00 : f32
    %5 = vector.broadcast %cst_4 : f32 to vector<1x512xf32>
    %6 = arith.divf %4, %5 : vector<1x512xf32>
    %7 = arith.mulf %2, %2 : vector<4x512xf32>
    %cst_5 = arith.constant dense<0.000000e+00> : vector<512xf32>
    %8 = vector.multi_reduction <add>, %7, %cst_5 [0] : vector<4x512xf32> to vector<512xf32>
    %9 = vector.shape_cast %8 : vector<512xf32> to vector<1x512xf32>
    %cst_6 = arith.constant 4.000000e+00 : f32
    %10 = vector.broadcast %cst_6 : f32 to vector<1x512xf32>
    %11 = arith.divf %9, %10 : vector<1x512xf32>
    %12 = arith.mulf %6, %6 : vector<1x512xf32>
    %13 = arith.subf %11, %12 : vector<1x512xf32>
    %cst_7 = arith.constant 0.000000e+00 : f32
    %14 = vector.broadcast %cst_7 : f32 to vector<1x512xf32>
    %15 = arith.maximumf %13, %14 : vector<1x512xf32>
    %16 = vector.broadcast %6 : vector<1x512xf32> to vector<4x512xf32>
    %17 = arith.subf %2, %16 : vector<4x512xf32>
    %cst_8 = arith.constant 9.99999974E-6 : f32
    %18 = vector.broadcast %cst_8 : f32 to vector<1x512xf32>
    %19 = arith.addf %15, %18 : vector<1x512xf32>
    %20 = math.rsqrt %19 : vector<1x512xf32>
    %21 = vector.broadcast %20 : vector<1x512xf32> to vector<4x512xf32>
    %22 = arith.mulf %17, %21 : vector<4x512xf32>
    %c0_9 = arith.constant 0 : index
    %c0_10 = arith.constant 0 : index
    %23 = vector.load %arg3[%c0_9, %c0_10] : memref<1x512xf32, #tpu.memory_space<vmem>>, vector<1x512xf32>
    %24 = vector.broadcast %23 : vector<1x512xf32> to vector<4x512xf32>
    %25 = arith.mulf %22, %24 : vector<4x512xf32>
    %c0_11 = arith.constant 0 : index
    %c0_12 = arith.constant 0 : index
    %26 = vector.load %arg4[%c0_11, %c0_12] : memref<1x512xf32, #tpu.memory_space<vmem>>, vector<1x512xf32>
    %27 = vector.broadcast %26 : vector<1x512xf32> to vector<4x512xf32>
    %28 = arith.addf %25, %27 : vector<4x512xf32>
    %cst_13 = arith.constant 0.000000e+00 : f32
    %29 = vector.broadcast %cst_13 : f32 to vector<4x512xf32>
    %30 = arith.maximumf %28, %29 : vector<4x512xf32>
    %31 = arith.truncf %30 : vector<4x512xf32> to vector<4x512xbf16>
    %c0_14 = arith.constant 0 : index
    %c0_15 = arith.constant 0 : index
    %32 = vector.load %arg5[%c0_14, %c0_15] : memref<4x512xbf16, #tpu.memory_space<vmem>>, vector<4x512xbf16>
    tpu.vector_store %arg5[%c0_14, %c0_15], %31 {strides = array<i32>} : memref<4x512xbf16, #tpu.memory_space<vmem>>, vector<4x512xbf16>,
    return
  }
  func.func @transform_0(%arg0: i32) -> (i32, i32) {
    %c0_i32 = arith.constant 0 : i32
    %c0_i32_0 = arith.constant 0 : i32
    %c0_i32_1 = arith.constant 0 : i32
    return %c0_i32, %c0_i32_0 : i32, i32
  }
  func.func @transform_1(%arg0: i32) -> (i32, i32) {
    %c0_i32 = arith.constant 0 : i32
    %c0_i32_0 = arith.constant 0 : i32
    return %c0_i32, %arg0 : i32, i32
  }
  func.func @transform_2(%arg0: i32) -> (i32, i32) {
    %c0_i32 = arith.constant 0 : i32
    %c0_i32_0 = arith.constant 0 : i32
    return %c0_i32, %arg0 : i32, i32
  }
  func.func @transform_3(%arg0: i32) -> (i32, i32) {
    %c0_i32 = arith.constant 0 : i32
    %c0_i32_0 = arith.constant 0 : i32
    return %c0_i32, %arg0 : i32, i32
  }
  func.func @transform_4(%arg0: i32) -> (i32, i32) {
    %c0_i32 = arith.constant 0 : i32
    %c0_i32_0 = arith.constant 0 : i32
    return %c0_i32, %arg0 : i32, i32
  }
}

module attributes {stable_mosaic.version = 11 : i64} {
  func.func @_matmul_bn_act_kernel(%arg0: i32, %arg1: memref<4x1024xbf16, #tpu.memory_space<vmem>>, %arg2: memref<1024x1024xbf16, #tpu.memory_space<vmem>>, %arg3: memref<1x1024xf32, #tpu.memory_space<vmem>>, %arg4: memref<1x1024xf32, #tpu.memory_space<vmem>>, %arg5: memref<4x1024xbf16, #tpu.memory_space<vmem>>) attributes {dimension_semantics = [#tpu.dimension_semantics<parallel>], iteration_bounds = array<i64: 2>, scalar_prefetch = 0 : i64, scratch_operands = 0 : i64, tpu.core_type = #tpu.core_type<tc>, window_params = [{pipeline_mode = #tpu.pipeline_mode<synchronous>, transform_indices = @transform_0, window_bounds = array<i64: 4, 1024>}, {transform_indices = @transform_1, window_bounds = array<i64: 1024, 1024>}, {transform_indices = @transform_2, window_bounds = array<i64: 1, 1024>}, {transform_indices = @transform_3, window_bounds = array<i64: 1, 1024>}, {transform_indices = @transform_4, window_bounds = array<i64: 4, 1024>}]} {
    %c0 = arith.constant 0 : index
    %c0_0 = arith.constant 0 : index
    %0 = vector.load %arg1[%c0, %c0_0] : memref<4x1024xbf16, #tpu.memory_space<vmem>>, vector<4x1024xbf16>
    %c0_1 = arith.constant 0 : index
    %c0_2 = arith.constant 0 : index
    %1 = vector.load %arg2[%c0_1, %c0_2] : memref<1024x1024xbf16, #tpu.memory_space<vmem>>, vector<1024x1024xbf16>
    %cst = arith.constant dense<0.000000e+00> : vector<4x1024xf32>
    %2 = tpu.matmul %0, %1, %cst {dimension_numbers = #tpu.dot_dimension_numbers<[1], [0], [0], [1], [0, 0, 1, 1], [], []>} : vector<4x1024xbf16>, vector<1024x1024xbf16>, vector<4x1024xf32> -> vector<4x1024xf32>
    %cst_3 = arith.constant dense<0.000000e+00> : vector<1024xf32>
    %3 = vector.multi_reduction <add>, %2, %cst_3 [0] : vector<4x1024xf32> to vector<1024xf32>
    %4 = vector.shape_cast %3 : vector<1024xf32> to vector<1x1024xf32>
    %cst_4 = arith.constant 4.000000e+00 : f32
    %5 = vector.broadcast %cst_4 : f32 to vector<1x1024xf32>
    %6 = arith.divf %4, %5 : vector<1x1024xf32>
    %7 = arith.mulf %2, %2 : vector<4x1024xf32>
    %cst_5 = arith.constant dense<0.000000e+00> : vector<1024xf32>
    %8 = vector.multi_reduction <add>, %7, %cst_5 [0] : vector<4x1024xf32> to vector<1024xf32>
    %9 = vector.shape_cast %8 : vector<1024xf32> to vector<1x1024xf32>
    %cst_6 = arith.constant 4.000000e+00 : f32
    %10 = vector.broadcast %cst_6 : f32 to vector<1x1024xf32>
    %11 = arith.divf %9, %10 : vector<1x1024xf32>
    %12 = arith.mulf %6, %6 : vector<1x1024xf32>
    %13 = arith.subf %11, %12 : vector<1x1024xf32>
    %cst_7 = arith.constant 0.000000e+00 : f32
    %14 = vector.broadcast %cst_7 : f32 to vector<1x1024xf32>
    %15 = arith.maximumf %13, %14 : vector<1x1024xf32>
    %16 = vector.broadcast %6 : vector<1x1024xf32> to vector<4x1024xf32>
    %17 = arith.subf %2, %16 : vector<4x1024xf32>
    %cst_8 = arith.constant 9.99999974E-6 : f32
    %18 = vector.broadcast %cst_8 : f32 to vector<1x1024xf32>
    %19 = arith.addf %15, %18 : vector<1x1024xf32>
    %20 = math.rsqrt %19 : vector<1x1024xf32>
    %21 = vector.broadcast %20 : vector<1x1024xf32> to vector<4x1024xf32>
    %22 = arith.mulf %17, %21 : vector<4x1024xf32>
    %c0_9 = arith.constant 0 : index
    %c0_10 = arith.constant 0 : index
    %23 = vector.load %arg3[%c0_9, %c0_10] : memref<1x1024xf32, #tpu.memory_space<vmem>>, vector<1x1024xf32>
    %24 = vector.broadcast %23 : vector<1x1024xf32> to vector<4x1024xf32>
    %25 = arith.mulf %22, %24 : vector<4x1024xf32>
    %c0_11 = arith.constant 0 : index
    %c0_12 = arith.constant 0 : index
    %26 = vector.load %arg4[%c0_11, %c0_12] : memref<1x1024xf32, #tpu.memory_space<vmem>>, vector<1x1024xf32>
    %27 = vector.broadcast %26 : vector<1x1024xf32> to vector<4x1024xf32>
    %28 = arith.addf %25, %27 : vector<4x1024xf32>
    %cst_13 = arith.constant 0.000000e+00 : f32
    %29 = vector.broadcast %cst_13 : f32 to vector<4x1024xf32>
    %30 = arith.maximumf %28, %29 : vector<4x1024xf32>
    %31 = arith.truncf %30 : vector<4x1024xf32> to vector<4x1024xbf16>
    %c0_14 = arith.constant 0 : index
    %c0_15 = arith.constant 0 : index
    %32 = vector.load %arg5[%c0_14, %c0_15] : memref<4x1024xbf16, #tpu.memory_space<vmem>>, vector<4x1024xbf16>
    tpu.vector_store %arg5[%c0_14, %c0_15], %31 {strides = array<i32>} : memref<4x1024xbf16, #tpu.memory_space<vmem>>, vector<4x1024xbf16>,
    return
  }
  func.func @transform_0(%arg0: i32) -> (i32, i32) {
    %c0_i32 = arith.constant 0 : i32
    %c0_i32_0 = arith.constant 0 : i32
    %c0_i32_1 = arith.constant 0 : i32
    return %c0_i32, %c0_i32_0 : i32, i32
  }
  func.func @transform_1(%arg0: i32) -> (i32, i32) {
    %c0_i32 = arith.constant 0 : i32
    %c0_i32_0 = arith.constant 0 : i32
    return %c0_i32, %arg0 : i32, i32
  }
  func.func @transform_2(%arg0: i32) -> (i32, i32) {
    %c0_i32 = arith.constant 0 : i32
    %c0_i32_0 = arith.constant 0 : i32
    return %c0_i32, %arg0 : i32, i32
  }
  func.func @transform_3(%arg0: i32) -> (i32, i32) {
    %c0_i32 = arith.constant 0 : i32
    %c0_i32_0 = arith.constant 0 : i32
    return %c0_i32, %arg0 : i32, i32
  }
  func.func @transform_4(%arg0: i32) -> (i32, i32) {
    %c0_i32 = arith.constant 0 : i32
    %c0_i32_0 = arith.constant 0 : i32
    return %c0_i32, %arg0 : i32, i32
  }
}

module attributes {stable_mosaic.version = 11 : i64} {
  func.func @_matmul_bn_act_kernel(%arg0: i32, %arg1: memref<64x128xbf16, #tpu.memory_space<vmem>>, %arg2: memref<128x512xbf16, #tpu.memory_space<vmem>>, %arg3: memref<64x512xbf16, #tpu.memory_space<vmem>>) attributes {dimension_semantics = [#tpu.dimension_semantics<parallel>], iteration_bounds = array<i64: 2>, scalar_prefetch = 0 : i64, scratch_operands = 0 : i64, tpu.core_type = #tpu.core_type<tc>, window_params = [{pipeline_mode = #tpu.pipeline_mode<synchronous>, transform_indices = @transform_0, window_bounds = array<i64: 64, 128>}, {transform_indices = @transform_1, window_bounds = array<i64: 128, 512>}, {transform_indices = @transform_2, window_bounds = array<i64: 64, 512>}]} {
    %c0 = arith.constant 0 : index
    %c0_0 = arith.constant 0 : index
    %0 = vector.load %arg1[%c0, %c0_0] : memref<64x128xbf16, #tpu.memory_space<vmem>>, vector<64x128xbf16>
    %c0_1 = arith.constant 0 : index
    %c0_2 = arith.constant 0 : index
    %1 = vector.load %arg2[%c0_1, %c0_2] : memref<128x512xbf16, #tpu.memory_space<vmem>>, vector<128x512xbf16>
    %cst = arith.constant dense<0.000000e+00> : vector<64x512xf32>
    %2 = tpu.matmul %0, %1, %cst {dimension_numbers = #tpu.dot_dimension_numbers<[1], [0], [0], [1], [0, 0, 1, 1], [], []>} : vector<64x128xbf16>, vector<128x512xbf16>, vector<64x512xf32> -> vector<64x512xf32>
    %3 = arith.truncf %2 : vector<64x512xf32> to vector<64x512xbf16>
    %c0_3 = arith.constant 0 : index
    %c0_4 = arith.constant 0 : index
    %4 = vector.load %arg3[%c0_3, %c0_4] : memref<64x512xbf16, #tpu.memory_space<vmem>>, vector<64x512xbf16>
    tpu.vector_store %arg3[%c0_3, %c0_4], %3 {strides = array<i32>} : memref<64x512xbf16, #tpu.memory_space<vmem>>, vector<64x512xbf16>,
    return
  }
  func.func @transform_0(%arg0: i32) -> (i32, i32) {
    %c0_i32 = arith.constant 0 : i32
    %c0_i32_0 = arith.constant 0 : i32
    %c0_i32_1 = arith.constant 0 : i32
    return %c0_i32, %c0_i32_0 : i32, i32
  }
  func.func @transform_1(%arg0: i32) -> (i32, i32) {
    %c0_i32 = arith.constant 0 : i32
    %c0_i32_0 = arith.constant 0 : i32
    return %c0_i32, %arg0 : i32, i32
  }
  func.func @transform_2(%arg0: i32) -> (i32, i32) {
    %c0_i32 = arith.constant 0 : i32
    %c0_i32_0 = arith.constant 0 : i32
    return %c0_i32, %arg0 : i32, i32
  }
}

module attributes {stable_mosaic.version = 11 : i64} {
  func.func @_rows_bn_act_kernel(%arg0: i32, %arg1: memref<256x64xbf16, #tpu.memory_space<vmem>>, %arg2: memref<1x64xf32, #tpu.memory_space<vmem>>, %arg3: memref<1x64xf32, #tpu.memory_space<vmem>>, %arg4: memref<256x64xbf16, #tpu.memory_space<vmem>>) attributes {dimension_semantics = [#tpu.dimension_semantics<parallel>], iteration_bounds = array<i64: 1>, scalar_prefetch = 0 : i64, scratch_operands = 0 : i64, tpu.core_type = #tpu.core_type<tc>, window_params = [{transform_indices = @transform_0, window_bounds = array<i64: 256, 64>}, {transform_indices = @transform_1, window_bounds = array<i64: 1, 64>}, {transform_indices = @transform_2, window_bounds = array<i64: 1, 64>}, {transform_indices = @transform_3, window_bounds = array<i64: 256, 64>}]} {
    %c0 = arith.constant 0 : index
    %c0_0 = arith.constant 0 : index
    %0 = vector.load %arg1[%c0, %c0_0] : memref<256x64xbf16, #tpu.memory_space<vmem>>, vector<256x64xbf16>
    %1 = arith.extf %0 : vector<256x64xbf16> to vector<256x64xf32>
    %cst = arith.constant dense<0.000000e+00> : vector<64xf32>
    %2 = vector.multi_reduction <add>, %1, %cst [0] : vector<256x64xf32> to vector<64xf32>
    %3 = vector.shape_cast %2 : vector<64xf32> to vector<1x64xf32>
    %cst_1 = arith.constant 2.560000e+02 : f32
    %4 = vector.broadcast %cst_1 : f32 to vector<1x64xf32>
    %5 = arith.divf %3, %4 : vector<1x64xf32>
    %6 = arith.mulf %1, %1 : vector<256x64xf32>
    %cst_2 = arith.constant dense<0.000000e+00> : vector<64xf32>
    %7 = vector.multi_reduction <add>, %6, %cst_2 [0] : vector<256x64xf32> to vector<64xf32>
    %8 = vector.shape_cast %7 : vector<64xf32> to vector<1x64xf32>
    %cst_3 = arith.constant 2.560000e+02 : f32
    %9 = vector.broadcast %cst_3 : f32 to vector<1x64xf32>
    %10 = arith.divf %8, %9 : vector<1x64xf32>
    %11 = arith.mulf %5, %5 : vector<1x64xf32>
    %12 = arith.subf %10, %11 : vector<1x64xf32>
    %cst_4 = arith.constant 0.000000e+00 : f32
    %13 = vector.broadcast %cst_4 : f32 to vector<1x64xf32>
    %14 = arith.maximumf %12, %13 : vector<1x64xf32>
    %15 = vector.broadcast %5 : vector<1x64xf32> to vector<256x64xf32>
    %16 = arith.subf %1, %15 : vector<256x64xf32>
    %cst_5 = arith.constant 9.99999974E-6 : f32
    %17 = vector.broadcast %cst_5 : f32 to vector<1x64xf32>
    %18 = arith.addf %14, %17 : vector<1x64xf32>
    %19 = math.rsqrt %18 : vector<1x64xf32>
    %20 = vector.broadcast %19 : vector<1x64xf32> to vector<256x64xf32>
    %21 = arith.mulf %16, %20 : vector<256x64xf32>
    %c0_6 = arith.constant 0 : index
    %c0_7 = arith.constant 0 : index
    %22 = vector.load %arg2[%c0_6, %c0_7] : memref<1x64xf32, #tpu.memory_space<vmem>>, vector<1x64xf32>
    %23 = vector.broadcast %22 : vector<1x64xf32> to vector<256x64xf32>
    %24 = arith.mulf %21, %23 : vector<256x64xf32>
    %c0_8 = arith.constant 0 : index
    %c0_9 = arith.constant 0 : index
    %25 = vector.load %arg3[%c0_8, %c0_9] : memref<1x64xf32, #tpu.memory_space<vmem>>, vector<1x64xf32>
    %26 = vector.broadcast %25 : vector<1x64xf32> to vector<256x64xf32>
    %27 = arith.addf %24, %26 : vector<256x64xf32>
    %cst_10 = arith.constant 0.000000e+00 : f32
    %28 = vector.broadcast %cst_10 : f32 to vector<256x64xf32>
    %29 = arith.maximumf %27, %28 : vector<256x64xf32>
    %30 = arith.truncf %29 : vector<256x64xf32> to vector<256x64xbf16>
    %c0_11 = arith.constant 0 : index
    %c0_12 = arith.constant 0 : index
    %31 = vector.load %arg4[%c0_11, %c0_12] : memref<256x64xbf16, #tpu.memory_space<vmem>>, vector<256x64xbf16>
    tpu.vector_store %arg4[%c0_11, %c0_12], %30 {strides = array<i32>} : memref<256x64xbf16, #tpu.memory_space<vmem>>, vector<256x64xbf16>,
    return
  }
  func.func @transform_0(%arg0: i32) -> (i32, i32) {
    %c0_i32 = arith.constant 0 : i32
    %c0_i32_0 = arith.constant 0 : i32
    return %c0_i32, %arg0 : i32, i32
  }
  func.func @transform_1(%arg0: i32) -> (i32, i32) {
    %c0_i32 = arith.constant 0 : i32
    %c0_i32_0 = arith.constant 0 : i32
    return %c0_i32, %arg0 : i32, i32
  }
  func.func @transform_2(%arg0: i32) -> (i32, i32) {
    %c0_i32 = arith.constant 0 : i32
    %c0_i32_0 = arith.constant 0 : i32
    return %c0_i32, %arg0 : i32, i32
  }
  func.func @transform_3(%arg0: i32) -> (i32, i32) {
    %c0_i32 = arith.constant 0 : i32
    %c0_i32_0 = arith.constant 0 : i32
    return %c0_i32, %arg0 : i32, i32
  }
}

module attributes {stable_mosaic.version = 11 : i64} {
  func.func @_matmul_bn_act_kernel(%arg0: i32, %arg1: memref<256x64xbf16, #tpu.memory_space<vmem>>, %arg2: memref<64x16xbf16, #tpu.memory_space<vmem>>, %arg3: memref<256x16xbf16, #tpu.memory_space<vmem>>) attributes {dimension_semantics = [#tpu.dimension_semantics<parallel>], iteration_bounds = array<i64: 1>, scalar_prefetch = 0 : i64, scratch_operands = 0 : i64, tpu.core_type = #tpu.core_type<tc>, window_params = [{pipeline_mode = #tpu.pipeline_mode<synchronous>, transform_indices = @transform_0, window_bounds = array<i64: 256, 64>}, {transform_indices = @transform_1, window_bounds = array<i64: 64, 16>}, {transform_indices = @transform_2, window_bounds = array<i64: 256, 16>}]} {
    %c0 = arith.constant 0 : index
    %c0_0 = arith.constant 0 : index
    %0 = vector.load %arg1[%c0, %c0_0] : memref<256x64xbf16, #tpu.memory_space<vmem>>, vector<256x64xbf16>
    %c0_1 = arith.constant 0 : index
    %c0_2 = arith.constant 0 : index
    %1 = vector.load %arg2[%c0_1, %c0_2] : memref<64x16xbf16, #tpu.memory_space<vmem>>, vector<64x16xbf16>
    %cst = arith.constant dense<0.000000e+00> : vector<256x16xf32>
    %2 = tpu.matmul %0, %1, %cst {dimension_numbers = #tpu.dot_dimension_numbers<[1], [0], [0], [1], [0, 0, 1, 1], [], []>} : vector<256x64xbf16>, vector<64x16xbf16>, vector<256x16xf32> -> vector<256x16xf32>
    %3 = arith.truncf %2 : vector<256x16xf32> to vector<256x16xbf16>
    %c0_3 = arith.constant 0 : index
    %c0_4 = arith.constant 0 : index
    %4 = vector.load %arg3[%c0_3, %c0_4] : memref<256x16xbf16, #tpu.memory_space<vmem>>, vector<256x16xbf16>
    tpu.vector_store %arg3[%c0_3, %c0_4], %3 {strides = array<i32>} : memref<256x16xbf16, #tpu.memory_space<vmem>>, vector<256x16xbf16>,
    return
  }
  func.func @transform_0(%arg0: i32) -> (i32, i32) {
    %c0_i32 = arith.constant 0 : i32
    %c0_i32_0 = arith.constant 0 : i32
    %c0_i32_1 = arith.constant 0 : i32
    return %c0_i32, %c0_i32_0 : i32, i32
  }
  func.func @transform_1(%arg0: i32) -> (i32, i32) {
    %c0_i32 = arith.constant 0 : i32
    %c0_i32_0 = arith.constant 0 : i32
    return %c0_i32, %arg0 : i32, i32
  }
  func.func @transform_2(%arg0: i32) -> (i32, i32) {
    %c0_i32 = arith.constant 0 : i32
    %c0_i32_0 = arith.constant 0 : i32
    return %c0_i32, %arg0 : i32, i32
  }
}

module attributes {stable_mosaic.version = 11 : i64} {
  func.func @_rows_bn_act_kernel(%arg0: i32, %arg1: memref<64x16xbf16, #tpu.memory_space<vmem>>, %arg2: memref<1x16xf32, #tpu.memory_space<vmem>>, %arg3: memref<64x16xf32, #tpu.memory_space<vmem>>) attributes {dimension_semantics = [#tpu.dimension_semantics<parallel>], iteration_bounds = array<i64: 1>, scalar_prefetch = 0 : i64, scratch_operands = 0 : i64, tpu.core_type = #tpu.core_type<tc>, window_params = [{transform_indices = @transform_0, window_bounds = array<i64: 64, 16>}, {transform_indices = @transform_1, window_bounds = array<i64: 1, 16>}, {transform_indices = @transform_2, window_bounds = array<i64: 64, 16>}]} {
    %c0 = arith.constant 0 : index
    %c0_0 = arith.constant 0 : index
    %0 = vector.load %arg1[%c0, %c0_0] : memref<64x16xbf16, #tpu.memory_space<vmem>>, vector<64x16xbf16>
    %1 = arith.extf %0 : vector<64x16xbf16> to vector<64x16xf32>
    %c0_1 = arith.constant 0 : index
    %c0_2 = arith.constant 0 : index
    %2 = vector.load %arg2[%c0_1, %c0_2] : memref<1x16xf32, #tpu.memory_space<vmem>>, vector<1x16xf32>
    %3 = vector.broadcast %2 : vector<1x16xf32> to vector<64x16xf32>
    %4 = arith.addf %1, %3 : vector<64x16xf32>
    %5 = math.tanh %4 : vector<64x16xf32>
    %c0_3 = arith.constant 0 : index
    %c0_4 = arith.constant 0 : index
    %6 = vector.load %arg3[%c0_3, %c0_4] : memref<64x16xf32, #tpu.memory_space<vmem>>, vector<64x16xf32>
    tpu.vector_store %arg3[%c0_3, %c0_4], %5 {strides = array<i32>} : memref<64x16xf32, #tpu.memory_space<vmem>>, vector<64x16xf32>,
    return
  }
  func.func @transform_0(%arg0: i32) -> (i32, i32) {
    %c0_i32 = arith.constant 0 : i32
    %c0_i32_0 = arith.constant 0 : i32
    return %c0_i32, %arg0 : i32, i32
  }
  func.func @transform_1(%arg0: i32) -> (i32, i32) {
    %c0_i32 = arith.constant 0 : i32
    %c0_i32_0 = arith.constant 0 : i32
    return %c0_i32, %arg0 : i32, i32
  }
  func.func @transform_2(%arg0: i32) -> (i32, i32) {
    %c0_i32 = arith.constant 0 : i32
    %c0_i32_0 = arith.constant 0 : i32
    return %c0_i32, %arg0 : i32, i32
  }
}

</mosaic_0001>

<bundles_post_ra>
// kernel: generator_forward.6
= control target key start
LH: loop header
LB: loop body
LE: loop exit
PB: predicated region body
PF: predicated region fallthrough
CT: control target
= control target key end

     0   :  { %s821_s15 = smov 0   ;;  %s823_s16 = smov 0   ;;  %s974_s0 = inlined_call_operand.vmem [shape: bf16[4,40], index: 0, kind: input, shape index: {}]   ;;  %s975_s1 = inlined_call_operand.vmem [shape: bf16[40,1024], index: 1, kind: input, shape index: {}]   ;;  %s976_s2 = inlined_call_operand.vmem [shape: f32[1,1024], index: 2, kind: input, shape index: {}]   ;;  %s977_s3 = inlined_call_operand.vmem [shape: f32[1,1024], index: 3, kind: input, shape index: {}]   ;;  %s978_s4 = inlined_call_operand.vmem [shape: bf16[4,1024], index: 4, kind: output, shape index: {}]  }
   0x1   :  { %s825_s17 = smov 0  }
   0x2 LB: > { %s676_s18 = sadd.s32 4294967295, %s793_s17   ;;  %s838_s19 = sadd.s32 1, %s793_s17   ;;  %s793_s17 = sphi %s825_s17, %s981_s17   ;;  %s789_s16 = sphi %s823_s16, %s980_s16   ;;  %s785_s15 = sphi %s821_s15, %s979_s15  }
   0x3   : > { %s39_s20 = ssub.s32 %s793_s17, %s838_s19  ;;  %s42_s21 = sadd.s32 1, %s789_s16 }
   0x4   : > { %p40_p0 = scmp.eq.s32.totalorder %s39_s20, 0  ;;  %p49_p1 = scmp.ne.s32.totalorder %s789_s16, %s785_s15 }
   0x5   : > { %p50_p2 = scmp.eq.s32.totalorder %s793_s17, 0  ;;  %p679_p4 = scmp.ge.s32.totalorder %s793_s17, 2 }
   0x6   : > { %s847_s22 = scalar_select %p40_p0, %s789_s16, %s42_s21  }
   0x7   : > { %p51_p3 = por %p50_p2, %p49_p1  ;;  %156 = sbr.rel (%p679_p4) target bundleno = 26 (0x1a), region = 20 }
   0xc   : > { %159 = sbr.rel (!%p51_p3) target bundleno = 26 (0x1a), region = 24  ;;  %s161_s23 = sand.u32 (%p51_p3), 1, %s789_s16  }
   0xd   : > { %s725_s24 = sshll.u32 (%p51_p3), %s793_s17, 4  ;;  %s734_s25 = smul.u32 (%p51_p3), 80, %s161_s23 }
   0xe   : > { %s166_s28 = scalar_lea.vmem (%p51_p3), %s975_s1, %s725_s24 }
   0xf   : > { %v179_v0 = vld [vmem:[%s166_s28] sm:$0xff] (%p51_p3)  ;;  %v181_v1 = vld [vmem:[%s166_s28 + $0x8] sm:$0xff] (%p51_p3)  ;;  %s163_s29 = scalar_lea.vmem (%p51_p3), [#allocation2], %s734_s25 }
  0x10   : > { %v183_v2 = vld [vmem:[%s166_s28 + $0x20] sm:$0xff] (%p51_p3)  ;;  %180 = vst [vmem:[%s163_s29] sm:$0xff] (%p51_p3), %v179_v0  ;;  %v185_v3 = vld [vmem:[%s166_s28 + $0x28] sm:$0xff] (%p51_p3) }
  0x11   : > { %182 = vst [vmem:[%s163_s29 + $0x8] sm:$0xff] %v181_v1  ;;  %v187_v4 = vld [vmem:[%s166_s28 + $0x40] sm:$0xff]  ;;  %v189_v5 = vld [vmem:[%s166_s28 + $0x48] sm:$0xff] }
  0x12   : > { %184 = vst [vmem:[%s163_s29 + $0x10] sm:$0xff] %v183_v2  ;;  %v191_v6 = vld [vmem:[%s166_s28 + $0x60] sm:$0xff]  ;;  %v193_v7 = vld [vmem:[%s166_s28 + $0x68] sm:$0xff] }
  0x13   : > { %186 = vst [vmem:[%s163_s29 + $0x18] sm:$0xff] %v185_v3  ;;  %v195_v8 = vld [vmem:[%s166_s28 + $0x80] sm:$0xff]  ;;  %v197_v9 = vld [vmem:[%s166_s28 + $0x88] sm:$0xff] }
  0x14   : > { %188 = vst [vmem:[%s163_s29 + $0x20] sm:$0xff] %v187_v4 }
  0x15   : > { %190 = vst [vmem:[%s163_s29 + $0x28] sm:$0xff] %v189_v5 }
  0x16   : > { %192 = vst [vmem:[%s163_s29 + $0x30] sm:$0xff] %v191_v6 }
  0x17   : > { %194 = vst [vmem:[%s163_s29 + $0x38] sm:$0xff] %v193_v7 }
  0x18   : > { %196 = vst [vmem:[%s163_s29 + $0x40] sm:$0xff] %v195_v8 }
  0x19   : > { %198 = vst [vmem:[%s163_s29 + $0x48] sm:$0xff] %v197_v9 }
  0x1a PF: > { %p682_p5 = scmp.ge.s32.totalorder %s793_s17, 1  ;;  %p219_p6 = scmp.lt.s32.totalorder %s793_s17, 3 }
  0x1c   : > { %p220_p7 = pnand %p682_p5, %p219_p6 }
  0x1d   : > { %s226_s30 = sand.u32 (!%p220_p7), 1, %s785_s15   ;;  %s683_s9 = sshll.u32 (!%p220_p7), %s676_s18, 2 }
  0x1e   : > { %223 = sbr.rel (%p220_p7) target bundleno = 244 (0xf4), region = 55  ;;  %p261_p8 = scmp.lt.s32.totalorder (!%p220_p7), %s683_s9, 7 }
  0x1f   : > { %s735_s5 = smul.u32 (!%p220_p7), 80, %s226_s30 }
  0x21   : > { %s858_s6 = scalar_lea.vmem (!%p220_p7), [#allocation2], %s735_s5 }
  0x23   : > { %v286_v10 = vld [vmem:[%s858_s6 + $0x40] sm:$0xff]  ;;  %v287_v11 = vld [vmem:[%s858_s6 + $0x48] sm:$0xff]  ;;  %vm342_vm0 = vcmask 1043456   ;;  %v732_v17 = vld [vmem:[%s858_s6 + $0x2c] sm:$0xf0]  ;;  %vm338_vm1 = vcmask 326656  }
  0x24   : > { %v314_v12 = vunpack.c.l.b16 %v286_v10  ;;  %v315_v13 = vunpack.c.h.b16 %v286_v10  ;;  %v316_v14 = vunpack.c.l.b16 %v287_v11  ;;  %v317_v15 = vunpack.c.h.b16 %v287_v11  ;;  %v705_v16 = vld [vmem:[%s858_s6 + $0x20] sm:$0xf]  ;;  %v730_v22 = vld [vmem:[%s858_s6 + $0x24] sm:$0xf]  ;;  %v707_v23 = vld [vmem:[%s858_s6 + $0x30] sm:$0xf0] }
  0x25   : > { %v713_v24 = vld [vmem:[%s858_s6 + $0x28] sm:$0xf]  ;;  %v733_v25 = vld [vmem:[%s858_s6 + $0x34] sm:$0xf0]  ;;  %v731_v26 = vld [vmem:[%s858_s6 + $0x2c] sm:$0xf]  ;;  %v706_v32 = vor.u32 %v732_v17, %v705_v16  ;;  %v710_v33 = vor.u32 %v730_v22, %v707_v23 }
  0x26   : > { %v326_v18 = vpack.c.b16 %v314_v12, %v314_v12  ;;  %v327_v19 = vpack.c.b16 %v315_v13, %v315_v13  ;;  %v328_v20 = vpack.c.b16 %v316_v14, %v316_v14  ;;  %v329_v21 = vpack.c.b16 %v317_v15, %v317_v15  ;;  %v715_v27 = vld [vmem:[%s858_s6 + $0x38] sm:$0xf0]  ;;  %v689_v34 = vld [vmem:[%s858_s6] sm:$0xf]  ;;  %v728_v35 = vld [vmem:[%s858_s6 + $0xc] sm:$0xf0] }
  0x27   : > { %v714_v36 = vor.u32 %v733_v25, %v713_v24  ;;  %v718_v37 = vor.u32 %v731_v26, %v715_v27  ;;  %v726_v38 = vld [vmem:[%s858_s6 + $0x4] sm:$0xf]  ;;  %v691_v39 = vld [vmem:[%s858_s6 + $0x10] sm:$0xf0]  ;;  %v697_v40 = vld [vmem:[%s858_s6 + $0x8] sm:$0xf]  ;;  %v690_v44 = vor.u32 %v728_v35, %v689_v34 }
  0x28   : > { %v344_v28 = vsel %vm342_vm0, %v326_v18, 0  ;;  %v347_v29 = vsel %vm342_vm0, %v327_v19, 0  ;;  %v350_v30 = vsel %vm342_vm0, %v328_v20, 0  ;;  %v353_v31 = vsel %vm342_vm0, %v329_v21, 0  ;;  %v729_v41 = vld [vmem:[%s858_s6 + $0x14] sm:$0xf0] }
  0x29   : > { %360 = vmatpush.bf16.msra.mxu0 %v344_v28  ;;  %373 = vmatpush.bf16.msra.mxu1 %v347_v29  ;;  %v727_v42 = vld [vmem:[%s858_s6 + $0xc] sm:$0xf]  ;;  %v699_v43 = vld [vmem:[%s858_s6 + $0x18] sm:$0xf0]  ;;  %v694_v45 = vor.u32 %v726_v38, %v691_v39  ;;  %v698_v46 = vor.u32 %v729_v41, %v697_v40  ;;  %v277_v48 = vld [vmem:[%s974_s0] sm:$0x3] }
  0x2a   : > { %386 = vmatpush.bf16.msra.mxu2 %v350_v30  ;;  %399 = vmatpush.bf16.msra.mxu3 %v353_v31  ;;  %v702_v47 = vor.u32 %v727_v42, %v699_v43  ;;  %v795_v49 = vmov 4.0   ;;  %s983_s9 = smov (!%p261_p8, %s683_s9), 7  ;;  %vm585_vm15 = vcmask 1041408  }
  0x2b   : > { %761 = vrcp.f32 %v795_v49  ;;  %s263_s12 = scalar_lea.vmem %s976_s2, %s983_s9  ;;  %s268_s15 = scalar_lea.vmem %s977_s3, %s983_s9 }
  0x2c   : > { %s686_s17 = sshll.u32 %s983_s9, 1 }
  0x2d   : > { %361 = vmatpush.bf16.msra.mxu0 %v706_v32  ;;  %374 = vmatpush.bf16.msra.mxu1 %v710_v33  ;;  %s274_s21 = scalar_lea.vmem %s978_s4, %s686_s17 }
  0x2e   : > { %387 = vmatpush.bf16.msra.mxu2 %v714_v36  ;;  %400 = vmatpush.bf16.msra.mxu3 %v718_v37 }
  0x31   : > { %362 = vmatpush.bf16.msra.mxu0 %v690_v44  ;;  %375 = vmatpush.bf16.msra.mxu1 %v694_v45  ;;  %v762_v50 = vpop.eup %761 }
  0x32   : > { %388 = vmatpush.bf16.msra.mxu2 %v698_v46  ;;  %401 = vmatpush.bf16.msra.mxu3 %v702_v47  ;;  %v436_v51 = vmul.f32 4.0, %v762_v50  ;;  %vm440_vm2 = vweird.f32 %v762_v50 }
  0x34   : > { %719 = vmatmul.msk.bf16.vlgmr.msra.gmra.mxu0 %vm338_vm1, %v277_v48  ;;  %720 = vmatmul.msk.bf16.vlgmr.msra.gmra.mxu1 %vm338_vm1, %v277_v48  ;;  %v437_v52 = vsub.f32 1.0, %v436_v51 }
  0x35   : > { %721 = vmatmul.msk.bf16.vlgmr.msra.gmra.mxu2 %vm338_vm1, %v277_v48  ;;  %722 = vmatmul.msk.bf16.vlgmr.msra.gmra.mxu3 %vm338_vm1, %v277_v48  ;;  %vm589_vm1 = vcmask 1045508  }
  0x36   : > { %v438_v54 = vmul.f32 %v762_v50, %v437_v52 }
  0x38   : > { %v439_v4 = vadd.f32 %v762_v50, %v438_v54 }
  0x3a   : > { %v903_v17 = vsel %vm440_vm2, %v762_v50, %v439_v4 }
  0xb1   : > { %v885_v53 = vpop.f32.mrf.mxu0  ;;  %v887_v55 = vpop.f32.mrf.mxu1 }
  0xb2   : > { %v407_v56 = vsel %vm342_vm0, %v885_v53, 0.0  ;;  %v446_v57 = vmul.f32 %v885_v53, %v885_v53  ;;  %v414_v58 = vsel %vm342_vm0, %v887_v55, 0.0  ;;  %v447_v59 = vmul.f32 %v887_v55, %v887_v55 }
  0xb3   : > { %v408_v60 = vrot.slane %v407_v56, 4  ;;  %v415_v61 = vrot.slane %v414_v58, 4 }
  0xb4   : > { %v450_v62 = vsel %vm342_vm0, %v446_v57, 0.0  ;;  %v457_v63 = vsel %vm342_vm0, %v447_v59, 0.0 }
  0xb5   : > { %v409_v0 = vadd.f32 %v408_v60, %v407_v56  ;;  %v451_v1 = vrot.slane %v450_v62, 4  ;;  %v416_v2 = vadd.f32 %v415_v61, %v414_v58  ;;  %v458_v3 = vrot.slane %v457_v63, 4 }
  0xb7   : > { %v410_v5 = vrot.slane %v409_v0, 2  ;;  %v452_v6 = vadd.f32 %v451_v1, %v450_v62  ;;  %v417_v7 = vrot.slane %v416_v2, 2  ;;  %v459_v8 = vadd.f32 %v458_v3, %v457_v63 }
  0xb8   : > { %v899_v9 = vpop.f32.mrf.mxu2  ;;  %v901_v10 = vpop.f32.mrf.mxu3 }
  0xb9   : > { %v411_v11 = vadd.f32 %v410_v5, %v409_v0  ;;  %v453_v12 = vrot.slane %v452_v6, 2  ;;  %v418_v13 = vadd.f32 %v417_v7, %v416_v2  ;;  %v460_v14 = vrot.slane %v459_v8, 2  ;;  %v366_v15 = vpop.f32.mrf.mxu0  ;;  %v379_v16 = vpop.f32.mrf.mxu1 }
  0xba   : > { %v421_v18 = vsel %vm342_vm0, %v899_v9, 0.0  ;;  %v448_v19 = vmul.f32 %v899_v9, %v899_v9  ;;  %v428_v26 = vsel %vm342_vm0, %v901_v10, 0.0  ;;  %v449_v27 = vmul.f32 %v901_v10, %v901_v10 }
  0xbb   : > { %v412_v20 = vrot.slane %v411_v11, 1  ;;  %v454_v21 = vadd.f32 %v453_v12, %v452_v6  ;;  %v419_v22 = vrot.slane %v418_v13, 1  ;;  %v461_v23 = vadd.f32 %v460_v14, %v459_v8 }
  0xbc   : > { %v422_v24 = vrot.slane %v421_v18, 4  ;;  %v464_v25 = vsel %vm342_vm0, %v448_v19, 0.0  ;;  %v429_v40 = vrot.slane %v428_v26, 4  ;;  %v471_v41 = vsel %vm342_vm0, %v449_v27, 0.0 }
  0xbd   : > { %v413_v28 = vadd.f32 %v412_v20, %v411_v11  ;;  %v455_v29 = vrot.slane %v454_v21, 1  ;;  %v420_v30 = vadd.f32 %v419_v22, %v418_v13  ;;  %v462_v31 = vrot.slane %v461_v23, 1 }
  0xbe   : > { %v423_v32 = vadd.f32 %v422_v24, %v421_v18  ;;  %v465_v33 = vrot.slane %v464_v25, 4  ;;  %v430_v51 = vadd.f32 %v429_v40, %v428_v26  ;;  %v472_v52 = vrot.slane %v471_v41, 4 }
  0xbf   : > { %v915_v34 = vmul.f32 %v903_v17, %v413_v28  ;;  %v456_v35 = vadd.f32 %v455_v29, %v454_v21  ;;  %v918_v36 = vmul.f32 %v903_v17, %v420_v30  ;;  %v463_v37 = vadd.f32 %v462_v31, %v461_v23 }
  0xc0   : > { %v424_v38 = vrot.slane %v423_v32, 2  ;;  %v466_v39 = vadd.f32 %v465_v33, %v464_v25  ;;  %v392_v42 = vpop.f32.mrf.mxu2  ;;  %v405_v43 = vpop.f32.mrf.mxu3  ;;  %v431_v59 = vrot.slane %v430_v51, 2  ;;  %v473_v60 = vadd.f32 %v472_v52, %v471_v41 }
  0xc1   : > { %v478_v44 = vmul.f32 %v456_v35, %v903_v17  ;;  %v482_v45 = vmul.f32 %v915_v34, %v915_v34  ;;  %v479_v46 = vmul.f32 %v463_v37, %v903_v17  ;;  %v483_v47 = vmul.f32 %v918_v36, %v918_v36 }
  0xc2   : > { %v425_v48 = vadd.f32 %v424_v38, %v423_v32  ;;  %v467_v49 = vrot.slane %v466_v39, 2  ;;  %v432_v1 = vadd.f32 %v431_v59, %v430_v51  ;;  %v474_v2 = vrot.slane %v473_v60, 2  ;;  %v546_v38 = vld [vmem:[%s263_s12] sm:$0xf] }
  0xc3   : > { %v486_v50 = vsub.f32 %v478_v44, %v482_v45  ;;  %v487_v54 = vsub.f32 %v479_v46, %v483_v47  ;;  %v494_v42 = vsub.f32 %v885_v53, %v915_v34  ;;  %v495_v43 = vsub.f32 %v887_v55, %v918_v36 }
  0xc4   : > { %v426_v56 = vrot.slane %v425_v48, 1  ;;  %v468_v57 = vadd.f32 %v467_v49, %v466_v39  ;;  %v433_v6 = vrot.slane %v432_v1, 1  ;;  %v475_v7 = vadd.f32 %v474_v2, %v473_v60  ;;  %v560_v49 = vld [vmem:[%s268_s15] sm:$0xf] }
  0xc5   : > { %v490_v58 = vmax.f32 %v486_v50, 0.0  ;;  %v491_v61 = vmax.f32 %v487_v54, 0.0  ;;  %v548_v46 = vperm.slane %v546_v38, 0  ;;  %v549_v51 = vperm.slane %v546_v38, 1 }
  0xc6   : > { %v427_v62 = vadd.f32 %v426_v56, %v425_v48  ;;  %v469_v63 = vrot.slane %v468_v57, 1  ;;  %v434_v12 = vadd.f32 %v433_v6, %v432_v1  ;;  %v476_v13 = vrot.slane %v475_v7, 1 }
  0xc7   : > { %v498_v0 = vadd.f32 1e-05, %v490_v58  ;;  %v499_v3 = vadd.f32 1e-05, %v491_v61  ;;  %v563_v58 = vperm.slane %v560_v49, 1  ;;  %v550_v36 = vperm.slane %v546_v38, 2 }
  0xc8   : > { %v928_v4 = vmul.f32 %v903_v17, %v427_v62  ;;  %v470_v5 = vadd.f32 %v469_v63, %v468_v57  ;;  %v936_v15 = vmul.f32 %v903_v17, %v434_v12  ;;  %v477_v16 = vadd.f32 %v476_v13, %v475_v7 }
  0xc9   : > { %763 = vrsqrt.f32 %v498_v0  ;;  %vm508_vm5 = vweird.f32 %v498_v0  ;;  %vm518_vm7 = vweird.f32 %v499_v3  ;;  %v562_v57 = vperm.slane %v560_v49, 0 }
  0xca   : > { %765 = vrsqrt.f32 %v499_v3  ;;  %v480_v8 = vmul.f32 %v470_v5, %v903_v17  ;;  %v484_v11 = vmul.f32 %v928_v4, %v928_v4  ;;  %v481_v20 = vmul.f32 %v477_v16, %v903_v17 }
  0xcb   : > { %v485_v21 = vmul.f32 %v936_v15, %v936_v15  ;;  %v496_v55 = vsub.f32 %v899_v9, %v928_v4  ;;  %v497_v7 = vsub.f32 %v901_v10, %v936_v15  ;;  %v565_v4 = vperm.slane %v560_v49, 3 }
  0xcc   : > { %v488_v14 = vsub.f32 %v480_v8, %v484_v11  ;;  %v551_v8 = vperm.slane %v546_v38, 3 }
  0xcd   : > { %v489_v26 = vsub.f32 %v481_v20, %v485_v21 }
  0xce   : > { %v492_v18 = vmax.f32 %v488_v14, 0.0 }
  0xcf   : > { %v764_v19 = vpop.eup %763  ;;  %v493_v29 = vmax.f32 %v489_v26, 0.0 }
  0xd0   : > { %v766_v22 = vpop.eup %765  ;;  %v503_v23 = vmul.f32 %v764_v19, %v498_v0  ;;  %v500_v24 = vadd.f32 1e-05, %v492_v18  ;;  %vm509_vm3 = vweird.f32 %v764_v19 }
  0xd1   : > { %v513_v25 = vmul.f32 %v766_v22, %v499_v3  ;;  %v501_v32 = vadd.f32 1e-05, %v493_v29  ;;  %vm519_vm4 = vweird.f32 %v766_v22  ;;  %vm510_vm6 = vmor %vm508_vm5, %vm509_vm3  ;;  %v564_v3 = vperm.slane %v560_v49, 2 }
  0xd2   : > { %v504_v27 = vmul.f32 %v764_v19, %v503_v23  ;;  %767 = vrsqrt.f32 %v500_v24  ;;  %vm520_vm8 = vmor %vm518_vm7, %vm519_vm4  ;;  %vm528_vm10 = vweird.f32 %v500_v24 }
  0xd3   : > { %v514_v28 = vmul.f32 %v766_v22, %v513_v25  ;;  %769 = vrsqrt.f32 %v501_v32  ;;  %vm538_vm13 = vweird.f32 %v501_v32 }
  0xd4   : > { %v505_v30 = vmul.f32 0.5, %v504_v27 }
  0xd5   : > { %v515_v31 = vmul.f32 0.5, %v514_v28 }
  0xd6   : > { %v506_v17 = vsub.f32 1.5, %v505_v30 }
  0xd7   : > { %v516_v33 = vsub.f32 1.5, %v515_v31 }
  0xd8   : > { %v768_v35 = vpop.eup %767  ;;  %v507_v37 = vmul.f32 %v764_v19, %v506_v17 }
  0xd9   : > { %v517_v39 = vmul.f32 %v766_v22, %v516_v33  ;;  %v523_v40 = vmul.f32 %v768_v35, %v500_v24  ;;  %v770_v47 = vpop.eup %769  ;;  %vm529_vm9 = vweird.f32 %v768_v35 }
  0xda   : > { %v511_v41 = vsel %vm510_vm6, %v764_v19, %v507_v37  ;;  %v533_v54 = vmul.f32 %v770_v47, %v501_v32  ;;  %vm530_vm11 = vmor %vm528_vm10, %vm529_vm9  ;;  %vm539_vm12 = vweird.f32 %v770_v47 }
  0xdb   : > { %v521_v44 = vsel %vm520_vm8, %v766_v22, %v517_v39  ;;  %v524_v45 = vmul.f32 %v768_v35, %v523_v40  ;;  %v542_v48 = vmul.f32 %v511_v41, %v494_v42  ;;  %vm540_vm14 = vmor %vm538_vm13, %vm539_vm12 }
  0xdc   : > { %v543_v50 = vmul.f32 %v521_v44, %v495_v43  ;;  %v534_v59 = vmul.f32 %v770_v47, %v533_v54 }
  0xdd   : > { %v525_v52 = vmul.f32 0.5, %v524_v45  ;;  %v556_v60 = vmul.f32 %v548_v46, %v542_v48 }
  0xde   : > { %v557_v53 = vmul.f32 %v549_v51, %v543_v50  ;;  %v535_v61 = vmul.f32 0.5, %v534_v59 }
  0xdf   : > { %v526_v56 = vsub.f32 1.5, %v525_v52  ;;  %v570_v1 = vadd.f32 %v562_v57, %v556_v60 }
  0xe0   : > { %v536_v0 = vsub.f32 1.5, %v535_v61  ;;  %v571_v2 = vadd.f32 %v563_v58, %v557_v53 }
  0xe1   : > { %v527_v34 = vmul.f32 %v768_v35, %v526_v56  ;;  %v574_v11 = vmax.f32 %v570_v1, 0.0 }
  0xe2   : > { %v537_v6 = vmul.f32 %v770_v47, %v536_v0  ;;  %v575_v12 = vmax.f32 %v571_v2, 0.0 }
  0xe3   : > { %v531_v62 = vsel %vm530_vm11, %v768_v35, %v527_v34 }
  0xe4   : > { %v544_v63 = vmul.f32 %v531_v62, %v496_v55  ;;  %v541_v9 = vsel %vm540_vm14, %v770_v47, %v537_v6  ;;  %v578_v18 = vpack.c.bf16 %v575_v12, %v574_v11 }
  0xe5   : > { %v545_v14 = vmul.f32 %v541_v9, %v497_v7 }
  0xe6   : > { %v558_v5 = vmul.f32 %v550_v36, %v544_v63  ;;  %v582_v22 = vrot.slane %v578_v18, 2 }
  0xe7   : > { %v559_v16 = vmul.f32 %v551_v8, %v545_v14 }
  0xe8   : > { %v572_v13 = vadd.f32 %v564_v3, %v558_v5  ;;  %v588_v15 = vsel %vm585_vm15, %v578_v18, %v582_v22 }
  0xe9   : > { %v573_v20 = vadd.f32 %v565_v4, %v559_v16 }
  0xea   : > { %v576_v19 = vmax.f32 %v572_v13, 0.0 }
  0xeb   : > { %v577_v21 = vmax.f32 %v573_v20, 0.0 }
  0xed   : > { %v579_v23 = vpack.c.bf16 %v577_v21, %v576_v19 }
  0xef   : > { %v583_v24 = vrot.slane %v579_v23, 4  ;;  %v584_v10 = vrot.slane %v579_v23, 6 }
  0xf1   : > { %v592_v25 = vsel %vm589_vm1, %v583_v24, %v584_v10 }
  0xf2   : > { %v593_v26 = vsel %vm342_vm0, %v588_v15, %v592_v25 }
  0xf3   : > { %595 = vst [vmem:[%s274_s21] sm:$0xff] %v593_v26 }
  0xf4 PF: > { %p11_p9 = scmp.ge.s32.totalorder %s838_s19, 4   ;;  %s979_s15 = smov %s789_s16 }
  0xf5   : > { %s980_s16 = smov %s847_s22  ;;  %s981_s17 = smov %s838_s19 }
  0xf6   :  { %13 = sbr.rel (!%p11_p9) target bundleno = 2 (0x2), region = 100 }

// kernel: generator_forward.8
= control target key start
LH: loop header
LB: loop body
LE: loop exit
PB: predicated region body
PF: predicated region fallthrough
CT: control target
= control target key end

     0   :  { %s967_s9 = smov 0   ;;  %s969_s10 = smov 0   ;;  %s1211_s0 = inlined_call_operand.vmem [shape: bf16[64,128], index: 0, kind: input, shape index: {}]   ;;  %s1212_s1 = inlined_call_operand.vmem [shape: bf16[128,1024], index: 1, kind: input, shape index: {}]   ;;  %s1213_s2 = inlined_call_operand.vmem [shape: bf16[64,1024], index: 2, kind: output, shape index: {}]  }
   0x1   :  { %s971_s11 = smov 0  }
   0x2 LB: > { %s707_s12 = sadd.s32 4294967295, %s950_s11   ;;  %s984_s13 = sadd.s32 1, %s950_s11   ;;  %s950_s11 = sphi %s971_s11, %s1217_s11   ;;  %s946_s10 = sphi %s969_s10, %s1216_s10   ;;  %s942_s9 = sphi %s967_s9, %s1215_s9  }
   0x3   : > { %s37_s14 = ssub.s32 %s950_s11, %s984_s13  ;;  %s40_s15 = sadd.s32 1, %s946_s10 }
   0x4   : > { %p38_p0 = scmp.eq.s32.totalorder %s37_s14, 0  ;;  %p47_p1 = scmp.ne.s32.totalorder %s946_s10, %s942_s9 }
   0x5   : > { %p48_p2 = scmp.eq.s32.totalorder %s950_s11, 0  ;;  %p77_p3 = scmp.eq.s32.totalorder %s707_s12, 1 }
   0x6   : > { %s995_s16 = scalar_select %p38_p0, %s946_s10, %s40_s15  }
   0x7   : > { %p49_p4 = por %p48_p2, %p47_p1  ;;  %p997_p5 = por %p77_p3, %p47_p1 }
   0x8   : > { %p710_p6 = scmp.ge.s32.totalorder %s950_s11, 2 }
   0xa   : > { %102 = sbr.rel (%p710_p6) target bundleno = 51 (0x33), region = 20 }
   0xf   : > { %105 = sbr.rel (!%p49_p4) target bundleno = 51 (0x33), region = 24  ;;  %s107_s18 = sand.u32 (%p49_p4), 1, %s946_s10  }
  0x10   : > { %s866_s19 = sshll.u32 (%p49_p4), %s950_s11, 4  ;;  %s711_s20 = sshll.u32 (%p49_p4), %s107_s18, 8 }
  0x11   : > { %s1007_s23 = scalar_lea.vmem (%p49_p4), %s1212_s1, %s866_s19  ;;  %s1012_s24 = scalar_lea.vmem (%p49_p4), [#allocation2], %s711_s20 }
  0x12   : > { %v125_v0 = vld [vmem:[%s1007_s23] sm:$0xff] (%p49_p4)  ;;  %v127_v1 = vld [vmem:[%s1007_s23 + $0x8] sm:$0xff] (%p49_p4) }
  0x13   : > { %v129_v2 = vld [vmem:[%s1007_s23 + $0x20] sm:$0xff] (%p49_p4)  ;;  %126 = vst [vmem:[%s1012_s24] sm:$0xff] (%p49_p4), %v125_v0  ;;  %v131_v3 = vld [vmem:[%s1007_s23 + $0x28] sm:$0xff] (%p49_p4) }
  0x14   : > { %128 = vst [vmem:[%s1012_s24 + $0x8] sm:$0xff] %v127_v1  ;;  %v133_v4 = vld [vmem:[%s1007_s23 + $0x40] sm:$0xff]  ;;  %v135_v5 = vld [vmem:[%s1007_s23 + $0x48] sm:$0xff] }
  0x15   : > { %130 = vst [vmem:[%s1012_s24 + $0x10] sm:$0xff] %v129_v2  ;;  %v137_v6 = vld [vmem:[%s1007_s23 + $0x60] sm:$0xff]  ;;  %v139_v7 = vld [vmem:[%s1007_s23 + $0x68] sm:$0xff] }
  0x16   : > { %132 = vst [vmem:[%s1012_s24 + $0x18] sm:$0xff] %v131_v3  ;;  %v141_v8 = vld [vmem:[%s1007_s23 + $0x80] sm:$0xff]  ;;  %v143_v9 = vld [vmem:[%s1007_s23 + $0x88] sm:$0xff] }
  0x17   : > { %134 = vst [vmem:[%s1012_s24 + $0x20] sm:$0xff] %v133_v4  ;;  %v145_v10 = vld [vmem:[%s1007_s23 + $0xa0] sm:$0xff]  ;;  %v147_v11 = vld [vmem:[%s1007_s23 + $0xa8] sm:$0xff] }
  0x18   : > { %136 = vst [vmem:[%s1012_s24 + $0x28] sm:$0xff] %v135_v5  ;;  %v149_v12 = vld [vmem:[%s1007_s23 + $0xc0] sm:$0xff]  ;;  %v151_v13 = vld [vmem:[%s1007_s23 + $0xc8] sm:$0xff] }
  0x19   : > { %138 = vst [vmem:[%s1012_s24 + $0x30] sm:$0xff] %v137_v6  ;;  %v153_v14 = vld [vmem:[%s1007_s23 + $0xe0] sm:$0xff]  ;;  %v155_v15 = vld [vmem:[%s1007_s23 + $0xe8] sm:$0xff] }
  0x1a   : > { %140 = vst [vmem:[%s1012_s24 + $0x38] sm:$0xff] %v139_v7  ;;  %v157_v16 = vld [vmem:[%s1007_s23 + $0x100] sm:$0xff]  ;;  %v159_v17 = vld [vmem:[%s1007_s23 + $0x108] sm:$0xff] }
  0x1b   : > { %142 = vst [vmem:[%s1012_s24 + $0x40] sm:$0xff] %v141_v8  ;;  %v161_v18 = vld [vmem:[%s1007_s23 + $0x120] sm:$0xff]  ;;  %v163_v19 = vld [vmem:[%s1007_s23 + $0x128] sm:$0xff] }
  0x1c   : > { %144 = vst [vmem:[%s1012_s24 + $0x48] sm:$0xff] %v143_v9  ;;  %v165_v20 = vld [vmem:[%s1007_s23 + $0x140] sm:$0xff]  ;;  %v167_v21 = vld [vmem:[%s1007_s23 + $0x148] sm:$0xff] }
  0x1d   : > { %146 = vst [vmem:[%s1012_s24 + $0x50] sm:$0xff] %v145_v10  ;;  %v169_v22 = vld [vmem:[%s1007_s23 + $0x160] sm:$0xff]  ;;  %v171_v23 = vld [vmem:[%s1007_s23 + $0x168] sm:$0xff] }
  0x1e   : > { %148 = vst [vmem:[%s1012_s24 + $0x58] sm:$0xff] %v147_v11  ;;  %v173_v24 = vld [vmem:[%s1007_s23 + $0x180] sm:$0xff]  ;;  %v175_v25 = vld [vmem:[%s1007_s23 + $0x188] sm:$0xff] }
  0x1f   : > { %150 = vst [vmem:[%s1012_s24 + $0x60] sm:$0xff] %v149_v12  ;;  %v177_v26 = vld [vmem:[%s1007_s23 + $0x1a0] sm:$0xff]  ;;  %v179_v27 = vld [vmem:[%s1007_s23 + $0x1a8] sm:$0xff] }
  0x20   : > { %152 = vst [vmem:[%s1012_s24 + $0x68] sm:$0xff] %v151_v13  ;;  %v181_v28 = vld [vmem:[%s1007_s23 + $0x1c0] sm:$0xff]  ;;  %v183_v29 = vld [vmem:[%s1007_s23 + $0x1c8] sm:$0xff] }
  0x21   : > { %154 = vst [vmem:[%s1012_s24 + $0x70] sm:$0xff] %v153_v14  ;;  %v185_v30 = vld [vmem:[%s1007_s23 + $0x1e0] sm:$0xff]  ;;  %v187_v31 = vld [vmem:[%s1007_s23 + $0x1e8] sm:$0xff] }
  0x22   : > { %156 = vst [vmem:[%s1012_s24 + $0x78] sm:$0xff] %v155_v15 }
  0x23   : > { %158 = vst [vmem:[%s1012_s24 + $0x80] sm:$0xff] %v157_v16 }
  0x24   : > { %160 = vst [vmem:[%s1012_s24 + $0x88] sm:$0xff] %v159_v17 }
  0x25   : > { %162 = vst [vmem:[%s1012_s24 + $0x90] sm:$0xff] %v161_v18 }
  0x26   : > { %164 = vst [vmem:[%s1012_s24 + $0x98] sm:$0xff] %v163_v19 }
  0x27   : > { %166 = vst [vmem:[%s1012_s24 + $0xa0] sm:$0xff] %v165_v20 }
  0x28   : > { %168 = vst [vmem:[%s1012_s24 + $0xa8] sm:$0xff] %v167_v21 }
  0x29   : > { %170 = vst [vmem:[%s1012_s24 + $0xb0] sm:$0xff] %v169_v22 }
  0x2a   : > { %172 = vst [vmem:[%s1012_s24 + $0xb8] sm:$0xff] %v171_v23 }
  0x2b   : > { %174 = vst [vmem:[%s1012_s24 + $0xc0] sm:$0xff] %v173_v24 }
  0x2c   : > { %176 = vst [vmem:[%s1012_s24 + $0xc8] sm:$0xff] %v175_v25 }
  0x2d   : > { %178 = vst [vmem:[%s1012_s24 + $0xd0] sm:$0xff] %v177_v26 }
  0x2e   : > { %180 = vst [vmem:[%s1012_s24 + $0xd8] sm:$0xff] %v179_v27 }
  0x2f   : > { %182 = vst [vmem:[%s1012_s24 + $0xe0] sm:$0xff] %v181_v28 }
  0x30   : > { %184 = vst [vmem:[%s1012_s24 + $0xe8] sm:$0xff] %v183_v29 }
  0x31   : > { %186 = vst [vmem:[%s1012_s24 + $0xf0] sm:$0xff] %v185_v30 }
  0x32   : > { %188 = vst [vmem:[%s1012_s24 + $0xf8] sm:$0xff] %v187_v31 }
  0x33 PF: > { %p714_p7 = scmp.ge.s32.totalorder %s950_s11, 1  ;;  %p193_p8 = scmp.lt.s32.totalorder %s950_s11, 3 }
  0x35   : > { %p194_p9 = pnand %p714_p7, %p193_p8 }
  0x36   : > { %s200_s25 = sand.u32 (!%p194_p9), 1, %s942_s9  }
  0x37   : > { %197 = sbr.rel (%p194_p9) target bundleno = 295 (0x127), region = 47  ;;  %s715_s26 = sshll.u32 (!%p194_p9), %s200_s25, 8 }
  0x38   : > { %s1080_s27 = scalar_lea.vmem (!%p194_p9), [#allocation2], %s715_s26  ;;  %s716_s8 = sshll.u32 (!%p194_p9), %s200_s25, 7 }
  0x39   : > { %s1160_s14 = scalar_lea.vmem (!%p194_p9), [#allocation3], %s716_s8 }
  0x3c   : > { %v847_v32 = vld [vmem:[%s1080_s27 + $0xe0] sm:$0xf]  ;;  %v901_v33 = vld [vmem:[%s1080_s27 + $0xec] sm:$0xf0]  ;;  %v899_v34 = vld [vmem:[%s1080_s27 + $0xe4] sm:$0xf] }
  0x3d   : > { %v848_v35 = vor.u32 %v901_v33, %v847_v32  ;;  %v849_v36 = vld [vmem:[%s1080_s27 + $0xf0] sm:$0xf0]  ;;  %v855_v37 = vld [vmem:[%s1080_s27 + $0xe8] sm:$0xf]  ;;  %v902_v38 = vld [vmem:[%s1080_s27 + $0xf4] sm:$0xf0] }
  0x3e   : > { %v852_v39 = vor.u32 %v899_v34, %v849_v36  ;;  %v856_v40 = vor.u32 %v902_v38, %v855_v37  ;;  %v900_v41 = vld [vmem:[%s1080_s27 + $0xec] sm:$0xf]  ;;  %v857_v42 = vld [vmem:[%s1080_s27 + $0xf8] sm:$0xf0]  ;;  %v831_v43 = vld [vmem:[%s1080_s27 + $0xc0] sm:$0xf] }
  0x3f   : > { %446 = vmatpush.bf16.msra.mxu0 %v848_v35  ;;  %v860_v44 = vor.u32 %v900_v41, %v857_v42  ;;  %v897_v45 = vld [vmem:[%s1080_s27 + $0xcc] sm:$0xf0]  ;;  %v895_v46 = vld [vmem:[%s1080_s27 + $0xc4] sm:$0xf]  ;;  %v833_v47 = vld [vmem:[%s1080_s27 + $0xd0] sm:$0xf0] }
  0x40   : > { %475 = vmatpush.bf16.msra.mxu1 %v852_v39  ;;  %504 = vmatpush.bf16.msra.mxu2 %v856_v40  ;;  %v832_v48 = vor.u32 %v897_v45, %v831_v43  ;;  %v836_v49 = vor.u32 %v895_v46, %v833_v47  ;;  %v839_v50 = vld [vmem:[%s1080_s27 + $0xc8] sm:$0xf]  ;;  %v898_v51 = vld [vmem:[%s1080_s27 + $0xd4] sm:$0xf0]  ;;  %v896_v52 = vld [vmem:[%s1080_s27 + $0xcc] sm:$0xf] }
  0x41   : > { %533 = vmatpush.bf16.msra.mxu3 %v860_v44  ;;  %v840_v53 = vor.u32 %v898_v51, %v839_v50  ;;  %v841_v54 = vld [vmem:[%s1080_s27 + $0xd8] sm:$0xf0]  ;;  %v815_v55 = vld [vmem:[%s1080_s27 + $0xa0] sm:$0xf]  ;;  %v893_v56 = vld [vmem:[%s1080_s27 + $0xac] sm:$0xf0] }
  0x42   : > { %v844_v57 = vor.u32 %v896_v52, %v841_v54  ;;  %v891_v58 = vld [vmem:[%s1080_s27 + $0xa4] sm:$0xf]  ;;  %v817_v59 = vld [vmem:[%s1080_s27 + $0xb0] sm:$0xf0]  ;;  %v823_v60 = vld [vmem:[%s1080_s27 + $0xa8] sm:$0xf]  ;;  %v816_v61 = vor.u32 %v893_v56, %v815_v55 }
  0x43   : > { %447 = vmatpush.bf16.msra.mxu0 %v832_v48  ;;  %v894_v62 = vld [vmem:[%s1080_s27 + $0xb4] sm:$0xf0]  ;;  %v892_v63 = vld [vmem:[%s1080_s27 + $0xac] sm:$0xf]  ;;  %v825_v0 = vld [vmem:[%s1080_s27 + $0xb8] sm:$0xf0]  ;;  %v820_v1 = vor.u32 %v891_v58, %v817_v59 }
  0x44   : > { %476 = vmatpush.bf16.msra.mxu1 %v836_v49  ;;  %505 = vmatpush.bf16.msra.mxu2 %v840_v53  ;;  %v824_v2 = vor.u32 %v894_v62, %v823_v60  ;;  %v799_v3 = vld [vmem:[%s1080_s27 + $0x80] sm:$0xf]  ;;  %v889_v4 = vld [vmem:[%s1080_s27 + $0x8c] sm:$0xf0]  ;;  %v887_v5 = vld [vmem:[%s1080_s27 + $0x84] sm:$0xf]  ;;  %v828_v6 = vor.u32 %v892_v63, %v825_v0 }
  0x45   : > { %534 = vmatpush.bf16.msra.mxu3 %v844_v57  ;;  %v801_v7 = vld [vmem:[%s1080_s27 + $0x90] sm:$0xf0]  ;;  %v807_v8 = vld [vmem:[%s1080_s27 + $0x88] sm:$0xf]  ;;  %v890_v9 = vld [vmem:[%s1080_s27 + $0x94] sm:$0xf0]  ;;  %v800_v12 = vor.u32 %v889_v4, %v799_v3 }
  0x46   : > { %v888_v10 = vld [vmem:[%s1080_s27 + $0x8c] sm:$0xf]  ;;  %v809_v11 = vld [vmem:[%s1080_s27 + $0x98] sm:$0xf0]  ;;  %v804_v13 = vor.u32 %v887_v5, %v801_v7  ;;  %v808_v14 = vor.u32 %v890_v9, %v807_v8  ;;  %v783_v15 = vld [vmem:[%s1080_s27 + $0x60] sm:$0xf] }
  0x47   : > { %448 = vmatpush.bf16.msra.mxu0 %v816_v61  ;;  %v885_v16 = vld [vmem:[%s1080_s27 + $0x6c] sm:$0xf0]  ;;  %v883_v17 = vld [vmem:[%s1080_s27 + $0x64] sm:$0xf]  ;;  %v812_v18 = vor.u32 %v888_v10, %v809_v11  ;;  %v785_v19 = vld [vmem:[%s1080_s27 + $0x70] sm:$0xf0] }
  0x48   : > { %477 = vmatpush.bf16.msra.mxu1 %v820_v1  ;;  %506 = vmatpush.bf16.msra.mxu2 %v824_v2  ;;  %v791_v20 = vld [vmem:[%s1080_s27 + $0x68] sm:$0xf]  ;;  %v886_v21 = vld [vmem:[%s1080_s27 + $0x74] sm:$0xf0]  ;;  %v884_v22 = vld [vmem:[%s1080_s27 + $0x6c] sm:$0xf]  ;;  %v784_v24 = vor.u32 %v885_v16, %v783_v15  ;;  %v788_v25 = vor.u32 %v883_v17, %v785_v19 }
  0x49   : > { %535 = vmatpush.bf16.msra.mxu3 %v828_v6  ;;  %v793_v23 = vld [vmem:[%s1080_s27 + $0x78] sm:$0xf0]  ;;  %v792_v26 = vor.u32 %v886_v21, %v791_v20  ;;  %v767_v27 = vld [vmem:[%s1080_s27 + $0x40] sm:$0xf]  ;;  %v881_v28 = vld [vmem:[%s1080_s27 + $0x4c] sm:$0xf0] }
  0x4a   : > { %v879_v29 = vld [vmem:[%s1080_s27 + $0x44] sm:$0xf]  ;;  %v796_v30 = vor.u32 %v884_v22, %v793_v23  ;;  %v769_v31 = vld [vmem:[%s1080_s27 + $0x50] sm:$0xf0]  ;;  %v775_v32 = vld [vmem:[%s1080_s27 + $0x48] sm:$0xf]  ;;  %v768_v36 = vor.u32 %v881_v28, %v767_v27 }
  0x4b   : > { %449 = vmatpush.bf16.msra.mxu0 %v800_v12  ;;  %v882_v33 = vld [vmem:[%s1080_s27 + $0x54] sm:$0xf0]  ;;  %v880_v34 = vld [vmem:[%s1080_s27 + $0x4c] sm:$0xf]  ;;  %v777_v35 = vld [vmem:[%s1080_s27 + $0x58] sm:$0xf0]  ;;  %v772_v37 = vor.u32 %v879_v29, %v769_v31 }
  0x4c   : > { %478 = vmatpush.bf16.msra.mxu1 %v804_v13  ;;  %507 = vmatpush.bf16.msra.mxu2 %v808_v14  ;;  %v776_v38 = vor.u32 %v882_v33, %v775_v32  ;;  %v751_v39 = vld [vmem:[%s1080_s27 + $0x20] sm:$0xf]  ;;  %v877_v40 = vld [vmem:[%s1080_s27 + $0x2c] sm:$0xf0]  ;;  %v875_v41 = vld [vmem:[%s1080_s27 + $0x24] sm:$0xf]  ;;  %v780_v42 = vor.u32 %v880_v34, %v777_v35 }
  0x4d   : > { %536 = vmatpush.bf16.msra.mxu3 %v812_v18  ;;  %v753_v43 = vld [vmem:[%s1080_s27 + $0x30] sm:$0xf0]  ;;  %v759_v44 = vld [vmem:[%s1080_s27 + $0x28] sm:$0xf]  ;;  %v878_v45 = vld [vmem:[%s1080_s27 + $0x34] sm:$0xf0]  ;;  %v752_v48 = vor.u32 %v877_v40, %v751_v39 }
  0x4e   : > { %v876_v46 = vld [vmem:[%s1080_s27 + $0x2c] sm:$0xf]  ;;  %v761_v47 = vld [vmem:[%s1080_s27 + $0x38] sm:$0xf0]  ;;  %v756_v49 = vor.u32 %v875_v41, %v753_v43  ;;  %v760_v50 = vor.u32 %v878_v45, %v759_v44  ;;  %v735_v51 = vld [vmem:[%s1080_s27] sm:$0xf] }
  0x4f   : > { %450 = vmatpush.bf16.msra.mxu0 %v784_v24  ;;  %v873_v52 = vld [vmem:[%s1080_s27 + $0xc] sm:$0xf0]  ;;  %v871_v53 = vld [vmem:[%s1080_s27 + $0x4] sm:$0xf]  ;;  %v764_v54 = vor.u32 %v876_v46, %v761_v47  ;;  %v737_v55 = vld [vmem:[%s1080_s27 + $0x10] sm:$0xf0] }
  0x50   : > { %479 = vmatpush.bf16.msra.mxu1 %v788_v25  ;;  %508 = vmatpush.bf16.msra.mxu2 %v792_v26  ;;  %v743_v56 = vld [vmem:[%s1080_s27 + $0x8] sm:$0xf]  ;;  %v874_v57 = vld [vmem:[%s1080_s27 + $0x14] sm:$0xf0]  ;;  %v872_v58 = vld [vmem:[%s1080_s27 + $0xc] sm:$0xf]  ;;  %v736_v60 = vor.u32 %v873_v52, %v735_v51  ;;  %v740_v61 = vor.u32 %v871_v53, %v737_v55 }
  0x51   : > { %537 = vmatpush.bf16.msra.mxu3 %v796_v30  ;;  %v745_v59 = vld [vmem:[%s1080_s27 + $0x18] sm:$0xf0]  ;;  %v744_v62 = vor.u32 %v874_v57, %v743_v56  ;;  %v867_v0 = vld [vmem:[%s1211_s0] sm:$0xff]  ;;  %v868_v1 = vld [vmem:[%s1211_s0 + $0x8] sm:$0xff]  ;;  %s903_s9 = sshll.u32 (%p997_p5), %s707_s12, 4 }
  0x52   : > { %v748_v63 = vor.u32 %v872_v58, %v745_v59  ;;  %v869_v2 = vld [vmem:[%s1211_s0 + $0x10] sm:$0xff]  ;;  %v870_v3 = vld [vmem:[%s1211_s0 + $0x18] sm:$0xff]  ;;  %s603_s17 = scalar_lea.vmem (%p997_p5), %s1213_s2, %s903_s9 }
  0x53   : > { %451 = vmatpush.bf16.msra.mxu0 %v768_v36 }
  0x54   : > { %480 = vmatpush.bf16.msra.mxu1 %v772_v37  ;;  %509 = vmatpush.bf16.msra.mxu2 %v776_v38 }
  0x55   : > { %538 = vmatpush.bf16.msra.mxu3 %v780_v42 }
  0x57   : > { %452 = vmatpush.bf16.msra.mxu0 %v752_v48 }
  0x58   : > { %481 = vmatpush.bf16.msra.mxu1 %v756_v49  ;;  %510 = vmatpush.bf16.msra.mxu2 %v760_v50 }
  0x59   : > { %539 = vmatpush.bf16.msra.mxu3 %v764_v54 }
  0x5b   : > { %453 = vmatpush.bf16.msra.mxu0 %v736_v60 }
  0x5c   : > { %482 = vmatpush.bf16.msra.mxu1 %v740_v61  ;;  %511 = vmatpush.bf16.msra.mxu2 %v744_v62 }
  0x5d   : > { %540 = vmatpush.bf16.msra.mxu3 %v748_v63 }
  0x5e   : > { %454 = vmatmul.bf16.vlgmr.msra.gmra.mxu0 %v867_v0 }
  0x5f   : > { %483 = vmatmul.bf16.vlgmr.msra.gmra.mxu1 %v867_v0  ;;  %512 = vmatmul.bf16.vlgmr.msra.gmra.mxu2 %v867_v0 }
  0x60   : > { %541 = vmatmul.bf16.vlgmr.msra.gmra.mxu3 %v867_v0 }
  0x6e   : > { %459 = vmatmul.bf16.gmra.mxu0 %v868_v1 }
  0x6f   : > { %488 = vmatmul.bf16.gmra.mxu1 %v868_v1  ;;  %517 = vmatmul.bf16.gmra.mxu2 %v868_v1 }
  0x70   : > { %546 = vmatmul.bf16.gmra.mxu3 %v868_v1 }
  0x7e   : > { %464 = vmatmul.bf16.gmra.mxu0 %v869_v2 }
  0x7f   : > { %493 = vmatmul.bf16.gmra.mxu1 %v869_v2  ;;  %522 = vmatmul.bf16.gmra.mxu2 %v869_v2 }
  0x80   : > { %551 = vmatmul.bf16.gmra.mxu3 %v869_v2 }
  0x8e   : > { %469 = vmatmul.bf16.gmra.mxu0 %v870_v3 }
  0x8f   : > { %498 = vmatmul.bf16.gmra.mxu1 %v870_v3  ;;  %527 = vmatmul.bf16.gmra.mxu2 %v870_v3 }
  0x90   : > { %556 = vmatmul.bf16.gmra.mxu3 %v870_v3 }
  0xdb   : > { %v455_v4 = vpop.f32.mrf.mxu0 }
  0xdc   : > { %v484_v5 = vpop.f32.mrf.mxu1 }
  0xdd   : > { %v562_v6 = vpack.c.bf16 %v484_v5, %v455_v4 }
  0xdf   : > { %578 = vst [vmem:[%s1160_s14] sm:$0xff] %v562_v6 }
  0xe2   : > { %v513_v7 = vpop.f32.mrf.mxu2 }
  0xe3   : > { %v542_v8 = vpop.f32.mrf.mxu3  ;;  %v457_v9 = vpop.f32.mrf.mxu0 }
  0xe4   : > { %v563_v10 = vpack.c.bf16 %v542_v8, %v513_v7  ;;  %v486_v11 = vpop.f32.mrf.mxu1 }
  0xe5   : > { %v564_v12 = vpack.c.bf16 %v486_v11, %v457_v9 }
  0xe6   : > { %579 = vst [vmem:[%s1160_s14 + $0x8] sm:$0xff] %v563_v10  ;;  %v616_v52 = vld [vmem:[%s1160_s14] sm:$0xff] (%p997_p5) }
  0xe7   : > { %580 = vst [vmem:[%s1160_s14 + $0x10] sm:$0xff] %v564_v12 }
  0xe8   : > { %617 = vst [vmem:[%s603_s17] sm:$0xff] (%p997_p5), %v616_v52 }
  0xea   : > { %v515_v13 = vpop.f32.mrf.mxu2 }
  0xeb   : > { %v544_v14 = vpop.f32.mrf.mxu3  ;;  %v460_v15 = vpop.f32.mrf.mxu0 }
  0xec   : > { %v565_v16 = vpack.c.bf16 %v544_v14, %v515_v13  ;;  %v489_v17 = vpop.f32.mrf.mxu1 }
  0xed   : > { %v566_v18 = vpack.c.bf16 %v489_v17, %v460_v15  ;;  %v618_v53 = vld [vmem:[%s1160_s14 + $0x8] sm:$0xff] (%p997_p5) }
  0xee   : > { %581 = vst [vmem:[%s1160_s14 + $0x18] sm:$0xff] %v565_v16  ;;  %v620_v54 = vld [vmem:[%s1160_s14 + $0x10] sm:$0xff] (%p997_p5) }
  0xef   : > { %582 = vst [vmem:[%s1160_s14 + $0x20] sm:$0xff] %v566_v18 }
  0xf0   : > { %619 = vst [vmem:[%s603_s17 + $0x8] sm:$0xff] (%p997_p5), %v618_v53 }
  0xf1   : > { %621 = vst [vmem:[%s603_s17 + $0x20] sm:$0xff] (%p997_p5), %v620_v54 }
  0xf2   : > { %v518_v19 = vpop.f32.mrf.mxu2 }
  0xf3   : > { %v547_v20 = vpop.f32.mrf.mxu3  ;;  %v462_v21 = vpop.f32.mrf.mxu0 }
  0xf4   : > { %v567_v22 = vpack.c.bf16 %v547_v20, %v518_v19  ;;  %v491_v23 = vpop.f32.mrf.mxu1 }
  0xf5   : > { %v568_v24 = vpack.c.bf16 %v491_v23, %v462_v21  ;;  %v622_v55 = vld [vmem:[%s1160_s14 + $0x18] sm:$0xff] (%p997_p5) }
  0xf6   : > { %583 = vst [vmem:[%s1160_s14 + $0x28] sm:$0xff] %v567_v22  ;;  %v624_v56 = vld [vmem:[%s1160_s14 + $0x20] sm:$0xff] (%p997_p5) }
  0xf7   : > { %584 = vst [vmem:[%s1160_s14 + $0x30] sm:$0xff] %v568_v24 }
  0xf8   : > { %623 = vst [vmem:[%s603_s17 + $0x28] sm:$0xff] (%p997_p5), %v622_v55 }
  0xf9   : > { %625 = vst [vmem:[%s603_s17 + $0x40] sm:$0xff] (%p997_p5), %v624_v56 }
  0xfa   : > { %v520_v25 = vpop.f32.mrf.mxu2 }
  0xfb   : > { %v549_v26 = vpop.f32.mrf.mxu3  ;;  %v465_v27 = vpop.f32.mrf.mxu0 }
  0xfc   : > { %v569_v28 = vpack.c.bf16 %v549_v26, %v520_v25  ;;  %v494_v29 = vpop.f32.mrf.mxu1 }
  0xfd   : > { %v570_v30 = vpack.c.bf16 %v494_v29, %v465_v27  ;;  %v626_v57 = vld [vmem:[%s1160_s14 + $0x28] sm:$0xff] (%p997_p5) }
  0xfe   : > { %585 = vst [vmem:[%s1160_s14 + $0x38] sm:$0xff] %v569_v28  ;;  %v628_v58 = vld [vmem:[%s1160_s14 + $0x30] sm:$0xff] (%p997_p5) }
  0xff   : > { %586 = vst [vmem:[%s1160_s14 + $0x40] sm:$0xff] %v570_v30 }
 0x100   : > { %627 = vst [vmem:[%s603_s17 + $0x48] sm:$0xff] (%p997_p5), %v626_v57 }
 0x101   : > { %629 = vst [vmem:[%s603_s17 + $0x60] sm:$0xff] (%p997_p5), %v628_v58 }
 0x102   : > { %v523_v31 = vpop.f32.mrf.mxu2 }
 0x103   : > { %v552_v32 = vpop.f32.mrf.mxu3  ;;  %v467_v33 = vpop.f32.mrf.mxu0 }
 0x104   : > { %v571_v34 = vpack.c.bf16 %v552_v32, %v523_v31  ;;  %v496_v35 = vpop.f32.mrf.mxu1 }
 0x105   : > { %v572_v36 = vpack.c.bf16 %v496_v35, %v467_v33  ;;  %v630_v59 = vld [vmem:[%s1160_s14 + $0x38] sm:$0xff] (%p997_p5) }
 0x106   : > { %587 = vst [vmem:[%s1160_s14 + $0x48] sm:$0xff] %v571_v34  ;;  %v632_v60 = vld [vmem:[%s1160_s14 + $0x40] sm:$0xff] (%p997_p5) }
 0x107   : > { %588 = vst [vmem:[%s1160_s14 + $0x50] sm:$0xff] %v572_v36 }
 0x108   : > { %631 = vst [vmem:[%s603_s17 + $0x68] sm:$0xff] (%p997_p5), %v630_v59 }
 0x109   : > { %633 = vst [vmem:[%s603_s17 + $0x80] sm:$0xff] (%p997_p5), %v632_v60 }
 0x10a   : > { %v525_v37 = vpop.f32.mrf.mxu2 }
 0x10b   : > { %v554_v38 = vpop.f32.mrf.mxu3  ;;  %v470_v39 = vpop.f32.mrf.mxu0 }
 0x10c   : > { %v573_v40 = vpack.c.bf16 %v554_v38, %v525_v37  ;;  %v499_v41 = vpop.f32.mrf.mxu1 }
 0x10d   : > { %v574_v42 = vpack.c.bf16 %v499_v41, %v470_v39  ;;  %v634_v61 = vld [vmem:[%s1160_s14 + $0x48] sm:$0xff] (%p997_p5) }
 0x10e   : > { %589 = vst [vmem:[%s1160_s14 + $0x58] sm:$0xff] %v573_v40  ;;  %v636_v62 = vld [vmem:[%s1160_s14 + $0x50] sm:$0xff] (%p997_p5) }
 0x10f   : > { %590 = vst [vmem:[%s1160_s14 + $0x60] sm:$0xff] %v574_v42 }
 0x110   : > { %635 = vst [vmem:[%s603_s17 + $0x88] sm:$0xff] (%p997_p5), %v634_v61 }
 0x111   : > { %637 = vst [vmem:[%s603_s17 + $0xa0] sm:$0xff] (%p997_p5), %v636_v62 }
 0x112   : > { %v528_v43 = vpop.f32.mrf.mxu2 }
 0x113   : > { %v557_v44 = vpop.f32.mrf.mxu3  ;;  %v472_v45 = vpop.f32.mrf.mxu0 }
 0x114   : > { %v575_v46 = vpack.c.bf16 %v557_v44, %v528_v43  ;;  %v501_v47 = vpop.f32.mrf.mxu1 }
 0x115   : > { %v576_v48 = vpack.c.bf16 %v501_v47, %v472_v45  ;;  %v638_v63 = vld [vmem:[%s1160_s14 + $0x58] sm:$0xff] (%p997_p5) }
 0x116   : > { %591 = vst [vmem:[%s1160_s14 + $0x68] sm:$0xff] %v575_v46  ;;  %v640_v0 = vld [vmem:[%s1160_s14 + $0x60] sm:$0xff] (%p997_p5) }
 0x117   : > { %592 = vst [vmem:[%s1160_s14 + $0x70] sm:$0xff] %v576_v48 }
 0x118   : > { %639 = vst [vmem:[%s603_s17 + $0xa8] sm:$0xff] (%p997_p5), %v638_v63 }
 0x119   : > { %641 = vst [vmem:[%s603_s17 + $0xc0] sm:$0xff] (%p997_p5), %v640_v0 }
 0x11a   : > { %v530_v49 = vpop.f32.mrf.mxu2  ;;  %600 = sbr.rel (!%p997_p5) target bundleno = 295 (0x127), region = 55 }
 0x11b   : > { %v559_v50 = vpop.f32.mrf.mxu3 }
 0x11c   : > { %v577_v51 = vpack.c.bf16 %v559_v50, %v530_v49 }
 0x11d   : > { %v642_v1 = vld [vmem:[%s1160_s14 + $0x68] sm:$0xff] (%p997_p5) }
 0x11e   : > { %593 = vst [vmem:[%s1160_s14 + $0x78] sm:$0xff] %v577_v51  ;;  %v644_v2 = vld [vmem:[%s1160_s14 + $0x70] sm:$0xff] (%p997_p5) }
 0x11f   : > { %643 = vst [vmem:[%s603_s17 + $0xc8] sm:$0xff] %v642_v1 }
 0x120   : > { %645 = vst [vmem:[%s603_s17 + $0xe0] sm:$0xff] %v644_v2 }
 0x125   : > { %v646_v3 = vld [vmem:[%s1160_s14 + $0x78] sm:$0xff] }
 0x126   : > { %647 = vst [vmem:[%s603_s17 + $0xe8] sm:$0xff] %v646_v3 }
 0x127 PF: > { %p9_p10 = scmp.ge.s32.totalorder %s984_s13, 4   ;;  %s1215_s9 = smov %s946_s10 }
 0x128   : > { %s1216_s10 = smov %s995_s16  ;;  %s1217_s11 = smov %s984_s13 }
 0x129   :  { %11 = sbr.rel (!%p9_p10) target bundleno = 2 (0x2), region = 109 }

// kernel: generator_forward.7
= control target key start
LH: loop header
LB: loop body
LE: loop exit
PB: predicated region body
PF: predicated region fallthrough
CT: control target
= control target key end

     0   :  { %s8350_s15 = smov 0   ;;  %s8352_s16 = smov 0   ;;  %s10860_s0 = inlined_call_operand.vmem [shape: bf16[4,1024], index: 0, kind: input, shape index: {}]   ;;  %s10861_s1 = inlined_call_operand.vmem [shape: bf16[1024,2048], index: 1, kind: input, shape index: {}]   ;;  %s10862_s2 = inlined_call_operand.vmem [shape: f32[1,2048], index: 2, kind: input, shape index: {}]   ;;  %s10863_s3 = inlined_call_operand.vmem [shape: f32[1,2048], index: 3, kind: input, shape index: {}]   ;;  %s10864_s4 = inlined_call_operand.vmem [shape: bf16[4,2048], index: 4, kind: output, shape index: {}]  }
   0x1   :  { %s8354_s17 = smov 0  }
   0x2 LB: > { %s5653_s18 = sadd.s32 4294967295, %s8322_s17   ;;  %s8367_s19 = sadd.s32 1, %s8322_s17   ;;  %s8322_s17 = sphi %s8354_s17, %s10871_s17   ;;  %s8318_s16 = sphi %s8352_s16, %s10870_s16   ;;  %s8314_s15 = sphi %s8350_s15, %s10869_s15  }
   0x3   : > { %s39_s20 = ssub.s32 %s8322_s17, %s8367_s19  ;;  %s42_s21 = sadd.s32 1, %s8318_s16 }
   0x4   : > { %p40_p0 = scmp.eq.s32.totalorder %s39_s20, 0  ;;  %p49_p1 = scmp.ne.s32.totalorder %s8318_s16, %s8314_s15 }
   0x5   : > { %p50_p2 = scmp.eq.s32.totalorder %s8322_s17, 0  ;;  %p5656_p4 = scmp.ge.s32.totalorder %s8322_s17, 2 }
   0x6   : > { %s8376_s22 = scalar_select %p40_p0, %s8318_s16, %s42_s21  }
   0x7   : > { %p51_p3 = por %p50_p2, %p49_p1  ;;  %156 = sbr.rel (%p5656_p4) target bundleno = 528 (0x210), region = 20 }
   0xc   : > { %159 = sbr.rel (!%p51_p3) target bundleno = 528 (0x210), region = 24  ;;  %s161_s23 = sand.u32 (%p51_p3), 1, %s8318_s16  }
   0xd   : > { %s7716_s24 = sshll.u32 (%p51_p3), %s8322_s17, 5  ;;  %s5657_s25 = sshll.u32 (%p51_p3), %s161_s23, 12 }
   0xe   : > { %s8384_s28 = scalar_lea.vmem (%p51_p3), %s10861_s1, %s7716_s24  ;;  %s8389_s29 = scalar_lea.vmem (%p51_p3), [#allocation2], %s5657_s25 }
   0xf   : > { %v179_v0 = vld [vmem:[%s8384_s28] sm:$0xff] (%p51_p3)  ;;  %v181_v1 = vld [vmem:[%s8384_s28 + $0x8] sm:$0xff] (%p51_p3)  ;;  %v183_v2 = vld [vmem:[%s8384_s28 + $0x10] sm:$0xff] (%p51_p3) }
  0x10   : > { %180 = vst [vmem:[%s8389_s29] sm:$0xff] (%p51_p3), %v179_v0  ;;  %v185_v3 = vld [vmem:[%s8384_s28 + $0x18] sm:$0xff] (%p51_p3)  ;;  %v187_v4 = vld [vmem:[%s8384_s28 + $0x40] sm:$0xff] (%p51_p3)  ;;  %v189_v5 = vld [vmem:[%s8384_s28 + $0x48] sm:$0xff] (%p51_p3) }
  0x11   : > { %182 = vst [vmem:[%s8389_s29 + $0x8] sm:$0xff] %v181_v1  ;;  %v191_v6 = vld [vmem:[%s8384_s28 + $0x50] sm:$0xff]  ;;  %v193_v7 = vld [vmem:[%s8384_s28 + $0x58] sm:$0xff]  ;;  %v195_v8 = vld [vmem:[%s8384_s28 + $0x80] sm:$0xff] }
  0x12   : > { %184 = vst [vmem:[%s8389_s29 + $0x10] sm:$0xff] %v183_v2  ;;  %v197_v9 = vld [vmem:[%s8384_s28 + $0x88] sm:$0xff]  ;;  %v199_v10 = vld [vmem:[%s8384_s28 + $0x90] sm:$0xff]  ;;  %v201_v11 = vld [vmem:[%s8384_s28 + $0x98] sm:$0xff] }
  0x13   : > { %186 = vst [vmem:[%s8389_s29 + $0x18] sm:$0xff] %v185_v3  ;;  %v203_v12 = vld [vmem:[%s8384_s28 + $0xc0] sm:$0xff]  ;;  %v205_v13 = vld [vmem:[%s8384_s28 + $0xc8] sm:$0xff]  ;;  %v207_v14 = vld [vmem:[%s8384_s28 + $0xd0] sm:$0xff] }
  0x14   : > { %188 = vst [vmem:[%s8389_s29 + $0x20] sm:$0xff] %v187_v4  ;;  %v209_v15 = vld [vmem:[%s8384_s28 + $0xd8] sm:$0xff]  ;;  %v211_v16 = vld [vmem:[%s8384_s28 + $0x100] sm:$0xff]  ;;  %v213_v17 = vld [vmem:[%s8384_s28 + $0x108] sm:$0xff] }
  0x15   : > { %190 = vst [vmem:[%s8389_s29 + $0x28] sm:$0xff] %v189_v5  ;;  %v215_v18 = vld [vmem:[%s8384_s28 + $0x110] sm:$0xff]  ;;  %v217_v19 = vld [vmem:[%s8384_s28 + $0x118] sm:$0xff]  ;;  %v219_v20 = vld [vmem:[%s8384_s28 + $0x140] sm:$0xff] }
  0x16   : > { %192 = vst [vmem:[%s8389_s29 + $0x30] sm:$0xff] %v191_v6  ;;  %v221_v21 = vld [vmem:[%s8384_s28 + $0x148] sm:$0xff]  ;;  %v223_v22 = vld [vmem:[%s8384_s28 + $0x150] sm:$0xff]  ;;  %v225_v23 = vld [vmem:[%s8384_s28 + $0x158] sm:$0xff] }
  0x17   : > { %194 = vst [vmem:[%s8389_s29 + $0x38] sm:$0xff] %v193_v7  ;;  %v227_v24 = vld [vmem:[%s8384_s28 + $0x180] sm:$0xff]  ;;  %v229_v25 = vld [vmem:[%s8384_s28 + $0x188] sm:$0xff]  ;;  %v231_v26 = vld [vmem:[%s8384_s28 + $0x190] sm:$0xff] }
  0x18   : > { %196 = vst [vmem:[%s8389_s29 + $0x40] sm:$0xff] %v195_v8  ;;  %v233_v27 = vld [vmem:[%s8384_s28 + $0x198] sm:$0xff]  ;;  %v235_v28 = vld [vmem:[%s8384_s28 + $0x1c0] sm:$0xff]  ;;  %v237_v29 = vld [vmem:[%s8384_s28 + $0x1c8] sm:$0xff] }
  0x19   : > { %198 = vst [vmem:[%s8389_s29 + $0x48] sm:$0xff] %v197_v9  ;;  %v239_v30 = vld [vmem:[%s8384_s28 + $0x1d0] sm:$0xff]  ;;  %v241_v31 = vld [vmem:[%s8384_s28 + $0x1d8] sm:$0xff]  ;;  %v243_v32 = vld [vmem:[%s8384_s28 + $0x200] sm:$0xff] }
  0x1a   : > { %200 = vst [vmem:[%s8389_s29 + $0x50] sm:$0xff] %v199_v10  ;;  %v245_v33 = vld [vmem:[%s8384_s28 + $0x208] sm:$0xff]  ;;  %v247_v34 = vld [vmem:[%s8384_s28 + $0x210] sm:$0xff]  ;;  %v249_v35 = vld [vmem:[%s8384_s28 + $0x218] sm:$0xff] }
  0x1b   : > { %202 = vst [vmem:[%s8389_s29 + $0x58] sm:$0xff] %v201_v11  ;;  %v251_v36 = vld [vmem:[%s8384_s28 + $0x240] sm:$0xff]  ;;  %v253_v37 = vld [vmem:[%s8384_s28 + $0x248] sm:$0xff]  ;;  %v255_v38 = vld [vmem:[%s8384_s28 + $0x250] sm:$0xff] }
  0x1c   : > { %204 = vst [vmem:[%s8389_s29 + $0x60] sm:$0xff] %v203_v12  ;;  %v257_v39 = vld [vmem:[%s8384_s28 + $0x258] sm:$0xff]  ;;  %v259_v40 = vld [vmem:[%s8384_s28 + $0x280] sm:$0xff]  ;;  %v261_v41 = vld [vmem:[%s8384_s28 + $0x288] sm:$0xff] }
  0x1d   : > { %206 = vst [vmem:[%s8389_s29 + $0x68] sm:$0xff] %v205_v13  ;;  %v263_v42 = vld [vmem:[%s8384_s28 + $0x290] sm:$0xff]  ;;  %v265_v43 = vld [vmem:[%s8384_s28 + $0x298] sm:$0xff]  ;;  %v267_v44 = vld [vmem:[%s8384_s28 + $0x2c0] sm:$0xff] }
  0x1e   : > { %208 = vst [vmem:[%s8389_s29 + $0x70] sm:$0xff] %v207_v14  ;;  %v269_v45 = vld [vmem:[%s8384_s28 + $0x2c8] sm:$0xff]  ;;  %v271_v46 = vld [vmem:[%s8384_s28 + $0x2d0] sm:$0xff]  ;;  %v273_v47 = vld [vmem:[%s8384_s28 + $0x2d8] sm:$0xff] }
  0x1f   : > { %210 = vst [vmem:[%s8389_s29 + $0x78] sm:$0xff] %v209_v15  ;;  %v275_v48 = vld [vmem:[%s8384_s28 + $0x300] sm:$0xff]  ;;  %v277_v49 = vld [vmem:[%s8384_s28 + $0x308] sm:$0xff]  ;;  %v279_v50 = vld [vmem:[%s8384_s28 + $0x310] sm:$0xff] }
  0x20   : > { %212 = vst [vmem:[%s8389_s29 + $0x80] sm:$0xff] %v211_v16  ;;  %v281_v51 = vld [vmem:[%s8384_s28 + $0x318] sm:$0xff]  ;;  %v283_v52 = vld [vmem:[%s8384_s28 + $0x340] sm:$0xff]  ;;  %v285_v53 = vld [vmem:[%s8384_s28 + $0x348] sm:$0xff] }
  0x21   : > { %214 = vst [vmem:[%s8389_s29 + $0x88] sm:$0xff] %v213_v17  ;;  %v287_v54 = vld [vmem:[%s8384_s28 + $0x350] sm:$0xff]  ;;  %v289_v55 = vld [vmem:[%s8384_s28 + $0x358] sm:$0xff]  ;;  %v291_v56 = vld [vmem:[%s8384_s28 + $0x380] sm:$0xff] }
  0x22   : > { %216 = vst [vmem:[%s8389_s29 + $0x90] sm:$0xff] %v215_v18  ;;  %v293_v57 = vld [vmem:[%s8384_s28 + $0x388] sm:$0xff]  ;;  %v295_v58 = vld [vmem:[%s8384_s28 + $0x390] sm:$0xff]  ;;  %v297_v59 = vld [vmem:[%s8384_s28 + $0x398] sm:$0xff] }
  0x23   : > { %218 = vst [vmem:[%s8389_s29 + $0x98] sm:$0xff] %v217_v19  ;;  %v299_v60 = vld [vmem:[%s8384_s28 + $0x3c0] sm:$0xff]  ;;  %v301_v61 = vld [vmem:[%s8384_s28 + $0x3c8] sm:$0xff]  ;;  %v303_v62 = vld [vmem:[%s8384_s28 + $0x3d0] sm:$0xff] }
  0x24   : > { %220 = vst [vmem:[%s8389_s29 + $0xa0] sm:$0xff] %v219_v20  ;;  %v305_v63 = vld [vmem:[%s8384_s28 + $0x3d8] sm:$0xff]  ;;  %v307_v0 = vld [vmem:[%s8384_s28 + $0x400] sm:$0xff]  ;;  %v309_v1 = vld [vmem:[%s8384_s28 + $0x408] sm:$0xff] }
  0x25   : > { %222 = vst [vmem:[%s8389_s29 + $0xa8] sm:$0xff] %v221_v21  ;;  %v311_v2 = vld [vmem:[%s8384_s28 + $0x410] sm:$0xff]  ;;  %v313_v3 = vld [vmem:[%s8384_s28 + $0x418] sm:$0xff]  ;;  %v315_v4 = vld [vmem:[%s8384_s28 + $0x440] sm:$0xff] }
  0x26   : > { %224 = vst [vmem:[%s8389_s29 + $0xb0] sm:$0xff] %v223_v22  ;;  %v317_v5 = vld [vmem:[%s8384_s28 + $0x448] sm:$0xff]  ;;  %v319_v6 = vld [vmem:[%s8384_s28 + $0x450] sm:$0xff]  ;;  %v321_v7 = vld [vmem:[%s8384_s28 + $0x458] sm:$0xff] }
  0x27   : > { %226 = vst [vmem:[%s8389_s29 + $0xb8] sm:$0xff] %v225_v23  ;;  %v323_v8 = vld [vmem:[%s8384_s28 + $0x480] sm:$0xff]  ;;  %v325_v9 = vld [vmem:[%s8384_s28 + $0x488] sm:$0xff]  ;;  %v327_v10 = vld [vmem:[%s8384_s28 + $0x490] sm:$0xff] }
  0x28   : > { %228 = vst [vmem:[%s8389_s29 + $0xc0] sm:$0xff] %v227_v24  ;;  %v329_v11 = vld [vmem:[%s8384_s28 + $0x498] sm:$0xff]  ;;  %v331_v12 = vld [vmem:[%s8384_s28 + $0x4c0] sm:$0xff]  ;;  %v333_v13 = vld [vmem:[%s8384_s28 + $0x4c8] sm:$0xff] }
  0x29   : > { %230 = vst [vmem:[%s8389_s29 + $0xc8] sm:$0xff] %v229_v25  ;;  %v335_v14 = vld [vmem:[%s8384_s28 + $0x4d0] sm:$0xff]  ;;  %v337_v15 = vld [vmem:[%s8384_s28 + $0x4d8] sm:$0xff]  ;;  %v339_v16 = vld [vmem:[%s8384_s28 + $0x500] sm:$0xff] }
  0x2a   : > { %232 = vst [vmem:[%s8389_s29 + $0xd0] sm:$0xff] %v231_v26  ;;  %v341_v17 = vld [vmem:[%s8384_s28 + $0x508] sm:$0xff]  ;;  %v343_v18 = vld [vmem:[%s8384_s28 + $0x510] sm:$0xff]  ;;  %v345_v19 = vld [vmem:[%s8384_s28 + $0x518] sm:$0xff] }
  0x2b   : > { %234 = vst [vmem:[%s8389_s29 + $0xd8] sm:$0xff] %v233_v27  ;;  %v347_v20 = vld [vmem:[%s8384_s28 + $0x540] sm:$0xff]  ;;  %v349_v21 = vld [vmem:[%s8384_s28 + $0x548] sm:$0xff]  ;;  %v351_v22 = vld [vmem:[%s8384_s28 + $0x550] sm:$0xff] }
  0x2c   : > { %236 = vst [vmem:[%s8389_s29 + $0xe0] sm:$0xff] %v235_v28  ;;  %v353_v23 = vld [vmem:[%s8384_s28 + $0x558] sm:$0xff]  ;;  %v355_v24 = vld [vmem:[%s8384_s28 + $0x580] sm:$0xff]  ;;  %v357_v25 = vld [vmem:[%s8384_s28 + $0x588] sm:$0xff] }
  0x2d   : > { %238 = vst [vmem:[%s8389_s29 + $0xe8] sm:$0xff] %v237_v29  ;;  %v359_v26 = vld [vmem:[%s8384_s28 + $0x590] sm:$0xff]  ;;  %v361_v27 = vld [vmem:[%s8384_s28 + $0x598] sm:$0xff]  ;;  %v363_v28 = vld [vmem:[%s8384_s28 + $0x5c0] sm:$0xff] }
  0x2e   : > { %240 = vst [vmem:[%s8389_s29 + $0xf0] sm:$0xff] %v239_v30  ;;  %v365_v29 = vld [vmem:[%s8384_s28 + $0x5c8] sm:$0xff]  ;;  %v367_v30 = vld [vmem:[%s8384_s28 + $0x5d0] sm:$0xff] }
  0x2f   : > { %242 = vst [vmem:[%s8389_s29 + $0xf8] sm:$0xff] %v241_v31  ;;  %v369_v31 = vld [vmem:[%s8384_s28 + $0x5d8] sm:$0xff] }
  0x30   : > { %244 = vst [vmem:[%s8389_s29 + $0x100] sm:$0xff] %v243_v32  ;;  %v371_v32 = vld [vmem:[%s8384_s28 + $0x600] sm:$0xff] }
  0x31   : > { %246 = vst [vmem:[%s8389_s29 + $0x108] sm:$0xff] %v245_v33  ;;  %v373_v33 = vld [vmem:[%s8384_s28 + $0x608] sm:$0xff] }
  0x32   : > { %248 = vst [vmem:[%s8389_s29 + $0x110] sm:$0xff] %v247_v34  ;;  %v375_v34 = vld [vmem:[%s8384_s28 + $0x610] sm:$0xff] }
  0x33   : > { %250 = vst [vmem:[%s8389_s29 + $0x118] sm:$0xff] %v249_v35  ;;  %v377_v35 = vld [vmem:[%s8384_s28 + $0x618] sm:$0xff] }
  0x34   : > { %252 = vst [vmem:[%s8389_s29 + $0x120] sm:$0xff] %v251_v36  ;;  %v379_v36 = vld [vmem:[%s8384_s28 + $0x640] sm:$0xff] }
  0x35   : > { %254 = vst [vmem:[%s8389_s29 + $0x128] sm:$0xff] %v253_v37  ;;  %v381_v37 = vld [vmem:[%s8384_s28 + $0x648] sm:$0xff] }
  0x36   : > { %256 = vst [vmem:[%s8389_s29 + $0x130] sm:$0xff] %v255_v38  ;;  %v383_v38 = vld [vmem:[%s8384_s28 + $0x650] sm:$0xff] }
  0x37   : > { %258 = vst [vmem:[%s8389_s29 + $0x138] sm:$0xff] %v257_v39  ;;  %v385_v39 = vld [vmem:[%s8384_s28 + $0x658] sm:$0xff] }
  0x38   : > { %260 = vst [vmem:[%s8389_s29 + $0x140] sm:$0xff] %v259_v40  ;;  %v387_v40 = vld [vmem:[%s8384_s28 + $0x680] sm:$0xff] }
  0x39   : > { %262 = vst [vmem:[%s8389_s29 + $0x148] sm:$0xff] %v261_v41  ;;  %v389_v41 = vld [vmem:[%s8384_s28 + $0x688] sm:$0xff] }
  0x3a   : > { %264 = vst [vmem:[%s8389_s29 + $0x150] sm:$0xff] %v263_v42  ;;  %v391_v42 = vld [vmem:[%s8384_s28 + $0x690] sm:$0xff] }
  0x3b   : > { %266 = vst [vmem:[%s8389_s29 + $0x158] sm:$0xff] %v265_v43  ;;  %v393_v43 = vld [vmem:[%s8384_s28 + $0x698] sm:$0xff] }
  0x3c   : > { %268 = vst [vmem:[%s8389_s29 + $0x160] sm:$0xff] %v267_v44  ;;  %v395_v44 = vld [vmem:[%s8384_s28 + $0x6c0] sm:$0xff] }
  0x3d   : > { %270 = vst [vmem:[%s8389_s29 + $0x168] sm:$0xff] %v269_v45  ;;  %v397_v45 = vld [vmem:[%s8384_s28 + $0x6c8] sm:$0xff] }
  0x3e   : > { %272 = vst [vmem:[%s8389_s29 + $0x170] sm:$0xff] %v271_v46  ;;  %v399_v46 = vld [vmem:[%s8384_s28 + $0x6d0] sm:$0xff] }
  0x3f   : > { %274 = vst [vmem:[%s8389_s29 + $0x178] sm:$0xff] %v273_v47  ;;  %v401_v47 = vld [vmem:[%s8384_s28 + $0x6d8] sm:$0xff] }
  0x40   : > { %276 = vst [vmem:[%s8389_s29 + $0x180] sm:$0xff] %v275_v48  ;;  %v403_v48 = vld [vmem:[%s8384_s28 + $0x700] sm:$0xff] }
  0x41   : > { %278 = vst [vmem:[%s8389_s29 + $0x188] sm:$0xff] %v277_v49  ;;  %v405_v49 = vld [vmem:[%s8384_s28 + $0x708] sm:$0xff] }
  0x42   : > { %280 = vst [vmem:[%s8389_s29 + $0x190] sm:$0xff] %v279_v50  ;;  %v407_v50 = vld [vmem:[%s8384_s28 + $0x710] sm:$0xff] }
  0x43   : > { %282 = vst [vmem:[%s8389_s29 + $0x198] sm:$0xff] %v281_v51  ;;  %v409_v51 = vld [vmem:[%s8384_s28 + $0x718] sm:$0xff] }
  0x44   : > { %284 = vst [vmem:[%s8389_s29 + $0x1a0] sm:$0xff] %v283_v52  ;;  %v411_v52 = vld [vmem:[%s8384_s28 + $0x740] sm:$0xff] }
  0x45   : > { %286 = vst [vmem:[%s8389_s29 + $0x1a8] sm:$0xff] %v285_v53  ;;  %v413_v53 = vld [vmem:[%s8384_s28 + $0x748] sm:$0xff] }
  0x46   : > { %288 = vst [vmem:[%s8389_s29 + $0x1b0] sm:$0xff] %v287_v54  ;;  %v415_v54 = vld [vmem:[%s8384_s28 + $0x750] sm:$0xff] }
  0x47   : > { %290 = vst [vmem:[%s8389_s29 + $0x1b8] sm:$0xff] %v289_v55  ;;  %v417_v55 = vld [vmem:[%s8384_s28 + $0x758] sm:$0xff] }
  0x48   : > { %292 = vst [vmem:[%s8389_s29 + $0x1c0] sm:$0xff] %v291_v56  ;;  %v419_v56 = vld [vmem:[%s8384_s28 + $0x780] sm:$0xff] }
  0x49   : > { %294 = vst [vmem:[%s8389_s29 + $0x1c8] sm:$0xff] %v293_v57  ;;  %v421_v57 = vld [vmem:[%s8384_s28 + $0x788] sm:$0xff] }
  0x4a   : > { %296 = vst [vmem:[%s8389_s29 + $0x1d0] sm:$0xff] %v295_v58  ;;  %v423_v58 = vld [vmem:[%s8384_s28 + $0x790] sm:$0xff] }
  0x4b   : > { %298 = vst [vmem:[%s8389_s29 + $0x1d8] sm:$0xff] %v297_v59  ;;  %v425_v59 = vld [vmem:[%s8384_s28 + $0x798] sm:$0xff] }
  0x4c   : > { %300 = vst [vmem:[%s8389_s29 + $0x1e0] sm:$0xff] %v299_v60  ;;  %v427_v60 = vld [vmem:[%s8384_s28 + $0x7c0] sm:$0xff] }
  0x4d   : > { %302 = vst [vmem:[%s8389_s29 + $0x1e8] sm:$0xff] %v301_v61  ;;  %v429_v61 = vld [vmem:[%s8384_s28 + $0x7c8] sm:$0xff] }
  0x4e   : > { %304 = vst [vmem:[%s8389_s29 + $0x1f0] sm:$0xff] %v303_v62  ;;  %v431_v62 = vld [vmem:[%s8384_s28 + $0x7d0] sm:$0xff] }
  0x4f   : > { %306 = vst [vmem:[%s8389_s29 + $0x1f8] sm:$0xff] %v305_v63  ;;  %v433_v63 = vld [vmem:[%s8384_s28 + $0x7d8] sm:$0xff] }
  0x50   : > { %308 = vst [vmem:[%s8389_s29 + $0x200] sm:$0xff] %v307_v0  ;;  %v435_v0 = vld [vmem:[%s8384_s28 + $0x800] sm:$0xff] }
  0x51   : > { %310 = vst [vmem:[%s8389_s29 + $0x208] sm:$0xff] %v309_v1  ;;  %v437_v1 = vld [vmem:[%s8384_s28 + $0x808] sm:$0xff] }
  0x52   : > { %312 = vst [vmem:[%s8389_s29 + $0x210] sm:$0xff] %v311_v2  ;;  %v439_v2 = vld [vmem:[%s8384_s28 + $0x810] sm:$0xff] }
  0x53   : > { %314 = vst [vmem:[%s8389_s29 + $0x218] sm:$0xff] %v313_v3  ;;  %v441_v3 = vld [vmem:[%s8384_s28 + $0x818] sm:$0xff] }
  0x54   : > { %316 = vst [vmem:[%s8389_s29 + $0x220] sm:$0xff] %v315_v4  ;;  %v443_v4 = vld [vmem:[%s8384_s28 + $0x840] sm:$0xff] }
  0x55   : > { %318 = vst [vmem:[%s8389_s29 + $0x228] sm:$0xff] %v317_v5  ;;  %v445_v5 = vld [vmem:[%s8384_s28 + $0x848] sm:$0xff] }
  0x56   : > { %320 = vst [vmem:[%s8389_s29 + $0x230] sm:$0xff] %v319_v6  ;;  %v447_v6 = vld [vmem:[%s8384_s28 + $0x850] sm:$0xff] }
  0x57   : > { %322 = vst [vmem:[%s8389_s29 + $0x238] sm:$0xff] %v321_v7  ;;  %v449_v7 = vld [vmem:[%s8384_s28 + $0x858] sm:$0xff] }
  0x58   : > { %324 = vst [vmem:[%s8389_s29 + $0x240] sm:$0xff] %v323_v8  ;;  %v451_v8 = vld [vmem:[%s8384_s28 + $0x880] sm:$0xff] }
  0x59   : > { %326 = vst [vmem:[%s8389_s29 + $0x248] sm:$0xff] %v325_v9  ;;  %v453_v9 = vld [vmem:[%s8384_s28 + $0x888] sm:$0xff] }
  0x5a   : > { %328 = vst [vmem:[%s8389_s29 + $0x250] sm:$0xff] %v327_v10  ;;  %v455_v10 = vld [vmem:[%s8384_s28 + $0x890] sm:$0xff] }
  0x5b   : > { %330 = vst [vmem:[%s8389_s29 + $0x258] sm:$0xff] %v329_v11  ;;  %v457_v11 = vld [vmem:[%s8384_s28 + $0x898] sm:$0xff] }
  0x5c   : > { %332 = vst [vmem:[%s8389_s29 + $0x260] sm:$0xff] %v331_v12  ;;  %v459_v12 = vld [vmem:[%s8384_s28 + $0x8c0] sm:$0xff] }
  0x5d   : > { %334 = vst [vmem:[%s8389_s29 + $0x268] sm:$0xff] %v333_v13  ;;  %v461_v13 = vld [vmem:[%s8384_s28 + $0x8c8] sm:$0xff] }
  0x5e   : > { %336 = vst [vmem:[%s8389_s29 + $0x270] sm:$0xff] %v335_v14  ;;  %v463_v14 = vld [vmem:[%s8384_s28 + $0x8d0] sm:$0xff] }
  0x5f   : > { %338 = vst [vmem:[%s8389_s29 + $0x278] sm:$0xff] %v337_v15  ;;  %v465_v15 = vld [vmem:[%s8384_s28 + $0x8d8] sm:$0xff] }
  0x60   : > { %340 = vst [vmem:[%s8389_s29 + $0x280] sm:$0xff] %v339_v16  ;;  %v467_v16 = vld [vmem:[%s8384_s28 + $0x900] sm:$0xff] }
  0x61   : > { %342 = vst [vmem:[%s8389_s29 + $0x288] sm:$0xff] %v341_v17  ;;  %v469_v17 = vld [vmem:[%s8384_s28 + $0x908] sm:$0xff] }
  0x62   : > { %344 = vst [vmem:[%s8389_s29 + $0x290] sm:$0xff] %v343_v18  ;;  %v471_v18 = vld [vmem:[%s8384_s28 + $0x910] sm:$0xff] }
  0x63   : > { %346 = vst [vmem:[%s8389_s29 + $0x298] sm:$0xff] %v345_v19  ;;  %v473_v19 = vld [vmem:[%s8384_s28 + $0x918] sm:$0xff] }
  0x64   : > { %348 = vst [vmem:[%s8389_s29 + $0x2a0] sm:$0xff] %v347_v20  ;;  %v475_v20 = vld [vmem:[%s8384_s28 + $0x940] sm:$0xff] }
  0x65   : > { %350 = vst [vmem:[%s8389_s29 + $0x2a8] sm:$0xff] %v349_v21  ;;  %v477_v21 = vld [vmem:[%s8384_s28 + $0x948] sm:$0xff] }
  0x66   : > { %352 = vst [vmem:[%s8389_s29 + $0x2b0] sm:$0xff] %v351_v22  ;;  %v479_v22 = vld [vmem:[%s8384_s28 + $0x950] sm:$0xff] }
  0x67   : > { %354 = vst [vmem:[%s8389_s29 + $0x2b8] sm:$0xff] %v353_v23  ;;  %v481_v23 = vld [vmem:[%s8384_s28 + $0x958] sm:$0xff] }
  0x68   : > { %356 = vst [vmem:[%s8389_s29 + $0x2c0] sm:$0xff] %v355_v24  ;;  %v483_v24 = vld [vmem:[%s8384_s28 + $0x980] sm:$0xff] }
  0x69   : > { %358 = vst [vmem:[%s8389_s29 + $0x2c8] sm:$0xff] %v357_v25  ;;  %v485_v25 = vld [vmem:[%s8384_s28 + $0x988] sm:$0xff] }
  0x6a   : > { %360 = vst [vmem:[%s8389_s29 + $0x2d0] sm:$0xff] %v359_v26  ;;  %v487_v26 = vld [vmem:[%s8384_s28 + $0x990] sm:$0xff] }
  0x6b   : > { %362 = vst [vmem:[%s8389_s29 + $0x2d8] sm:$0xff] %v361_v27  ;;  %v489_v27 = vld [vmem:[%s8384_s28 + $0x998] sm:$0xff] }
  0x6c   : > { %364 = vst [vmem:[%s8389_s29 + $0x2e0] sm:$0xff] %v363_v28  ;;  %v491_v28 = vld [vmem:[%s8384_s28 + $0x9c0] sm:$0xff] }
  0x6d   : > { %366 = vst [vmem:[%s8389_s29 + $0x2e8] sm:$0xff] %v365_v29  ;;  %v493_v29 = vld [vmem:[%s8384_s28 + $0x9c8] sm:$0xff] }
  0x6e   : > { %368 = vst [vmem:[%s8389_s29 + $0x2f0] sm:$0xff] %v367_v30  ;;  %v495_v30 = vld [vmem:[%s8384_s28 + $0x9d0] sm:$0xff] }
  0x6f   : > { %370 = vst [vmem:[%s8389_s29 + $0x2f8] sm:$0xff] %v369_v31  ;;  %v497_v31 = vld [vmem:[%s8384_s28 + $0x9d8] sm:$0xff] }
  0x70   : > { %372 = vst [vmem:[%s8389_s29 + $0x300] sm:$0xff] %v371_v32  ;;  %v499_v32 = vld [vmem:[%s8384_s28 + $0xa00] sm:$0xff] }
  0x71   : > { %374 = vst [vmem:[%s8389_s29 + $0x308] sm:$0xff] %v373_v33  ;;  %v501_v33 = vld [vmem:[%s8384_s28 + $0xa08] sm:$0xff] }
  0x72   : > { %376 = vst [vmem:[%s8389_s29 + $0x310] sm:$0xff] %v375_v34  ;;  %v503_v34 = vld [vmem:[%s8384_s28 + $0xa10] sm:$0xff] }
  0x73   : > { %378 = vst [vmem:[%s8389_s29 + $0x318] sm:$0xff] %v377_v35  ;;  %v505_v35 = vld [vmem:[%s8384_s28 + $0xa18] sm:$0xff] }
  0x74   : > { %380 = vst [vmem:[%s8389_s29 + $0x320] sm:$0xff] %v379_v36  ;;  %v507_v36 = vld [vmem:[%s8384_s28 + $0xa40] sm:$0xff] }
  0x75   : > { %382 = vst [vmem:[%s8389_s29 + $0x328] sm:$0xff] %v381_v37  ;;  %v509_v37 = vld [vmem:[%s8384_s28 + $0xa48] sm:$0xff] }
  0x76   : > { %384 = vst [vmem:[%s8389_s29 + $0x330] sm:$0xff] %v383_v38  ;;  %v511_v38 = vld [vmem:[%s8384_s28 + $0xa50] sm:$0xff] }
  0x77   : > { %386 = vst [vmem:[%s8389_s29 + $0x338] sm:$0xff] %v385_v39  ;;  %v513_v39 = vld [vmem:[%s8384_s28 + $0xa58] sm:$0xff] }
  0x78   : > { %388 = vst [vmem:[%s8389_s29 + $0x340] sm:$0xff] %v387_v40  ;;  %v515_v40 = vld [vmem:[%s8384_s28 + $0xa80] sm:$0xff] }
  0x79   : > { %390 = vst [vmem:[%s8389_s29 + $0x348] sm:$0xff] %v389_v41  ;;  %v517_v41 = vld [vmem:[%s8384_s28 + $0xa88] sm:$0xff] }
  0x7a   : > { %392 = vst [vmem:[%s8389_s29 + $0x350] sm:$0xff] %v391_v42  ;;  %v519_v42 = vld [vmem:[%s8384_s28 + $0xa90] sm:$0xff] }
  0x7b   : > { %394 = vst [vmem:[%s8389_s29 + $0x358] sm:$0xff] %v393_v43  ;;  %v521_v43 = vld [vmem:[%s8384_s28 + $0xa98] sm:$0xff] }
  0x7c   : > { %396 = vst [vmem:[%s8389_s29 + $0x360] sm:$0xff] %v395_v44  ;;  %v523_v44 = vld [vmem:[%s8384_s28 + $0xac0] sm:$0xff] }
  0x7d   : > { %398 = vst [vmem:[%s8389_s29 + $0x368] sm:$0xff] %v397_v45  ;;  %v525_v45 = vld [vmem:[%s8384_s28 + $0xac8] sm:$0xff] }
  0x7e   : > { %400 = vst [vmem:[%s8389_s29 + $0x370] sm:$0xff] %v399_v46  ;;  %v527_v46 = vld [vmem:[%s8384_s28 + $0xad0] sm:$0xff] }
  0x7f   : > { %402 = vst [vmem:[%s8389_s29 + $0x378] sm:$0xff] %v401_v47  ;;  %v529_v47 = vld [vmem:[%s8384_s28 + $0xad8] sm:$0xff] }
  0x80   : > { %404 = vst [vmem:[%s8389_s29 + $0x380] sm:$0xff] %v403_v48  ;;  %v531_v48 = vld [vmem:[%s8384_s28 + $0xb00] sm:$0xff] }
  0x81   : > { %406 = vst [vmem:[%s8389_s29 + $0x388] sm:$0xff] %v405_v49  ;;  %v533_v49 = vld [vmem:[%s8384_s28 + $0xb08] sm:$0xff] }
  0x82   : > { %408 = vst [vmem:[%s8389_s29 + $0x390] sm:$0xff] %v407_v50  ;;  %v535_v50 = vld [vmem:[%s8384_s28 + $0xb10] sm:$0xff] }
  0x83   : > { %410 = vst [vmem:[%s8389_s29 + $0x398] sm:$0xff] %v409_v51  ;;  %v537_v51 = vld [vmem:[%s8384_s28 + $0xb18] sm:$0xff] }
  0x84   : > { %412 = vst [vmem:[%s8389_s29 + $0x3a0] sm:$0xff] %v411_v52  ;;  %v539_v52 = vld [vmem:[%s8384_s28 + $0xb40] sm:$0xff] }
  0x85   : > { %414 = vst [vmem:[%s8389_s29 + $0x3a8] sm:$0xff] %v413_v53  ;;  %v541_v53 = vld [vmem:[%s8384_s28 + $0xb48] sm:$0xff] }
  0x86   : > { %416 = vst [vmem:[%s8389_s29 + $0x3b0] sm:$0xff] %v415_v54  ;;  %v543_v54 = vld [vmem:[%s8384_s28 + $0xb50] sm:$0xff] }
  0x87   : > { %418 = vst [vmem:[%s8389_s29 + $0x3b8] sm:$0xff] %v417_v55  ;;  %v545_v55 = vld [vmem:[%s8384_s28 + $0xb58] sm:$0xff] }
  0x88   : > { %420 = vst [vmem:[%s8389_s29 + $0x3c0] sm:$0xff] %v419_v56  ;;  %v547_v56 = vld [vmem:[%s8384_s28 + $0xb80] sm:$0xff] }
  0x89   : > { %422 = vst [vmem:[%s8389_s29 + $0x3c8] sm:$0xff] %v421_v57  ;;  %v549_v57 = vld [vmem:[%s8384_s28 + $0xb88] sm:$0xff] }
  0x8a   : > { %424 = vst [vmem:[%s8389_s29 + $0x3d0] sm:$0xff] %v423_v58  ;;  %v551_v58 = vld [vmem:[%s8384_s28 + $0xb90] sm:$0xff] }
  0x8b   : > { %426 = vst [vmem:[%s8389_s29 + $0x3d8] sm:$0xff] %v425_v59  ;;  %v553_v59 = vld [vmem:[%s8384_s28 + $0xb98] sm:$0xff] }
  0x8c   : > { %428 = vst [vmem:[%s8389_s29 + $0x3e0] sm:$0xff] %v427_v60  ;;  %v555_v60 = vld [vmem:[%s8384_s28 + $0xbc0] sm:$0xff] }
  0x8d   : > { %430 = vst [vmem:[%s8389_s29 + $0x3e8] sm:$0xff] %v429_v61  ;;  %v557_v61 = vld [vmem:[%s8384_s28 + $0xbc8] sm:$0xff] }
  0x8e   : > { %432 = vst [vmem:[%s8389_s29 + $0x3f0] sm:$0xff] %v431_v62  ;;  %v559_v62 = vld [vmem:[%s8384_s28 + $0xbd0] sm:$0xff] }
  0x8f   : > { %434 = vst [vmem:[%s8389_s29 + $0x3f8] sm:$0xff] %v433_v63  ;;  %v561_v63 = vld [vmem:[%s8384_s28 + $0xbd8] sm:$0xff] }
  0x90   : > { %436 = vst [vmem:[%s8389_s29 + $0x400] sm:$0xff] %v435_v0  ;;  %v563_v0 = vld [vmem:[%s8384_s28 + $0xc00] sm:$0xff] }
  0x91   : > { %438 = vst [vmem:[%s8389_s29 + $0x408] sm:$0xff] %v437_v1  ;;  %v565_v1 = vld [vmem:[%s8384_s28 + $0xc08] sm:$0xff] }
  0x92   : > { %440 = vst [vmem:[%s8389_s29 + $0x410] sm:$0xff] %v439_v2  ;;  %v567_v2 = vld [vmem:[%s8384_s28 + $0xc10] sm:$0xff] }
  0x93   : > { %442 = vst [vmem:[%s8389_s29 + $0x418] sm:$0xff] %v441_v3  ;;  %v569_v3 = vld [vmem:[%s8384_s28 + $0xc18] sm:$0xff] }
  0x94   : > { %444 = vst [vmem:[%s8389_s29 + $0x420] sm:$0xff] %v443_v4  ;;  %v571_v4 = vld [vmem:[%s8384_s28 + $0xc40] sm:$0xff] }
  0x95   : > { %446 = vst [vmem:[%s8389_s29 + $0x428] sm:$0xff] %v445_v5  ;;  %v573_v5 = vld [vmem:[%s8384_s28 + $0xc48] sm:$0xff] }
  0x96   : > { %448 = vst [vmem:[%s8389_s29 + $0x430] sm:$0xff] %v447_v6  ;;  %v575_v6 = vld [vmem:[%s8384_s28 + $0xc50] sm:$0xff] }
  0x97   : > { %450 = vst [vmem:[%s8389_s29 + $0x438] sm:$0xff] %v449_v7  ;;  %v577_v7 = vld [vmem:[%s8384_s28 + $0xc58] sm:$0xff] }
  0x98   : > { %452 = vst [vmem:[%s8389_s29 + $0x440] sm:$0xff] %v451_v8  ;;  %v579_v8 = vld [vmem:[%s8384_s28 + $0xc80] sm:$0xff] }
  0x99   : > { %454 = vst [vmem:[%s8389_s29 + $0x448] sm:$0xff] %v453_v9  ;;  %v581_v9 = vld [vmem:[%s8384_s28 + $0xc88] sm:$0xff] }
  0x9a   : > { %456 = vst [vmem:[%s8389_s29 + $0x450] sm:$0xff] %v455_v10  ;;  %v583_v10 = vld [vmem:[%s8384_s28 + $0xc90] sm:$0xff] }
  0x9b   : > { %458 = vst [vmem:[%s8389_s29 + $0x458] sm:$0xff] %v457_v11  ;;  %v585_v11 = vld [vmem:[%s8384_s28 + $0xc98] sm:$0xff] }
  0x9c   : > { %460 = vst [vmem:[%s8389_s29 + $0x460] sm:$0xff] %v459_v12  ;;  %v587_v12 = vld [vmem:[%s8384_s28 + $0xcc0] sm:$0xff] }
  0x9d   : > { %462 = vst [vmem:[%s8389_s29 + $0x468] sm:$0xff] %v461_v13  ;;  %v589_v13 = vld [vmem:[%s8384_s28 + $0xcc8] sm:$0xff] }
  0x9e   : > { %464 = vst [vmem:[%s8389_s29 + $0x470] sm:$0xff] %v463_v14  ;;  %v591_v14 = vld [vmem:[%s8384_s28 + $0xcd0] sm:$0xff] }
  0x9f   : > { %466 = vst [vmem:[%s8389_s29 + $0x478] sm:$0xff] %v465_v15  ;;  %v593_v15 = vld [vmem:[%s8384_s28 + $0xcd8] sm:$0xff] }
  0xa0   : > { %468 = vst [vmem:[%s8389_s29 + $0x480] sm:$0xff] %v467_v16  ;;  %v595_v16 = vld [vmem:[%s8384_s28 + $0xd00] sm:$0xff] }
  0xa1   : > { %470 = vst [vmem:[%s8389_s29 + $0x488] sm:$0xff] %v469_v17  ;;  %v597_v17 = vld [vmem:[%s8384_s28 + $0xd08] sm:$0xff] }
  0xa2   : > { %472 = vst [vmem:[%s8389_s29 + $0x490] sm:$0xff] %v471_v18  ;;  %v599_v18 = vld [vmem:[%s8384_s28 + $0xd10] sm:$0xff] }
  0xa3   : > { %474 = vst [vmem:[%s8389_s29 + $0x498] sm:$0xff] %v473_v19  ;;  %v601_v19 = vld [vmem:[%s8384_s28 + $0xd18] sm:$0xff] }
  0xa4   : > { %476 = vst [vmem:[%s8389_s29 + $0x4a0] sm:$0xff] %v475_v20  ;;  %v603_v20 = vld [vmem:[%s8384_s28 + $0xd40] sm:$0xff] }
  0xa5   : > { %478 = vst [vmem:[%s8389_s29 + $0x4a8] sm:$0xff] %v477_v21  ;;  %v605_v21 = vld [vmem:[%s8384_s28 + $0xd48] sm:$0xff] }
  0xa6   : > { %480 = vst [vmem:[%s8389_s29 + $0x4b0] sm:$0xff] %v479_v22  ;;  %v607_v22 = vld [vmem:[%s8384_s28 + $0xd50] sm:$0xff] }
  0xa7   : > { %482 = vst [vmem:[%s8389_s29 + $0x4b8] sm:$0xff] %v481_v23  ;;  %v609_v23 = vld [vmem:[%s8384_s28 + $0xd58] sm:$0xff] }
  0xa8   : > { %484 = vst [vmem:[%s8389_s29 + $0x4c0] sm:$0xff] %v483_v24  ;;  %v611_v24 = vld [vmem:[%s8384_s28 + $0xd80] sm:$0xff] }
  0xa9   : > { %486 = vst [vmem:[%s8389_s29 + $0x4c8] sm:$0xff] %v485_v25  ;;  %v613_v25 = vld [vmem:[%s8384_s28 + $0xd88] sm:$0xff] }
  0xaa   : > { %488 = vst [vmem:[%s8389_s29 + $0x4d0] sm:$0xff] %v487_v26  ;;  %v615_v26 = vld [vmem:[%s8384_s28 + $0xd90] sm:$0xff] }
  0xab   : > { %490 = vst [vmem:[%s8389_s29 + $0x4d8] sm:$0xff] %v489_v27  ;;  %v617_v27 = vld [vmem:[%s8384_s28 + $0xd98] sm:$0xff] }
  0xac   : > { %492 = vst [vmem:[%s8389_s29 + $0x4e0] sm:$0xff] %v491_v28  ;;  %v619_v28 = vld [vmem:[%s8384_s28 + $0xdc0] sm:$0xff] }
  0xad   : > { %494 = vst [vmem:[%s8389_s29 + $0x4e8] sm:$0xff] %v493_v29  ;;  %v621_v29 = vld [vmem:[%s8384_s28 + $0xdc8] sm:$0xff] }
  0xae   : > { %496 = vst [vmem:[%s8389_s29 + $0x4f0] sm:$0xff] %v495_v30  ;;  %v623_v30 = vld [vmem:[%s8384_s28 + $0xdd0] sm:$0xff] }
  0xaf   : > { %498 = vst [vmem:[%s8389_s29 + $0x4f8] sm:$0xff] %v497_v31  ;;  %v625_v31 = vld [vmem:[%s8384_s28 + $0xdd8] sm:$0xff] }
  0xb0   : > { %500 = vst [vmem:[%s8389_s29 + $0x500] sm:$0xff] %v499_v32  ;;  %v627_v32 = vld [vmem:[%s8384_s28 + $0xe00] sm:$0xff] }
  0xb1   : > { %502 = vst [vmem:[%s8389_s29 + $0x508] sm:$0xff] %v501_v33  ;;  %v629_v33 = vld [vmem:[%s8384_s28 + $0xe08] sm:$0xff] }
  0xb2   : > { %504 = vst [vmem:[%s8389_s29 + $0x510] sm:$0xff] %v503_v34  ;;  %v631_v34 = vld [vmem:[%s8384_s28 + $0xe10] sm:$0xff] }
  0xb3   : > { %506 = vst [vmem:[%s8389_s29 + $0x518] sm:$0xff] %v505_v35  ;;  %v633_v35 = vld [vmem:[%s8384_s28 + $0xe18] sm:$0xff] }
  0xb4   : > { %508 = vst [vmem:[%s8389_s29 + $0x520] sm:$0xff] %v507_v36  ;;  %v635_v36 = vld [vmem:[%s8384_s28 + $0xe40] sm:$0xff] }
  0xb5   : > { %510 = vst [vmem:[%s8389_s29 + $0x528] sm:$0xff] %v509_v37  ;;  %v637_v37 = vld [vmem:[%s8384_s28 + $0xe48] sm:$0xff] }
  0xb6   : > { %512 = vst [vmem:[%s8389_s29 + $0x530] sm:$0xff] %v511_v38  ;;  %v639_v38 = vld [vmem:[%s8384_s28 + $0xe50] sm:$0xff] }
  0xb7   : > { %514 = vst [vmem:[%s8389_s29 + $0x538] sm:$0xff] %v513_v39  ;;  %v641_v39 = vld [vmem:[%s8384_s28 + $0xe58] sm:$0xff] }
  0xb8   : > { %516 = vst [vmem:[%s8389_s29 + $0x540] sm:$0xff] %v515_v40  ;;  %v643_v40 = vld [vmem:[%s8384_s28 + $0xe80] sm:$0xff] }
  0xb9   : > { %518 = vst [vmem:[%s8389_s29 + $0x548] sm:$0xff] %v517_v41  ;;  %v645_v41 = vld [vmem:[%s8384_s28 + $0xe88] sm:$0xff] }
  0xba   : > { %520 = vst [vmem:[%s8389_s29 + $0x550] sm:$0xff] %v519_v42  ;;  %v647_v42 = vld [vmem:[%s8384_s28 + $0xe90] sm:$0xff] }
  0xbb   : > { %522 = vst [vmem:[%s8389_s29 + $0x558] sm:$0xff] %v521_v43  ;;  %v649_v43 = vld [vmem:[%s8384_s28 + $0xe98] sm:$0xff] }
  0xbc   : > { %524 = vst [vmem:[%s8389_s29 + $0x560] sm:$0xff] %v523_v44  ;;  %v651_v44 = vld [vmem:[%s8384_s28 + $0xec0] sm:$0xff] }
  0xbd   : > { %526 = vst [vmem:[%s8389_s29 + $0x568] sm:$0xff] %v525_v45  ;;  %v653_v45 = vld [vmem:[%s8384_s28 + $0xec8] sm:$0xff] }
  0xbe   : > { %528 = vst [vmem:[%s8389_s29 + $0x570] sm:$0xff] %v527_v46  ;;  %v655_v46 = vld [vmem:[%s8384_s28 + $0xed0] sm:$0xff] }
  0xbf   : > { %530 = vst [vmem:[%s8389_s29 + $0x578] sm:$0xff] %v529_v47  ;;  %v657_v47 = vld [vmem:[%s8384_s28 + $0xed8] sm:$0xff] }
  0xc0   : > { %532 = vst [vmem:[%s8389_s29 + $0x580] sm:$0xff] %v531_v48  ;;  %v659_v48 = vld [vmem:[%s8384_s28 + $0xf00] sm:$0xff] }
  0xc1   : > { %534 = vst [vmem:[%s8389_s29 + $0x588] sm:$0xff] %v533_v49  ;;  %v661_v49 = vld [vmem:[%s8384_s28 + $0xf08] sm:$0xff] }
  0xc2   : > { %536 = vst [vmem:[%s8389_s29 + $0x590] sm:$0xff] %v535_v50  ;;  %v663_v50 = vld [vmem:[%s8384_s28 + $0xf10] sm:$0xff] }
  0xc3   : > { %538 = vst [vmem:[%s8389_s29 + $0x598] sm:$0xff] %v537_v51  ;;  %v665_v51 = vld [vmem:[%s8384_s28 + $0xf18] sm:$0xff] }
  0xc4   : > { %540 = vst [vmem:[%s8389_s29 + $0x5a0] sm:$0xff] %v539_v52  ;;  %v667_v52 = vld [vmem:[%s8384_s28 + $0xf40] sm:$0xff] }
  0xc5   : > { %542 = vst [vmem:[%s8389_s29 + $0x5a8] sm:$0xff] %v541_v53  ;;  %v669_v53 = vld [vmem:[%s8384_s28 + $0xf48] sm:$0xff] }
  0xc6   : > { %544 = vst [vmem:[%s8389_s29 + $0x5b0] sm:$0xff] %v543_v54  ;;  %v671_v54 = vld [vmem:[%s8384_s28 + $0xf50] sm:$0xff] }
  0xc7   : > { %546 = vst [vmem:[%s8389_s29 + $0x5b8] sm:$0xff] %v545_v55  ;;  %v673_v55 = vld [vmem:[%s8384_s28 + $0xf58] sm:$0xff] }
  0xc8   : > { %548 = vst [vmem:[%s8389_s29 + $0x5c0] sm:$0xff] %v547_v56  ;;  %v675_v56 = vld [vmem:[%s8384_s28 + $0xf80] sm:$0xff] }
  0xc9   : > { %550 = vst [vmem:[%s8389_s29 + $0x5c8] sm:$0xff] %v549_v57  ;;  %v677_v57 = vld [vmem:[%s8384_s28 + $0xf88] sm:$0xff] }
  0xca   : > { %552 = vst [vmem:[%s8389_s29 + $0x5d0] sm:$0xff] %v551_v58  ;;  %v679_v58 = vld [vmem:[%s8384_s28 + $0xf90] sm:$0xff] }
  0xcb   : > { %554 = vst [vmem:[%s8389_s29 + $0x5d8] sm:$0xff] %v553_v59  ;;  %v681_v59 = vld [vmem:[%s8384_s28 + $0xf98] sm:$0xff] }
  0xcc   : > { %556 = vst [vmem:[%s8389_s29 + $0x5e0] sm:$0xff] %v555_v60  ;;  %v683_v60 = vld [vmem:[%s8384_s28 + $0xfc0] sm:$0xff] }
  0xcd   : > { %558 = vst [vmem:[%s8389_s29 + $0x5e8] sm:$0xff] %v557_v61  ;;  %v685_v61 = vld [vmem:[%s8384_s28 + $0xfc8] sm:$0xff] }
  0xce   : > { %560 = vst [vmem:[%s8389_s29 + $0x5f0] sm:$0xff] %v559_v62  ;;  %v687_v62 = vld [vmem:[%s8384_s28 + $0xfd0] sm:$0xff] }
  0xcf   : > { %562 = vst [vmem:[%s8389_s29 + $0x5f8] sm:$0xff] %v561_v63  ;;  %v689_v63 = vld [vmem:[%s8384_s28 + $0xfd8] sm:$0xff] }
  0xd0   : > { %564 = vst [vmem:[%s8389_s29 + $0x600] sm:$0xff] %v563_v0  ;;  %v691_v0 = vld [vmem:[%s8384_s28 + $0x1000] sm:$0xff] }
  0xd1   : > { %566 = vst [vmem:[%s8389_s29 + $0x608] sm:$0xff] %v565_v1  ;;  %v693_v1 = vld [vmem:[%s8384_s28 + $0x1008] sm:$0xff] }
  0xd2   : > { %568 = vst [vmem:[%s8389_s29 + $0x610] sm:$0xff] %v567_v2  ;;  %v695_v2 = vld [vmem:[%s8384_s28 + $0x1010] sm:$0xff] }
  0xd3   : > { %570 = vst [vmem:[%s8389_s29 + $0x618] sm:$0xff] %v569_v3  ;;  %v697_v3 = vld [vmem:[%s8384_s28 + $0x1018] sm:$0xff] }
  0xd4   : > { %572 = vst [vmem:[%s8389_s29 + $0x620] sm:$0xff] %v571_v4  ;;  %v699_v4 = vld [vmem:[%s8384_s28 + $0x1040] sm:$0xff] }
  0xd5   : > { %574 = vst [vmem:[%s8389_s29 + $0x628] sm:$0xff] %v573_v5  ;;  %v701_v5 = vld [vmem:[%s8384_s28 + $0x1048] sm:$0xff] }
  0xd6   : > { %576 = vst [vmem:[%s8389_s29 + $0x630] sm:$0xff] %v575_v6  ;;  %v703_v6 = vld [vmem:[%s8384_s28 + $0x1050] sm:$0xff] }
  0xd7   : > { %578 = vst [vmem:[%s8389_s29 + $0x638] sm:$0xff] %v577_v7  ;;  %v705_v7 = vld [vmem:[%s8384_s28 + $0x1058] sm:$0xff] }
  0xd8   : > { %580 = vst [vmem:[%s8389_s29 + $0x640] sm:$0xff] %v579_v8  ;;  %v707_v8 = vld [vmem:[%s8384_s28 + $0x1080] sm:$0xff] }
  0xd9   : > { %582 = vst [vmem:[%s8389_s29 + $0x648] sm:$0xff] %v581_v9  ;;  %v709_v9 = vld [vmem:[%s8384_s28 + $0x1088] sm:$0xff] }
  0xda   : > { %584 = vst [vmem:[%s8389_s29 + $0x650] sm:$0xff] %v583_v10  ;;  %v711_v10 = vld [vmem:[%s8384_s28 + $0x1090] sm:$0xff] }
  0xdb   : > { %586 = vst [vmem:[%s8389_s29 + $0x658] sm:$0xff] %v585_v11  ;;  %v713_v11 = vld [vmem:[%s8384_s28 + $0x1098] sm:$0xff] }
  0xdc   : > { %588 = vst [vmem:[%s8389_s29 + $0x660] sm:$0xff] %v587_v12  ;;  %v715_v12 = vld [vmem:[%s8384_s28 + $0x10c0] sm:$0xff] }
  0xdd   : > { %590 = vst [vmem:[%s8389_s29 + $0x668] sm:$0xff] %v589_v13  ;;  %v717_v13 = vld [vmem:[%s8384_s28 + $0x10c8] sm:$0xff] }
  0xde   : > { %592 = vst [vmem:[%s8389_s29 + $0x670] sm:$0xff] %v591_v14  ;;  %v719_v14 = vld [vmem:[%s8384_s28 + $0x10d0] sm:$0xff] }
  0xdf   : > { %594 = vst [vmem:[%s8389_s29 + $0x678] sm:$0xff] %v593_v15  ;;  %v721_v15 = vld [vmem:[%s8384_s28 + $0x10d8] sm:$0xff] }
  0xe0   : > { %596 = vst [vmem:[%s8389_s29 + $0x680] sm:$0xff] %v595_v16  ;;  %v723_v16 = vld [vmem:[%s8384_s28 + $0x1100] sm:$0xff] }
  0xe1   : > { %598 = vst [vmem:[%s8389_s29 + $0x688] sm:$0xff] %v597_v17  ;;  %v725_v17 = vld [vmem:[%s8384_s28 + $0x1108] sm:$0xff] }
  0xe2   : > { %600 = vst [vmem:[%s8389_s29 + $0x690] sm:$0xff] %v599_v18  ;;  %v727_v18 = vld [vmem:[%s8384_s28 + $0x1110] sm:$0xff] }
  0xe3   : > { %602 = vst [vmem:[%s8389_s29 + $0x698] sm:$0xff] %v601_v19  ;;  %v729_v19 = vld [vmem:[%s8384_s28 + $0x1118] sm:$0xff] }
  0xe4   : > { %604 = vst [vmem:[%s8389_s29 + $0x6a0] sm:$0xff] %v603_v20  ;;  %v731_v20 = vld [vmem:[%s8384_s28 + $0x1140] sm:$0xff] }
  0xe5   : > { %606 = vst [vmem:[%s8389_s29 + $0x6a8] sm:$0xff] %v605_v21  ;;  %v733_v21 = vld [vmem:[%s8384_s28 + $0x1148] sm:$0xff] }
  0xe6   : > { %608 = vst [vmem:[%s8389_s29 + $0x6b0] sm:$0xff] %v607_v22  ;;  %v735_v22 = vld [vmem:[%s8384_s28 + $0x1150] sm:$0xff] }
  0xe7   : > { %610 = vst [vmem:[%s8389_s29 + $0x6b8] sm:$0xff] %v609_v23  ;;  %v737_v23 = vld [vmem:[%s8384_s28 + $0x1158] sm:$0xff] }
  0xe8   : > { %612 = vst [vmem:[%s8389_s29 + $0x6c0] sm:$0xff] %v611_v24  ;;  %v739_v24 = vld [vmem:[%s8384_s28 + $0x1180] sm:$0xff] }
  0xe9   : > { %614 = vst [vmem:[%s8389_s29 + $0x6c8] sm:$0xff] %v613_v25  ;;  %v741_v25 = vld [vmem:[%s8384_s28 + $0x1188] sm:$0xff] }
  0xea   : > { %616 = vst [vmem:[%s8389_s29 + $0x6d0] sm:$0xff] %v615_v26  ;;  %v743_v26 = vld [vmem:[%s8384_s28 + $0x1190] sm:$0xff] }
  0xeb   : > { %618 = vst [vmem:[%s8389_s29 + $0x6d8] sm:$0xff] %v617_v27  ;;  %v745_v27 = vld [vmem:[%s8384_s28 + $0x1198] sm:$0xff] }
  0xec   : > { %620 = vst [vmem:[%s8389_s29 + $0x6e0] sm:$0xff] %v619_v28  ;;  %v747_v28 = vld [vmem:[%s8384_s28 + $0x11c0] sm:$0xff] }
  0xed   : > { %622 = vst [vmem:[%s8389_s29 + $0x6e8] sm:$0xff] %v621_v29  ;;  %v749_v29 = vld [vmem:[%s8384_s28 + $0x11c8] sm:$0xff] }
  0xee   : > { %624 = vst [vmem:[%s8389_s29 + $0x6f0] sm:$0xff] %v623_v30  ;;  %v751_v30 = vld [vmem:[%s8384_s28 + $0x11d0] sm:$0xff] }
  0xef   : > { %626 = vst [vmem:[%s8389_s29 + $0x6f8] sm:$0xff] %v625_v31  ;;  %v753_v31 = vld [vmem:[%s8384_s28 + $0x11d8] sm:$0xff] }
  0xf0   : > { %628 = vst [vmem:[%s8389_s29 + $0x700] sm:$0xff] %v627_v32  ;;  %v755_v32 = vld [vmem:[%s8384_s28 + $0x1200] sm:$0xff] }
  0xf1   : > { %630 = vst [vmem:[%s8389_s29 + $0x708] sm:$0xff] %v629_v33  ;;  %v757_v33 = vld [vmem:[%s8384_s28 + $0x1208] sm:$0xff] }
  0xf2   : > { %632 = vst [vmem:[%s8389_s29 + $0x710] sm:$0xff] %v631_v34  ;;  %v759_v34 = vld [vmem:[%s8384_s28 + $0x1210] sm:$0xff] }
  0xf3   : > { %634 = vst [vmem:[%s8389_s29 + $0x718] sm:$0xff] %v633_v35  ;;  %v761_v35 = vld [vmem:[%s8384_s28 + $0x1218] sm:$0xff] }
  0xf4   : > { %636 = vst [vmem:[%s8389_s29 + $0x720] sm:$0xff] %v635_v36  ;;  %v763_v36 = vld [vmem:[%s8384_s28 + $0x1240] sm:$0xff] }
  0xf5   : > { %638 = vst [vmem:[%s8389_s29 + $0x728] sm:$0xff] %v637_v37  ;;  %v765_v37 = vld [vmem:[%s8384_s28 + $0x1248] sm:$0xff] }
  0xf6   : > { %640 = vst [vmem:[%s8389_s29 + $0x730] sm:$0xff] %v639_v38  ;;  %v767_v38 = vld [vmem:[%s8384_s28 + $0x1250] sm:$0xff] }
  0xf7   : > { %642 = vst [vmem:[%s8389_s29 + $0x738] sm:$0xff] %v641_v39  ;;  %v769_v39 = vld [vmem:[%s8384_s28 + $0x1258] sm:$0xff] }
  0xf8   : > { %644 = vst [vmem:[%s8389_s29 + $0x740] sm:$0xff] %v643_v40  ;;  %v771_v40 = vld [vmem:[%s8384_s28 + $0x1280] sm:$0xff] }
  0xf9   : > { %646 = vst [vmem:[%s8389_s29 + $0x748] sm:$0xff] %v645_v41  ;;  %v773_v41 = vld [vmem:[%s8384_s28 + $0x1288] sm:$0xff] }
  0xfa   : > { %648 = vst [vmem:[%s8389_s29 + $0x750] sm:$0xff] %v647_v42  ;;  %v775_v42 = vld [vmem:[%s8384_s28 + $0x1290] sm:$0xff] }
  0xfb   : > { %650 = vst [vmem:[%s8389_s29 + $0x758] sm:$0xff] %v649_v43  ;;  %v777_v43 = vld [vmem:[%s8384_s28 + $0x1298] sm:$0xff] }
  0xfc   : > { %652 = vst [vmem:[%s8389_s29 + $0x760] sm:$0xff] %v651_v44  ;;  %v779_v44 = vld [vmem:[%s8384_s28 + $0x12c0] sm:$0xff] }
  0xfd   : > { %654 = vst [vmem:[%s8389_s29 + $0x768] sm:$0xff] %v653_v45  ;;  %v781_v45 = vld [vmem:[%s8384_s28 + $0x12c8] sm:$0xff] }
  0xfe   : > { %656 = vst [vmem:[%s8389_s29 + $0x770] sm:$0xff] %v655_v46  ;;  %v783_v46 = vld [vmem:[%s8384_s28 + $0x12d0] sm:$0xff] }
  0xff   : > { %658 = vst [vmem:[%s8389_s29 + $0x778] sm:$0xff] %v657_v47  ;;  %v785_v47 = vld [vmem:[%s8384_s28 + $0x12d8] sm:$0xff] }
 0x100   : > { %660 = vst [vmem:[%s8389_s29 + $0x780] sm:$0xff] %v659_v48  ;;  %v787_v48 = vld [vmem:[%s8384_s28 + $0x1300] sm:$0xff] }
 0x101   : > { %662 = vst [vmem:[%s8389_s29 + $0x788] sm:$0xff] %v661_v49  ;;  %v789_v49 = vld [vmem:[%s8384_s28 + $0x1308] sm:$0xff] }
 0x102   : > { %664 = vst [vmem:[%s8389_s29 + $0x790] sm:$0xff] %v663_v50  ;;  %v791_v50 = vld [vmem:[%s8384_s28 + $0x1310] sm:$0xff] }
 0x103   : > { %666 = vst [vmem:[%s8389_s29 + $0x798] sm:$0xff] %v665_v51  ;;  %v793_v51 = vld [vmem:[%s8384_s28 + $0x1318] sm:$0xff] }
 0x104   : > { %668 = vst [vmem:[%s8389_s29 + $0x7a0] sm:$0xff] %v667_v52  ;;  %v795_v52 = vld [vmem:[%s8384_s28 + $0x1340] sm:$0xff] }
 0x105   : > { %670 = vst [vmem:[%s8389_s29 + $0x7a8] sm:$0xff] %v669_v53  ;;  %v797_v53 = vld [vmem:[%s8384_s28 + $0x1348] sm:$0xff] }
 0x106   : > { %672 = vst [vmem:[%s8389_s29 + $0x7b0] sm:$0xff] %v671_v54  ;;  %v799_v54 = vld [vmem:[%s8384_s28 + $0x1350] sm:$0xff] }
 0x107   : > { %674 = vst [vmem:[%s8389_s29 + $0x7b8] sm:$0xff] %v673_v55  ;;  %v801_v55 = vld [vmem:[%s8384_s28 + $0x1358] sm:$0xff] }
 0x108   : > { %676 = vst [vmem:[%s8389_s29 + $0x7c0] sm:$0xff] %v675_v56  ;;  %v803_v56 = vld [vmem:[%s8384_s28 + $0x1380] sm:$0xff] }
 0x109   : > { %678 = vst [vmem:[%s8389_s29 + $0x7c8] sm:$0xff] %v677_v57  ;;  %v805_v57 = vld [vmem:[%s8384_s28 + $0x1388] sm:$0xff] }
 0x10a   : > { %680 = vst [vmem:[%s8389_s29 + $0x7d0] sm:$0xff] %v679_v58  ;;  %v807_v58 = vld [vmem:[%s8384_s28 + $0x1390] sm:$0xff] }
 0x10b   : > { %682 = vst [vmem:[%s8389_s29 + $0x7d8] sm:$0xff] %v681_v59  ;;  %v809_v59 = vld [vmem:[%s8384_s28 + $0x1398] sm:$0xff] }
 0x10c   : > { %684 = vst [vmem:[%s8389_s29 + $0x7e0] sm:$0xff] %v683_v60  ;;  %v811_v60 = vld [vmem:[%s8384_s28 + $0x13c0] sm:$0xff] }
 0x10d   : > { %686 = vst [vmem:[%s8389_s29 + $0x7e8] sm:$0xff] %v685_v61  ;;  %v813_v61 = vld [vmem:[%s8384_s28 + $0x13c8] sm:$0xff] }
 0x10e   : > { %688 = vst [vmem:[%s8389_s29 + $0x7f0] sm:$0xff] %v687_v62  ;;  %v815_v62 = vld [vmem:[%s8384_s28 + $0x13d0] sm:$0xff] }
 0x10f   : > { %690 = vst [vmem:[%s8389_s29 + $0x7f8] sm:$0xff] %v689_v63  ;;  %v817_v63 = vld [vmem:[%s8384_s28 + $0x13d8] sm:$0xff] }
 0x110   : > { %692 = vst [vmem:[%s8389_s29 + $0x800] sm:$0xff] %v691_v0  ;;  %v819_v0 = vld [vmem:[%s8384_s28 + $0x1400] sm:$0xff] }
 0x111   : > { %694 = vst [vmem:[%s8389_s29 + $0x808] sm:$0xff] %v693_v1  ;;  %v821_v1 = vld [vmem:[%s8384_s28 + $0x1408] sm:$0xff] }
 0x112   : > { %696 = vst [vmem:[%s8389_s29 + $0x810] sm:$0xff] %v695_v2  ;;  %v823_v2 = vld [vmem:[%s8384_s28 + $0x1410] sm:$0xff] }
 0x113   : > { %698 = vst [vmem:[%s8389_s29 + $0x818] sm:$0xff] %v697_v3  ;;  %v825_v3 = vld [vmem:[%s8384_s28 + $0x1418] sm:$0xff] }
 0x114   : > { %700 = vst [vmem:[%s8389_s29 + $0x820] sm:$0xff] %v699_v4  ;;  %v827_v4 = vld [vmem:[%s8384_s28 + $0x1440] sm:$0xff] }
 0x115   : > { %702 = vst [vmem:[%s8389_s29 + $0x828] sm:$0xff] %v701_v5  ;;  %v829_v5 = vld [vmem:[%s8384_s28 + $0x1448] sm:$0xff] }
 0x116   : > { %704 = vst [vmem:[%s8389_s29 + $0x830] sm:$0xff] %v703_v6  ;;  %v831_v6 = vld [vmem:[%s8384_s28 + $0x1450] sm:$0xff] }
 0x117   : > { %706 = vst [vmem:[%s8389_s29 + $0x838] sm:$0xff] %v705_v7  ;;  %v833_v7 = vld [vmem:[%s8384_s28 + $0x1458] sm:$0xff] }
 0x118   : > { %708 = vst [vmem:[%s8389_s29 + $0x840] sm:$0xff] %v707_v8  ;;  %v835_v8 = vld [vmem:[%s8384_s28 + $0x1480] sm:$0xff] }
 0x119   : > { %710 = vst [vmem:[%s8389_s29 + $0x848] sm:$0xff] %v709_v9  ;;  %v837_v9 = vld [vmem:[%s8384_s28 + $0x1488] sm:$0xff] }
 0x11a   : > { %712 = vst [vmem:[%s8389_s29 + $0x850] sm:$0xff] %v711_v10  ;;  %v839_v10 = vld [vmem:[%s8384_s28 + $0x1490] sm:$0xff] }
 0x11b   : > { %714 = vst [vmem:[%s8389_s29 + $0x858] sm:$0xff] %v713_v11  ;;  %v841_v11 = vld [vmem:[%s8384_s28 + $0x1498] sm:$0xff] }
 0x11c   : > { %716 = vst [vmem:[%s8389_s29 + $0x860] sm:$0xff] %v715_v12  ;;  %v843_v12 = vld [vmem:[%s8384_s28 + $0x14c0] sm:$0xff] }
 0x11d   : > { %718 = vst [vmem:[%s8389_s29 + $0x868] sm:$0xff] %v717_v13  ;;  %v845_v13 = vld [vmem:[%s8384_s28 + $0x14c8] sm:$0xff] }
 0x11e   : > { %720 = vst [vmem:[%s8389_s29 + $0x870] sm:$0xff] %v719_v14  ;;  %v847_v14 = vld [vmem:[%s8384_s28 + $0x14d0] sm:$0xff] }
 0x11f   : > { %722 = vst [vmem:[%s8389_s29 + $0x878] sm:$0xff] %v721_v15  ;;  %v849_v15 = vld [vmem:[%s8384_s28 + $0x14d8] sm:$0xff] }
 0x120   : > { %724 = vst [vmem:[%s8389_s29 + $0x880] sm:$0xff] %v723_v16  ;;  %v851_v16 = vld [vmem:[%s8384_s28 + $0x1500] sm:$0xff] }
 0x121   : > { %726 = vst [vmem:[%s8389_s29 + $0x888] sm:$0xff] %v725_v17  ;;  %v853_v17 = vld [vmem:[%s8384_s28 + $0x1508] sm:$0xff] }
 0x122   : > { %728 = vst [vmem:[%s8389_s29 + $0x890] sm:$0xff] %v727_v18  ;;  %v855_v18 = vld [vmem:[%s8384_s28 + $0x1510] sm:$0xff] }
 0x123   : > { %730 = vst [vmem:[%s8389_s29 + $0x898] sm:$0xff] %v729_v19  ;;  %v857_v19 = vld [vmem:[%s8384_s28 + $0x1518] sm:$0xff] }
 0x124   : > { %732 = vst [vmem:[%s8389_s29 + $0x8a0] sm:$0xff] %v731_v20  ;;  %v859_v20 = vld [vmem:[%s8384_s28 + $0x1540] sm:$0xff] }
 0x125   : > { %734 = vst [vmem:[%s8389_s29 + $0x8a8] sm:$0xff] %v733_v21  ;;  %v861_v21 = vld [vmem:[%s8384_s28 + $0x1548] sm:$0xff] }
 0x126   : > { %736 = vst [vmem:[%s8389_s29 + $0x8b0] sm:$0xff] %v735_v22  ;;  %v863_v22 = vld [vmem:[%s8384_s28 + $0x1550] sm:$0xff] }
 0x127   : > { %738 = vst [vmem:[%s8389_s29 + $0x8b8] sm:$0xff] %v737_v23  ;;  %v865_v23 = vld [vmem:[%s8384_s28 + $0x1558] sm:$0xff] }
 0x128   : > { %740 = vst [vmem:[%s8389_s29 + $0x8c0] sm:$0xff] %v739_v24  ;;  %v867_v24 = vld [vmem:[%s8384_s28 + $0x1580] sm:$0xff] }
 0x129   : > { %742 = vst [vmem:[%s8389_s29 + $0x8c8] sm:$0xff] %v741_v25  ;;  %v869_v25 = vld [vmem:[%s8384_s28 + $0x1588] sm:$0xff] }
 0x12a   : > { %744 = vst [vmem:[%s8389_s29 + $0x8d0] sm:$0xff] %v743_v26  ;;  %v871_v26 = vld [vmem:[%s8384_s28 + $0x1590] sm:$0xff] }
 0x12b   : > { %746 = vst [vmem:[%s8389_s29 + $0x8d8] sm:$0xff] %v745_v27  ;;  %v873_v27 = vld [vmem:[%s8384_s28 + $0x1598] sm:$0xff] }
 0x12c   : > { %748 = vst [vmem:[%s8389_s29 + $0x8e0] sm:$0xff] %v747_v28  ;;  %v875_v28 = vld [vmem:[%s8384_s28 + $0x15c0] sm:$0xff] }
 0x12d   : > { %750 = vst [vmem:[%s8389_s29 + $0x8e8] sm:$0xff] %v749_v29  ;;  %v877_v29 = vld [vmem:[%s8384_s28 + $0x15c8] sm:$0xff] }
 0x12e   : > { %752 = vst [vmem:[%s8389_s29 + $0x8f0] sm:$0xff] %v751_v30  ;;  %v879_v30 = vld [vmem:[%s8384_s28 + $0x15d0] sm:$0xff] }
 0x12f   : > { %754 = vst [vmem:[%s8389_s29 + $0x8f8] sm:$0xff] %v753_v31  ;;  %v881_v31 = vld [vmem:[%s8384_s28 + $0x15d8] sm:$0xff] }
 0x130   : > { %756 = vst [vmem:[%s8389_s29 + $0x900] sm:$0xff] %v755_v32  ;;  %v883_v32 = vld [vmem:[%s8384_s28 + $0x1600] sm:$0xff] }
 0x131   : > { %758 = vst [vmem:[%s8389_s29 + $0x908] sm:$0xff] %v757_v33  ;;  %v885_v33 = vld [vmem:[%s8384_s28 + $0x1608] sm:$0xff] }
 0x132   : > { %760 = vst [vmem:[%s8389_s29 + $0x910] sm:$0xff] %v759_v34  ;;  %v887_v34 = vld [vmem:[%s8384_s28 + $0x1610] sm:$0xff] }
 0x133   : > { %762 = vst [vmem:[%s8389_s29 + $0x918] sm:$0xff] %v761_v35  ;;  %v889_v35 = vld [vmem:[%s8384_s28 + $0x1618] sm:$0xff] }
 0x134   : > { %764 = vst [vmem:[%s8389_s29 + $0x920] sm:$0xff] %v763_v36  ;;  %v891_v36 = vld [vmem:[%s8384_s28 + $0x1640] sm:$0xff] }
 0x135   : > { %766 = vst [vmem:[%s8389_s29 + $0x928] sm:$0xff] %v765_v37  ;;  %v893_v37 = vld [vmem:[%s8384_s28 + $0x1648] sm:$0xff] }
 0x136   : > { %768 = vst [vmem:[%s8389_s29 + $0x930] sm:$0xff] %v767_v38  ;;  %v895_v38 = vld [vmem:[%s8384_s28 + $0x1650] sm:$0xff] }
 0x137   : > { %770 = vst [vmem:[%s8389_s29 + $0x938] sm:$0xff] %v769_v39  ;;  %v897_v39 = vld [vmem:[%s8384_s28 + $0x1658] sm:$0xff] }
 0x138   : > { %772 = vst [vmem:[%s8389_s29 + $0x940] sm:$0xff] %v771_v40  ;;  %v899_v40 = vld [vmem:[%s8384_s28 + $0x1680] sm:$0xff] }
 0x139   : > { %774 = vst [vmem:[%s8389_s29 + $0x948] sm:$0xff] %v773_v41  ;;  %v901_v41 = vld [vmem:[%s8384_s28 + $0x1688] sm:$0xff] }
 0x13a   : > { %776 = vst [vmem:[%s8389_s29 + $0x950] sm:$0xff] %v775_v42  ;;  %v903_v42 = vld [vmem:[%s8384_s28 + $0x1690] sm:$0xff] }
 0x13b   : > { %778 = vst [vmem:[%s8389_s29 + $0x958] sm:$0xff] %v777_v43  ;;  %v905_v43 = vld [vmem:[%s8384_s28 + $0x1698] sm:$0xff] }
 0x13c   : > { %780 = vst [vmem:[%s8389_s29 + $0x960] sm:$0xff] %v779_v44  ;;  %v907_v44 = vld [vmem:[%s8384_s28 + $0x16c0] sm:$0xff] }
 0x13d   : > { %782 = vst [vmem:[%s8389_s29 + $0x968] sm:$0xff] %v781_v45  ;;  %v909_v45 = vld [vmem:[%s8384_s28 + $0x16c8] sm:$0xff] }
 0x13e   : > { %784 = vst [vmem:[%s8389_s29 + $0x970] sm:$0xff] %v783_v46  ;;  %v911_v46 = vld [vmem:[%s8384_s28 + $0x16d0] sm:$0xff] }
 0x13f   : > { %786 = vst [vmem:[%s8389_s29 + $0x978] sm:$0xff] %v785_v47  ;;  %v913_v47 = vld [vmem:[%s8384_s28 + $0x16d8] sm:$0xff] }
 0x140   : > { %788 = vst [vmem:[%s8389_s29 + $0x980] sm:$0xff] %v787_v48  ;;  %v915_v48 = vld [vmem:[%s8384_s28 + $0x1700] sm:$0xff] }
 0x141   : > { %790 = vst [vmem:[%s8389_s29 + $0x988] sm:$0xff] %v789_v49  ;;  %v917_v49 = vld [vmem:[%s8384_s28 + $0x1708] sm:$0xff] }
 0x142   : > { %792 = vst [vmem:[%s8389_s29 + $0x990] sm:$0xff] %v791_v50  ;;  %v919_v50 = vld [vmem:[%s8384_s28 + $0x1710] sm:$0xff] }
 0x143   : > { %794 = vst [vmem:[%s8389_s29 + $0x998] sm:$0xff] %v793_v51  ;;  %v921_v51 = vld [vmem:[%s8384_s28 + $0x1718] sm:$0xff] }
 0x144   : > { %796 = vst [vmem:[%s8389_s29 + $0x9a0] sm:$0xff] %v795_v52  ;;  %v923_v52 = vld [vmem:[%s8384_s28 + $0x1740] sm:$0xff] }
 0x145   : > { %798 = vst [vmem:[%s8389_s29 + $0x9a8] sm:$0xff] %v797_v53  ;;  %v925_v53 = vld [vmem:[%s8384_s28 + $0x1748] sm:$0xff] }
 0x146   : > { %800 = vst [vmem:[%s8389_s29 + $0x9b0] sm:$0xff] %v799_v54  ;;  %v927_v54 = vld [vmem:[%s8384_s28 + $0x1750] sm:$0xff] }
 0x147   : > { %802 = vst [vmem:[%s8389_s29 + $0x9b8] sm:$0xff] %v801_v55  ;;  %v929_v55 = vld [vmem:[%s8384_s28 + $0x1758] sm:$0xff] }
 0x148   : > { %804 = vst [vmem:[%s8389_s29 + $0x9c0] sm:$0xff] %v803_v56  ;;  %v931_v56 = vld [vmem:[%s8384_s28 + $0x1780] sm:$0xff] }
 0x149   : > { %806 = vst [vmem:[%s8389_s29 + $0x9c8] sm:$0xff] %v805_v57  ;;  %v933_v57 = vld [vmem:[%s8384_s28 + $0x1788] sm:$0xff] }
 0x14a   : > { %808 = vst [vmem:[%s8389_s29 + $0x9d0] sm:$0xff] %v807_v58  ;;  %v935_v58 = vld [vmem:[%s8384_s28 + $0x1790] sm:$0xff] }
 0x14b   : > { %810 = vst [vmem:[%s8389_s29 + $0x9d8] sm:$0xff] %v809_v59  ;;  %v937_v59 = vld [vmem:[%s8384_s28 + $0x1798] sm:$0xff] }
 0x14c   : > { %812 = vst [vmem:[%s8389_s29 + $0x9e0] sm:$0xff] %v811_v60  ;;  %v939_v60 = vld [vmem:[%s8384_s28 + $0x17c0] sm:$0xff] }
 0x14d   : > { %814 = vst [vmem:[%s8389_s29 + $0x9e8] sm:$0xff] %v813_v61  ;;  %v941_v61 = vld [vmem:[%s8384_s28 + $0x17c8] sm:$0xff] }
 0x14e   : > { %816 = vst [vmem:[%s8389_s29 + $0x9f0] sm:$0xff] %v815_v62  ;;  %v943_v62 = vld [vmem:[%s8384_s28 + $0x17d0] sm:$0xff] }
 0x14f   : > { %818 = vst [vmem:[%s8389_s29 + $0x9f8] sm:$0xff] %v817_v63  ;;  %v945_v63 = vld [vmem:[%s8384_s28 + $0x17d8] sm:$0xff] }
 0x150   : > { %820 = vst [vmem:[%s8389_s29 + $0xa00] sm:$0xff] %v819_v0  ;;  %v947_v0 = vld [vmem:[%s8384_s28 + $0x1800] sm:$0xff] }
 0x151   : > { %822 = vst [vmem:[%s8389_s29 + $0xa08] sm:$0xff] %v821_v1  ;;  %v949_v1 = vld [vmem:[%s8384_s28 + $0x1808] sm:$0xff] }
 0x152   : > { %824 = vst [vmem:[%s8389_s29 + $0xa10] sm:$0xff] %v823_v2  ;;  %v951_v2 = vld [vmem:[%s8384_s28 + $0x1810] sm:$0xff] }
 0x153   : > { %826 = vst [vmem:[%s8389_s29 + $0xa18] sm:$0xff] %v825_v3  ;;  %v953_v3 = vld [vmem:[%s8384_s28 + $0x1818] sm:$0xff] }
 0x154   : > { %828 = vst [vmem:[%s8389_s29 + $0xa20] sm:$0xff] %v827_v4  ;;  %v955_v4 = vld [vmem:[%s8384_s28 + $0x1840] sm:$0xff] }
 0x155   : > { %830 = vst [vmem:[%s8389_s29 + $0xa28] sm:$0xff] %v829_v5  ;;  %v957_v5 = vld [vmem:[%s8384_s28 + $0x1848] sm:$0xff] }
 0x156   : > { %832 = vst [vmem:[%s8389_s29 + $0xa30] sm:$0xff] %v831_v6  ;;  %v959_v6 = vld [vmem:[%s8384_s28 + $0x1850] sm:$0xff] }
 0x157   : > { %834 = vst [vmem:[%s8389_s29 + $0xa38] sm:$0xff] %v833_v7  ;;  %v961_v7 = vld [vmem:[%s8384_s28 + $0x1858] sm:$0xff] }
 0x158   : > { %836 = vst [vmem:[%s8389_s29 + $0xa40] sm:$0xff] %v835_v8  ;;  %v963_v8 = vld [vmem:[%s8384_s28 + $0x1880] sm:$0xff] }
 0x159   : > { %838 = vst [vmem:[%s8389_s29 + $0xa48] sm:$0xff] %v837_v9  ;;  %v965_v9 = vld [vmem:[%s8384_s28 + $0x1888] sm:$0xff] }
 0x15a   : > { %840 = vst [vmem:[%s8389_s29 + $0xa50] sm:$0xff] %v839_v10  ;;  %v967_v10 = vld [vmem:[%s8384_s28 + $0x1890] sm:$0xff] }
 0x15b   : > { %842 = vst [vmem:[%s8389_s29 + $0xa58] sm:$0xff] %v841_v11  ;;  %v969_v11 = vld [vmem:[%s8384_s28 + $0x1898] sm:$0xff] }
 0x15c   : > { %844 = vst [vmem:[%s8389_s29 + $0xa60] sm:$0xff] %v843_v12  ;;  %v971_v12 = vld [vmem:[%s8384_s28 + $0x18c0] sm:$0xff] }
 0x15d   : > { %846 = vst [vmem:[%s8389_s29 + $0xa68] sm:$0xff] %v845_v13  ;;  %v973_v13 = vld [vmem:[%s8384_s28 + $0x18c8] sm:$0xff] }
 0x15e   : > { %848 = vst [vmem:[%s8389_s29 + $0xa70] sm:$0xff] %v847_v14  ;;  %v975_v14 = vld [vmem:[%s8384_s28 + $0x18d0] sm:$0xff] }
 0x15f   : > { %850 = vst [vmem:[%s8389_s29 + $0xa78] sm:$0xff] %v849_v15  ;;  %v977_v15 = vld [vmem:[%s8384_s28 + $0x18d8] sm:$0xff] }
 0x160   : > { %852 = vst [vmem:[%s8389_s29 + $0xa80] sm:$0xff] %v851_v16  ;;  %v979_v16 = vld [vmem:[%s8384_s28 + $0x1900] sm:$0xff] }
 0x161   : > { %854 = vst [vmem:[%s8389_s29 + $0xa88] sm:$0xff] %v853_v17  ;;  %v981_v17 = vld [vmem:[%s8384_s28 + $0x1908] sm:$0xff] }
 0x162   : > { %856 = vst [vmem:[%s8389_s29 + $0xa90] sm:$0xff] %v855_v18  ;;  %v983_v18 = vld [vmem:[%s8384_s28 + $0x1910] sm:$0xff] }
 0x163   : > { %858 = vst [vmem:[%s8389_s29 + $0xa98] sm:$0xff] %v857_v19  ;;  %v985_v19 = vld [vmem:[%s8384_s28 + $0x1918] sm:$0xff] }
 0x164   : > { %860 = vst [vmem:[%s8389_s29 + $0xaa0] sm:$0xff] %v859_v20  ;;  %v987_v20 = vld [vmem:[%s8384_s28 + $0x1940] sm:$0xff] }
 0x165   : > { %862 = vst [vmem:[%s8389_s29 + $0xaa8] sm:$0xff] %v861_v21  ;;  %v989_v21 = vld [vmem:[%s8384_s28 + $0x1948] sm:$0xff] }
 0x166   : > { %864 = vst [vmem:[%s8389_s29 + $0xab0] sm:$0xff] %v863_v22  ;;  %v991_v22 = vld [vmem:[%s8384_s28 + $0x1950] sm:$0xff] }
 0x167   : > { %866 = vst [vmem:[%s8389_s29 + $0xab8] sm:$0xff] %v865_v23  ;;  %v993_v23 = vld [vmem:[%s8384_s28 + $0x1958] sm:$0xff] }
 0x168   : > { %868 = vst [vmem:[%s8389_s29 + $0xac0] sm:$0xff] %v867_v24  ;;  %v995_v24 = vld [vmem:[%s8384_s28 + $0x1980] sm:$0xff] }
 0x169   : > { %870 = vst [vmem:[%s8389_s29 + $0xac8] sm:$0xff] %v869_v25  ;;  %v997_v25 = vld [vmem:[%s8384_s28 + $0x1988] sm:$0xff] }
 0x16a   : > { %872 = vst [vmem:[%s8389_s29 + $0xad0] sm:$0xff] %v871_v26  ;;  %v999_v26 = vld [vmem:[%s8384_s28 + $0x1990] sm:$0xff] }
 0x16b   : > { %874 = vst [vmem:[%s8389_s29 + $0xad8] sm:$0xff] %v873_v27  ;;  %v1001_v27 = vld [vmem:[%s8384_s28 + $0x1998] sm:$0xff] }
 0x16c   : > { %876 = vst [vmem:[%s8389_s29 + $0xae0] sm:$0xff] %v875_v28  ;;  %v1003_v28 = vld [vmem:[%s8384_s28 + $0x19c0] sm:$0xff] }
 0x16d   : > { %878 = vst [vmem:[%s8389_s29 + $0xae8] sm:$0xff] %v877_v29  ;;  %v1005_v29 = vld [vmem:[%s8384_s28 + $0x19c8] sm:$0xff] }
 0x16e   : > { %880 = vst [vmem:[%s8389_s29 + $0xaf0] sm:$0xff] %v879_v30  ;;  %v1007_v30 = vld [vmem:[%s8384_s28 + $0x19d0] sm:$0xff] }
 0x16f   : > { %882 = vst [vmem:[%s8389_s29 + $0xaf8] sm:$0xff] %v881_v31  ;;  %v1009_v31 = vld [vmem:[%s8384_s28 + $0x19d8] sm:$0xff] }
 0x170   : > { %884 = vst [vmem:[%s8389_s29 + $0xb00] sm:$0xff] %v883_v32  ;;  %v1011_v32 = vld [vmem:[%s8384_s28 + $0x1a00] sm:$0xff] }
 0x171   : > { %886 = vst [vmem:[%s8389_s29 + $0xb08] sm:$0xff] %v885_v33  ;;  %v1013_v33 = vld [vmem:[%s8384_s28 + $0x1a08] sm:$0xff] }
 0x172   : > { %888 = vst [vmem:[%s8389_s29 + $0xb10] sm:$0xff] %v887_v34  ;;  %v1015_v34 = vld [vmem:[%s8384_s28 + $0x1a10] sm:$0xff] }
 0x173   : > { %890 = vst [vmem:[%s8389_s29 + $0xb18] sm:$0xff] %v889_v35  ;;  %v1017_v35 = vld [vmem:[%s8384_s28 + $0x1a18] sm:$0xff] }
 0x174   : > { %892 = vst [vmem:[%s8389_s29 + $0xb20] sm:$0xff] %v891_v36  ;;  %v1019_v36 = vld [vmem:[%s8384_s28 + $0x1a40] sm:$0xff] }
 0x175   : > { %894 = vst [vmem:[%s8389_s29 + $0xb28] sm:$0xff] %v893_v37  ;;  %v1021_v37 = vld [vmem:[%s8384_s28 + $0x1a48] sm:$0xff] }
 0x176   : > { %896 = vst [vmem:[%s8389_s29 + $0xb30] sm:$0xff] %v895_v38  ;;  %v1023_v38 = vld [vmem:[%s8384_s28 + $0x1a50] sm:$0xff] }
 0x177   : > { %898 = vst [vmem:[%s8389_s29 + $0xb38] sm:$0xff] %v897_v39  ;;  %v1025_v39 = vld [vmem:[%s8384_s28 + $0x1a58] sm:$0xff] }
 0x178   : > { %900 = vst [vmem:[%s8389_s29 + $0xb40] sm:$0xff] %v899_v40  ;;  %v1027_v40 = vld [vmem:[%s8384_s28 + $0x1a80] sm:$0xff] }
 0x179   : > { %902 = vst [vmem:[%s8389_s29 + $0xb48] sm:$0xff] %v901_v41  ;;  %v1029_v41 = vld [vmem:[%s8384_s28 + $0x1a88] sm:$0xff] }
 0x17a   : > { %904 = vst [vmem:[%s8389_s29 + $0xb50] sm:$0xff] %v903_v42  ;;  %v1031_v42 = vld [vmem:[%s8384_s28 + $0x1a90] sm:$0xff] }
 0x17b   : > { %906 = vst [vmem:[%s8389_s29 + $0xb58] sm:$0xff] %v905_v43  ;;  %v1033_v43 = vld [vmem:[%s8384_s28 + $0x1a98] sm:$0xff] }
 0x17c   : > { %908 = vst [vmem:[%s8389_s29 + $0xb60] sm:$0xff] %v907_v44  ;;  %v1035_v44 = vld [vmem:[%s8384_s28 + $0x1ac0] sm:$0xff] }
 0x17d   : > { %910 = vst [vmem:[%s8389_s29 + $0xb68] sm:$0xff] %v909_v45  ;;  %v1037_v45 = vld [vmem:[%s8384_s28 + $0x1ac8] sm:$0xff] }
 0x17e   : > { %912 = vst [vmem:[%s8389_s29 + $0xb70] sm:$0xff] %v911_v46  ;;  %v1039_v46 = vld [vmem:[%s8384_s28 + $0x1ad0] sm:$0xff] }
 0x17f   : > { %914 = vst [vmem:[%s8389_s29 + $0xb78] sm:$0xff] %v913_v47  ;;  %v1041_v47 = vld [vmem:[%s8384_s28 + $0x1ad8] sm:$0xff] }
 0x180   : > { %916 = vst [vmem:[%s8389_s29 + $0xb80] sm:$0xff] %v915_v48  ;;  %v1043_v48 = vld [vmem:[%s8384_s28 + $0x1b00] sm:$0xff] }
 0x181   : > { %918 = vst [vmem:[%s8389_s29 + $0xb88] sm:$0xff] %v917_v49  ;;  %v1045_v49 = vld [vmem:[%s8384_s28 + $0x1b08] sm:$0xff] }
 0x182   : > { %920 = vst [vmem:[%s8389_s29 + $0xb90] sm:$0xff] %v919_v50  ;;  %v1047_v50 = vld [vmem:[%s8384_s28 + $0x1b10] sm:$0xff] }
 0x183   : > { %922 = vst [vmem:[%s8389_s29 + $0xb98] sm:$0xff] %v921_v51  ;;  %v1049_v51 = vld [vmem:[%s8384_s28 + $0x1b18] sm:$0xff] }
 0x184   : > { %924 = vst [vmem:[%s8389_s29 + $0xba0] sm:$0xff] %v923_v52  ;;  %v1051_v52 = vld [vmem:[%s8384_s28 + $0x1b40] sm:$0xff] }
 0x185   : > { %926 = vst [vmem:[%s8389_s29 + $0xba8] sm:$0xff] %v925_v53  ;;  %v1053_v53 = vld [vmem:[%s8384_s28 + $0x1b48] sm:$0xff] }
 0x186   : > { %928 = vst [vmem:[%s8389_s29 + $0xbb0] sm:$0xff] %v927_v54  ;;  %v1055_v54 = vld [vmem:[%s8384_s28 + $0x1b50] sm:$0xff] }
 0x187   : > { %930 = vst [vmem:[%s8389_s29 + $0xbb8] sm:$0xff] %v929_v55  ;;  %v1057_v55 = vld [vmem:[%s8384_s28 + $0x1b58] sm:$0xff] }
 0x188   : > { %932 = vst [vmem:[%s8389_s29 + $0xbc0] sm:$0xff] %v931_v56  ;;  %v1059_v56 = vld [vmem:[%s8384_s28 + $0x1b80] sm:$0xff] }
 0x189   : > { %934 = vst [vmem:[%s8389_s29 + $0xbc8] sm:$0xff] %v933_v57  ;;  %v1061_v57 = vld [vmem:[%s8384_s28 + $0x1b88] sm:$0xff] }
 0x18a   : > { %936 = vst [vmem:[%s8389_s29 + $0xbd0] sm:$0xff] %v935_v58  ;;  %v1063_v58 = vld [vmem:[%s8384_s28 + $0x1b90] sm:$0xff] }
 0x18b   : > { %938 = vst [vmem:[%s8389_s29 + $0xbd8] sm:$0xff] %v937_v59  ;;  %v1065_v59 = vld [vmem:[%s8384_s28 + $0x1b98] sm:$0xff] }
 0x18c   : > { %940 = vst [vmem:[%s8389_s29 + $0xbe0] sm:$0xff] %v939_v60  ;;  %v1067_v60 = vld [vmem:[%s8384_s28 + $0x1bc0] sm:$0xff] }
 0x18d   : > { %942 = vst [vmem:[%s8389_s29 + $0xbe8] sm:$0xff] %v941_v61  ;;  %v1069_v61 = vld [vmem:[%s8384_s28 + $0x1bc8] sm:$0xff] }
 0x18e   : > { %944 = vst [vmem:[%s8389_s29 + $0xbf0] sm:$0xff] %v943_v62  ;;  %v1071_v62 = vld [vmem:[%s8384_s28 + $0x1bd0] sm:$0xff] }
 0x18f   : > { %946 = vst [vmem:[%s8389_s29 + $0xbf8] sm:$0xff] %v945_v63  ;;  %v1073_v63 = vld [vmem:[%s8384_s28 + $0x1bd8] sm:$0xff] }
 0x190   : > { %948 = vst [vmem:[%s8389_s29 + $0xc00] sm:$0xff] %v947_v0  ;;  %v1075_v0 = vld [vmem:[%s8384_s28 + $0x1c00] sm:$0xff] }
 0x191   : > { %950 = vst [vmem:[%s8389_s29 + $0xc08] sm:$0xff] %v949_v1  ;;  %v1077_v1 = vld [vmem:[%s8384_s28 + $0x1c08] sm:$0xff] }
 0x192   : > { %952 = vst [vmem:[%s8389_s29 + $0xc10] sm:$0xff] %v951_v2  ;;  %v1079_v2 = vld [vmem:[%s8384_s28 + $0x1c10] sm:$0xff] }
 0x193   : > { %954 = vst [vmem:[%s8389_s29 + $0xc18] sm:$0xff] %v953_v3  ;;  %v1081_v3 = vld [vmem:[%s8384_s28 + $0x1c18] sm:$0xff] }
 0x194   : > { %956 = vst [vmem:[%s8389_s29 + $0xc20] sm:$0xff] %v955_v4  ;;  %v1083_v4 = vld [vmem:[%s8384_s28 + $0x1c40] sm:$0xff] }
 0x195   : > { %958 = vst [vmem:[%s8389_s29 + $0xc28] sm:$0xff] %v957_v5  ;;  %v1085_v5 = vld [vmem:[%s8384_s28 + $0x1c48] sm:$0xff] }
 0x196   : > { %960 = vst [vmem:[%s8389_s29 + $0xc30] sm:$0xff] %v959_v6  ;;  %v1087_v6 = vld [vmem:[%s8384_s28 + $0x1c50] sm:$0xff] }
 0x197   : > { %962 = vst [vmem:[%s8389_s29 + $0xc38] sm:$0xff] %v961_v7  ;;  %v1089_v7 = vld [vmem:[%s8384_s28 + $0x1c58] sm:$0xff] }
 0x198   : > { %964 = vst [vmem:[%s8389_s29 + $0xc40] sm:$0xff] %v963_v8  ;;  %v1091_v8 = vld [vmem:[%s8384_s28 + $0x1c80] sm:$0xff] }
 0x199   : > { %966 = vst [vmem:[%s8389_s29 + $0xc48] sm:$0xff] %v965_v9  ;;  %v1093_v9 = vld [vmem:[%s8384_s28 + $0x1c88] sm:$0xff] }
 0x19a   : > { %968 = vst [vmem:[%s8389_s29 + $0xc50] sm:$0xff] %v967_v10  ;;  %v1095_v10 = vld [vmem:[%s8384_s28 + $0x1c90] sm:$0xff] }
 0x19b   : > { %970 = vst [vmem:[%s8389_s29 + $0xc58] sm:$0xff] %v969_v11  ;;  %v1097_v11 = vld [vmem:[%s8384_s28 + $0x1c98] sm:$0xff] }
 0x19c   : > { %972 = vst [vmem:[%s8389_s29 + $0xc60] sm:$0xff] %v971_v12  ;;  %v1099_v12 = vld [vmem:[%s8384_s28 + $0x1cc0] sm:$0xff] }
 0x19d   : > { %974 = vst [vmem:[%s8389_s29 + $0xc68] sm:$0xff] %v973_v13  ;;  %v1101_v13 = vld [vmem:[%s8384_s28 + $0x1cc8] sm:$0xff] }
 0x19e   : > { %976 = vst [vmem:[%s8389_s29 + $0xc70] sm:$0xff] %v975_v14  ;;  %v1103_v14 = vld [vmem:[%s8384_s28 + $0x1cd0] sm:$0xff] }
 0x19f   : > { %978 = vst [vmem:[%s8389_s29 + $0xc78] sm:$0xff] %v977_v15  ;;  %v1105_v15 = vld [vmem:[%s8384_s28 + $0x1cd8] sm:$0xff] }
 0x1a0   : > { %980 = vst [vmem:[%s8389_s29 + $0xc80] sm:$0xff] %v979_v16  ;;  %v1107_v16 = vld [vmem:[%s8384_s28 + $0x1d00] sm:$0xff] }
 0x1a1   : > { %982 = vst [vmem:[%s8389_s29 + $0xc88] sm:$0xff] %v981_v17  ;;  %v1109_v17 = vld [vmem:[%s8384_s28 + $0x1d08] sm:$0xff] }
 0x1a2   : > { %984 = vst [vmem:[%s8389_s29 + $0xc90] sm:$0xff] %v983_v18  ;;  %v1111_v18 = vld [vmem:[%s8384_s28 + $0x1d10] sm:$0xff] }
 0x1a3   : > { %986 = vst [vmem:[%s8389_s29 + $0xc98] sm:$0xff] %v985_v19  ;;  %v1113_v19 = vld [vmem:[%s8384_s28 + $0x1d18] sm:$0xff] }
 0x1a4   : > { %988 = vst [vmem:[%s8389_s29 + $0xca0] sm:$0xff] %v987_v20  ;;  %v1115_v20 = vld [vmem:[%s8384_s28 + $0x1d40] sm:$0xff] }
 0x1a5   : > { %990 = vst [vmem:[%s8389_s29 + $0xca8] sm:$0xff] %v989_v21  ;;  %v1117_v21 = vld [vmem:[%s8384_s28 + $0x1d48] sm:$0xff] }
 0x1a6   : > { %992 = vst [vmem:[%s8389_s29 + $0xcb0] sm:$0xff] %v991_v22  ;;  %v1119_v22 = vld [vmem:[%s8384_s28 + $0x1d50] sm:$0xff] }
 0x1a7   : > { %994 = vst [vmem:[%s8389_s29 + $0xcb8] sm:$0xff] %v993_v23  ;;  %v1121_v23 = vld [vmem:[%s8384_s28 + $0x1d58] sm:$0xff] }
 0x1a8   : > { %996 = vst [vmem:[%s8389_s29 + $0xcc0] sm:$0xff] %v995_v24  ;;  %v1123_v24 = vld [vmem:[%s8384_s28 + $0x1d80] sm:$0xff] }
 0x1a9   : > { %998 = vst [vmem:[%s8389_s29 + $0xcc8] sm:$0xff] %v997_v25  ;;  %v1125_v25 = vld [vmem:[%s8384_s28 + $0x1d88] sm:$0xff] }
 0x1aa   : > { %1000 = vst [vmem:[%s8389_s29 + $0xcd0] sm:$0xff] %v999_v26  ;;  %v1127_v26 = vld [vmem:[%s8384_s28 + $0x1d90] sm:$0xff] }
 0x1ab   : > { %1002 = vst [vmem:[%s8389_s29 + $0xcd8] sm:$0xff] %v1001_v27  ;;  %v1129_v27 = vld [vmem:[%s8384_s28 + $0x1d98] sm:$0xff] }
 0x1ac   : > { %1004 = vst [vmem:[%s8389_s29 + $0xce0] sm:$0xff] %v1003_v28  ;;  %v1131_v28 = vld [vmem:[%s8384_s28 + $0x1dc0] sm:$0xff] }
 0x1ad   : > { %1006 = vst [vmem:[%s8389_s29 + $0xce8] sm:$0xff] %v1005_v29  ;;  %v1133_v29 = vld [vmem:[%s8384_s28 + $0x1dc8] sm:$0xff] }
 0x1ae   : > { %1008 = vst [vmem:[%s8389_s29 + $0xcf0] sm:$0xff] %v1007_v30  ;;  %v1135_v30 = vld [vmem:[%s8384_s28 + $0x1dd0] sm:$0xff] }
 0x1af   : > { %1010 = vst [vmem:[%s8389_s29 + $0xcf8] sm:$0xff] %v1009_v31  ;;  %v1137_v31 = vld [vmem:[%s8384_s28 + $0x1dd8] sm:$0xff] }
 0x1b0   : > { %1012 = vst [vmem:[%s8389_s29 + $0xd00] sm:$0xff] %v1011_v32  ;;  %v1139_v32 = vld [vmem:[%s8384_s28 + $0x1e00] sm:$0xff] }
 0x1b1   : > { %1014 = vst [vmem:[%s8389_s29 + $0xd08] sm:$0xff] %v1013_v33  ;;  %v1141_v33 = vld [vmem:[%s8384_s28 + $0x1e08] sm:$0xff] }
 0x1b2   : > { %1016 = vst [vmem:[%s8389_s29 + $0xd10] sm:$0xff] %v1015_v34  ;;  %v1143_v34 = vld [vmem:[%s8384_s28 + $0x1e10] sm:$0xff] }
 0x1b3   : > { %1018 = vst [vmem:[%s8389_s29 + $0xd18] sm:$0xff] %v1017_v35  ;;  %v1145_v35 = vld [vmem:[%s8384_s28 + $0x1e18] sm:$0xff] }
 0x1b4   : > { %1020 = vst [vmem:[%s8389_s29 + $0xd20] sm:$0xff] %v1019_v36  ;;  %v1147_v36 = vld [vmem:[%s8384_s28 + $0x1e40] sm:$0xff] }
 0x1b5   : > { %1022 = vst [vmem:[%s8389_s29 + $0xd28] sm:$0xff] %v1021_v37  ;;  %v1149_v37 = vld [vmem:[%s8384_s28 + $0x1e48] sm:$0xff] }
 0x1b6   : > { %1024 = vst [vmem:[%s8389_s29 + $0xd30] sm:$0xff] %v1023_v38  ;;  %v1151_v38 = vld [vmem:[%s8384_s28 + $0x1e50] sm:$0xff] }
 0x1b7   : > { %1026 = vst [vmem:[%s8389_s29 + $0xd38] sm:$0xff] %v1025_v39  ;;  %v1153_v39 = vld [vmem:[%s8384_s28 + $0x1e58] sm:$0xff] }
 0x1b8   : > { %1028 = vst [vmem:[%s8389_s29 + $0xd40] sm:$0xff] %v1027_v40  ;;  %v1155_v40 = vld [vmem:[%s8384_s28 + $0x1e80] sm:$0xff] }
 0x1b9   : > { %1030 = vst [vmem:[%s8389_s29 + $0xd48] sm:$0xff] %v1029_v41  ;;  %v1157_v41 = vld [vmem:[%s8384_s28 + $0x1e88] sm:$0xff] }
 0x1ba   : > { %1032 = vst [vmem:[%s8389_s29 + $0xd50] sm:$0xff] %v1031_v42  ;;  %v1159_v42 = vld [vmem:[%s8384_s28 + $0x1e90] sm:$0xff] }
 0x1bb   : > { %1034 = vst [vmem:[%s8389_s29 + $0xd58] sm:$0xff] %v1033_v43  ;;  %v1161_v43 = vld [vmem:[%s8384_s28 + $0x1e98] sm:$0xff] }
 0x1bc   : > { %1036 = vst [vmem:[%s8389_s29 + $0xd60] sm:$0xff] %v1035_v44  ;;  %v1163_v44 = vld [vmem:[%s8384_s28 + $0x1ec0] sm:$0xff] }
 0x1bd   : > { %1038 = vst [vmem:[%s8389_s29 + $0xd68] sm:$0xff] %v1037_v45  ;;  %v1165_v45 = vld [vmem:[%s8384_s28 + $0x1ec8] sm:$0xff] }
 0x1be   : > { %1040 = vst [vmem:[%s8389_s29 + $0xd70] sm:$0xff] %v1039_v46  ;;  %v1167_v46 = vld [vmem:[%s8384_s28 + $0x1ed0] sm:$0xff] }
 0x1bf   : > { %1042 = vst [vmem:[%s8389_s29 + $0xd78] sm:$0xff] %v1041_v47  ;;  %v1169_v47 = vld [vmem:[%s8384_s28 + $0x1ed8] sm:$0xff] }
 0x1c0   : > { %1044 = vst [vmem:[%s8389_s29 + $0xd80] sm:$0xff] %v1043_v48  ;;  %v1171_v48 = vld [vmem:[%s8384_s28 + $0x1f00] sm:$0xff] }
 0x1c1   : > { %1046 = vst [vmem:[%s8389_s29 + $0xd88] sm:$0xff] %v1045_v49  ;;  %v1173_v49 = vld [vmem:[%s8384_s28 + $0x1f08] sm:$0xff] }
 0x1c2   : > { %1048 = vst [vmem:[%s8389_s29 + $0xd90] sm:$0xff] %v1047_v50  ;;  %v1175_v50 = vld [vmem:[%s8384_s28 + $0x1f10] sm:$0xff] }
 0x1c3   : > { %1050 = vst [vmem:[%s8389_s29 + $0xd98] sm:$0xff] %v1049_v51  ;;  %v1177_v51 = vld [vmem:[%s8384_s28 + $0x1f18] sm:$0xff] }
 0x1c4   : > { %1052 = vst [vmem:[%s8389_s29 + $0xda0] sm:$0xff] %v1051_v52  ;;  %v1179_v52 = vld [vmem:[%s8384_s28 + $0x1f40] sm:$0xff] }
 0x1c5   : > { %1054 = vst [vmem:[%s8389_s29 + $0xda8] sm:$0xff] %v1053_v53  ;;  %v1181_v53 = vld [vmem:[%s8384_s28 + $0x1f48] sm:$0xff] }
 0x1c6   : > { %1056 = vst [vmem:[%s8389_s29 + $0xdb0] sm:$0xff] %v1055_v54  ;;  %v1183_v54 = vld [vmem:[%s8384_s28 + $0x1f50] sm:$0xff] }
 0x1c7   : > { %1058 = vst [vmem:[%s8389_s29 + $0xdb8] sm:$0xff] %v1057_v55  ;;  %v1185_v55 = vld [vmem:[%s8384_s28 + $0x1f58] sm:$0xff] }
 0x1c8   : > { %1060 = vst [vmem:[%s8389_s29 + $0xdc0] sm:$0xff] %v1059_v56  ;;  %v1187_v56 = vld [vmem:[%s8384_s28 + $0x1f80] sm:$0xff] }
 0x1c9   : > { %1062 = vst [vmem:[%s8389_s29 + $0xdc8] sm:$0xff] %v1061_v57  ;;  %v1189_v57 = vld [vmem:[%s8384_s28 + $0x1f88] sm:$0xff] }
 0x1ca   : > { %1064 = vst [vmem:[%s8389_s29 + $0xdd0] sm:$0xff] %v1063_v58  ;;  %v1191_v58 = vld [vmem:[%s8384_s28 + $0x1f90] sm:$0xff] }
 0x1cb   : > { %1066 = vst [vmem:[%s8389_s29 + $0xdd8] sm:$0xff] %v1065_v59  ;;  %v1193_v59 = vld [vmem:[%s8384_s28 + $0x1f98] sm:$0xff] }
 0x1cc   : > { %1068 = vst [vmem:[%s8389_s29 + $0xde0] sm:$0xff] %v1067_v60  ;;  %v1195_v60 = vld [vmem:[%s8384_s28 + $0x1fc0] sm:$0xff] }
 0x1cd   : > { %1070 = vst [vmem:[%s8389_s29 + $0xde8] sm:$0xff] %v1069_v61  ;;  %v1197_v61 = vld [vmem:[%s8384_s28 + $0x1fc8] sm:$0xff] }
 0x1ce   : > { %1072 = vst [vmem:[%s8389_s29 + $0xdf0] sm:$0xff] %v1071_v62  ;;  %v1199_v62 = vld [vmem:[%s8384_s28 + $0x1fd0] sm:$0xff] }
 0x1cf   : > { %1074 = vst [vmem:[%s8389_s29 + $0xdf8] sm:$0xff] %v1073_v63  ;;  %v1201_v63 = vld [vmem:[%s8384_s28 + $0x1fd8] sm:$0xff] }
 0x1d0   : > { %1076 = vst [vmem:[%s8389_s29 + $0xe00] sm:$0xff] %v1075_v0 }
 0x1d1   : > { %1078 = vst [vmem:[%s8389_s29 + $0xe08] sm:$0xff] %v1077_v1 }
 0x1d2   : > { %1080 = vst [vmem:[%s8389_s29 + $0xe10] sm:$0xff] %v1079_v2 }
 0x1d3   : > { %1082 = vst [vmem:[%s8389_s29 + $0xe18] sm:$0xff] %v1081_v3 }
 0x1d4   : > { %1084 = vst [vmem:[%s8389_s29 + $0xe20] sm:$0xff] %v1083_v4 }
 0x1d5   : > { %1086 = vst [vmem:[%s8389_s29 + $0xe28] sm:$0xff] %v1085_v5 }
 0x1d6   : > { %1088 = vst [vmem:[%s8389_s29 + $0xe30] sm:$0xff] %v1087_v6 }
 0x1d7   : > { %1090 = vst [vmem:[%s8389_s29 + $0xe38] sm:$0xff] %v1089_v7 }
 0x1d8   : > { %1092 = vst [vmem:[%s8389_s29 + $0xe40] sm:$0xff] %v1091_v8 }
 0x1d9   : > { %1094 = vst [vmem:[%s8389_s29 + $0xe48] sm:$0xff] %v1093_v9 }
 0x1da   : > { %1096 = vst [vmem:[%s8389_s29 + $0xe50] sm:$0xff] %v1095_v10 }
 0x1db   : > { %1098 = vst [vmem:[%s8389_s29 + $0xe58] sm:$0xff] %v1097_v11 }
 0x1dc   : > { %1100 = vst [vmem:[%s8389_s29 + $0xe60] sm:$0xff] %v1099_v12 }
 0x1dd   : > { %1102 = vst [vmem:[%s8389_s29 + $0xe68] sm:$0xff] %v1101_v13 }
 0x1de   : > { %1104 = vst [vmem:[%s8389_s29 + $0xe70] sm:$0xff] %v1103_v14 }
 0x1df   : > { %1106 = vst [vmem:[%s8389_s29 + $0xe78] sm:$0xff] %v1105_v15 }
 0x1e0   : > { %1108 = vst [vmem:[%s8389_s29 + $0xe80] sm:$0xff] %v1107_v16 }
 0x1e1   : > { %1110 = vst [vmem:[%s8389_s29 + $0xe88] sm:$0xff] %v1109_v17 }
 0x1e2   : > { %1112 = vst [vmem:[%s8389_s29 + $0xe90] sm:$0xff] %v1111_v18 }
 0x1e3   : > { %1114 = vst [vmem:[%s8389_s29 + $0xe98] sm:$0xff] %v1113_v19 }
 0x1e4   : > { %1116 = vst [vmem:[%s8389_s29 + $0xea0] sm:$0xff] %v1115_v20 }
 0x1e5   : > { %1118 = vst [vmem:[%s8389_s29 + $0xea8] sm:$0xff] %v1117_v21 }
 0x1e6   : > { %1120 = vst [vmem:[%s8389_s29 + $0xeb0] sm:$0xff] %v1119_v22 }
 0x1e7   : > { %1122 = vst [vmem:[%s8389_s29 + $0xeb8] sm:$0xff] %v1121_v23 }
 0x1e8   : > { %1124 = vst [vmem:[%s8389_s29 + $0xec0] sm:$0xff] %v1123_v24 }
 0x1e9   : > { %1126 = vst [vmem:[%s8389_s29 + $0xec8] sm:$0xff] %v1125_v25 }
 0x1ea   : > { %1128 = vst [vmem:[%s8389_s29 + $0xed0] sm:$0xff] %v1127_v26 }
 0x1eb   : > { %1130 = vst [vmem:[%s8389_s29 + $0xed8] sm:$0xff] %v1129_v27 }
 0x1ec   : > { %1132 = vst [vmem:[%s8389_s29 + $0xee0] sm:$0xff] %v1131_v28 }
 0x1ed   : > { %1134 = vst [vmem:[%s8389_s29 + $0xee8] sm:$0xff] %v1133_v29 }
 0x1ee   : > { %1136 = vst [vmem:[%s8389_s29 + $0xef0] sm:$0xff] %v1135_v30 }
 0x1ef   : > { %1138 = vst [vmem:[%s8389_s29 + $0xef8] sm:$0xff] %v1137_v31 }
 0x1f0   : > { %1140 = vst [vmem:[%s8389_s29 + $0xf00] sm:$0xff] %v1139_v32 }
 0x1f1   : > { %1142 = vst [vmem:[%s8389_s29 + $0xf08] sm:$0xff] %v1141_v33 }
 0x1f2   : > { %1144 = vst [vmem:[%s8389_s29 + $0xf10] sm:$0xff] %v1143_v34 }
 0x1f3   : > { %1146 = vst [vmem:[%s8389_s29 + $0xf18] sm:$0xff] %v1145_v35 }
 0x1f4   : > { %1148 = vst [vmem:[%s8389_s29 + $0xf20] sm:$0xff] %v1147_v36 }
 0x1f5   : > { %1150 = vst [vmem:[%s8389_s29 + $0xf28] sm:$0xff] %v1149_v37 }
 0x1f6   : > { %1152 = vst [vmem:[%s8389_s29 + $0xf30] sm:$0xff] %v1151_v38 }
 0x1f7   : > { %1154 = vst [vmem:[%s8389_s29 + $0xf38] sm:$0xff] %v1153_v39 }
 0x1f8   : > { %1156 = vst [vmem:[%s8389_s29 + $0xf40] sm:$0xff] %v1155_v40 }
 0x1f9   : > { %1158 = vst [vmem:[%s8389_s29 + $0xf48] sm:$0xff] %v1157_v41 }
 0x1fa   : > { %1160 = vst [vmem:[%s8389_s29 + $0xf50] sm:$0xff] %v1159_v42 }
 0x1fb   : > { %1162 = vst [vmem:[%s8389_s29 + $0xf58] sm:$0xff] %v1161_v43 }
 0x1fc   : > { %1164 = vst [vmem:[%s8389_s29 + $0xf60] sm:$0xff] %v1163_v44 }
 0x1fd   : > { %1166 = vst [vmem:[%s8389_s29 + $0xf68] sm:$0xff] %v1165_v45 }
 0x1fe   : > { %1168 = vst [vmem:[%s8389_s29 + $0xf70] sm:$0xff] %v1167_v46 }
 0x1ff   : > { %1170 = vst [vmem:[%s8389_s29 + $0xf78] sm:$0xff] %v1169_v47 }
 0x200   : > { %1172 = vst [vmem:[%s8389_s29 + $0xf80] sm:$0xff] %v1171_v48 }
 0x201   : > { %1174 = vst [vmem:[%s8389_s29 + $0xf88] sm:$0xff] %v1173_v49 }
 0x202   : > { %1176 = vst [vmem:[%s8389_s29 + $0xf90] sm:$0xff] %v1175_v50 }
 0x203   : > { %1178 = vst [vmem:[%s8389_s29 + $0xf98] sm:$0xff] %v1177_v51 }
 0x204   : > { %1180 = vst [vmem:[%s8389_s29 + $0xfa0] sm:$0xff] %v1179_v52 }
 0x205   : > { %1182 = vst [vmem:[%s8389_s29 + $0xfa8] sm:$0xff] %v1181_v53 }
 0x206   : > { %1184 = vst [vmem:[%s8389_s29 + $0xfb0] sm:$0xff] %v1183_v54 }
 0x207   : > { %1186 = vst [vmem:[%s8389_s29 + $0xfb8] sm:$0xff] %v1185_v55 }
 0x208   : > { %1188 = vst [vmem:[%s8389_s29 + $0xfc0] sm:$0xff] %v1187_v56 }
 0x209   : > { %1190 = vst [vmem:[%s8389_s29 + $0xfc8] sm:$0xff] %v1189_v57 }
 0x20a   : > { %1192 = vst [vmem:[%s8389_s29 + $0xfd0] sm:$0xff] %v1191_v58 }
 0x20b   : > { %1194 = vst [vmem:[%s8389_s29 + $0xfd8] sm:$0xff] %v1193_v59 }
 0x20c   : > { %1196 = vst [vmem:[%s8389_s29 + $0xfe0] sm:$0xff] %v1195_v60 }
 0x20d   : > { %1198 = vst [vmem:[%s8389_s29 + $0xfe8] sm:$0xff] %v1197_v61 }
 0x20e   : > { %1200 = vst [vmem:[%s8389_s29 + $0xff0] sm:$0xff] %v1199_v62 }
 0x20f   : > { %1202 = vst [vmem:[%s8389_s29 + $0xff8] sm:$0xff] %v1201_v63 }
 0x210 PF: > { %p5660_p5 = scmp.ge.s32.totalorder %s8322_s17, 1  ;;  %p1223_p6 = scmp.lt.s32.totalorder %s8322_s17, 3 }
 0x212   : > { %p1224_p7 = pnand %p5660_p5, %p1223_p6 }
 0x213   : > { %s1230_s30 = sand.u32 (!%p1224_p7), 1, %s8314_s15   ;;  %s10119_s11 = sshll.u32 (!%p1224_p7), %s5653_s18, 3 }
 0x214   : > { %1227 = sbr.rel (%p1224_p7) target bundleno = 1528 (0x5f8), region = 55  ;;  %s5661_s5 = sshll.u32 (!%p1224_p7), %s1230_s30, 12 }
 0x215   : > { %s9415_s6 = scalar_lea.vmem (!%p1224_p7), [#allocation2], %s5661_s5  ;;  %p1265_p8 = scmp.lt.s32.totalorder (!%p1224_p7), %s10119_s11, 15 }
 0x219   : > { %v5892_v0 = vld [vmem:[%s9415_s6 + $0x1c0] sm:$0xf]  ;;  %vm5207_vm0 = vcmask 1043456   ;;  %s10873_s11 = smov (!%p1265_p8, %s10119_s11), 15  ;;  %vm5553_vm14 = vcmask 1041408   ;;  %vm5557_vm15 = vcmask 1045508  }
 0x21a   : > { %v7777_v1 = vld [vmem:[%s9415_s6 + $0x1dc] sm:$0xf0]  ;;  %s10173_s14 = scalar_lea.vmem %s10862_s2, %s10873_s11  ;;  %s10225_s18 = scalar_lea.vmem %s10863_s3, %s10873_s11 }
 0x21b   : > { %v6148_v2 = vld [vmem:[%s9415_s6 + $0x3c0] sm:$0xf]  ;;  %v5893_v3 = vor.u32 %v7777_v1, %v5892_v0  ;;  %s5665_s20 = sshll.u32 %s10873_s11, 1 }
 0x21c   : > { %v7841_v4 = vld [vmem:[%s9415_s6 + $0x3dc] sm:$0xf0]  ;;  %s10686_s24 = scalar_lea.vmem %s10864_s4, %s5665_s20 }
 0x21d   : > { %v6404_v5 = vld [vmem:[%s9415_s6 + $0x5c0] sm:$0xf]  ;;  %v6149_v7 = vor.u32 %v7841_v4, %v6148_v2  ;;  %4375 = vmatpush.bf16.msra.mxu0 %v5893_v3 }
 0x21e   : > { %v7905_v6 = vld [vmem:[%s9415_s6 + $0x5dc] sm:$0xf0] }
 0x21f   : > { %v6405_v8 = vor.u32 %v7905_v6, %v6404_v5  ;;  %v6660_v9 = vld [vmem:[%s9415_s6 + $0x7c0] sm:$0xf]  ;;  %4388 = vmatpush.bf16.msra.mxu1 %v6149_v7 }
 0x220   : > { %v7969_v10 = vld [vmem:[%s9415_s6 + $0x7dc] sm:$0xf0] }
 0x221   : > { %v5860_v11 = vld [vmem:[%s9415_s6 + $0x180] sm:$0xf]  ;;  %v6661_v12 = vor.u32 %v7969_v10, %v6660_v9  ;;  %4401 = vmatpush.bf16.msra.mxu2 %v6405_v8 }
 0x222   : > { %v7769_v13 = vld [vmem:[%s9415_s6 + $0x19c] sm:$0xf0] }
 0x223   : > { %v6116_v14 = vld [vmem:[%s9415_s6 + $0x380] sm:$0xf]  ;;  %v5861_v16 = vor.u32 %v7769_v13, %v5860_v11  ;;  %4414 = vmatpush.bf16.msra.mxu3 %v6661_v12 }
 0x224   : > { %v7833_v15 = vld [vmem:[%s9415_s6 + $0x39c] sm:$0xf0] }
 0x225   : > { %v6117_v17 = vor.u32 %v7833_v15, %v6116_v14  ;;  %v6372_v18 = vld [vmem:[%s9415_s6 + $0x580] sm:$0xf]  ;;  %4376 = vmatpush.bf16.msra.mxu0 %v5861_v16 }
 0x226   : > { %v7897_v19 = vld [vmem:[%s9415_s6 + $0x59c] sm:$0xf0] }
 0x227   : > { %v6628_v20 = vld [vmem:[%s9415_s6 + $0x780] sm:$0xf]  ;;  %v6373_v21 = vor.u32 %v7897_v19, %v6372_v18  ;;  %4389 = vmatpush.bf16.msra.mxu1 %v6117_v17 }
 0x228   : > { %v7961_v22 = vld [vmem:[%s9415_s6 + $0x79c] sm:$0xf0] }
 0x229   : > { %v5828_v23 = vld [vmem:[%s9415_s6 + $0x140] sm:$0xf]  ;;  %v6629_v25 = vor.u32 %v7961_v22, %v6628_v20  ;;  %4402 = vmatpush.bf16.msra.mxu2 %v6373_v21 }
 0x22a   : > { %v7761_v24 = vld [vmem:[%s9415_s6 + $0x15c] sm:$0xf0] }
 0x22b   : > { %v6084_v26 = vld [vmem:[%s9415_s6 + $0x340] sm:$0xf]  ;;  %v5829_v29 = vor.u32 %v7761_v24, %v5828_v23  ;;  %4415 = vmatpush.bf16.msra.mxu3 %v6629_v25 }
 0x22c   : > { %v7825_v27 = vld [vmem:[%s9415_s6 + $0x35c] sm:$0xf0] }
 0x22d   : > { %v6340_v28 = vld [vmem:[%s9415_s6 + $0x540] sm:$0xf]  ;;  %v6085_v33 = vor.u32 %v7825_v27, %v6084_v26  ;;  %4377 = vmatpush.bf16.msra.mxu0 %v5829_v29 }
 0x22e   : > { %v7889_v30 = vld [vmem:[%s9415_s6 + $0x55c] sm:$0xf0] }
 0x22f   : > { %v6596_v31 = vld [vmem:[%s9415_s6 + $0x740] sm:$0xf]  ;;  %v6341_v34 = vor.u32 %v7889_v30, %v6340_v28  ;;  %4390 = vmatpush.bf16.msra.mxu1 %v6085_v33 }
 0x230   : > { %v7953_v32 = vld [vmem:[%s9415_s6 + $0x75c] sm:$0xf0] }
 0x231   : > { %v5796_v35 = vld [vmem:[%s9415_s6 + $0x100] sm:$0xf]  ;;  %v6597_v38 = vor.u32 %v7953_v32, %v6596_v31  ;;  %4403 = vmatpush.bf16.msra.mxu2 %v6341_v34 }
 0x232   : > { %v7753_v36 = vld [vmem:[%s9415_s6 + $0x11c] sm:$0xf0] }
 0x233   : > { %v6052_v37 = vld [vmem:[%s9415_s6 + $0x300] sm:$0xf]  ;;  %v5797_v44 = vor.u32 %v7753_v36, %v5796_v35  ;;  %4416 = vmatpush.bf16.msra.mxu3 %v6597_v38 }
 0x234   : > { %v7817_v39 = vld [vmem:[%s9415_s6 + $0x31c] sm:$0xf0] }
 0x235   : > { %v6308_v40 = vld [vmem:[%s9415_s6 + $0x500] sm:$0xf]  ;;  %v6053_v45 = vor.u32 %v7817_v39, %v6052_v37  ;;  %4378 = vmatpush.bf16.msra.mxu0 %v5797_v44 }
 0x236   : > { %v7881_v41 = vld [vmem:[%s9415_s6 + $0x51c] sm:$0xf0] }
 0x237   : > { %v6564_v42 = vld [vmem:[%s9415_s6 + $0x700] sm:$0xf]  ;;  %v6309_v46 = vor.u32 %v7881_v41, %v6308_v40  ;;  %4391 = vmatpush.bf16.msra.mxu1 %v6053_v45 }
 0x238   : > { %v7945_v43 = vld [vmem:[%s9415_s6 + $0x71c] sm:$0xf0] }
 0x239   : > { %v5764_v47 = vld [vmem:[%s9415_s6 + $0xc0] sm:$0xf]  ;;  %v6565_v50 = vor.u32 %v7945_v43, %v6564_v42  ;;  %4404 = vmatpush.bf16.msra.mxu2 %v6309_v46 }
 0x23a   : > { %v7745_v48 = vld [vmem:[%s9415_s6 + $0xdc] sm:$0xf0] }
 0x23b   : > { %v6020_v49 = vld [vmem:[%s9415_s6 + $0x2c0] sm:$0xf]  ;;  %v5765_v56 = vor.u32 %v7745_v48, %v5764_v47  ;;  %4417 = vmatpush.bf16.msra.mxu3 %v6565_v50 }
 0x23c   : > { %v7809_v51 = vld [vmem:[%s9415_s6 + $0x2dc] sm:$0xf0] }
 0x23d   : > { %v6276_v52 = vld [vmem:[%s9415_s6 + $0x4c0] sm:$0xf]  ;;  %v6021_v57 = vor.u32 %v7809_v51, %v6020_v49  ;;  %4379 = vmatpush.bf16.msra.mxu0 %v5765_v56 }
 0x23e   : > { %v7873_v53 = vld [vmem:[%s9415_s6 + $0x4dc] sm:$0xf0] }
 0x23f   : > { %v6532_v54 = vld [vmem:[%s9415_s6 + $0x6c0] sm:$0xf]  ;;  %v6277_v58 = vor.u32 %v7873_v53, %v6276_v52  ;;  %4392 = vmatpush.bf16.msra.mxu1 %v6021_v57  ;;  %v1280_v52 = vld [vmem:[%s10860_s0] sm:$0xff] }
 0x240   : > { %v7937_v55 = vld [vmem:[%s9415_s6 + $0x6dc] sm:$0xf0]  ;;  %1795 = vst [vmem:[#allocation1] ss:$4 sm:$0xff] %v1280_v52 }
 0x241   : > { %v5732_v59 = vld [vmem:[%s9415_s6 + $0x80] sm:$0xf]  ;;  %v6533_v62 = vor.u32 %v7937_v55, %v6532_v54  ;;  %4405 = vmatpush.bf16.msra.mxu2 %v6277_v58 }
 0x242   : > { %v7737_v60 = vld [vmem:[%s9415_s6 + $0x9c] sm:$0xf0] }
 0x243   : > { %v5988_v61 = vld [vmem:[%s9415_s6 + $0x280] sm:$0xf]  ;;  %v5733_v4 = vor.u32 %v7737_v60, %v5732_v59  ;;  %4418 = vmatpush.bf16.msra.mxu3 %v6533_v62 }
 0x244   : > { %v7801_v63 = vld [vmem:[%s9415_s6 + $0x29c] sm:$0xf0] }
 0x245   : > { %v6244_v0 = vld [vmem:[%s9415_s6 + $0x480] sm:$0xf]  ;;  %v5989_v5 = vor.u32 %v7801_v63, %v5988_v61  ;;  %4380 = vmatpush.bf16.msra.mxu0 %v5733_v4 }
 0x246   : > { %v7865_v1 = vld [vmem:[%s9415_s6 + $0x49c] sm:$0xf0] }
 0x247   : > { %v6500_v2 = vld [vmem:[%s9415_s6 + $0x680] sm:$0xf]  ;;  %v6245_v6 = vor.u32 %v7865_v1, %v6244_v0  ;;  %4393 = vmatpush.bf16.msra.mxu1 %v5989_v5 }
 0x248   : > { %v7929_v3 = vld [vmem:[%s9415_s6 + $0x69c] sm:$0xf0] }
 0x249   : > { %v5700_v7 = vld [vmem:[%s9415_s6 + $0x40] sm:$0xf]  ;;  %v6501_v10 = vor.u32 %v7929_v3, %v6500_v2  ;;  %4406 = vmatpush.bf16.msra.mxu2 %v6245_v6 }
 0x24a   : > { %v7729_v8 = vld [vmem:[%s9415_s6 + $0x5c] sm:$0xf0] }
 0x24b   : > { %v5956_v9 = vld [vmem:[%s9415_s6 + $0x240] sm:$0xf]  ;;  %v5701_v16 = vor.u32 %v7729_v8, %v5700_v7  ;;  %4419 = vmatpush.bf16.msra.mxu3 %v6501_v10 }
 0x24c   : > { %v7793_v11 = vld [vmem:[%s9415_s6 + $0x25c] sm:$0xf0] }
 0x24d   : > { %v6212_v12 = vld [vmem:[%s9415_s6 + $0x440] sm:$0xf]  ;;  %v5957_v19 = vor.u32 %v7793_v11, %v5956_v9  ;;  %4381 = vmatpush.bf16.msra.mxu0 %v5701_v16  ;;  %v9521_v16 = vld.sshfl [vmem:[#allocation1 + $0x18] sm:$0xff pattern:$0x73625140] }
 0x24e   : > { %v7857_v13 = vld [vmem:[%s9415_s6 + $0x45c] sm:$0xf0] }
 0x24f   : > { %v6468_v14 = vld [vmem:[%s9415_s6 + $0x640] sm:$0xf]  ;;  %v6213_v20 = vor.u32 %v7857_v13, %v6212_v12  ;;  %4394 = vmatpush.bf16.msra.mxu1 %v5957_v19  ;;  %v9516_v13 = vld.sshfl [vmem:[#allocation1 + $0x10] sm:$0xff pattern:$0x73625140] }
 0x250   : > { %v7921_v15 = vld [vmem:[%s9415_s6 + $0x65c] sm:$0xf0] }
 0x251   : > { %v5668_v17 = vld [vmem:[%s9415_s6] sm:$0xf]  ;;  %v6469_v24 = vor.u32 %v7921_v15, %v6468_v14  ;;  %4407 = vmatpush.bf16.msra.mxu2 %v6213_v20  ;;  %v9518_v14 = vld.sshfl [vmem:[#allocation1] sm:$0xff pattern:$0x73625140] }
 0x252   : > { %v7721_v18 = vld [vmem:[%s9415_s6 + $0x1c] sm:$0xf0] }
 0x253   : > { %v5924_v21 = vld [vmem:[%s9415_s6 + $0x200] sm:$0xf]  ;;  %v5669_v31 = vor.u32 %v7721_v18, %v5668_v17  ;;  %4420 = vmatpush.bf16.msra.mxu3 %v6469_v24 }
 0x254   : > { %v7785_v22 = vld [vmem:[%s9415_s6 + $0x21c] sm:$0xf0] }
 0x255   : > { %v6180_v23 = vld [vmem:[%s9415_s6 + $0x400] sm:$0xf]  ;;  %v5925_v35 = vor.u32 %v7785_v22, %v5924_v21  ;;  %4382 = vmatpush.bf16.msra.mxu0 %v5669_v31 }
 0x256   : > { %v7849_v25 = vld [vmem:[%s9415_s6 + $0x41c] sm:$0xf0] }
 0x257   : > { %v6436_v26 = vld [vmem:[%s9415_s6 + $0x600] sm:$0xf]  ;;  %v6181_v36 = vor.u32 %v7849_v25, %v6180_v23  ;;  %4395 = vmatpush.bf16.msra.mxu1 %v5925_v35 }
 0x258   : > { %v7913_v27 = vld [vmem:[%s9415_s6 + $0x61c] sm:$0xf0]  ;;  %4383 = vmatmul.bf16.vlgmr.msra.gmra.mxu0 %v9518_v14 }
 0x259   : > { %v6916_v28 = vld [vmem:[%s9415_s6 + $0x9c0] sm:$0xf]  ;;  %v6437_v39 = vor.u32 %v7913_v27, %v6436_v26  ;;  %4408 = vmatpush.bf16.msra.mxu2 %v6181_v36 }
 0x25a   : > { %v8033_v29 = vld [vmem:[%s9415_s6 + $0x9dc] sm:$0xf0] }
 0x25b   : > { %v7172_v30 = vld [vmem:[%s9415_s6 + $0xbc0] sm:$0xf]  ;;  %v6917_v40 = vor.u32 %v8033_v29, %v6916_v28  ;;  %4421 = vmatpush.bf16.msra.mxu3 %v6437_v39 }
 0x25c   : > { %v8097_v32 = vld [vmem:[%s9415_s6 + $0xbdc] sm:$0xf0]  ;;  %4409 = vmatmul.bf16.vlgmr.msra.gmra.mxu2 %v9516_v13 }
 0x25d   : > { %v7428_v33 = vld [vmem:[%s9415_s6 + $0xdc0] sm:$0xf]  ;;  %v7173_v41 = vor.u32 %v8097_v32, %v7172_v30  ;;  %4427 = vmatpush.bf16.msrb.mxu0 %v6917_v40 }
 0x25e   : > { %v8161_v34 = vld [vmem:[%s9415_s6 + $0xddc] sm:$0xf0]  ;;  %4422 = vmatmul.bf16.vlgmr.msra.gmra.mxu3 %v9521_v16 }
 0x25f   : > { %v7684_v37 = vld [vmem:[%s9415_s6 + $0xfc0] sm:$0xf]  ;;  %v7429_v42 = vor.u32 %v8161_v34, %v7428_v33  ;;  %4440 = vmatpush.bf16.msrb.mxu1 %v7173_v41 }
 0x260   : > { %v8225_v38 = vld [vmem:[%s9415_s6 + $0xfdc] sm:$0xf0] }
 0x261   : > { %v6884_v43 = vld [vmem:[%s9415_s6 + $0x980] sm:$0xf]  ;;  %v7685_v46 = vor.u32 %v8225_v38, %v7684_v37  ;;  %4453 = vmatpush.bf16.msrb.mxu2 %v7429_v42 }
 0x262   : > { %v8025_v44 = vld [vmem:[%s9415_s6 + $0x99c] sm:$0xf0] }
 0x263   : > { %v7140_v45 = vld [vmem:[%s9415_s6 + $0xb80] sm:$0xf]  ;;  %v6885_v53 = vor.u32 %v8025_v44, %v6884_v43  ;;  %4466 = vmatpush.bf16.msrb.mxu3 %v7685_v46 }
 0x264   : > { %v8089_v47 = vld [vmem:[%s9415_s6 + $0xb9c] sm:$0xf0] }
 0x265   : > { %v7396_v48 = vld [vmem:[%s9415_s6 + $0xd80] sm:$0xf]  ;;  %v7141_v54 = vor.u32 %v8089_v47, %v7140_v45  ;;  %4428 = vmatpush.bf16.msrb.mxu0 %v6885_v53 }
 0x266   : > { %v8153_v49 = vld [vmem:[%s9415_s6 + $0xd9c] sm:$0xf0] }
 0x267   : > { %v7652_v50 = vld [vmem:[%s9415_s6 + $0xf80] sm:$0xf]  ;;  %v7397_v55 = vor.u32 %v8153_v49, %v7396_v48  ;;  %4441 = vmatpush.bf16.msrb.mxu1 %v7141_v54 }
 0x268   : > { %v8217_v51 = vld [vmem:[%s9415_s6 + $0xf9c] sm:$0xf0] }
 0x269   : > { %v6852_v56 = vld [vmem:[%s9415_s6 + $0x940] sm:$0xf]  ;;  %v7653_v59 = vor.u32 %v8217_v51, %v7652_v50  ;;  %4454 = vmatpush.bf16.msrb.mxu2 %v7397_v55 }
 0x26a   : > { %v8017_v57 = vld [vmem:[%s9415_s6 + $0x95c] sm:$0xf0] }
 0x26b   : > { %v7108_v58 = vld [vmem:[%s9415_s6 + $0xb40] sm:$0xf]  ;;  %v6853_v1 = vor.u32 %v8017_v57, %v6852_v56  ;;  %4467 = vmatpush.bf16.msrb.mxu3 %v7653_v59 }
 0x26c   : > { %v8081_v60 = vld [vmem:[%s9415_s6 + $0xb5c] sm:$0xf0] }
 0x26d   : > { %v7364_v61 = vld [vmem:[%s9415_s6 + $0xd40] sm:$0xf]  ;;  %v7109_v4 = vor.u32 %v8081_v60, %v7108_v58  ;;  %4429 = vmatpush.bf16.msrb.mxu0 %v6853_v1 }
 0x26e   : > { %v8145_v62 = vld [vmem:[%s9415_s6 + $0xd5c] sm:$0xf0] }
 0x26f   : > { %v7620_v63 = vld [vmem:[%s9415_s6 + $0xf40] sm:$0xf]  ;;  %v7365_v5 = vor.u32 %v8145_v62, %v7364_v61  ;;  %4442 = vmatpush.bf16.msrb.mxu1 %v7109_v4  ;;  %v7837_v4 = vld [vmem:[%s9415_s6 + $0x3c4] sm:$0xf] }
 0x270   : > { %v8209_v0 = vld [vmem:[%s9415_s6 + $0xf5c] sm:$0xf0] }
 0x271   : > { %v6820_v2 = vld [vmem:[%s9415_s6 + $0x900] sm:$0xf]  ;;  %v7621_v9 = vor.u32 %v8209_v0, %v7620_v63  ;;  %4455 = vmatpush.bf16.msrb.mxu2 %v7365_v5 }
 0x272   : > { %v8009_v3 = vld [vmem:[%s9415_s6 + $0x91c] sm:$0xf0] }
 0x273   : > { %v7076_v6 = vld [vmem:[%s9415_s6 + $0xb00] sm:$0xf]  ;;  %v6821_v15 = vor.u32 %v8009_v3, %v6820_v2  ;;  %4468 = vmatpush.bf16.msrb.mxu3 %v7621_v9  ;;  %v7773_v2 = vld [vmem:[%s9415_s6 + $0x1c4] sm:$0xf] }
 0x274   : > { %v8073_v7 = vld [vmem:[%s9415_s6 + $0xb1c] sm:$0xf0]  ;;  %v5894_v3 = vld [vmem:[%s9415_s6 + $0x1e0] sm:$0xf0] }
 0x275   : > { %v7332_v8 = vld [vmem:[%s9415_s6 + $0xd00] sm:$0xf]  ;;  %v7077_v18 = vor.u32 %v8073_v7, %v7076_v6  ;;  %4430 = vmatpush.bf16.msrb.mxu0 %v6821_v15  ;;  %v6150_v6 = vld [vmem:[%s9415_s6 + $0x3e0] sm:$0xf0] }
 0x276   : > { %v8137_v10 = vld [vmem:[%s9415_s6 + $0xd1c] sm:$0xf0]  ;;  %v7901_v7 = vld [vmem:[%s9415_s6 + $0x5c4] sm:$0xf] }
 0x277   : > { %v7588_v11 = vld [vmem:[%s9415_s6 + $0xf00] sm:$0xf]  ;;  %v7333_v19 = vor.u32 %v8137_v10, %v7332_v8  ;;  %4443 = vmatpush.bf16.msrb.mxu1 %v7077_v18  ;;  %v6406_v8 = vld [vmem:[%s9415_s6 + $0x5e0] sm:$0xf0]  ;;  %v5897_v18 = vor.u32 %v7773_v2, %v5894_v3 }
 0x278   : > { %v8201_v12 = vld [vmem:[%s9415_s6 + $0xf1c] sm:$0xf0]  ;;  %v7869_v2 = vld [vmem:[%s9415_s6 + $0x4c4] sm:$0xf] }
 0x279   : > { %v9523_v17 = vld.sshfl [vmem:[#allocation1 + $0x8] sm:$0xff pattern:$0x73625140]  ;;  %v7589_v23 = vor.u32 %v8201_v12, %v7588_v11  ;;  %4456 = vmatpush.bf16.msrb.mxu2 %v7333_v19 }
 0x27a   : > { %v6788_v20 = vld [vmem:[%s9415_s6 + $0x8c0] sm:$0xf]  ;;  %4396 = vmatmul.bf16.vlgmr.msra.gmra.mxu1 %v9523_v17  ;;  %v7965_v11 = vld [vmem:[%s9415_s6 + $0x7c4] sm:$0xf] }
 0x27b   : > { %v8001_v21 = vld [vmem:[%s9415_s6 + $0x8dc] sm:$0xf0]  ;;  %4469 = vmatpush.bf16.msrb.mxu3 %v7589_v23  ;;  %v6662_v12 = vld [vmem:[%s9415_s6 + $0x7e0] sm:$0xf0] }
 0x27c   : > { %v7044_v22 = vld [vmem:[%s9415_s6 + $0xac0] sm:$0xf]  ;;  %v6789_v29 = vor.u32 %v8001_v21, %v6788_v20  ;;  %v7765_v19 = vld [vmem:[%s9415_s6 + $0x184] sm:$0xf]  ;;  %v6153_v21 = vor.u32 %v7837_v4, %v6150_v6 }
 0x27d   : > { %v8065_v24 = vld [vmem:[%s9415_s6 + $0xadc] sm:$0xf0]  ;;  %v5862_v20 = vld [vmem:[%s9415_s6 + $0x1a0] sm:$0xf0] }
 0x27e   : > { %v7300_v25 = vld [vmem:[%s9415_s6 + $0xcc0] sm:$0xf]  ;;  %v7045_v30 = vor.u32 %v8065_v24, %v7044_v22  ;;  %4431 = vmatpush.bf16.msrb.mxu0 %v6789_v29  ;;  %v6409_v22 = vor.u32 %v7901_v7, %v6406_v8  ;;  %v7829_v23 = vld [vmem:[%s9415_s6 + $0x384] sm:$0xf] }
 0x27f   : > { %v8129_v26 = vld [vmem:[%s9415_s6 + $0xcdc] sm:$0xf0]  ;;  %v6118_v24 = vld [vmem:[%s9415_s6 + $0x3a0] sm:$0xf0] }
 0x280   : > { %v7556_v27 = vld [vmem:[%s9415_s6 + $0xec0] sm:$0xf]  ;;  %v7301_v31 = vor.u32 %v8129_v26, %v7300_v25  ;;  %4444 = vmatpush.bf16.msrb.mxu1 %v7045_v30  ;;  %v7893_v25 = vld [vmem:[%s9415_s6 + $0x584] sm:$0xf]  ;;  %v6665_v26 = vor.u32 %v7965_v11, %v6662_v12 }
 0x281   : > { %v8193_v28 = vld [vmem:[%s9415_s6 + $0xedc] sm:$0xf0]  ;;  %v6630_v29 = vld [vmem:[%s9415_s6 + $0x7a0] sm:$0xf0] }
 0x282   : > { %v6756_v32 = vld [vmem:[%s9415_s6 + $0x880] sm:$0xf]  ;;  %v7557_v35 = vor.u32 %v8193_v28, %v7556_v27  ;;  %4457 = vmatpush.bf16.msrb.mxu2 %v7301_v31  ;;  %v6374_v27 = vld [vmem:[%s9415_s6 + $0x5a0] sm:$0xf0] }
 0x283   : > { %v7993_v33 = vld [vmem:[%s9415_s6 + $0x89c] sm:$0xf0]  ;;  %v7957_v28 = vld [vmem:[%s9415_s6 + $0x784] sm:$0xf] }
 0x284   : > { %v7012_v34 = vld [vmem:[%s9415_s6 + $0xa80] sm:$0xf]  ;;  %v6757_v42 = vor.u32 %v7993_v33, %v6756_v32  ;;  %4470 = vmatpush.bf16.msrb.mxu3 %v7557_v35  ;;  %v7757_v31 = vld [vmem:[%s9415_s6 + $0x144] sm:$0xf]  ;;  %v5865_v35 = vor.u32 %v7765_v19, %v5862_v20 }
 0x285   : > { %v8057_v36 = vld [vmem:[%s9415_s6 + $0xa9c] sm:$0xf0]  ;;  %v5830_v32 = vld [vmem:[%s9415_s6 + $0x160] sm:$0xf0] }
 0x286   : > { %v7268_v37 = vld [vmem:[%s9415_s6 + $0xc80] sm:$0xf]  ;;  %v7013_v43 = vor.u32 %v8057_v36, %v7012_v34  ;;  %4432 = vmatpush.bf16.msrb.mxu0 %v6757_v42  ;;  %v6121_v36 = vor.u32 %v7829_v23, %v6118_v24  ;;  %v7885_v42 = vld [vmem:[%s9415_s6 + $0x544] sm:$0xf] }
 0x287   : > { %v8121_v38 = vld [vmem:[%s9415_s6 + $0xc9c] sm:$0xf0]  ;;  %v6278_v3 = vld [vmem:[%s9415_s6 + $0x4e0] sm:$0xf0] }
 0x288   : > { %v7524_v39 = vld [vmem:[%s9415_s6 + $0xe80] sm:$0xf]  ;;  %v7269_v44 = vor.u32 %v8121_v38, %v7268_v37  ;;  %4445 = vmatpush.bf16.msrb.mxu1 %v7013_v43  ;;  %v6377_v37 = vor.u32 %v7893_v25, %v6374_v27  ;;  %v6342_v43 = vld [vmem:[%s9415_s6 + $0x560] sm:$0xf0]  ;;  %v6281_v8 = vor.u32 %v7869_v2, %v6278_v3 }
 0x289   : > { %v8185_v40 = vld [vmem:[%s9415_s6 + $0xe9c] sm:$0xf0]  ;;  %v7933_v4 = vld [vmem:[%s9415_s6 + $0x6c4] sm:$0xf] }
 0x28a   : > { %v1281_v41 = vld [vmem:[%s10860_s0 + $0x8] sm:$0xff]  ;;  %v7525_v48 = vor.u32 %v8185_v40, %v7524_v39  ;;  %4458 = vmatpush.bf16.msrb.mxu2 %v7269_v44  ;;  %v6633_v40 = vor.u32 %v7957_v28, %v6630_v29 }
 0x28b   : > { %1798 = vst [vmem:[#allocation1 + $0x20] ss:$4 sm:$0xff] %v1281_v41  ;;  %v6724_v45 = vld [vmem:[%s9415_s6 + $0x840] sm:$0xf]  ;;  %v7821_v39 = vld [vmem:[%s9415_s6 + $0x344] sm:$0xf] }
 0x28c   : > { %v7985_v46 = vld [vmem:[%s9415_s6 + $0x85c] sm:$0xf0]  ;;  %4471 = vmatpush.bf16.msrb.mxu3 %v7525_v48  ;;  %v6086_v41 = vld [vmem:[%s9415_s6 + $0x360] sm:$0xf0]  ;;  %v6345_v48 = vor.u32 %v7885_v42, %v6342_v43 }
 0x28d   : > { %v6980_v47 = vld [vmem:[%s9415_s6 + $0xa40] sm:$0xf]  ;;  %v6725_v54 = vor.u32 %v7985_v46, %v6724_v45  ;;  %v7949_v44 = vld [vmem:[%s9415_s6 + $0x744] sm:$0xf]  ;;  %v5833_v46 = vor.u32 %v7757_v31, %v5830_v32 }
 0x28e   : > { %v8049_v49 = vld [vmem:[%s9415_s6 + $0xa5c] sm:$0xf0]  ;;  %v6598_v45 = vld [vmem:[%s9415_s6 + $0x760] sm:$0xf0] }
 0x28f   : > { %v7236_v50 = vld [vmem:[%s9415_s6 + $0xc40] sm:$0xf]  ;;  %v6981_v57 = vor.u32 %v8049_v49, %v6980_v47  ;;  %4433 = vmatpush.bf16.msrb.mxu0 %v6725_v54  ;;  %v6089_v47 = vor.u32 %v7821_v39, %v6086_v41  ;;  %v7749_v49 = vld [vmem:[%s9415_s6 + $0x104] sm:$0xf] }
 0x290   : > { %v8113_v51 = vld [vmem:[%s9415_s6 + $0xc5c] sm:$0xf0]  ;;  %v7877_v54 = vld [vmem:[%s9415_s6 + $0x504] sm:$0xf] }
 0x291   : > { %v7492_v52 = vld [vmem:[%s9415_s6 + $0xe40] sm:$0xf]  ;;  %v7237_v58 = vor.u32 %v8113_v51, %v7236_v50  ;;  %4446 = vmatpush.bf16.msrb.mxu1 %v6981_v57  ;;  %v5798_v50 = vld [vmem:[%s9415_s6 + $0x120] sm:$0xf0] }
 0x292   : > { %v8177_v53 = vld [vmem:[%s9415_s6 + $0xe5c] sm:$0xf0]  ;;  %v9579_v30 = vld.sshfl [vmem:[#allocation1 + $0x30] sm:$0xff pattern:$0x73625140] }
 0x293   : > { %v6692_v55 = vld [vmem:[%s9415_s6 + $0x800] sm:$0xf]  ;;  %v7493_v62 = vor.u32 %v8177_v53, %v7492_v52  ;;  %4459 = vmatpush.bf16.msrb.mxu2 %v7237_v58  ;;  %v9583_v33 = vld.sshfl [vmem:[#allocation1 + $0x20] sm:$0xff pattern:$0x73625140]  ;;  %v6601_v52 = vor.u32 %v7949_v44, %v6598_v45  ;;  %v5801_v58 = vor.u32 %v7749_v49, %v5798_v50 }
 0x294   : > { %v7977_v56 = vld [vmem:[%s9415_s6 + $0x81c] sm:$0xf0]  ;;  %v9585_v34 = vld.sshfl [vmem:[#allocation1 + $0x38] sm:$0xff pattern:$0x73625140] }
 0x295   : > { %v6948_v59 = vld [vmem:[%s9415_s6 + $0xa00] sm:$0xf]  ;;  %v6693_v5 = vor.u32 %v7977_v56, %v6692_v55  ;;  %4472 = vmatpush.bf16.msrb.mxu3 %v7493_v62  ;;  %v7813_v51 = vld [vmem:[%s9415_s6 + $0x304] sm:$0xf] }
 0x296   : > { %v8041_v60 = vld [vmem:[%s9415_s6 + $0xa1c] sm:$0xf0]  ;;  %v6054_v53 = vld [vmem:[%s9415_s6 + $0x320] sm:$0xf0] }
 0x297   : > { %v7204_v61 = vld [vmem:[%s9415_s6 + $0xc00] sm:$0xf]  ;;  %v6949_v9 = vor.u32 %v8041_v60, %v6948_v59  ;;  %4434 = vmatpush.bf16.msrb.mxu0 %v6693_v5  ;;  %v6310_v55 = vld [vmem:[%s9415_s6 + $0x520] sm:$0xf0]  ;;  %v6057_v59 = vor.u32 %v7813_v51, %v6054_v53 }
 0x298   : > { %v8105_v63 = vld [vmem:[%s9415_s6 + $0xc1c] sm:$0xf0]  ;;  %v7941_v56 = vld [vmem:[%s9415_s6 + $0x704] sm:$0xf]  ;;  %v6313_v60 = vor.u32 %v7877_v54, %v6310_v55 }
 0x299   : > { %v7460_v0 = vld [vmem:[%s9415_s6 + $0xe00] sm:$0xf]  ;;  %v7205_v10 = vor.u32 %v8105_v63, %v7204_v61  ;;  %4447 = vmatpush.bf16.msrb.mxu1 %v6949_v9  ;;  %v6566_v57 = vld [vmem:[%s9415_s6 + $0x720] sm:$0xf0] }
 0x29a   : > { %v8169_v1 = vld [vmem:[%s9415_s6 + $0xe1c] sm:$0xf0]  ;;  %4435 = vmatmul.bf16.vlgmr.msrb.gmra.mxu0 %v9583_v33  ;;  %v7741_v61 = vld [vmem:[%s9415_s6 + $0xc4] sm:$0xf] }
 0x29b   : > { %v7461_v15 = vor.u32 %v8169_v1, %v7460_v0  ;;  %4460 = vmatpush.bf16.msrb.mxu2 %v7205_v10  ;;  %4479 = vmatpush.bf16.msra.mxu0 %v5897_v18  ;;  %v9587_v38 = vld.sshfl [vmem:[#allocation1 + $0x28] sm:$0xff pattern:$0x73625140]  ;;  %v6569_v0 = vor.u32 %v7941_v56, %v6566_v57 }
 0x29c   : > { %4448 = vmatmul.bf16.vlgmr.msrb.gmra.mxu1 %v9587_v38  ;;  %v5766_v62 = vld [vmem:[%s9415_s6 + $0xe0] sm:$0xf0] }
 0x29d   : > { %4473 = vmatpush.bf16.msrb.mxu3 %v7461_v15  ;;  %4492 = vmatpush.bf16.msra.mxu1 %v6153_v21  ;;  %v7805_v63 = vld [vmem:[%s9415_s6 + $0x2c4] sm:$0xf]  ;;  %v5769_v6 = vor.u32 %v7741_v61, %v5766_v62 }
 0x29e   : > { %4461 = vmatmul.bf16.vlgmr.msrb.gmra.mxu2 %v9579_v30  ;;  %v6022_v1 = vld [vmem:[%s9415_s6 + $0x2e0] sm:$0xf0] }
 0x29f   : > { %4505 = vmatpush.bf16.msra.mxu2 %v6409_v22  ;;  %4480 = vmatpush.bf16.msra.mxu0 %v5865_v35  ;;  %v6534_v5 = vld [vmem:[%s9415_s6 + $0x6e0] sm:$0xf0]  ;;  %v6025_v7 = vor.u32 %v7805_v63, %v6022_v1 }
 0x2a0   : > { %4474 = vmatmul.bf16.vlgmr.msrb.gmra.mxu3 %v9585_v34  ;;  %v7733_v9 = vld [vmem:[%s9415_s6 + $0x84] sm:$0xf]  ;;  %v6537_v12 = vor.u32 %v7933_v4, %v6534_v5 }
 0x2a1   : > { %4518 = vmatpush.bf16.msra.mxu3 %v6665_v26  ;;  %4493 = vmatpush.bf16.msra.mxu1 %v6121_v36  ;;  %v5734_v10 = vld [vmem:[%s9415_s6 + $0xa0] sm:$0xf0] }
 0x2a2   : > { %v7797_v11 = vld [vmem:[%s9415_s6 + $0x284] sm:$0xf]  ;;  %v5737_v22 = vor.u32 %v7733_v9, %v5734_v10 }
 0x2a3   : > { %4506 = vmatpush.bf16.msra.mxu2 %v6377_v37  ;;  %4481 = vmatpush.bf16.msra.mxu0 %v5833_v46  ;;  %v5990_v15 = vld [vmem:[%s9415_s6 + $0x2a0] sm:$0xf0] }
 0x2a4   : > { %v7861_v18 = vld [vmem:[%s9415_s6 + $0x484] sm:$0xf]  ;;  %v5993_v23 = vor.u32 %v7797_v11, %v5990_v15 }
 0x2a5   : > { %4519 = vmatpush.bf16.msra.mxu3 %v6633_v40  ;;  %4494 = vmatpush.bf16.msra.mxu1 %v6089_v47  ;;  %v6246_v19 = vld [vmem:[%s9415_s6 + $0x4a0] sm:$0xf0] }
 0x2a6   : > { %v7925_v20 = vld [vmem:[%s9415_s6 + $0x684] sm:$0xf]  ;;  %v6249_v24 = vor.u32 %v7861_v18, %v6246_v19 }
 0x2a7   : > { %4507 = vmatpush.bf16.msra.mxu2 %v6345_v48  ;;  %4482 = vmatpush.bf16.msra.mxu0 %v5801_v58  ;;  %v6502_v21 = vld [vmem:[%s9415_s6 + $0x6a0] sm:$0xf0] }
 0x2a8   : > { %v7725_v25 = vld [vmem:[%s9415_s6 + $0x44] sm:$0xf]  ;;  %v6505_v28 = vor.u32 %v7925_v20, %v6502_v21 }
 0x2a9   : > { %4520 = vmatpush.bf16.msra.mxu3 %v6601_v52  ;;  %4495 = vmatpush.bf16.msra.mxu1 %v6057_v59  ;;  %v5702_v26 = vld [vmem:[%s9415_s6 + $0x60] sm:$0xf0] }
 0x2aa   : > { %v7789_v27 = vld [vmem:[%s9415_s6 + $0x244] sm:$0xf]  ;;  %v5705_v37 = vor.u32 %v7725_v25, %v5702_v26 }
 0x2ab   : > { %4508 = vmatpush.bf16.msra.mxu2 %v6313_v60  ;;  %4483 = vmatpush.bf16.msra.mxu0 %v5769_v6  ;;  %v5958_v29 = vld [vmem:[%s9415_s6 + $0x260] sm:$0xf0] }
 0x2ac   : > { %v7853_v31 = vld [vmem:[%s9415_s6 + $0x444] sm:$0xf]  ;;  %v5961_v41 = vor.u32 %v7789_v27, %v5958_v29 }
 0x2ad   : > { %4521 = vmatpush.bf16.msra.mxu3 %v6569_v0  ;;  %4496 = vmatpush.bf16.msra.mxu1 %v6025_v7  ;;  %v6214_v32 = vld [vmem:[%s9415_s6 + $0x460] sm:$0xf0] }
 0x2ae   : > { %v7917_v35 = vld [vmem:[%s9415_s6 + $0x644] sm:$0xf]  ;;  %v6217_v42 = vor.u32 %v7853_v31, %v6214_v32 }
 0x2af   : > { %4509 = vmatpush.bf16.msra.mxu2 %v6281_v8  ;;  %v6470_v36 = vld [vmem:[%s9415_s6 + $0x660] sm:$0xf0]  ;;  %4484 = vmatpush.bf16.msra.mxu0 %v5737_v22 }
 0x2b0   : > { %v7717_v39 = vld [vmem:[%s9415_s6 + $0x4] sm:$0xf]  ;;  %v6473_v46 = vor.u32 %v7917_v35, %v6470_v36 }
 0x2b1   : > { %4522 = vmatpush.bf16.msra.mxu3 %v6537_v12  ;;  %v5670_v40 = vld [vmem:[%s9415_s6 + $0x20] sm:$0xf0]  ;;  %4497 = vmatpush.bf16.msra.mxu1 %v5993_v23 }
 0x2b2   : > { %v7781_v43 = vld [vmem:[%s9415_s6 + $0x204] sm:$0xf]  ;;  %v5673_v53 = vor.u32 %v7717_v39, %v5670_v40 }
 0x2b3   : > { %4510 = vmatpush.bf16.msra.mxu2 %v6249_v24  ;;  %v5926_v44 = vld [vmem:[%s9415_s6 + $0x220] sm:$0xf0]  ;;  %4485 = vmatpush.bf16.msra.mxu0 %v5705_v37 }
 0x2b4   : > { %v7845_v45 = vld [vmem:[%s9415_s6 + $0x404] sm:$0xf]  ;;  %v5929_v57 = vor.u32 %v7781_v43, %v5926_v44 }
 0x2b5   : > { %4523 = vmatpush.bf16.msra.mxu3 %v6505_v28  ;;  %v6182_v47 = vld [vmem:[%s9415_s6 + $0x420] sm:$0xf0]  ;;  %4498 = vmatpush.bf16.msra.mxu1 %v5961_v41 }
 0x2b6   : > { %v7909_v48 = vld [vmem:[%s9415_s6 + $0x604] sm:$0xf]  ;;  %v6185_v58 = vor.u32 %v7845_v45, %v6182_v47 }
 0x2b7   : > { %v6438_v49 = vld [vmem:[%s9415_s6 + $0x620] sm:$0xf0]  ;;  %4511 = vmatpush.bf16.msra.mxu2 %v6217_v42  ;;  %4486 = vmatpush.bf16.msra.mxu0 %v5673_v53 }
 0x2b8   : > { %v8029_v50 = vld [vmem:[%s9415_s6 + $0x9c4] sm:$0xf]  ;;  %v6441_v61 = vor.u32 %v7909_v48, %v6438_v49 }
 0x2b9   : > { %v6918_v51 = vld [vmem:[%s9415_s6 + $0x9e0] sm:$0xf0]  ;;  %4524 = vmatpush.bf16.msra.mxu3 %v6473_v46  ;;  %4499 = vmatpush.bf16.msra.mxu1 %v5929_v57 }
 0x2ba   : > { %v8093_v52 = vld [vmem:[%s9415_s6 + $0xbc4] sm:$0xf]  ;;  %v6921_v62 = vor.u32 %v8029_v50, %v6918_v51  ;;  %4487 = vmatmul.bf16.vlgmr.msra.gmra.mxu0 %v9518_v14 }
 0x2bb   : > { %v7174_v54 = vld [vmem:[%s9415_s6 + $0xbe0] sm:$0xf0]  ;;  %4512 = vmatpush.bf16.msra.mxu2 %v6185_v58 }
 0x2bc   : > { %v8157_v55 = vld [vmem:[%s9415_s6 + $0xdc4] sm:$0xf]  ;;  %v7177_v63 = vor.u32 %v8093_v52, %v7174_v54  ;;  %4531 = vmatpush.bf16.msrb.mxu0 %v6921_v62  ;;  %4500 = vmatmul.bf16.vlgmr.msra.gmra.mxu1 %v9523_v17 }
 0x2bd   : > { %v7430_v56 = vld [vmem:[%s9415_s6 + $0xde0] sm:$0xf0]  ;;  %4525 = vmatpush.bf16.msra.mxu3 %v6441_v61 }
 0x2be   : > { %v8221_v59 = vld [vmem:[%s9415_s6 + $0xfc4] sm:$0xf]  ;;  %v7433_v0 = vor.u32 %v8157_v55, %v7430_v56  ;;  %4544 = vmatpush.bf16.msrb.mxu1 %v7177_v63  ;;  %4513 = vmatmul.bf16.vlgmr.msra.gmra.mxu2 %v9516_v13 }
 0x2bf   : > { %v7686_v60 = vld [vmem:[%s9415_s6 + $0xfe0] sm:$0xf0] }
 0x2c0   : > { %v8021_v1 = vld [vmem:[%s9415_s6 + $0x984] sm:$0xf]  ;;  %v7689_v4 = vor.u32 %v8221_v59, %v7686_v60  ;;  %4557 = vmatpush.bf16.msrb.mxu2 %v7433_v0  ;;  %4526 = vmatmul.bf16.vlgmr.msra.gmra.mxu3 %v9521_v16 }
 0x2c1   : > { %v6886_v2 = vld [vmem:[%s9415_s6 + $0x9a0] sm:$0xf0] }
 0x2c2   : > { %v8085_v3 = vld [vmem:[%s9415_s6 + $0xb84] sm:$0xf]  ;;  %v6889_v10 = vor.u32 %v8021_v1, %v6886_v2  ;;  %4570 = vmatpush.bf16.msrb.mxu3 %v7689_v4 }
 0x2c3   : > { %v7142_v5 = vld [vmem:[%s9415_s6 + $0xba0] sm:$0xf0] }
 0x2c4   : > { %v8149_v6 = vld [vmem:[%s9415_s6 + $0xd84] sm:$0xf]  ;;  %v7145_v11 = vor.u32 %v8085_v3, %v7142_v5  ;;  %4532 = vmatpush.bf16.msrb.mxu0 %v6889_v10 }
 0x2c5   : > { %v7398_v7 = vld [vmem:[%s9415_s6 + $0xda0] sm:$0xf0] }
 0x2c6   : > { %v8213_v8 = vld [vmem:[%s9415_s6 + $0xf84] sm:$0xf]  ;;  %v7401_v12 = vor.u32 %v8149_v6, %v7398_v7  ;;  %4545 = vmatpush.bf16.msrb.mxu1 %v7145_v11 }
 0x2c7   : > { %v7654_v9 = vld [vmem:[%s9415_s6 + $0xfa0] sm:$0xf0] }
 0x2c8   : > { %v8013_v15 = vld [vmem:[%s9415_s6 + $0x944] sm:$0xf]  ;;  %v7657_v20 = vor.u32 %v8213_v8, %v7654_v9  ;;  %4558 = vmatpush.bf16.msrb.mxu2 %v7401_v12 }
 0x2c9   : > { %v6854_v18 = vld [vmem:[%s9415_s6 + $0x960] sm:$0xf0] }
 0x2ca   : > { %v8077_v19 = vld [vmem:[%s9415_s6 + $0xb44] sm:$0xf]  ;;  %v6857_v26 = vor.u32 %v8013_v15, %v6854_v18  ;;  %4571 = vmatpush.bf16.msrb.mxu3 %v7657_v20 }
 0x2cb   : > { %v7110_v21 = vld [vmem:[%s9415_s6 + $0xb60] sm:$0xf0] }
 0x2cc   : > { %v8141_v22 = vld [vmem:[%s9415_s6 + $0xd44] sm:$0xf]  ;;  %v7113_v27 = vor.u32 %v8077_v19, %v7110_v21  ;;  %4533 = vmatpush.bf16.msrb.mxu0 %v6857_v26  ;;  %v5900_v26 = vld [vmem:[%s9415_s6 + $0x1c8] sm:$0xf] }
 0x2cd   : > { %v7366_v23 = vld [vmem:[%s9415_s6 + $0xd60] sm:$0xf0] }
 0x2ce   : > { %v8205_v24 = vld [vmem:[%s9415_s6 + $0xf44] sm:$0xf]  ;;  %v7369_v28 = vor.u32 %v8141_v22, %v7366_v23  ;;  %4546 = vmatpush.bf16.msrb.mxu1 %v7113_v27  ;;  %v7778_v27 = vld [vmem:[%s9415_s6 + $0x1e4] sm:$0xf0] }
 0x2cf   : > { %v7622_v25 = vld [vmem:[%s9415_s6 + $0xf60] sm:$0xf0] }
 0x2d0   : > { %v8005_v13 = vld [vmem:[%s9415_s6 + $0x904] sm:$0xf]  ;;  %v7625_v14 = vor.u32 %v8205_v24, %v7622_v25  ;;  %4559 = vmatpush.bf16.msrb.mxu2 %v7369_v28  ;;  %v6156_v28 = vld [vmem:[%s9415_s6 + $0x3c8] sm:$0xf] }
 0x2d1   : > { %v6822_v29 = vld [vmem:[%s9415_s6 + $0x920] sm:$0xf0] }
 0x2d2   : > { %v8069_v31 = vld [vmem:[%s9415_s6 + $0xb04] sm:$0xf]  ;;  %v6825_v37 = vor.u32 %v8005_v13, %v6822_v29  ;;  %4572 = vmatpush.bf16.msrb.mxu3 %v7625_v14  ;;  %v7842_v29 = vld [vmem:[%s9415_s6 + $0x3e4] sm:$0xf0] }
 0x2d3   : > { %v7078_v32 = vld [vmem:[%s9415_s6 + $0xb20] sm:$0xf0]  ;;  %v7906_v14 = vld [vmem:[%s9415_s6 + $0x5e4] sm:$0xf0] }
 0x2d4   : > { %v8133_v16 = vld [vmem:[%s9415_s6 + $0xd04] sm:$0xf]  ;;  %v7081_v39 = vor.u32 %v8069_v31, %v7078_v32  ;;  %4534 = vmatpush.bf16.msrb.mxu0 %v6825_v37  ;;  %v6412_v31 = vld [vmem:[%s9415_s6 + $0x5c8] sm:$0xf]  ;;  %v5901_v37 = vor.u32 %v7778_v27, %v5900_v26 }
 0x2d5   : > { %v7334_v35 = vld [vmem:[%s9415_s6 + $0xd20] sm:$0xf0]  ;;  %v7738_v26 = vld [vmem:[%s9415_s6 + $0xa4] sm:$0xf0] }
 0x2d6   : > { %v8197_v36 = vld [vmem:[%s9415_s6 + $0xf04] sm:$0xf]  ;;  %v7337_v40 = vor.u32 %v8133_v16, %v7334_v35  ;;  %4547 = vmatpush.bf16.msrb.mxu1 %v7081_v39  ;;  %v6668_v35 = vld [vmem:[%s9415_s6 + $0x7c8] sm:$0xf]  ;;  %v6157_v39 = vor.u32 %v7842_v29, %v6156_v28 }
 0x2d7   : > { %v7590_v17 = vld [vmem:[%s9415_s6 + $0xf20] sm:$0xf0]  ;;  %v5996_v27 = vld [vmem:[%s9415_s6 + $0x288] sm:$0xf] }
 0x2d8   : > { %v7997_v41 = vld [vmem:[%s9415_s6 + $0x8c4] sm:$0xf]  ;;  %v7593_v44 = vor.u32 %v8197_v36, %v7590_v17  ;;  %4560 = vmatpush.bf16.msrb.mxu2 %v7337_v40  ;;  %v7970_v36 = vld [vmem:[%s9415_s6 + $0x7e4] sm:$0xf0]  ;;  %v6413_v40 = vor.u32 %v7906_v14, %v6412_v31 }
 0x2d9   : > { %v6790_v42 = vld [vmem:[%s9415_s6 + $0x8e0] sm:$0xf0]  ;;  %v6252_v29 = vld [vmem:[%s9415_s6 + $0x488] sm:$0xf] }
 0x2da   : > { %v8061_v43 = vld [vmem:[%s9415_s6 + $0xac4] sm:$0xf]  ;;  %v6793_v50 = vor.u32 %v7997_v41, %v6790_v42  ;;  %4573 = vmatpush.bf16.msrb.mxu3 %v7593_v44  ;;  %v5868_v41 = vld [vmem:[%s9415_s6 + $0x188] sm:$0xf]  ;;  %v6669_v44 = vor.u32 %v7970_v36, %v6668_v35 }
 0x2db   : > { %v7046_v45 = vld [vmem:[%s9415_s6 + $0xae0] sm:$0xf0]  ;;  %v7770_v42 = vld [vmem:[%s9415_s6 + $0x1a4] sm:$0xf0] }
 0x2dc   : > { %v8125_v46 = vld [vmem:[%s9415_s6 + $0xcc4] sm:$0xf]  ;;  %v7049_v51 = vor.u32 %v8061_v43, %v7046_v45  ;;  %4535 = vmatpush.bf16.msrb.mxu0 %v6793_v50  ;;  %v6124_v43 = vld [vmem:[%s9415_s6 + $0x388] sm:$0xf]  ;;  %v5869_v50 = vor.u32 %v7770_v42, %v5868_v41 }
 0x2dd   : > { %v7302_v47 = vld [vmem:[%s9415_s6 + $0xce0] sm:$0xf0]  ;;  %v7834_v45 = vld [vmem:[%s9415_s6 + $0x3a4] sm:$0xf0] }
 0x2de   : > { %v8189_v48 = vld [vmem:[%s9415_s6 + $0xec4] sm:$0xf]  ;;  %v7305_v52 = vor.u32 %v8125_v46, %v7302_v47  ;;  %4548 = vmatpush.bf16.msrb.mxu1 %v7049_v51  ;;  %v6380_v46 = vld [vmem:[%s9415_s6 + $0x588] sm:$0xf]  ;;  %v6125_v51 = vor.u32 %v7834_v45, %v6124_v43 }
 0x2df   : > { %v7558_v49 = vld [vmem:[%s9415_s6 + $0xee0] sm:$0xf0]  ;;  %v7898_v47 = vld [vmem:[%s9415_s6 + $0x5a4] sm:$0xf0] }
 0x2e0   : > { %v7989_v53 = vld [vmem:[%s9415_s6 + $0x884] sm:$0xf]  ;;  %v7561_v56 = vor.u32 %v8189_v48, %v7558_v49  ;;  %4561 = vmatpush.bf16.msrb.mxu2 %v7305_v52  ;;  %v6636_v48 = vld [vmem:[%s9415_s6 + $0x788] sm:$0xf]  ;;  %v6381_v52 = vor.u32 %v7898_v47, %v6380_v46 }
 0x2e1   : > { %v6758_v54 = vld [vmem:[%s9415_s6 + $0x8a0] sm:$0xf0]  ;;  %v7962_v49 = vld [vmem:[%s9415_s6 + $0x7a4] sm:$0xf0] }
 0x2e2   : > { %v8053_v55 = vld [vmem:[%s9415_s6 + $0xa84] sm:$0xf]  ;;  %v6761_v62 = vor.u32 %v7989_v53, %v6758_v54  ;;  %4574 = vmatpush.bf16.msrb.mxu3 %v7561_v56  ;;  %v5836_v53 = vld [vmem:[%s9415_s6 + $0x148] sm:$0xf]  ;;  %v6637_v56 = vor.u32 %v7962_v49, %v6636_v48 }
 0x2e3   : > { %v7014_v57 = vld [vmem:[%s9415_s6 + $0xaa0] sm:$0xf0]  ;;  %v7762_v54 = vld [vmem:[%s9415_s6 + $0x164] sm:$0xf0] }
 0x2e4   : > { %v8117_v58 = vld [vmem:[%s9415_s6 + $0xc84] sm:$0xf]  ;;  %v7017_v63 = vor.u32 %v8053_v55, %v7014_v57  ;;  %4536 = vmatpush.bf16.msrb.mxu0 %v6761_v62  ;;  %v6092_v55 = vld [vmem:[%s9415_s6 + $0x348] sm:$0xf] }
 0x2e5   : > { %v7270_v59 = vld [vmem:[%s9415_s6 + $0xca0] sm:$0xf0]  ;;  %v7826_v57 = vld [vmem:[%s9415_s6 + $0x364] sm:$0xf0] }
 0x2e6   : > { %v8181_v60 = vld [vmem:[%s9415_s6 + $0xe84] sm:$0xf]  ;;  %v7273_v0 = vor.u32 %v8117_v58, %v7270_v59  ;;  %4549 = vmatpush.bf16.msrb.mxu1 %v7017_v63  ;;  %v6348_v58 = vld [vmem:[%s9415_s6 + $0x548] sm:$0xf]  ;;  %v6093_v62 = vor.u32 %v7826_v57, %v6092_v55 }
 0x2e7   : > { %v7526_v61 = vld [vmem:[%s9415_s6 + $0xea0] sm:$0xf0]  ;;  %v7890_v59 = vld [vmem:[%s9415_s6 + $0x564] sm:$0xf0] }
 0x2e8   : > { %v7981_v1 = vld [vmem:[%s9415_s6 + $0x844] sm:$0xf]  ;;  %v7529_v4 = vor.u32 %v8181_v60, %v7526_v61  ;;  %4562 = vmatpush.bf16.msrb.mxu2 %v7273_v0  ;;  %v6604_v60 = vld [vmem:[%s9415_s6 + $0x748] sm:$0xf]  ;;  %v6349_v63 = vor.u32 %v7890_v59, %v6348_v58 }
 0x2e9   : > { %v6726_v2 = vld [vmem:[%s9415_s6 + $0x860] sm:$0xf0]  ;;  %v7954_v61 = vld [vmem:[%s9415_s6 + $0x764] sm:$0xf0] }
 0x2ea   : > { %v8045_v3 = vld [vmem:[%s9415_s6 + $0xa44] sm:$0xf]  ;;  %v6729_v10 = vor.u32 %v7981_v1, %v6726_v2  ;;  %4575 = vmatpush.bf16.msrb.mxu3 %v7529_v4  ;;  %v5804_v0 = vld [vmem:[%s9415_s6 + $0x108] sm:$0xf] }
 0x2eb   : > { %v6982_v5 = vld [vmem:[%s9415_s6 + $0xa60] sm:$0xf0]  ;;  %v6060_v1 = vld [vmem:[%s9415_s6 + $0x308] sm:$0xf] }
 0x2ec   : > { %v8109_v6 = vld [vmem:[%s9415_s6 + $0xc44] sm:$0xf]  ;;  %v6985_v15 = vor.u32 %v8045_v3, %v6982_v5  ;;  %4537 = vmatpush.bf16.msrb.mxu0 %v6729_v10  ;;  %v7818_v2 = vld [vmem:[%s9415_s6 + $0x324] sm:$0xf0] }
 0x2ed   : > { %v7238_v7 = vld [vmem:[%s9415_s6 + $0xc60] sm:$0xf0]  ;;  %v6316_v3 = vld [vmem:[%s9415_s6 + $0x508] sm:$0xf] }
 0x2ee   : > { %v8173_v8 = vld [vmem:[%s9415_s6 + $0xe44] sm:$0xf]  ;;  %v7241_v18 = vor.u32 %v8109_v6, %v7238_v7  ;;  %4550 = vmatpush.bf16.msrb.mxu1 %v6985_v15  ;;  %v7882_v4 = vld [vmem:[%s9415_s6 + $0x524] sm:$0xf0]  ;;  %v6061_v7 = vor.u32 %v7818_v2, %v6060_v1 }
 0x2ef   : > { %v7494_v9 = vld [vmem:[%s9415_s6 + $0xe60] sm:$0xf0]  ;;  %v7946_v5 = vld [vmem:[%s9415_s6 + $0x724] sm:$0xf0] }
 0x2f0   : > { %v7973_v11 = vld [vmem:[%s9415_s6 + $0x804] sm:$0xf]  ;;  %v7497_v22 = vor.u32 %v8173_v8, %v7494_v9  ;;  %4563 = vmatpush.bf16.msrb.mxu2 %v7241_v18  ;;  %v6317_v8 = vor.u32 %v7882_v4, %v6316_v3  ;;  %v5772_v9 = vld [vmem:[%s9415_s6 + $0xc8] sm:$0xf] }
 0x2f1   : > { %v6694_v12 = vld [vmem:[%s9415_s6 + $0x820] sm:$0xf0]  ;;  %v7746_v10 = vld [vmem:[%s9415_s6 + $0xe4] sm:$0xf0] }
 0x2f2   : > { %v8037_v19 = vld [vmem:[%s9415_s6 + $0xa04] sm:$0xf]  ;;  %v6697_v13 = vor.u32 %v7973_v11, %v6694_v12  ;;  %4576 = vmatpush.bf16.msrb.mxu3 %v7497_v22  ;;  %v6028_v11 = vld [vmem:[%s9415_s6 + $0x2c8] sm:$0xf]  ;;  %v5773_v22 = vor.u32 %v7746_v10, %v5772_v9 }
 0x2f3   : > { %v6950_v20 = vld [vmem:[%s9415_s6 + $0xa20] sm:$0xf0]  ;;  %v7810_v15 = vld [vmem:[%s9415_s6 + $0x2e4] sm:$0xf0] }
 0x2f4   : > { %v8101_v21 = vld [vmem:[%s9415_s6 + $0xc04] sm:$0xf]  ;;  %v6953_v32 = vor.u32 %v8037_v19, %v6950_v20  ;;  %4538 = vmatpush.bf16.msrb.mxu0 %v6697_v13  ;;  %v6284_v18 = vld [vmem:[%s9415_s6 + $0x4c8] sm:$0xf] }
 0x2f5   : > { %v7206_v23 = vld [vmem:[%s9415_s6 + $0xc20] sm:$0xf0]  ;;  %v7874_v19 = vld [vmem:[%s9415_s6 + $0x4e4] sm:$0xf0] }
 0x2f6   : > { %v8165_v24 = vld [vmem:[%s9415_s6 + $0xe04] sm:$0xf]  ;;  %v7209_v16 = vor.u32 %v8101_v21, %v7206_v23  ;;  %4551 = vmatpush.bf16.msrb.mxu1 %v6953_v32  ;;  %v6540_v20 = vld [vmem:[%s9415_s6 + $0x6c8] sm:$0xf]  ;;  %v6029_v23 = vor.u32 %v7810_v15, %v6028_v11 }
 0x2f7   : > { %v7462_v25 = vld [vmem:[%s9415_s6 + $0xe20] sm:$0xf0]  ;;  %4539 = vmatmul.bf16.vlgmr.msrb.gmra.mxu0 %v9583_v33  ;;  %v7754_v33 = vld [vmem:[%s9415_s6 + $0x124] sm:$0xf0] }
 0x2f8   : > { %v7465_v17 = vor.u32 %v8165_v24, %v7462_v25  ;;  %4564 = vmatpush.bf16.msrb.mxu2 %v7209_v16  ;;  %4583 = vmatpush.bf16.msra.mxu0 %v5901_v37  ;;  %v5805_v6 = vor.u32 %v7754_v33, %v5804_v0  ;;  %v7938_v21 = vld [vmem:[%s9415_s6 + $0x6e4] sm:$0xf0]  ;;  %v6285_v24 = vor.u32 %v7874_v19, %v6284_v18 }
 0x2f9   : > { %4552 = vmatmul.bf16.vlgmr.msrb.gmra.mxu1 %v9587_v38  ;;  %v6572_v38 = vld [vmem:[%s9415_s6 + $0x708] sm:$0xf]  ;;  %v6541_v28 = vor.u32 %v7938_v21, %v6540_v20 }
 0x2fa   : > { %4577 = vmatpush.bf16.msrb.mxu3 %v7465_v17  ;;  %4596 = vmatpush.bf16.msra.mxu1 %v6157_v39  ;;  %v6573_v12 = vor.u32 %v7946_v5, %v6572_v38  ;;  %v5740_v25 = vld [vmem:[%s9415_s6 + $0x88] sm:$0xf] }
 0x2fb   : > { %4565 = vmatmul.bf16.vlgmr.msrb.gmra.mxu2 %v9579_v30  ;;  %v5837_v30 = vor.u32 %v7762_v54, %v5836_v53  ;;  %v7802_v13 = vld [vmem:[%s9415_s6 + $0x2a4] sm:$0xf0]  ;;  %v5741_v16 = vor.u32 %v7738_v26, %v5740_v25 }
 0x2fc   : > { %4609 = vmatpush.bf16.msra.mxu2 %v6413_v40  ;;  %4584 = vmatpush.bf16.msra.mxu0 %v5869_v50  ;;  %v7866_v31 = vld [vmem:[%s9415_s6 + $0x4a4] sm:$0xf0]  ;;  %v5997_v35 = vor.u32 %v7802_v13, %v5996_v27 }
 0x2fd   : > { %4578 = vmatmul.bf16.vlgmr.msrb.gmra.mxu3 %v9585_v34  ;;  %v6605_v34 = vor.u32 %v7954_v61, %v6604_v60  ;;  %v6508_v14 = vld [vmem:[%s9415_s6 + $0x688] sm:$0xf]  ;;  %v6253_v36 = vor.u32 %v7866_v31, %v6252_v29  ;;  %v9802_v31 = vld.sshfl [vmem:[#allocation1] sm:$0xff pattern:$0x73625140] }
 0x2fe   : > { %4622 = vmatpush.bf16.msra.mxu3 %v6669_v44  ;;  %4597 = vmatpush.bf16.msra.mxu1 %v6125_v51  ;;  %v7930_v32 = vld [vmem:[%s9415_s6 + $0x6a4] sm:$0xf0] }
 0x2ff   : > { %v5708_v17 = vld [vmem:[%s9415_s6 + $0x48] sm:$0xf]  ;;  %v6509_v40 = vor.u32 %v7930_v32, %v6508_v14  ;;  %v9805_v14 = vld.sshfl [vmem:[#allocation1 + $0x18] sm:$0xff pattern:$0x73625140] }
 0x300   : > { %4610 = vmatpush.bf16.msra.mxu2 %v6381_v52  ;;  %4585 = vmatpush.bf16.msra.mxu0 %v5837_v30  ;;  %v7730_v37 = vld [vmem:[%s9415_s6 + $0x64] sm:$0xf0] }
 0x301   : > { %v5964_v39 = vld [vmem:[%s9415_s6 + $0x248] sm:$0xf]  ;;  %v5709_v46 = vor.u32 %v7730_v37, %v5708_v17 }
 0x302   : > { %4623 = vmatpush.bf16.msra.mxu3 %v6637_v56  ;;  %4598 = vmatpush.bf16.msra.mxu1 %v6093_v62  ;;  %v7794_v41 = vld [vmem:[%s9415_s6 + $0x264] sm:$0xf0] }
 0x303   : > { %v6220_v42 = vld [vmem:[%s9415_s6 + $0x448] sm:$0xf]  ;;  %v5965_v49 = vor.u32 %v7794_v41, %v5964_v39 }
 0x304   : > { %4611 = vmatpush.bf16.msra.mxu2 %v6349_v63  ;;  %4586 = vmatpush.bf16.msra.mxu0 %v5805_v6  ;;  %v7858_v43 = vld [vmem:[%s9415_s6 + $0x464] sm:$0xf0] }
 0x305   : > { %v6476_v44 = vld [vmem:[%s9415_s6 + $0x648] sm:$0xf]  ;;  %v6221_v50 = vor.u32 %v7858_v43, %v6220_v42 }
 0x306   : > { %4624 = vmatpush.bf16.msra.mxu3 %v6605_v34  ;;  %4599 = vmatpush.bf16.msra.mxu1 %v6061_v7  ;;  %v7922_v45 = vld [vmem:[%s9415_s6 + $0x664] sm:$0xf0] }
 0x307   : > { %v5676_v47 = vld [vmem:[%s9415_s6 + $0x8] sm:$0xf]  ;;  %v6477_v54 = vor.u32 %v7922_v45, %v6476_v44 }
 0x308   : > { %4612 = vmatpush.bf16.msra.mxu2 %v6317_v8  ;;  %4587 = vmatpush.bf16.msra.mxu0 %v5773_v22  ;;  %v7722_v48 = vld [vmem:[%s9415_s6 + $0x24] sm:$0xf0] }
 0x309   : > { %v5932_v51 = vld [vmem:[%s9415_s6 + $0x208] sm:$0xf]  ;;  %v5677_v61 = vor.u32 %v7722_v48, %v5676_v47 }
 0x30a   : > { %4625 = vmatpush.bf16.msra.mxu3 %v6573_v12  ;;  %4600 = vmatpush.bf16.msra.mxu1 %v6029_v23  ;;  %v7786_v52 = vld [vmem:[%s9415_s6 + $0x224] sm:$0xf0] }
 0x30b   : > { %v6188_v53 = vld [vmem:[%s9415_s6 + $0x408] sm:$0xf]  ;;  %v5933_v0 = vor.u32 %v7786_v52, %v5932_v51 }
 0x30c   : > { %4613 = vmatpush.bf16.msra.mxu2 %v6285_v24  ;;  %4588 = vmatpush.bf16.msra.mxu0 %v5741_v16  ;;  %v7850_v55 = vld [vmem:[%s9415_s6 + $0x424] sm:$0xf0]  ;;  %v9808_v16 = vld.sshfl [vmem:[#allocation1 + $0x8] sm:$0xff pattern:$0x73625140] }
 0x30d   : > { %v6444_v56 = vld [vmem:[%s9415_s6 + $0x608] sm:$0xf]  ;;  %v6189_v33 = vor.u32 %v7850_v55, %v6188_v53 }
 0x30e   : > { %4626 = vmatpush.bf16.msra.mxu3 %v6541_v28  ;;  %4601 = vmatpush.bf16.msra.mxu1 %v5997_v35  ;;  %v7914_v57 = vld [vmem:[%s9415_s6 + $0x624] sm:$0xf0] }
 0x30f   : > { %v6924_v58 = vld [vmem:[%s9415_s6 + $0x9c8] sm:$0xf]  ;;  %v6445_v2 = vor.u32 %v7914_v57, %v6444_v56 }
 0x310   : > { %4614 = vmatpush.bf16.msra.mxu2 %v6253_v36  ;;  %v8034_v59 = vld [vmem:[%s9415_s6 + $0x9e4] sm:$0xf0]  ;;  %4589 = vmatpush.bf16.msra.mxu0 %v5709_v46 }
 0x311   : > { %v7180_v60 = vld [vmem:[%s9415_s6 + $0xbc8] sm:$0xf]  ;;  %v6925_v3 = vor.u32 %v8034_v59, %v6924_v58 }
 0x312   : > { %4627 = vmatpush.bf16.msra.mxu3 %v6509_v40  ;;  %v8098_v30 = vld [vmem:[%s9415_s6 + $0xbe4] sm:$0xf0]  ;;  %4602 = vmatpush.bf16.msra.mxu1 %v5965_v49 }
 0x313   : > { %v7436_v62 = vld [vmem:[%s9415_s6 + $0xdc8] sm:$0xf]  ;;  %v7181_v4 = vor.u32 %v8098_v30, %v7180_v60 }
 0x314   : > { %v8162_v63 = vld [vmem:[%s9415_s6 + $0xde4] sm:$0xf0]  ;;  %4615 = vmatpush.bf16.msra.mxu2 %v6221_v50  ;;  %4590 = vmatpush.bf16.msra.mxu0 %v5677_v61 }
 0x315   : > { %v7692_v1 = vld [vmem:[%s9415_s6 + $0xfc8] sm:$0xf]  ;;  %v7437_v38 = vor.u32 %v8162_v63, %v7436_v62 }
 0x316   : > { %v8226_v34 = vld [vmem:[%s9415_s6 + $0xfe4] sm:$0xf0]  ;;  %4628 = vmatpush.bf16.msra.mxu3 %v6477_v54  ;;  %4603 = vmatpush.bf16.msra.mxu1 %v5933_v0 }
 0x317   : > { %v6892_v5 = vld [vmem:[%s9415_s6 + $0x988] sm:$0xf]  ;;  %v7693_v8 = vor.u32 %v8226_v34, %v7692_v1  ;;  %4591 = vmatmul.bf16.vlgmr.msra.gmra.mxu0 %v9802_v31 }
 0x318   : > { %v8026_v6 = vld [vmem:[%s9415_s6 + $0x9a4] sm:$0xf0]  ;;  %4616 = vmatpush.bf16.msra.mxu2 %v6189_v33  ;;  %4635 = vmatpush.bf16.msrb.mxu0 %v6925_v3  ;;  %v4384_v3 = vpop.f32.mrf.mxu0 }
 0x319   : > { %v7148_v7 = vld [vmem:[%s9415_s6 + $0xb88] sm:$0xf]  ;;  %v6893_v18 = vor.u32 %v8026_v6, %v6892_v5  ;;  %4604 = vmatmul.bf16.vlgmr.msra.gmra.mxu1 %v9808_v16 }
 0x31a   : > { %v8090_v9 = vld [vmem:[%s9415_s6 + $0xba4] sm:$0xf0]  ;;  %4629 = vmatpush.bf16.msra.mxu3 %v6445_v2  ;;  %4648 = vmatpush.bf16.msrb.mxu1 %v7181_v4 }
 0x31b   : > { %v7404_v10 = vld [vmem:[%s9415_s6 + $0xd88] sm:$0xf]  ;;  %v7149_v19 = vor.u32 %v8090_v9, %v7148_v7 }
 0x31c   : > { %v8154_v11 = vld [vmem:[%s9415_s6 + $0xda4] sm:$0xf0]  ;;  %4661 = vmatpush.bf16.msrb.mxu2 %v7437_v38  ;;  %4636 = vmatpush.bf16.msrb.mxu0 %v6893_v18  ;;  %v4397_v38 = vpop.f32.mrf.mxu1 }
 0x31d   : > { %v7660_v12 = vld [vmem:[%s9415_s6 + $0xf88] sm:$0xf]  ;;  %v7405_v20 = vor.u32 %v8154_v11, %v7404_v10  ;;  %4630 = vmatmul.bf16.vlgmr.msra.gmra.mxu3 %v9805_v14  ;;  %v4398_v10 = vadd.f32 %v4397_v38, %v4384_v3  ;;  %v7758_v38 = vld [vmem:[%s9415_s6 + $0x14c] sm:$0xf] }
 0x31e   : > { %v8218_v15 = vld [vmem:[%s9415_s6 + $0xfa4] sm:$0xf0]  ;;  %4674 = vmatpush.bf16.msrb.mxu3 %v7693_v8  ;;  %4649 = vmatpush.bf16.msrb.mxu1 %v7149_v19 }
 0x31f   : > { %v6860_v21 = vld [vmem:[%s9415_s6 + $0x948] sm:$0xf]  ;;  %v7661_v24 = vor.u32 %v8218_v15, %v7660_v12 }
 0x320   : > { %v8018_v22 = vld [vmem:[%s9415_s6 + $0x964] sm:$0xf0]  ;;  %4662 = vmatpush.bf16.msrb.mxu2 %v7405_v20 }
 0x321   : > { %v7116_v23 = vld [vmem:[%s9415_s6 + $0xb48] sm:$0xf]  ;;  %v6861_v32 = vor.u32 %v8018_v22, %v6860_v21  ;;  %v4410_v21 = vpop.f32.mrf.mxu2 }
 0x322   : > { %v8082_v25 = vld [vmem:[%s9415_s6 + $0xb64] sm:$0xf0]  ;;  %4675 = vmatpush.bf16.msrb.mxu3 %v7661_v24 }
 0x323   : > { %v7372_v26 = vld [vmem:[%s9415_s6 + $0xd48] sm:$0xf]  ;;  %v7117_v35 = vor.u32 %v8082_v25, %v7116_v23  ;;  %4637 = vmatpush.bf16.msrb.mxu0 %v6861_v32  ;;  %v4411_v25 = vadd.f32 %v4410_v21, %v4398_v10  ;;  %v7886_v10 = vld [vmem:[%s9415_s6 + $0x54c] sm:$0xf] }
 0x324   : > { %v8146_v27 = vld [vmem:[%s9415_s6 + $0xd64] sm:$0xf0] }
 0x325   : > { %v9797_v28 = vld.sshfl [vmem:[#allocation1 + $0x10] sm:$0xff pattern:$0x73625140]  ;;  %v7373_v36 = vor.u32 %v8146_v27, %v7372_v26  ;;  %4650 = vmatpush.bf16.msrb.mxu1 %v7117_v35 }
 0x326   : > { %4617 = vmatmul.bf16.vlgmr.msra.gmra.mxu2 %v9797_v28  ;;  %v7628_v13 = vld [vmem:[%s9415_s6 + $0xf48] sm:$0xf] }
 0x327   : > { %v8210_v29 = vld [vmem:[%s9415_s6 + $0xf64] sm:$0xf0]  ;;  %4663 = vmatpush.bf16.msrb.mxu2 %v7373_v36 }
 0x328   : > { %v6828_v17 = vld [vmem:[%s9415_s6 + $0x908] sm:$0xf]  ;;  %v7629_v40 = vor.u32 %v8210_v29, %v7628_v13 }
 0x329   : > { %v8010_v37 = vld [vmem:[%s9415_s6 + $0x924] sm:$0xf0] }
 0x32a   : > { %v7084_v39 = vld [vmem:[%s9415_s6 + $0xb08] sm:$0xf]  ;;  %v6829_v46 = vor.u32 %v8010_v37, %v6828_v17  ;;  %4676 = vmatpush.bf16.msrb.mxu3 %v7629_v40  ;;  %v7774_v40 = vld [vmem:[%s9415_s6 + $0x1cc] sm:$0xf] }
 0x32b   : > { %v8074_v41 = vld [vmem:[%s9415_s6 + $0xb24] sm:$0xf0] }
 0x32c   : > { %v7340_v42 = vld [vmem:[%s9415_s6 + $0xd08] sm:$0xf]  ;;  %v7085_v47 = vor.u32 %v8074_v41, %v7084_v39  ;;  %4638 = vmatpush.bf16.msrb.mxu0 %v6829_v46  ;;  %v4423_v39 = vpop.f32.mrf.mxu3  ;;  %v5902_v41 = vld [vmem:[%s9415_s6 + $0x1e8] sm:$0xf0] }
 0x32d   : > { %v8138_v43 = vld [vmem:[%s9415_s6 + $0xd24] sm:$0xf0]  ;;  %v6158_v46 = vld [vmem:[%s9415_s6 + $0x3e8] sm:$0xf0] }
 0x32e   : > { %v7596_v44 = vld [vmem:[%s9415_s6 + $0xf08] sm:$0xf]  ;;  %v7341_v48 = vor.u32 %v8138_v43, %v7340_v42  ;;  %4651 = vmatpush.bf16.msrb.mxu1 %v7085_v47  ;;  %v7838_v42 = vld [vmem:[%s9415_s6 + $0x3cc] sm:$0xf]  ;;  %v9854_v43 = vadd.f32 %v4423_v39, %v4411_v25 }
 0x32f   : > { %v8202_v45 = vld [vmem:[%s9415_s6 + $0xf24] sm:$0xf0]  ;;  %v7902_v47 = vld [vmem:[%s9415_s6 + $0x5cc] sm:$0xf] }
 0x330   : > { %v6796_v49 = vld [vmem:[%s9415_s6 + $0x8c8] sm:$0xf]  ;;  %v7597_v52 = vor.u32 %v8202_v45, %v7596_v44  ;;  %4664 = vmatpush.bf16.msrb.mxu2 %v7341_v48  ;;  %v4386_v44 = vpop.f32.mrf.mxu0  ;;  %v6414_v48 = vld [vmem:[%s9415_s6 + $0x5e8] sm:$0xf0] }
 0x331   : > { %v8002_v50 = vld [vmem:[%s9415_s6 + $0x8e4] sm:$0xf0]  ;;  %v5806_v25 = vld [vmem:[%s9415_s6 + $0x128] sm:$0xf0] }
 0x332   : > { %v7052_v51 = vld [vmem:[%s9415_s6 + $0xac8] sm:$0xf]  ;;  %v6797_v58 = vor.u32 %v8002_v50, %v6796_v49  ;;  %4677 = vmatpush.bf16.msrb.mxu3 %v7597_v52  ;;  %v4399_v49 = vpop.f32.mrf.mxu1  ;;  %v7966_v52 = vld [vmem:[%s9415_s6 + $0x7cc] sm:$0xf] }
 0x333   : > { %v8066_v53 = vld [vmem:[%s9415_s6 + $0xae4] sm:$0xf0]  ;;  %v7742_v44 = vld [vmem:[%s9415_s6 + $0xcc] sm:$0xf] }
 0x334   : > { %v7308_v54 = vld [vmem:[%s9415_s6 + $0xcc8] sm:$0xf]  ;;  %v7053_v59 = vor.u32 %v8066_v53, %v7052_v51  ;;  %4639 = vmatpush.bf16.msrb.mxu0 %v6797_v58  ;;  %v6670_v53 = vld [vmem:[%s9415_s6 + $0x7e8] sm:$0xf0] }
 0x335   : > { %v8130_v55 = vld [vmem:[%s9415_s6 + $0xce4] sm:$0xf0]  ;;  %v7766_v58 = vld [vmem:[%s9415_s6 + $0x18c] sm:$0xf] }
 0x336   : > { %v7564_v56 = vld [vmem:[%s9415_s6 + $0xec8] sm:$0xf]  ;;  %v7309_v60 = vor.u32 %v8130_v55, %v7308_v54  ;;  %4652 = vmatpush.bf16.msrb.mxu1 %v7053_v59  ;;  %v5905_v55 = vor.u32 %v7774_v40, %v5902_v41  ;;  %v5870_v59 = vld [vmem:[%s9415_s6 + $0x1a8] sm:$0xf0] }
 0x337   : > { %v8194_v57 = vld [vmem:[%s9415_s6 + $0xee4] sm:$0xf0]  ;;  %v7870_v49 = vld [vmem:[%s9415_s6 + $0x4cc] sm:$0xf] }
 0x338   : > { %v6764_v61 = vld [vmem:[%s9415_s6 + $0x888] sm:$0xf]  ;;  %v7565_v63 = vor.u32 %v8194_v57, %v7564_v56  ;;  %4665 = vmatpush.bf16.msrb.mxu2 %v7309_v60  ;;  %v6161_v56 = vor.u32 %v7838_v42, %v6158_v46  ;;  %v6417_v57 = vor.u32 %v7902_v47, %v6414_v48  ;;  %v7830_v60 = vld [vmem:[%s9415_s6 + $0x38c] sm:$0xf] }
 0x339   : > { %v7994_v30 = vld [vmem:[%s9415_s6 + $0x8a4] sm:$0xf0]  ;;  %v7806_v46 = vld [vmem:[%s9415_s6 + $0x2cc] sm:$0xf] }
 0x33a   : > { %v7020_v62 = vld [vmem:[%s9415_s6 + $0xa88] sm:$0xf]  ;;  %v6765_v4 = vor.u32 %v7994_v30, %v6764_v61  ;;  %4678 = vmatpush.bf16.msrb.mxu3 %v7565_v63  ;;  %v4412_v61 = vpop.f32.mrf.mxu2  ;;  %v6673_v30 = vor.u32 %v7966_v52, %v6670_v53  ;;  %v7894_v63 = vld [vmem:[%s9415_s6 + $0x58c] sm:$0xf]  ;;  %v4449_v42 = vpop.f32.mrf.mxu1 }
 0x33b   : > { %v8058_v0 = vld [vmem:[%s9415_s6 + $0xaa4] sm:$0xf0]  ;;  %v6030_v48 = vld [vmem:[%s9415_s6 + $0x2e8] sm:$0xf0] }
 0x33c   : > { %v7276_v33 = vld [vmem:[%s9415_s6 + $0xc88] sm:$0xf]  ;;  %v7021_v5 = vor.u32 %v8058_v0, %v7020_v62  ;;  %4640 = vmatpush.bf16.msrb.mxu0 %v6765_v4  ;;  %v6126_v62 = vld [vmem:[%s9415_s6 + $0x3a8] sm:$0xf0] }
 0x33d   : > { %v8122_v1 = vld [vmem:[%s9415_s6 + $0xca4] sm:$0xf0]  ;;  %v6382_v0 = vld [vmem:[%s9415_s6 + $0x5a8] sm:$0xf0]  ;;  %v6129_v3 = vor.u32 %v7830_v60, %v6126_v62 }
 0x33e   : > { %v7532_v34 = vld [vmem:[%s9415_s6 + $0xe88] sm:$0xf]  ;;  %v7277_v6 = vor.u32 %v8122_v1, %v7276_v33  ;;  %4653 = vmatpush.bf16.msrb.mxu1 %v7021_v5  ;;  %v7958_v33 = vld [vmem:[%s9415_s6 + $0x78c] sm:$0xf]  ;;  %v6385_v4 = vor.u32 %v7894_v63, %v6382_v0 }
 0x33f   : > { %v8186_v2 = vld [vmem:[%s9415_s6 + $0xea4] sm:$0xf0]  ;;  %v6638_v1 = vld [vmem:[%s9415_s6 + $0x7a8] sm:$0xf0] }
 0x340   : > { %v6732_v7 = vld [vmem:[%s9415_s6 + $0x848] sm:$0xf]  ;;  %v7533_v11 = vor.u32 %v8186_v2, %v7532_v34  ;;  %4666 = vmatpush.bf16.msrb.mxu2 %v7277_v6  ;;  %v5873_v34 = vor.u32 %v7766_v58, %v5870_v59  ;;  %v4425_v2 = vpop.f32.mrf.mxu3  ;;  %v5838_v5 = vld [vmem:[%s9415_s6 + $0x168] sm:$0xf0] }
 0x341   : > { %v7986_v8 = vld [vmem:[%s9415_s6 + $0x864] sm:$0xf0]  ;;  %v7822_v6 = vld [vmem:[%s9415_s6 + $0x34c] sm:$0xf]  ;;  %v5841_v21 = vor.u32 %v7758_v38, %v5838_v5 }
 0x342   : > { %v6988_v9 = vld [vmem:[%s9415_s6 + $0xa48] sm:$0xf]  ;;  %v6733_v22 = vor.u32 %v7986_v8, %v6732_v7  ;;  %4679 = vmatpush.bf16.msrb.mxu3 %v7533_v11  ;;  %v6641_v8 = vor.u32 %v7958_v33, %v6638_v1  ;;  %v6350_v11 = vld [vmem:[%s9415_s6 + $0x568] sm:$0xf0] }
 0x343   : > { %v8050_v12 = vld [vmem:[%s9415_s6 + $0xa64] sm:$0xf0]  ;;  %v7934_v52 = vld [vmem:[%s9415_s6 + $0x6cc] sm:$0xf] }
 0x344   : > { %v7244_v15 = vld [vmem:[%s9415_s6 + $0xc48] sm:$0xf]  ;;  %v6989_v26 = vor.u32 %v8050_v12, %v6988_v9  ;;  %4641 = vmatpush.bf16.msrb.mxu0 %v6733_v22  ;;  %v6094_v9 = vld [vmem:[%s9415_s6 + $0x368] sm:$0xf0] }
 0x345   : > { %v8114_v18 = vld [vmem:[%s9415_s6 + $0xc64] sm:$0xf0]  ;;  %v9878_v12 = vld.sshfl [vmem:[#allocation1 + $0x20] sm:$0xff pattern:$0x73625140]  ;;  %v6097_v22 = vor.u32 %v7822_v6, %v6094_v9  ;;  %v4451_v9 = vpop.f32.mrf.mxu1 }
 0x346   : > { %v7500_v19 = vld [vmem:[%s9415_s6 + $0xe48] sm:$0xf]  ;;  %v7245_v27 = vor.u32 %v8114_v18, %v7244_v15  ;;  %4654 = vmatpush.bf16.msrb.mxu1 %v6989_v26  ;;  %v9881_v15 = vld.sshfl [vmem:[#allocation1 + $0x38] sm:$0xff pattern:$0x73625140] }
 0x347   : > { %v8178_v20 = vld [vmem:[%s9415_s6 + $0xe64] sm:$0xf0]  ;;  %v7950_v18 = vld [vmem:[%s9415_s6 + $0x74c] sm:$0xf] }
 0x348   : > { %v6700_v23 = vld [vmem:[%s9415_s6 + $0x808] sm:$0xf]  ;;  %v7501_v35 = vor.u32 %v8178_v20, %v7500_v19  ;;  %4667 = vmatpush.bf16.msrb.mxu2 %v7245_v27  ;;  %v6606_v19 = vld [vmem:[%s9415_s6 + $0x768] sm:$0xf0] }
 0x349   : > { %v7978_v24 = vld [vmem:[%s9415_s6 + $0x824] sm:$0xf0]  ;;  %v9886_v20 = vld.sshfl [vmem:[#allocation1 + $0x28] sm:$0xff pattern:$0x73625140]  ;;  %v6609_v27 = vor.u32 %v7950_v18, %v6606_v19 }
 0x34a   : > { %v6956_v13 = vld [vmem:[%s9415_s6 + $0xa08] sm:$0xf]  ;;  %v6701_v45 = vor.u32 %v7978_v24, %v6700_v23  ;;  %4680 = vmatpush.bf16.msrb.mxu3 %v7501_v35  ;;  %v6353_v23 = vor.u32 %v7886_v10, %v6350_v11  ;;  %v7750_v24 = vld [vmem:[%s9415_s6 + $0x10c] sm:$0xf] }
 0x34b   : > { %v8042_v29 = vld [vmem:[%s9415_s6 + $0xa24] sm:$0xf0]  ;;  %v7814_v26 = vld [vmem:[%s9415_s6 + $0x30c] sm:$0xf] }
 0x34c   : > { %v7212_v32 = vld [vmem:[%s9415_s6 + $0xc08] sm:$0xf]  ;;  %v6957_v50 = vor.u32 %v8042_v29, %v6956_v13  ;;  %4642 = vmatpush.bf16.msrb.mxu0 %v6701_v45  ;;  %v6062_v13 = vld [vmem:[%s9415_s6 + $0x328] sm:$0xf0] }
 0x34d   : > { %v8106_v36 = vld [vmem:[%s9415_s6 + $0xc24] sm:$0xf0]  ;;  %v7878_v29 = vld [vmem:[%s9415_s6 + $0x50c] sm:$0xf]  ;;  %v6065_v39 = vor.u32 %v7814_v26, %v6062_v13 }
 0x34e   : > { %v7468_v17 = vld [vmem:[%s9415_s6 + $0xe08] sm:$0xf]  ;;  %v7213_v51 = vor.u32 %v8106_v36, %v7212_v32  ;;  %4655 = vmatpush.bf16.msrb.mxu1 %v6957_v50  ;;  %v6318_v32 = vld [vmem:[%s9415_s6 + $0x528] sm:$0xf0] }
 0x34f   : > { %v8170_v37 = vld [vmem:[%s9415_s6 + $0xe24] sm:$0xf0]  ;;  %4643 = vmatmul.bf16.vlgmr.msrb.gmra.mxu0 %v9878_v12  ;;  %v7942_v35 = vld [vmem:[%s9415_s6 + $0x70c] sm:$0xf]  ;;  %v6321_v40 = vor.u32 %v7878_v29, %v6318_v32 }
 0x350   : > { %v7469_v54 = vor.u32 %v8170_v37, %v7468_v17  ;;  %4668 = vmatpush.bf16.msrb.mxu2 %v7213_v51  ;;  %4687 = vmatpush.bf16.msra.mxu0 %v5905_v55  ;;  %v9872_v7 = vld.sshfl [vmem:[#allocation1 + $0x30] sm:$0xff pattern:$0x73625140]  ;;  %v5809_v17 = vor.u32 %v7750_v24, %v5806_v25  ;;  %v4436_v37 = vpop.f32.mrf.mxu0 }
 0x351   : > { %4656 = vmatmul.bf16.vlgmr.msrb.gmra.mxu1 %v9886_v20  ;;  %v6574_v36 = vld [vmem:[%s9415_s6 + $0x728] sm:$0xf0]  ;;  %v4437_v41 = vadd.f32 %v4436_v37, %v9854_v43 }
 0x352   : > { %4681 = vmatpush.bf16.msrb.mxu3 %v7469_v54  ;;  %4700 = vmatpush.bf16.msra.mxu1 %v6161_v56  ;;  %v5774_v45 = vld [vmem:[%s9415_s6 + $0xe8] sm:$0xf0]  ;;  %v6577_v47 = vor.u32 %v7942_v35, %v6574_v36  ;;  %v6033_v54 = vor.u32 %v7806_v46, %v6030_v48  ;;  %v4462_v56 = vpop.f32.mrf.mxu2 }
 0x353   : > { %4669 = vmatmul.bf16.vlgmr.msrb.gmra.mxu2 %v9872_v7  ;;  %v6286_v50 = vld [vmem:[%s9415_s6 + $0x4e8] sm:$0xf0]  ;;  %v4450_v51 = vadd.f32 %v4449_v42, %v4437_v41  ;;  %v5777_v43 = vor.u32 %v7742_v44, %v5774_v45 }
 0x354   : > { %4713 = vmatpush.bf16.msra.mxu2 %v6417_v57  ;;  %4688 = vmatpush.bf16.msra.mxu0 %v5873_v34  ;;  %v6542_v53 = vld [vmem:[%s9415_s6 + $0x6e8] sm:$0xf0]  ;;  %v6289_v55 = vor.u32 %v7870_v49, %v6286_v50 }
 0x355   : > { %4682 = vmatmul.bf16.vlgmr.msrb.gmra.mxu3 %v9881_v15  ;;  %v7734_v57 = vld [vmem:[%s9415_s6 + $0x8c] sm:$0xf]  ;;  %v6545_v60 = vor.u32 %v7934_v52, %v6542_v53  ;;  %v4463_v61 = vadd.f32 %v4462_v56, %v4450_v51 }
 0x356   : > { %4726 = vmatpush.bf16.msra.mxu3 %v6673_v30  ;;  %4701 = vmatpush.bf16.msra.mxu1 %v6129_v3  ;;  %v5742_v58 = vld [vmem:[%s9415_s6 + $0xa8] sm:$0xf0]  ;;  %v4475_v30 = vpop.f32.mrf.mxu3 }
 0x357   : > { %v7798_v59 = vld [vmem:[%s9415_s6 + $0x28c] sm:$0xf]  ;;  %v9914_v34 = vadd.f32 %v4475_v30, %v4463_v61  ;;  %v5745_v2 = vor.u32 %v7734_v57, %v5742_v58 }
 0x358   : > { %4714 = vmatpush.bf16.msra.mxu2 %v6385_v4  ;;  %4689 = vmatpush.bf16.msra.mxu0 %v5841_v21  ;;  %v5998_v62 = vld [vmem:[%s9415_s6 + $0x2a8] sm:$0xf0]  ;;  %v4438_v3 = vpop.f32.mrf.mxu0 }
 0x359   : > { %v7862_v63 = vld [vmem:[%s9415_s6 + $0x48c] sm:$0xf]  ;;  %v6001_v4 = vor.u32 %v7798_v59, %v5998_v62  ;;  %v8324_v59 = vmov 4.0  }
 0x35a   : > { %4727 = vmatpush.bf16.msra.mxu3 %v6641_v8  ;;  %4702 = vmatpush.bf16.msra.mxu1 %v6097_v22  ;;  %v6254_v0 = vld [vmem:[%s9415_s6 + $0x4a8] sm:$0xf0]  ;;  %v4464_v35 = vpop.f32.mrf.mxu2  ;;  %8254 = vrcp.f32 %v8324_v59 }
 0x35b   : > { %v7926_v33 = vld [vmem:[%s9415_s6 + $0x68c] sm:$0xf]  ;;  %v6257_v38 = vor.u32 %v7862_v63, %v6254_v0  ;;  %v5208_v63 = vsel %vm5207_vm0, %v9914_v34, 0.0  ;;  %v5279_v0 = vmul.f32 %v9914_v34, %v9914_v34 }
 0x35c   : > { %4715 = vmatpush.bf16.msra.mxu2 %v6353_v23  ;;  %4690 = vmatpush.bf16.msra.mxu0 %v5809_v17  ;;  %v6510_v1 = vld [vmem:[%s9415_s6 + $0x6a8] sm:$0xf0]  ;;  %v5209_v9 = vrot.slane %v5208_v63, 4 }
 0x35d   : > { %v7726_v5 = vld [vmem:[%s9415_s6 + $0x4c] sm:$0xf]  ;;  %v6513_v10 = vor.u32 %v7926_v33, %v6510_v1 }
 0x35e   : > { %4728 = vmatpush.bf16.msra.mxu3 %v6609_v27  ;;  %4703 = vmatpush.bf16.msra.mxu1 %v6065_v39  ;;  %v5710_v6 = vld [vmem:[%s9415_s6 + $0x68] sm:$0xf0] }
 0x35f   : > { %v7790_v8 = vld [vmem:[%s9415_s6 + $0x24c] sm:$0xf]  ;;  %v5713_v23 = vor.u32 %v7726_v5, %v5710_v6 }
 0x360   : > { %4716 = vmatpush.bf16.msra.mxu2 %v6321_v40  ;;  %4691 = vmatpush.bf16.msra.mxu0 %v5777_v43  ;;  %v5966_v11 = vld [vmem:[%s9415_s6 + $0x268] sm:$0xf0]  ;;  %v4477_v40 = vpop.f32.mrf.mxu3 }
 0x361   : > { %v7854_v18 = vld [vmem:[%s9415_s6 + $0x44c] sm:$0xf]  ;;  %v5969_v26 = vor.u32 %v7790_v8, %v5966_v11 }
 0x362   : > { %4729 = vmatpush.bf16.msra.mxu3 %v6577_v47  ;;  %4704 = vmatpush.bf16.msra.mxu1 %v6033_v54  ;;  %v6222_v19 = vld [vmem:[%s9415_s6 + $0x468] sm:$0xf0] }
 0x363   : > { %v7918_v21 = vld [vmem:[%s9415_s6 + $0x64c] sm:$0xf]  ;;  %v6225_v27 = vor.u32 %v7854_v18, %v6222_v19  ;;  %v5287_v19 = vsel %vm5207_vm0, %v5279_v0, 0.0 }
 0x364   : > { %4717 = vmatpush.bf16.msra.mxu2 %v6289_v55  ;;  %v6478_v22 = vld [vmem:[%s9415_s6 + $0x668] sm:$0xf0]  ;;  %4692 = vmatpush.bf16.msra.mxu0 %v5745_v2 }
 0x365   : > { %v7718_v24 = vld [vmem:[%s9415_s6 + $0xc] sm:$0xf]  ;;  %v6481_v36 = vor.u32 %v7918_v21, %v6478_v22 }
 0x366   : > { %4730 = vmatpush.bf16.msra.mxu3 %v6545_v60  ;;  %v5678_v25 = vld [vmem:[%s9415_s6 + $0x28] sm:$0xf0]  ;;  %4705 = vmatpush.bf16.msra.mxu1 %v6001_v4 }
 0x367   : > { %v7782_v13 = vld [vmem:[%s9415_s6 + $0x20c] sm:$0xf]  ;;  %v5681_v45 = vor.u32 %v7718_v24, %v5678_v25 }
 0x368   : > { %4718 = vmatpush.bf16.msra.mxu2 %v6257_v38  ;;  %v5934_v29 = vld [vmem:[%s9415_s6 + $0x228] sm:$0xf0]  ;;  %4693 = vmatpush.bf16.msra.mxu0 %v5713_v23  ;;  %v9964_v23 = vpop.eup %8254 }
 0x369   : > { %v7846_v32 = vld [vmem:[%s9415_s6 + $0x40c] sm:$0xf]  ;;  %v5937_v49 = vor.u32 %v7782_v13, %v5934_v29  ;;  %v5288_v29 = vrot.slane %v5287_v19, 4  ;;  %vm5269_vm1 = vweird.f32 %v9964_v23 }
 0x36a   : > { %4731 = vmatpush.bf16.msra.mxu3 %v6513_v10  ;;  %v6190_v17 = vld [vmem:[%s9415_s6 + $0x428] sm:$0xf0]  ;;  %4706 = vmatpush.bf16.msra.mxu1 %v5969_v26 }
 0x36b   : > { %v7910_v37 = vld [vmem:[%s9415_s6 + $0x60c] sm:$0xf]  ;;  %v6193_v50 = vor.u32 %v7846_v32, %v6190_v17 }
 0x36c   : > { %v6446_v39 = vld [vmem:[%s9415_s6 + $0x628] sm:$0xf0]  ;;  %4719 = vmatpush.bf16.msra.mxu2 %v6225_v27  ;;  %4694 = vmatpush.bf16.msra.mxu0 %v5681_v45 }
 0x36d   : > { %v8030_v41 = vld [vmem:[%s9415_s6 + $0x9cc] sm:$0xf]  ;;  %v6449_v53 = vor.u32 %v7910_v37, %v6446_v39 }
 0x36e   : > { %v6926_v42 = vld [vmem:[%s9415_s6 + $0x9e8] sm:$0xf0]  ;;  %4732 = vmatpush.bf16.msra.mxu3 %v6481_v36  ;;  %4707 = vmatpush.bf16.msra.mxu1 %v5937_v49 }
 0x36f   : > { %v8094_v44 = vld [vmem:[%s9415_s6 + $0xbcc] sm:$0xf]  ;;  %v6929_v43 = vor.u32 %v8030_v41, %v6926_v42  ;;  %4695 = vmatmul.bf16.vlgmr.msra.gmra.mxu0 %v9802_v31  ;;  %v4488_v41 = vpop.f32.mrf.mxu0 }
 0x370   : > { %v7182_v46 = vld [vmem:[%s9415_s6 + $0xbe8] sm:$0xf0]  ;;  %4720 = vmatpush.bf16.msra.mxu2 %v6193_v50  ;;  %v5289_v50 = vadd.f32 %v5288_v29, %v5287_v19 }
 0x371   : > { %v8158_v47 = vld [vmem:[%s9415_s6 + $0xdcc] sm:$0xf]  ;;  %v7185_v54 = vor.u32 %v8094_v44, %v7182_v46  ;;  %4739 = vmatpush.bf16.msrb.mxu0 %v6929_v43  ;;  %4708 = vmatmul.bf16.vlgmr.msra.gmra.mxu1 %v9808_v16  ;;  %v5265_v16 = vmul.f32 4.0, %v9964_v23 }
 0x372   : > { %v7438_v48 = vld [vmem:[%s9415_s6 + $0xde8] sm:$0xf0]  ;;  %4733 = vmatpush.bf16.msra.mxu3 %v6449_v53 }
 0x373   : > { %v8222_v51 = vld [vmem:[%s9415_s6 + $0xfcc] sm:$0xf]  ;;  %v7441_v55 = vor.u32 %v8158_v47, %v7438_v48  ;;  %4752 = vmatpush.bf16.msrb.mxu1 %v7185_v54  ;;  %4721 = vmatmul.bf16.vlgmr.msra.gmra.mxu2 %v9797_v28  ;;  %v4501_v48 = vpop.f32.mrf.mxu1  ;;  %v5266_v54 = vsub.f32 1.0, %v5265_v16 }
 0x374   : > { %v7694_v52 = vld [vmem:[%s9415_s6 + $0xfe8] sm:$0xf0]  ;;  %v4502_v43 = vadd.f32 %v4501_v48, %v4488_v41 }
 0x375   : > { %v8022_v56 = vld [vmem:[%s9415_s6 + $0x98c] sm:$0xf]  ;;  %v7697_v60 = vor.u32 %v8222_v51, %v7694_v52  ;;  %4765 = vmatpush.bf16.msrb.mxu2 %v7441_v55  ;;  %4734 = vmatmul.bf16.vlgmr.msra.gmra.mxu3 %v9805_v14  ;;  %v5210_v14 = vadd.f32 %v5209_v9, %v5208_v63  ;;  %v4514_v63 = vpop.f32.mrf.mxu2 }
 0x376   : > { %v6894_v57 = vld [vmem:[%s9415_s6 + $0x9a8] sm:$0xf0] }
 0x377   : > { %v8086_v58 = vld [vmem:[%s9415_s6 + $0xb8c] sm:$0xf]  ;;  %v6897_v2 = vor.u32 %v8022_v56, %v6894_v57  ;;  %4778 = vmatpush.bf16.msrb.mxu3 %v7697_v60  ;;  %v5211_v49 = vrot.slane %v5210_v14, 2 }
 0x378   : > { %v7150_v61 = vld [vmem:[%s9415_s6 + $0xba8] sm:$0xf0] }
 0x379   : > { %v8150_v30 = vld [vmem:[%s9415_s6 + $0xd8c] sm:$0xf]  ;;  %v7153_v4 = vor.u32 %v8086_v58, %v7150_v61  ;;  %4740 = vmatpush.bf16.msrb.mxu0 %v6897_v2  ;;  %v5212_v0 = vadd.f32 %v5211_v49, %v5210_v14 }
 0x37a   : > { %v7406_v62 = vld [vmem:[%s9415_s6 + $0xda8] sm:$0xf0] }
 0x37b   : > { %v8214_v33 = vld [vmem:[%s9415_s6 + $0xf8c] sm:$0xf]  ;;  %v7409_v38 = vor.u32 %v8150_v30, %v7406_v62  ;;  %4753 = vmatpush.bf16.msrb.mxu1 %v7153_v4  ;;  %v4515_v4 = vadd.f32 %v4514_v63, %v4502_v43  ;;  %v7779_v43 = vld [vmem:[%s9415_s6 + $0x1ec] sm:$0xf0] }
 0x37c   : > { %v7662_v1 = vld [vmem:[%s9415_s6 + $0xfa8] sm:$0xf0] }
 0x37d   : > { %v8014_v3 = vld [vmem:[%s9415_s6 + $0x94c] sm:$0xf]  ;;  %v7665_v10 = vor.u32 %v8214_v33, %v7662_v1  ;;  %4766 = vmatpush.bf16.msrb.mxu2 %v7409_v38  ;;  %v5290_v33 = vrot.slane %v5289_v50, 2  ;;  %v4527_v38 = vpop.f32.mrf.mxu3 }
 0x37e   : > { %v6862_v5 = vld [vmem:[%s9415_s6 + $0x968] sm:$0xf0] }
 0x37f   : > { %v8078_v6 = vld [vmem:[%s9415_s6 + $0xb4c] sm:$0xf]  ;;  %v6865_v24 = vor.u32 %v8014_v3, %v6862_v5  ;;  %4779 = vmatpush.bf16.msrb.mxu3 %v7665_v10  ;;  %v5267_v5 = vmul.f32 %v9964_v23, %v5266_v54  ;;  %v6164_v54 = vld [vmem:[%s9415_s6 + $0x3d0] sm:$0xf] }
 0x380   : > { %v7118_v8 = vld [vmem:[%s9415_s6 + $0xb68] sm:$0xf0] }
 0x381   : > { %v8142_v11 = vld [vmem:[%s9415_s6 + $0xd4c] sm:$0xf]  ;;  %v7121_v28 = vor.u32 %v8078_v6, %v7118_v8  ;;  %4741 = vmatpush.bf16.msrb.mxu0 %v6865_v24  ;;  %v5268_v29 = vadd.f32 %v9964_v23, %v5267_v5  ;;  %v7835_v5 = vld [vmem:[%s9415_s6 + $0x3ac] sm:$0xf0] }
 0x382   : > { %v7374_v18 = vld [vmem:[%s9415_s6 + $0xd68] sm:$0xf0] }
 0x383   : > { %v8206_v21 = vld [vmem:[%s9415_s6 + $0xf4c] sm:$0xf]  ;;  %v7377_v26 = vor.u32 %v8142_v11, %v7374_v18  ;;  %4754 = vmatpush.bf16.msrb.mxu1 %v7121_v28  ;;  %v9994_v11 = vadd.f32 %v4527_v38, %v4515_v4  ;;  %v4490_v18 = vpop.f32.mrf.mxu0  ;;  %v4503_v28 = vpop.f32.mrf.mxu1  ;;  %v6132_v4 = vld [vmem:[%s9415_s6 + $0x390] sm:$0xf] }
 0x384   : > { %v7630_v22 = vld [vmem:[%s9415_s6 + $0xf68] sm:$0xf0]  ;;  %v7763_v28 = vld [vmem:[%s9415_s6 + $0x16c] sm:$0xf0] }
 0x385   : > { %v8006_v25 = vld [vmem:[%s9415_s6 + $0x90c] sm:$0xf]  ;;  %v7633_v32 = vor.u32 %v8206_v21, %v7630_v22  ;;  %4767 = vmatpush.bf16.msrb.mxu2 %v7377_v26  ;;  %v5213_v26 = vrot.slane %v5212_v0, 1 }
 0x386   : > { %v6830_v27 = vld [vmem:[%s9415_s6 + $0x928] sm:$0xf0] }
 0x387   : > { %v8070_v31 = vld [vmem:[%s9415_s6 + $0xb0c] sm:$0xf]  ;;  %v6833_v39 = vor.u32 %v8006_v25, %v6830_v27  ;;  %4780 = vmatpush.bf16.msrb.mxu3 %v7633_v32  ;;  %v5291_v27 = vadd.f32 %v5290_v33, %v5289_v50 }
 0x388   : > { %v7086_v13 = vld [vmem:[%s9415_s6 + $0xb28] sm:$0xf0] }
 0x389   : > { %v8134_v35 = vld [vmem:[%s9415_s6 + $0xd0c] sm:$0xf]  ;;  %v7089_v42 = vor.u32 %v8070_v31, %v7086_v13  ;;  %4742 = vmatpush.bf16.msrb.mxu0 %v6833_v39 }
 0x38a   : > { %v7342_v36 = vld [vmem:[%s9415_s6 + $0xd28] sm:$0xf0] }
 0x38b   : > { %v8198_v17 = vld [vmem:[%s9415_s6 + $0xf0c] sm:$0xf]  ;;  %v7345_v44 = vor.u32 %v8134_v35, %v7342_v36  ;;  %4755 = vmatpush.bf16.msrb.mxu1 %v7089_v42 }
 0x38c   : > { %v7598_v37 = vld [vmem:[%s9415_s6 + $0xf28] sm:$0xf0] }
 0x38d   : > { %v7998_v40 = vld [vmem:[%s9415_s6 + $0x8cc] sm:$0xf]  ;;  %v7601_v51 = vor.u32 %v8198_v17, %v7598_v37  ;;  %4768 = vmatpush.bf16.msrb.mxu2 %v7345_v44 }
 0x38e   : > { %v6798_v45 = vld [vmem:[%s9415_s6 + $0x8e8] sm:$0xf0] }
 0x38f   : > { %v8062_v46 = vld [vmem:[%s9415_s6 + $0xacc] sm:$0xf]  ;;  %v6801_v57 = vor.u32 %v7998_v40, %v6798_v45  ;;  %4781 = vmatpush.bf16.msrb.mxu3 %v7601_v51  ;;  %v4516_v45 = vpop.f32.mrf.mxu2  ;;  %v4529_v51 = vpop.f32.mrf.mxu3 }
 0x390   : > { %v7054_v47 = vld [vmem:[%s9415_s6 + $0xae8] sm:$0xf0]  ;;  %v5780_v51 = vld [vmem:[%s9415_s6 + $0xd0] sm:$0xf] }
 0x391   : > { %v8126_v52 = vld [vmem:[%s9415_s6 + $0xccc] sm:$0xf]  ;;  %v7057_v59 = vor.u32 %v8062_v46, %v7054_v47  ;;  %4743 = vmatpush.bf16.msrb.mxu0 %v6801_v57  ;;  %v5214_v46 = vadd.f32 %v5213_v26, %v5212_v0  ;;  %v5292_v47 = vrot.slane %v5291_v27, 1  ;;  %v6420_v57 = vld [vmem:[%s9415_s6 + $0x5d0] sm:$0xf] }
 0x392   : > { %v7310_v53 = vld [vmem:[%s9415_s6 + $0xce8] sm:$0xf0]  ;;  %v6100_v26 = vld [vmem:[%s9415_s6 + $0x350] sm:$0xf] }
 0x393   : > { %v8190_v55 = vld [vmem:[%s9415_s6 + $0xecc] sm:$0xf]  ;;  %v7313_v60 = vor.u32 %v8126_v52, %v7310_v53  ;;  %4756 = vmatpush.bf16.msrb.mxu1 %v7057_v59  ;;  %v10016_v52 = vsel %vm5269_vm1, %v9964_v23, %v5268_v29  ;;  %v5908_v53 = vld [vmem:[%s9415_s6 + $0x1d0] sm:$0xf] }
 0x394   : > { %v7566_v56 = vld [vmem:[%s9415_s6 + $0xee8] sm:$0xf0]  ;;  %v7971_v23 = vld [vmem:[%s9415_s6 + $0x7ec] sm:$0xf0]  ;;  %v5909_v0 = vor.u32 %v7779_v43, %v5908_v53 }
 0x395   : > { %v7990_v58 = vld [vmem:[%s9415_s6 + $0x88c] sm:$0xf]  ;;  %v7569_v1 = vor.u32 %v8190_v55, %v7566_v56  ;;  %4769 = vmatpush.bf16.msrb.mxu2 %v7313_v60  ;;  %v7843_v56 = vld [vmem:[%s9415_s6 + $0x3ec] sm:$0xf0] }
 0x396   : > { %v6766_v61 = vld [vmem:[%s9415_s6 + $0x8a8] sm:$0xf0]  ;;  %v6165_v33 = vor.u32 %v7843_v56, %v6164_v54  ;;  %v6612_v29 = vld [vmem:[%s9415_s6 + $0x750] sm:$0xf] }
 0x397   : > { %v8054_v30 = vld [vmem:[%s9415_s6 + $0xa8c] sm:$0xf]  ;;  %v6769_v9 = vor.u32 %v7990_v58, %v6766_v61  ;;  %4782 = vmatpush.bf16.msrb.mxu3 %v7569_v1  ;;  %v7907_v58 = vld [vmem:[%s9415_s6 + $0x5ec] sm:$0xf0] }
 0x398   : > { %v7022_v62 = vld [vmem:[%s9415_s6 + $0xaa8] sm:$0xf0]  ;;  %v6676_v61 = vld [vmem:[%s9415_s6 + $0x7d0] sm:$0xf]  ;;  %v6421_v1 = vor.u32 %v7907_v58, %v6420_v57 }
 0x399   : > { %v8118_v2 = vld [vmem:[%s9415_s6 + $0xc8c] sm:$0xf]  ;;  %v7025_v19 = vor.u32 %v8054_v30, %v7022_v62  ;;  %4744 = vmatpush.bf16.msrb.mxu0 %v6769_v9  ;;  %v10027_v30 = vmul.f32 %v10016_v52, %v5214_v46  ;;  %v5293_v62 = vadd.f32 %v5292_v47, %v5291_v27  ;;  %v6677_v38 = vor.u32 %v7971_v23, %v6676_v61  ;;  %v6644_v9 = vld [vmem:[%s9415_s6 + $0x790] sm:$0xf]  ;;  %v4540_v46 = vpop.f32.mrf.mxu0 }
 0x39a   : > { %v7278_v3 = vld [vmem:[%s9415_s6 + $0xca8] sm:$0xf0]  ;;  %v7747_v53 = vld [vmem:[%s9415_s6 + $0xec] sm:$0xf0] }
 0x39b   : > { %v8182_v6 = vld [vmem:[%s9415_s6 + $0xe8c] sm:$0xf]  ;;  %v7281_v21 = vor.u32 %v8118_v2, %v7278_v3  ;;  %4757 = vmatpush.bf16.msrb.mxu1 %v7025_v19  ;;  %v5876_v2 = vld [vmem:[%s9415_s6 + $0x190] sm:$0xf]  ;;  %v5343_v18 = vmul.f32 %v5293_v62, %v10016_v52  ;;  %v5351_v19 = vmul.f32 %v10027_v30, %v10027_v30 }
 0x39c   : > { %v7534_v8 = vld [vmem:[%s9415_s6 + $0xea8] sm:$0xf0]  ;;  %v7771_v3 = vld [vmem:[%s9415_s6 + $0x1ac] sm:$0xf0] }
 0x39d   : > { %v7982_v10 = vld [vmem:[%s9415_s6 + $0x84c] sm:$0xf]  ;;  %v7537_v31 = vor.u32 %v8182_v6, %v7534_v8  ;;  %4770 = vmatpush.bf16.msrb.mxu2 %v7281_v21  ;;  %v6388_v6 = vld [vmem:[%s9415_s6 + $0x590] sm:$0xf]  ;;  %v5877_v21 = vor.u32 %v7771_v3, %v5876_v2 }
 0x39e   : > { %v6734_v22 = vld [vmem:[%s9415_s6 + $0x868] sm:$0xf0]  ;;  %v7899_v8 = vld [vmem:[%s9415_s6 + $0x5ac] sm:$0xf0] }
 0x39f   : > { %v8046_v24 = vld [vmem:[%s9415_s6 + $0xa4c] sm:$0xf]  ;;  %v6737_v36 = vor.u32 %v7982_v10, %v6734_v22  ;;  %4783 = vmatpush.bf16.msrb.mxu3 %v7537_v31  ;;  %v7963_v10 = vld [vmem:[%s9415_s6 + $0x7ac] sm:$0xf0]  ;;  %v6133_v22 = vor.u32 %v7835_v5, %v6132_v4  ;;  %v4579_v4 = vpop.f32.mrf.mxu3 }
 0x3a0   : > { %v6990_v25 = vld [vmem:[%s9415_s6 + $0xa68] sm:$0xf0]  ;;  %v6645_v27 = vor.u32 %v7963_v10, %v6644_v9  ;;  %v7827_v31 = vld [vmem:[%s9415_s6 + $0x36c] sm:$0xf0] }
 0x3a1   : > { %v8110_v13 = vld [vmem:[%s9415_s6 + $0xc4c] sm:$0xf]  ;;  %v6993_v39 = vor.u32 %v8046_v24, %v6990_v25  ;;  %4745 = vmatpush.bf16.msrb.mxu0 %v6737_v36  ;;  %v6389_v24 = vor.u32 %v7899_v8, %v6388_v6  ;;  %v5844_v25 = vld [vmem:[%s9415_s6 + $0x150] sm:$0xf]  ;;  %v6101_v36 = vor.u32 %v7827_v31, %v6100_v26 }
 0x3a2   : > { %v7246_v14 = vld [vmem:[%s9415_s6 + $0xc68] sm:$0xf0]  ;;  %v6036_v43 = vld [vmem:[%s9415_s6 + $0x2d0] sm:$0xf] }
 0x3a3   : > { %v8174_v32 = vld [vmem:[%s9415_s6 + $0xe4c] sm:$0xf]  ;;  %v7249_v40 = vor.u32 %v8110_v13, %v7246_v14  ;;  %4758 = vmatpush.bf16.msrb.mxu1 %v6993_v39  ;;  %v6356_v13 = vld [vmem:[%s9415_s6 + $0x550] sm:$0xf] }
 0x3a4   : > { %v7502_v35 = vld [vmem:[%s9415_s6 + $0xe68] sm:$0xf0]  ;;  %v7891_v14 = vld [vmem:[%s9415_s6 + $0x56c] sm:$0xf0] }
 0x3a5   : > { %v7974_v16 = vld [vmem:[%s9415_s6 + $0x80c] sm:$0xf]  ;;  %v7505_v48 = vor.u32 %v8174_v32, %v7502_v35  ;;  %4771 = vmatpush.bf16.msrb.mxu2 %v7249_v40  ;;  %v7955_v32 = vld [vmem:[%s9415_s6 + $0x76c] sm:$0xf0]  ;;  %v5359_v35 = vsub.f32 %v5343_v18, %v5351_v19 }
 0x3a6   : > { %v6702_v17 = vld [vmem:[%s9415_s6 + $0x828] sm:$0xf0]  ;;  %v7819_v39 = vld [vmem:[%s9415_s6 + $0x32c] sm:$0xf0] }
 0x3a7   : > { %v8038_v37 = vld [vmem:[%s9415_s6 + $0xa0c] sm:$0xf]  ;;  %v6705_v55 = vor.u32 %v7974_v16, %v6702_v17  ;;  %4784 = vmatpush.bf16.msrb.mxu3 %v7505_v48  ;;  %v6357_v16 = vor.u32 %v7891_v14, %v6356_v13  ;;  %v5812_v17 = vld [vmem:[%s9415_s6 + $0x110] sm:$0xf] }
 0x3a8   : > { %v6958_v41 = vld [vmem:[%s9415_s6 + $0xa28] sm:$0xf0]  ;;  %v6324_v40 = vld [vmem:[%s9415_s6 + $0x510] sm:$0xf] }
 0x3a9   : > { %v8102_v42 = vld [vmem:[%s9415_s6 + $0xc0c] sm:$0xf]  ;;  %v6961_v59 = vor.u32 %v8038_v37, %v6958_v41  ;;  %4746 = vmatpush.bf16.msrb.mxu0 %v6705_v55  ;;  %v6068_v37 = vld [vmem:[%s9415_s6 + $0x310] sm:$0xf] }
 0x3aa   : > { %v7214_v44 = vld [vmem:[%s9415_s6 + $0xc28] sm:$0xf0]  ;;  %v7883_v41 = vld [vmem:[%s9415_s6 + $0x52c] sm:$0xf0]  ;;  %v6069_v47 = vor.u32 %v7819_v39, %v6068_v37 }
 0x3ab   : > { %v8166_v49 = vld [vmem:[%s9415_s6 + $0xe0c] sm:$0xf]  ;;  %v7217_v60 = vor.u32 %v8102_v42, %v7214_v44  ;;  %4759 = vmatpush.bf16.msrb.mxu1 %v6961_v59  ;;  %v6580_v42 = vld [vmem:[%s9415_s6 + $0x710] sm:$0xf]  ;;  %v6325_v48 = vor.u32 %v7883_v41, %v6324_v40 }
 0x3ac   : > { %v7470_v50 = vld [vmem:[%s9415_s6 + $0xe28] sm:$0xf0]  ;;  %4747 = vmatmul.bf16.vlgmr.msrb.gmra.mxu0 %v9878_v12  ;;  %v7755_v12 = vld [vmem:[%s9415_s6 + $0x12c] sm:$0xf0] }
 0x3ad   : > { %v7473_v63 = vor.u32 %v8166_v49, %v7470_v50  ;;  %4772 = vmatpush.bf16.msrb.mxu2 %v7217_v60  ;;  %4791 = vmatpush.bf16.msra.mxu0 %v5909_v0  ;;  %v7947_v44 = vld [vmem:[%s9415_s6 + $0x72c] sm:$0xf0]  ;;  %v5813_v45 = vor.u32 %v7755_v12, %v5812_v17  ;;  %v4541_v49 = vadd.f32 %v4540_v46, %v9994_v11  ;;  %v4553_v50 = vpop.f32.mrf.mxu1 }
 0x3ae   : > { %4760 = vmatmul.bf16.vlgmr.msrb.gmra.mxu1 %v9886_v20  ;;  %v5367_v20 = vmax.f32 %v5359_v35, 0.0  ;;  %v6581_v54 = vor.u32 %v7947_v44, %v6580_v42  ;;  %v7811_v55 = vld [vmem:[%s9415_s6 + $0x2ec] sm:$0xf0]  ;;  %v5781_v11 = vor.u32 %v7747_v53, %v5780_v51  ;;  %v4581_v51 = vpop.f32.mrf.mxu3 }
 0x3af   : > { %4785 = vmatpush.bf16.msrb.mxu3 %v7473_v63  ;;  %4804 = vmatpush.bf16.msra.mxu1 %v6165_v33  ;;  %v6292_v56 = vld [vmem:[%s9415_s6 + $0x4d0] sm:$0xf]  ;;  %v4554_v58 = vadd.f32 %v4553_v50, %v4541_v49  ;;  %v6037_v23 = vor.u32 %v7811_v55, %v6036_v43  ;;  %v4566_v63 = vpop.f32.mrf.mxu2 }
 0x3b0   : > { %4773 = vmatmul.bf16.vlgmr.msrb.gmra.mxu2 %v9872_v7  ;;  %v5845_v7 = vor.u32 %v7763_v28, %v5844_v25  ;;  %v7875_v57 = vld [vmem:[%s9415_s6 + $0x4ec] sm:$0xf0]  ;;  %v10069_v61 = vadd.f32 1e-05, %v5367_v20 }
 0x3b1   : > { %4817 = vmatpush.bf16.msra.mxu2 %v6421_v1  ;;  %4792 = vmatpush.bf16.msra.mxu0 %v5877_v21  ;;  %v6548_v59 = vld [vmem:[%s9415_s6 + $0x6d0] sm:$0xf]  ;;  %v6293_v62 = vor.u32 %v7875_v57, %v6292_v56  ;;  %v4567_v3 = vadd.f32 %v4566_v63, %v4554_v58 }
 0x3b2   : > { %4786 = vmatmul.bf16.vlgmr.msrb.gmra.mxu3 %v9881_v15  ;;  %v6613_v15 = vor.u32 %v7955_v32, %v6612_v29  ;;  %v7939_v60 = vld [vmem:[%s9415_s6 + $0x6ec] sm:$0xf0]  ;;  %8256 = vrsqrt.f32 %v10069_v61  ;;  %vm5397_vm3 = vweird.f32 %v10069_v61 }
 0x3b3   : > { %4830 = vmatpush.bf16.msra.mxu3 %v6677_v38  ;;  %4805 = vmatpush.bf16.msra.mxu1 %v6133_v22  ;;  %v5748_v0 = vld [vmem:[%s9415_s6 + $0x90] sm:$0xf]  ;;  %v6549_v2 = vor.u32 %v7939_v60, %v6548_v59  ;;  %v10079_v10 = vadd.f32 %v4579_v4, %v4567_v3 }
 0x3b4   : > { %v7739_v33 = vld [vmem:[%s9415_s6 + $0xac] sm:$0xf0] }
 0x3b5   : > { %4818 = vmatpush.bf16.msra.mxu2 %v6389_v24  ;;  %4793 = vmatpush.bf16.msra.mxu0 %v5845_v7  ;;  %v6004_v1 = vld [vmem:[%s9415_s6 + $0x290] sm:$0xf]  ;;  %v5749_v18 = vor.u32 %v7739_v33, %v5748_v0  ;;  %v4542_v24 = vpop.f32.mrf.mxu0  ;;  %v4555_v13 = vpop.f32.mrf.mxu1  ;;  %v5215_v14 = vsel %vm5207_vm0, %v10079_v10, 0.0  ;;  %v5280_v29 = vmul.f32 %v10079_v10, %v10079_v10 }
 0x3b6   : > { %v7803_v38 = vld [vmem:[%s9415_s6 + $0x2ac] sm:$0xf0] }
 0x3b7   : > { %4831 = vmatpush.bf16.msra.mxu3 %v6645_v27  ;;  %4806 = vmatpush.bf16.msra.mxu1 %v6101_v36  ;;  %v6260_v5 = vld [vmem:[%s9415_s6 + $0x490] sm:$0xf]  ;;  %v6005_v25 = vor.u32 %v7803_v38, %v6004_v1  ;;  %v5216_v36 = vrot.slane %v5215_v14, 4  ;;  %v5294_v12 = vsel %vm5207_vm0, %v5280_v29, 0.0  ;;  %v4568_v46 = vpop.f32.mrf.mxu2 }
 0x3b8   : > { %v7867_v6 = vld [vmem:[%s9415_s6 + $0x4ac] sm:$0xf0]  ;;  %v5295_v41 = vrot.slane %v5294_v12, 4  ;;  %v10104_v53 = vpop.eup %8256 }
 0x3b9   : > { %4819 = vmatpush.bf16.msra.mxu2 %v6357_v16  ;;  %4794 = vmatpush.bf16.msra.mxu0 %v5813_v45  ;;  %v6516_v8 = vld [vmem:[%s9415_s6 + $0x690] sm:$0xf]  ;;  %v6261_v28 = vor.u32 %v7867_v6, %v6260_v5  ;;  %v5217_v40 = vadd.f32 %v5216_v36, %v5215_v14  ;;  %v5392_v1 = vmul.f32 %v10104_v53, %v10069_v61  ;;  %vm5398_vm2 = vweird.f32 %v10104_v53 }
 0x3ba   : > { %v7931_v9 = vld [vmem:[%s9415_s6 + $0x6ac] sm:$0xf0]  ;;  %vm10201_vm4 = vmor %vm5397_vm3, %vm5398_vm2 }
 0x3bb   : > { %4832 = vmatpush.bf16.msra.mxu3 %v6613_v15  ;;  %4807 = vmatpush.bf16.msra.mxu1 %v6069_v47  ;;  %v5716_v19 = vld [vmem:[%s9415_s6 + $0x50] sm:$0xf]  ;;  %v6517_v32 = vor.u32 %v7931_v9, %v6516_v8  ;;  %v5218_v43 = vrot.slane %v5217_v40, 2 }
 0x3bc   : > { %v7731_v21 = vld [vmem:[%s9415_s6 + $0x6c] sm:$0xf0] }
 0x3bd   : > { %4820 = vmatpush.bf16.msra.mxu2 %v6325_v48  ;;  %4795 = vmatpush.bf16.msra.mxu0 %v5781_v11  ;;  %v5972_v22 = vld [vmem:[%s9415_s6 + $0x250] sm:$0xf]  ;;  %v5717_v37 = vor.u32 %v7731_v21, %v5716_v19  ;;  %v5219_v11 = vadd.f32 %v5218_v43, %v5217_v40 }
 0x3be   : > { %v7795_v26 = vld [vmem:[%s9415_s6 + $0x26c] sm:$0xf0] }
 0x3bf   : > { %4833 = vmatpush.bf16.msra.mxu3 %v6581_v54  ;;  %4808 = vmatpush.bf16.msra.mxu1 %v6037_v23  ;;  %v6228_v27 = vld [vmem:[%s9415_s6 + $0x450] sm:$0xf]  ;;  %v5973_v42 = vor.u32 %v7795_v26, %v5972_v22  ;;  %v5296_v54 = vadd.f32 %v5295_v41, %v5294_v12  ;;  %v5220_v5 = vrot.slane %v5219_v11, 1 }
 0x3c0   : > { %v7859_v31 = vld [vmem:[%s9415_s6 + $0x46c] sm:$0xf0] }
 0x3c1   : > { %4821 = vmatpush.bf16.msra.mxu2 %v6293_v62  ;;  %v6484_v35 = vld [vmem:[%s9415_s6 + $0x650] sm:$0xf]  ;;  %4796 = vmatpush.bf16.msra.mxu0 %v5749_v18  ;;  %v6229_v44 = vor.u32 %v7859_v31, %v6228_v27  ;;  %v5297_v23 = vrot.slane %v5296_v54, 2  ;;  %v5393_v31 = vmul.f32 %v10104_v53, %v5392_v1 }
 0x3c2   : > { %v7923_v7 = vld [vmem:[%s9415_s6 + $0x66c] sm:$0xf0] }
 0x3c3   : > { %4834 = vmatpush.bf16.msra.mxu3 %v6549_v2  ;;  %v5684_v16 = vld [vmem:[%s9415_s6 + $0x10] sm:$0xf]  ;;  %4809 = vmatpush.bf16.msra.mxu1 %v6005_v25  ;;  %v6485_v47 = vor.u32 %v7923_v7, %v6484_v35  ;;  %v5298_v6 = vadd.f32 %v5297_v23, %v5296_v54  ;;  %v5221_v25 = vadd.f32 %v5220_v5, %v5219_v11  ;;  %v5394_v46 = vmul.f32 0.5, %v5393_v31  ;;  %v4605_v5 = vpop.f32.mrf.mxu1 }
 0x3c4   : > { %v7723_v17 = vld [vmem:[%s9415_s6 + $0x2c] sm:$0xf0] }
 0x3c5   : > { %v5940_v15 = vld [vmem:[%s9415_s6 + $0x210] sm:$0xf]  ;;  %4822 = vmatpush.bf16.msra.mxu2 %v6261_v28  ;;  %4797 = vmatpush.bf16.msra.mxu0 %v5717_v37  ;;  %v5685_v57 = vor.u32 %v7723_v17, %v5684_v16  ;;  %v5299_v28 = vrot.slane %v5298_v6, 1  ;;  %v10130_v29 = vmul.f32 %v10016_v52, %v5221_v25 }
 0x3c6   : > { %v7787_v39 = vld [vmem:[%s9415_s6 + $0x22c] sm:$0xf0] }
 0x3c7   : > { %v6196_v20 = vld [vmem:[%s9415_s6 + $0x410] sm:$0xf]  ;;  %4835 = vmatpush.bf16.msra.mxu3 %v6517_v32  ;;  %4810 = vmatpush.bf16.msra.mxu1 %v5973_v42  ;;  %v5941_v62 = vor.u32 %v7787_v39, %v5940_v15  ;;  %v5300_v32 = vadd.f32 %v5299_v28, %v5298_v6  ;;  %v10138_v39 = vld.sshfl [vmem:[#allocation1 + $0x10] sm:$0xff pattern:$0x73625140]  ;;  %v5352_v41 = vmul.f32 %v10130_v29, %v10130_v29 }
 0x3c8   : > { %v7851_v45 = vld [vmem:[%s9415_s6 + $0x42c] sm:$0xf0] }
 0x3c9   : > { %v6452_v48 = vld [vmem:[%s9415_s6 + $0x610] sm:$0xf]  ;;  %4823 = vmatpush.bf16.msra.mxu2 %v6229_v44  ;;  %v6197_v63 = vor.u32 %v7851_v45, %v6196_v20  ;;  %4798 = vmatpush.bf16.msra.mxu0 %v5685_v57  ;;  %v5344_v40 = vmul.f32 %v5300_v32, %v10016_v52  ;;  %v10146_v20 = vld.sshfl [vmem:[#allocation1] sm:$0xff pattern:$0x73625140] }
 0x3ca   : > { %v7915_v49 = vld [vmem:[%s9415_s6 + $0x62c] sm:$0xf0] }
 0x3cb   : > { %v6932_v50 = vld [vmem:[%s9415_s6 + $0x9d0] sm:$0xf]  ;;  %4836 = vmatpush.bf16.msra.mxu3 %v6485_v47  ;;  %v6453_v2 = vor.u32 %v7915_v49, %v6452_v48  ;;  %4811 = vmatpush.bf16.msra.mxu1 %v5941_v62  ;;  %v10157_v48 = vld.sshfl [vmem:[#allocation1 + $0x8] sm:$0xff pattern:$0x73625140]  ;;  %v5360_v49 = vsub.f32 %v5344_v40, %v5352_v41  ;;  %v5395_v62 = vsub.f32 1.5, %v5394_v46 }
 0x3cc   : > { %v8035_v55 = vld [vmem:[%s9415_s6 + $0x9ec] sm:$0xf0]  ;;  %4799 = vmatmul.bf16.vlgmr.msra.gmra.mxu0 %v10146_v20 }
 0x3cd   : > { %v7188_v56 = vld [vmem:[%s9415_s6 + $0xbd0] sm:$0xf]  ;;  %v6933_v3 = vor.u32 %v8035_v55, %v6932_v50  ;;  %4824 = vmatpush.bf16.msra.mxu2 %v6197_v63  ;;  %v5396_v32 = vmul.f32 %v10104_v53, %v5395_v62 }
 0x3ce   : > { %v8099_v58 = vld [vmem:[%s9415_s6 + $0xbec] sm:$0xf0]  ;;  %4812 = vmatmul.bf16.vlgmr.msra.gmra.mxu1 %v10157_v48 }
 0x3cf   : > { %v7444_v59 = vld [vmem:[%s9415_s6 + $0xdd0] sm:$0xf]  ;;  %v7189_v8 = vor.u32 %v8099_v58, %v7188_v56  ;;  %4837 = vmatpush.bf16.msra.mxu3 %v6453_v2  ;;  %4843 = vmatpush.bf16.msrb.mxu0 %v6933_v3 }
 0x3d0   : > { %v8163_v60 = vld [vmem:[%s9415_s6 + $0xdec] sm:$0xf0]  ;;  %4825 = vmatmul.bf16.vlgmr.msra.gmra.mxu2 %v10138_v39 }
 0x3d1   : > { %v7700_v0 = vld [vmem:[%s9415_s6 + $0xfd0] sm:$0xf]  ;;  %v7445_v9 = vor.u32 %v8163_v60, %v7444_v59  ;;  %4856 = vmatpush.bf16.msrb.mxu1 %v7189_v8  ;;  %v5368_v60 = vmax.f32 %v5360_v49, 0.0 }
 0x3d2   : > { %v8227_v33 = vld [vmem:[%s9415_s6 + $0xfec] sm:$0xf0] }
 0x3d3   : > { %v6900_v4 = vld [vmem:[%s9415_s6 + $0x990] sm:$0xf]  ;;  %v7701_v21 = vor.u32 %v8227_v33, %v7700_v0  ;;  %4869 = vmatpush.bf16.msrb.mxu2 %v7445_v9  ;;  %v4592_v33 = vpop.f32.mrf.mxu0  ;;  %v10175_v1 = vadd.f32 1e-05, %v5368_v60 }
 0x3d4   : > { %v8027_v38 = vld [vmem:[%s9415_s6 + $0x9ac] sm:$0xf0] }
 0x3d5   : > { %v7156_v18 = vld [vmem:[%s9415_s6 + $0xb90] sm:$0xf]  ;;  %v6901_v13 = vor.u32 %v8027_v38, %v6900_v4  ;;  %4882 = vmatpush.bf16.msrb.mxu3 %v7701_v21  ;;  %8258 = vrsqrt.f32 %v10175_v1  ;;  %vm5407_vm6 = vweird.f32 %v10175_v1 }
 0x3d6   : > { %v8091_v19 = vld [vmem:[%s9415_s6 + $0xbac] sm:$0xf0] }
 0x3d7   : > { %v7412_v22 = vld [vmem:[%s9415_s6 + $0xd90] sm:$0xf]  ;;  %v7157_v14 = vor.u32 %v8091_v19, %v7156_v18  ;;  %4844 = vmatpush.bf16.msrb.mxu0 %v6901_v13  ;;  %v4606_v19 = vadd.f32 %v4605_v5, %v4592_v33 }
 0x3d8   : > { %v8155_v24 = vld [vmem:[%s9415_s6 + $0xdac] sm:$0xf0] }
 0x3d9   : > { %v7668_v26 = vld [vmem:[%s9415_s6 + $0xf90] sm:$0xf]  ;;  %v7413_v35 = vor.u32 %v8155_v24, %v7412_v22  ;;  %4857 = vmatpush.bf16.msrb.mxu1 %v7157_v14  ;;  %v10186_v24 = vld [vmem:[%s10173_s14] sm:$0xff]  ;;  %v4618_v14 = vpop.f32.mrf.mxu2 }
 0x3da   : > { %v8219_v27 = vld [vmem:[%s9415_s6 + $0xfac] sm:$0xf0]  ;;  %v5481_v41 = vperm.slane %v10186_v24, 0 }
 0x3db   : > { %v6868_v7 = vld [vmem:[%s9415_s6 + $0x950] sm:$0xf]  ;;  %v7669_v17 = vor.u32 %v8219_v27, %v7668_v26  ;;  %4870 = vmatpush.bf16.msrb.mxu2 %v7413_v35  ;;  %v4594_v46 = vpop.f32.mrf.mxu0  ;;  %v10208_v61 = vpop.eup %8258 }
 0x3dc   : > { %v8019_v36 = vld [vmem:[%s9415_s6 + $0x96c] sm:$0xf0]  ;;  %vm5408_vm5 = vweird.f32 %v10208_v61  ;;  %v5482_v46 = vperm.slane %v10186_v24, 1  ;;  %v7959_v24 = vld [vmem:[%s9415_s6 + $0x794] sm:$0xf] }
 0x3dd   : > { %v7124_v16 = vld [vmem:[%s9415_s6 + $0xb50] sm:$0xf]  ;;  %v6869_v47 = vor.u32 %v8019_v36, %v6868_v7  ;;  %4883 = vmatpush.bf16.msrb.mxu3 %v7669_v17  ;;  %v4619_v17 = vadd.f32 %v4618_v14, %v4606_v19  ;;  %v7903_v14 = vld [vmem:[%s9415_s6 + $0x5d4] sm:$0xf]  ;;  %vm5409_vm7 = vmor %vm5407_vm6, %vm5408_vm5 }
 0x3de   : > { %v8083_v12 = vld [vmem:[%s9415_s6 + $0xb6c] sm:$0xf0] }
 0x3df   : > { %v7380_v37 = vld [vmem:[%s9415_s6 + $0xd50] sm:$0xf]  ;;  %v7125_v50 = vor.u32 %v8083_v12, %v7124_v16  ;;  %4845 = vmatpush.bf16.msrb.mxu0 %v6869_v47  ;;  %v4631_v12 = vpop.f32.mrf.mxu3 }
 0x3e0   : > { %v8147_v15 = vld [vmem:[%s9415_s6 + $0xd6c] sm:$0xf0] }
 0x3e1   : > { %v7636_v42 = vld [vmem:[%s9415_s6 + $0xf50] sm:$0xf]  ;;  %v7381_v51 = vor.u32 %v8147_v15, %v7380_v37  ;;  %4858 = vmatpush.bf16.msrb.mxu1 %v7125_v50 }
 0x3e2   : > { %v8211_v44 = vld [vmem:[%s9415_s6 + $0xf6c] sm:$0xf0] }
 0x3e3   : > { %v10149_v45 = vld.sshfl [vmem:[#allocation1 + $0x18] sm:$0xff pattern:$0x73625140]  ;;  %v7637_v56 = vor.u32 %v8211_v44, %v7636_v42  ;;  %4871 = vmatpush.bf16.msrb.mxu2 %v7381_v51  ;;  %v10206_v44 = vadd.f32 %v4631_v12, %v4619_v17 }
 0x3e4   : > { %4838 = vmatmul.bf16.vlgmr.msra.gmra.mxu3 %v10149_v45  ;;  %v6836_v43 = vld [vmem:[%s9415_s6 + $0x910] sm:$0xf]  ;;  %v7967_v17 = vld [vmem:[%s9415_s6 + $0x7d4] sm:$0xf] }
 0x3e5   : > { %v8011_v54 = vld [vmem:[%s9415_s6 + $0x92c] sm:$0xf0]  ;;  %4884 = vmatpush.bf16.msrb.mxu3 %v7637_v56  ;;  %v5402_v56 = vmul.f32 %v10208_v61, %v10175_v1  ;;  %v6678_v12 = vld [vmem:[%s9415_s6 + $0x7f0] sm:$0xf0] }
 0x3e6   : > { %v7092_v55 = vld [vmem:[%s9415_s6 + $0xb10] sm:$0xf]  ;;  %v6837_v63 = vor.u32 %v8011_v54, %v6836_v43  ;;  %v4607_v54 = vpop.f32.mrf.mxu1  ;;  %v7831_v1 = vld [vmem:[%s9415_s6 + $0x394] sm:$0xf] }
 0x3e7   : > { %v8075_v57 = vld [vmem:[%s9415_s6 + $0xb2c] sm:$0xf0]  ;;  %v6134_v54 = vld [vmem:[%s9415_s6 + $0x3b0] sm:$0xf0] }
 0x3e8   : > { %v7348_v58 = vld [vmem:[%s9415_s6 + $0xd10] sm:$0xf]  ;;  %v7093_v2 = vor.u32 %v8075_v57, %v7092_v55  ;;  %4846 = vmatpush.bf16.msrb.mxu0 %v6837_v63  ;;  %v5400_v55 = vsel %vm10201_vm4, %v10104_v53, %v5396_v32  ;;  %v5403_v63 = vmul.f32 %v10208_v61, %v5402_v56  ;;  %v6422_v32 = vld [vmem:[%s9415_s6 + $0x5f0] sm:$0xf0] }
 0x3e9   : > { %v8139_v59 = vld [vmem:[%s9415_s6 + $0xd2c] sm:$0xf0]  ;;  %v6390_v56 = vld [vmem:[%s9415_s6 + $0x5b0] sm:$0xf0] }
 0x3ea   : > { %v7604_v11 = vld [vmem:[%s9415_s6 + $0xf10] sm:$0xf]  ;;  %v7349_v3 = vor.u32 %v8139_v59, %v7348_v58  ;;  %4859 = vmatpush.bf16.msrb.mxu1 %v7093_v2 }
 0x3eb   : > { %v8203_v23 = vld [vmem:[%s9415_s6 + $0xf2c] sm:$0xf0] }
 0x3ec   : > { %v6804_v0 = vld [vmem:[%s9415_s6 + $0x8d0] sm:$0xf]  ;;  %v7605_v6 = vor.u32 %v8203_v23, %v7604_v11  ;;  %4872 = vmatpush.bf16.msrb.mxu2 %v7349_v3  ;;  %v5375_v11 = vsub.f32 %v9914_v34, %v10027_v30 }
 0x3ed   : > { %v8003_v4 = vld [vmem:[%s9415_s6 + $0x8ec] sm:$0xf0] }
 0x3ee   : > { %v7060_v38 = vld [vmem:[%s9415_s6 + $0xad0] sm:$0xf]  ;;  %v6805_v25 = vor.u32 %v8003_v4, %v6804_v0  ;;  %4885 = vmatpush.bf16.msrb.mxu3 %v7605_v6  ;;  %v5471_v4 = vmul.f32 %v5400_v55, %v5375_v11  ;;  %v7895_v55 = vld [vmem:[%s9415_s6 + $0x594] sm:$0xf] }
 0x3ef   : > { %v8067_v8 = vld [vmem:[%s9415_s6 + $0xaec] sm:$0xf0]  ;;  %v6393_v11 = vor.u32 %v7895_v55, %v6390_v56  ;;  %v7735_v56 = vld [vmem:[%s9415_s6 + $0x94] sm:$0xf] }
 0x3f0   : > { %v7316_v9 = vld [vmem:[%s9415_s6 + $0xcd0] sm:$0xf]  ;;  %v7061_v28 = vor.u32 %v8067_v8, %v7060_v38  ;;  %4847 = vmatpush.bf16.msrb.mxu0 %v6805_v25  ;;  %v4620_v8 = vpop.f32.mrf.mxu2  ;;  %v4633_v25 = vpop.f32.mrf.mxu3 }
 0x3f1   : > { %v8131_v18 = vld [vmem:[%s9415_s6 + $0xcec] sm:$0xf0]  ;;  %v5814_v25 = vld [vmem:[%s9415_s6 + $0x130] sm:$0xf0] }
 0x3f2   : > { %v7572_v21 = vld [vmem:[%s9415_s6 + $0xed0] sm:$0xf]  ;;  %v7317_v26 = vor.u32 %v8131_v18, %v7316_v9  ;;  %4860 = vmatpush.bf16.msrb.mxu1 %v7061_v28  ;;  %v10240_v9 = vld [vmem:[%s10225_s18] sm:$0xff]  ;;  %v5404_v18 = vmul.f32 0.5, %v5403_v63  ;;  %v5910_v28 = vld [vmem:[%s9415_s6 + $0x1f0] sm:$0xf0] }
 0x3f3   : > { %v8195_v22 = vld [vmem:[%s9415_s6 + $0xeec] sm:$0xf0]  ;;  %v10273_v63 = vld.sshfl [vmem:[#allocation1 + $0x30] sm:$0xff pattern:$0x73625140] }
 0x3f4   : > { %v6772_v27 = vld [vmem:[%s9415_s6 + $0x890] sm:$0xf]  ;;  %v7573_v35 = vor.u32 %v8195_v22, %v7572_v21  ;;  %4873 = vmatpush.bf16.msrb.mxu2 %v7317_v26  ;;  %v7775_v22 = vld [vmem:[%s9415_s6 + $0x1d4] sm:$0xf] }
 0x3f5   : > { %v7995_v31 = vld [vmem:[%s9415_s6 + $0x8ac] sm:$0xf0]  ;;  %v7839_v26 = vld [vmem:[%s9415_s6 + $0x3d4] sm:$0xf]  ;;  %v5913_v40 = vor.u32 %v7775_v22, %v5910_v28 }
 0x3f6   : > { %v7028_v13 = vld [vmem:[%s9415_s6 + $0xa90] sm:$0xf]  ;;  %v6773_v42 = vor.u32 %v7995_v31, %v6772_v27  ;;  %4886 = vmatpush.bf16.msrb.mxu3 %v7573_v35  ;;  %v6166_v27 = vld [vmem:[%s9415_s6 + $0x3f0] sm:$0xf0]  ;;  %v5405_v31 = vsub.f32 1.5, %v5404_v18  ;;  %v5497_v35 = vmul.f32 %v5481_v41, %v5471_v4 }
 0x3f7   : > { %v8059_v7 = vld [vmem:[%s9415_s6 + $0xaac] sm:$0xf0]  ;;  %v7767_v41 = vld [vmem:[%s9415_s6 + $0x194] sm:$0xf] }
 0x3f8   : > { %v7284_v36 = vld [vmem:[%s9415_s6 + $0xc90] sm:$0xf]  ;;  %v7029_v47 = vor.u32 %v8059_v7, %v7028_v13  ;;  %4848 = vmatpush.bf16.msrb.mxu0 %v6773_v42  ;;  %v5507_v7 = vperm.slane %v10240_v9, 0  ;;  %v5376_v42 = vsub.f32 %v10079_v10, %v10130_v29  ;;  %v5508_v29 = vperm.slane %v10240_v9, 1  ;;  %v7751_v9 = vld [vmem:[%s9415_s6 + $0x114] sm:$0xf]  ;;  %v4670_v55 = vpop.f32.mrf.mxu2 }
 0x3f9   : > { %v8123_v16 = vld [vmem:[%s9415_s6 + $0xcac] sm:$0xf0]  ;;  %v7815_v28 = vld [vmem:[%s9415_s6 + $0x314] sm:$0xf] }
 0x3fa   : > { %v7540_v37 = vld [vmem:[%s9415_s6 + $0xe90] sm:$0xf]  ;;  %v7285_v49 = vor.u32 %v8123_v16, %v7284_v36  ;;  %4861 = vmatpush.bf16.msrb.mxu1 %v7029_v47  ;;  %v6169_v47 = vor.u32 %v7839_v26, %v6166_v27  ;;  %v6070_v27 = vld [vmem:[%s9415_s6 + $0x330] sm:$0xf0] }
 0x3fb   : > { %v8187_v15 = vld [vmem:[%s9415_s6 + $0xeac] sm:$0xf0] }
 0x3fc   : > { %v6740_v50 = vld [vmem:[%s9415_s6 + $0x850] sm:$0xf]  ;;  %v7541_v57 = vor.u32 %v8187_v15, %v7540_v37  ;;  %4874 = vmatpush.bf16.msrb.mxu2 %v7285_v49  ;;  %v5406_v37 = vmul.f32 %v10208_v61, %v5405_v31  ;;  %v6425_v49 = vor.u32 %v7903_v14, %v6422_v32  ;;  %v7879_v31 = vld [vmem:[%s9415_s6 + $0x514] sm:$0xf] }
 0x3fd   : > { %v7987_v51 = vld [vmem:[%s9415_s6 + $0x86c] sm:$0xf0]  ;;  %v7943_v32 = vld [vmem:[%s9415_s6 + $0x714] sm:$0xf] }
 0x3fe   : > { %v6996_v43 = vld [vmem:[%s9415_s6 + $0xa50] sm:$0xf]  ;;  %v6741_v0 = vor.u32 %v7987_v51, %v6740_v50  ;;  %4887 = vmatpush.bf16.msrb.mxu3 %v7541_v57  ;;  %v5878_v50 = vld [vmem:[%s9415_s6 + $0x1b0] sm:$0xf0]  ;;  %v5410_v51 = vsel %vm5409_vm7, %v10208_v61, %v5406_v37 }
 0x3ff   : > { %v8051_v58 = vld [vmem:[%s9415_s6 + $0xa6c] sm:$0xf0]  ;;  %v5472_v10 = vmul.f32 %v5410_v51, %v5376_v42  ;;  %v6646_v57 = vld [vmem:[%s9415_s6 + $0x7b0] sm:$0xf0]  ;;  %v5881_v61 = vor.u32 %v7767_v41, %v5878_v50 }
 0x400   : > { %v7252_v59 = vld [vmem:[%s9415_s6 + $0xc50] sm:$0xf]  ;;  %v6997_v34 = vor.u32 %v8051_v58, %v6996_v43  ;;  %4849 = vmatpush.bf16.msrb.mxu0 %v6741_v0  ;;  %v6681_v43 = vor.u32 %v7967_v17, %v6678_v12  ;;  %v5523_v58 = vadd.f32 %v5507_v7, %v5497_v35  ;;  %v6649_v0 = vor.u32 %v7959_v24, %v6646_v57  ;;  %v6582_v35 = vld [vmem:[%s9415_s6 + $0x730] sm:$0xf0]  ;;  %v4657_v12 = vpop.f32.mrf.mxu1  ;;  %v4683_v57 = vpop.f32.mrf.mxu3 }
 0x401   : > { %v8115_v60 = vld [vmem:[%s9415_s6 + $0xc6c] sm:$0xf0]  ;;  %v5817_v7 = vor.u32 %v7751_v9, %v5814_v25  ;;  %v7743_v37 = vld [vmem:[%s9415_s6 + $0xd4] sm:$0xf]  ;;  %v6585_v41 = vor.u32 %v7943_v32, %v6582_v35  ;;  %v4672_v35 = vpop.f32.mrf.mxu2 }
 0x402   : > { %v7508_v53 = vld [vmem:[%s9415_s6 + $0xe50] sm:$0xf]  ;;  %v7253_v30 = vor.u32 %v8115_v60, %v7252_v59  ;;  %4862 = vmatpush.bf16.msrb.mxu1 %v6997_v34  ;;  %v5498_v59 = vmul.f32 %v5482_v46, %v5472_v10  ;;  %v6137_v60 = vor.u32 %v7831_v1, %v6134_v54  ;;  %v10279_v34 = vld.sshfl [vmem:[#allocation1 + $0x20] sm:$0xff pattern:$0x73625140]  ;;  %v5531_v18 = vmax.f32 %v5523_v58, 0.0 }
 0x403   : > { %v8179_v23 = vld [vmem:[%s9415_s6 + $0xe6c] sm:$0xf0]  ;;  %v6038_v42 = vld [vmem:[%s9415_s6 + $0x2f0] sm:$0xf0] }
 0x404   : > { %v6708_v62 = vld [vmem:[%s9415_s6 + $0x810] sm:$0xf]  ;;  %v7509_v19 = vor.u32 %v8179_v23, %v7508_v53  ;;  %4875 = vmatpush.bf16.msrb.mxu2 %v7253_v30  ;;  %v7759_v53 = vld [vmem:[%s9415_s6 + $0x154] sm:$0xf]  ;;  %v5524_v4 = vadd.f32 %v5508_v29, %v5498_v59 }
 0x405   : > { %v7979_v33 = vld [vmem:[%s9415_s6 + $0x82c] sm:$0xf0]  ;;  %v5846_v23 = vld [vmem:[%s9415_s6 + $0x170] sm:$0xf0] }
 0x406   : > { %v6964_v2 = vld [vmem:[%s9415_s6 + $0xa10] sm:$0xf]  ;;  %v6709_v13 = vor.u32 %v7979_v33, %v6708_v62  ;;  %4888 = vmatpush.bf16.msrb.mxu3 %v7509_v19  ;;  %v7823_v62 = vld [vmem:[%s9415_s6 + $0x354] sm:$0xf]  ;;  %v5849_v8 = vor.u32 %v7759_v53, %v5846_v23  ;;  %v5532_v19 = vmax.f32 %v5524_v4, 0.0 }
 0x407   : > { %v8043_v3 = vld [vmem:[%s9415_s6 + $0xa2c] sm:$0xf0]  ;;  %v6102_v33 = vld [vmem:[%s9415_s6 + $0x370] sm:$0xf0] }
 0x408   : > { %v7220_v38 = vld [vmem:[%s9415_s6 + $0xc10] sm:$0xf]  ;;  %v6965_v36 = vor.u32 %v8043_v3, %v6964_v2  ;;  %4850 = vmatpush.bf16.msrb.mxu0 %v6709_v13  ;;  %v7887_v2 = vld [vmem:[%s9415_s6 + $0x554] sm:$0xf]  ;;  %v10296_v14 = vpack.c.bf16 %v5532_v19, %v5531_v18  ;;  %v4659_v4 = vpop.f32.mrf.mxu1 }
 0x409   : > { %v8107_v5 = vld [vmem:[%s9415_s6 + $0xc2c] sm:$0xf0]  ;;  %v6358_v3 = vld [vmem:[%s9415_s6 + $0x570] sm:$0xf0] }
 0x40a   : > { %v7476_v6 = vld [vmem:[%s9415_s6 + $0xe10] sm:$0xf]  ;;  %v7221_v16 = vor.u32 %v8107_v5, %v7220_v38  ;;  %4863 = vmatpush.bf16.msrb.mxu1 %v6965_v36  ;;  %v7951_v38 = vld [vmem:[%s9415_s6 + $0x754] sm:$0xf]  ;;  %v6361_v22 = vor.u32 %v7887_v2, %v6358_v3  ;;  %v4644_v36 = vpop.f32.mrf.mxu0 }
 0x40b   : > { %v8171_v21 = vld [vmem:[%s9415_s6 + $0xe2c] sm:$0xf0]  ;;  %4851 = vmatmul.bf16.vlgmr.msrb.gmra.mxu0 %v10279_v34  ;;  %v6614_v5 = vld [vmem:[%s9415_s6 + $0x770] sm:$0xf0]  ;;  %v4645_v51 = vadd.f32 %v4644_v36, %v10206_v44 }
 0x40c   : > { %v7477_v15 = vor.u32 %v8171_v21, %v7476_v6  ;;  %4876 = vmatpush.bf16.msrb.mxu2 %v7221_v16  ;;  %4895 = vmatpush.bf16.msra.mxu0 %v5913_v40  ;;  %v10282_v30 = vld.sshfl [vmem:[#allocation1 + $0x38] sm:$0xff pattern:$0x73625140]  ;;  %v10287_v6 = vld.sshfl [vmem:[#allocation1 + $0x28] sm:$0xff pattern:$0x73625140]  ;;  %v6105_v21 = vor.u32 %v7823_v62, %v6102_v33  ;;  %v6617_v26 = vor.u32 %v7951_v38, %v6614_v5 }
 0x40d   : > { %4864 = vmatmul.bf16.vlgmr.msrb.gmra.mxu1 %v10287_v6  ;;  %v6326_v13 = vld [vmem:[%s9415_s6 + $0x530] sm:$0xf0]  ;;  %v6073_v16 = vor.u32 %v7815_v28, %v6070_v27  ;;  %v4658_v23 = vadd.f32 %v4657_v12, %v4645_v51  ;;  %v4685_v12 = vpop.f32.mrf.mxu3 }
 0x40e   : > { %4889 = vmatpush.bf16.msrb.mxu3 %v7477_v15  ;;  %4908 = vmatpush.bf16.msra.mxu1 %v6169_v47  ;;  %v6329_v17 = vor.u32 %v7879_v31, %v6326_v13  ;;  %v5782_v15 = vld [vmem:[%s9415_s6 + $0xf0] sm:$0xf0] }
 0x40f   : > { %4877 = vmatmul.bf16.vlgmr.msrb.gmra.mxu2 %v10273_v63  ;;  %v7807_v40 = vld [vmem:[%s9415_s6 + $0x2d4] sm:$0xf]  ;;  %v5785_v1 = vor.u32 %v7743_v37, %v5782_v15  ;;  %v4671_v28 = vadd.f32 %v4670_v55, %v4658_v23 }
 0x410   : > { %4921 = vmatpush.bf16.msra.mxu2 %v6425_v49  ;;  %4896 = vmatpush.bf16.msra.mxu0 %v5881_v61  ;;  %v7871_v46 = vld [vmem:[%s9415_s6 + $0x4d4] sm:$0xf] }
 0x411   : > { %4890 = vmatmul.bf16.vlgmr.msrb.gmra.mxu3 %v10282_v30  ;;  %v6294_v47 = vld [vmem:[%s9415_s6 + $0x4f0] sm:$0xf0] }
 0x412   : > { %4934 = vmatpush.bf16.msra.mxu3 %v6681_v43  ;;  %4909 = vmatpush.bf16.msra.mxu1 %v6137_v60  ;;  %v7935_v49 = vld [vmem:[%s9415_s6 + $0x6d4] sm:$0xf]  ;;  %v6041_v43 = vor.u32 %v7807_v40, %v6038_v42  ;;  %v6297_v54 = vor.u32 %v7871_v46, %v6294_v47  ;;  %v4646_v53 = vpop.f32.mrf.mxu0 }
 0x413   : > { %v6550_v50 = vld [vmem:[%s9415_s6 + $0x6f0] sm:$0xf0] }
 0x414   : > { %4922 = vmatpush.bf16.msra.mxu2 %v6393_v11  ;;  %4897 = vmatpush.bf16.msra.mxu0 %v5849_v8  ;;  %v5750_v10 = vld [vmem:[%s9415_s6 + $0xb0] sm:$0xf0]  ;;  %v6553_v24 = vor.u32 %v7935_v49, %v6550_v50  ;;  %v10339_v49 = vadd.f32 %v4683_v57, %v4671_v28 }
 0x415   : > { %v7799_v29 = vld [vmem:[%s9415_s6 + $0x294] sm:$0xf]  ;;  %v5753_v44 = vor.u32 %v7735_v56, %v5750_v10 }
 0x416   : > { %4935 = vmatpush.bf16.msra.mxu3 %v6649_v0  ;;  %4910 = vmatpush.bf16.msra.mxu1 %v6105_v21  ;;  %v6006_v58 = vld [vmem:[%s9415_s6 + $0x2b0] sm:$0xf0] }
 0x417   : > { %v7863_v61 = vld [vmem:[%s9415_s6 + $0x494] sm:$0xf]  ;;  %v6009_v62 = vor.u32 %v7799_v29, %v6006_v58 }
 0x418   : > { %4923 = vmatpush.bf16.msra.mxu2 %v6361_v22  ;;  %4898 = vmatpush.bf16.msra.mxu0 %v5817_v7  ;;  %v6262_v59 = vld [vmem:[%s9415_s6 + $0x4b0] sm:$0xf0] }
 0x419   : > { %v7927_v60 = vld [vmem:[%s9415_s6 + $0x694] sm:$0xf]  ;;  %v6265_v0 = vor.u32 %v7863_v61, %v6262_v59 }
 0x41a   : > { %4936 = vmatpush.bf16.msra.mxu3 %v6617_v26  ;;  %4911 = vmatpush.bf16.msra.mxu1 %v6073_v16  ;;  %v6518_v11 = vld [vmem:[%s9415_s6 + $0x6b0] sm:$0xf0]  ;;  %v10377_v12 = vpop.f32.mrf.mxu0 }
 0x41b   : > { %v7727_v33 = vld [vmem:[%s9415_s6 + $0x54] sm:$0xf]  ;;  %v6521_v38 = vor.u32 %v7927_v60, %v6518_v11  ;;  %v5222_v11 = vsel %vm5207_vm0, %v10339_v49, 0.0 }
 0x41c   : > { %4924 = vmatpush.bf16.msra.mxu2 %v6329_v17  ;;  %4899 = vmatpush.bf16.msra.mxu0 %v5785_v1  ;;  %v5718_v2 = vld [vmem:[%s9415_s6 + $0x70] sm:$0xf0] }
 0x41d   : > { %v7791_v3 = vld [vmem:[%s9415_s6 + $0x254] sm:$0xf]  ;;  %v5721_v21 = vor.u32 %v7727_v33, %v5718_v2 }
 0x41e   : > { %4937 = vmatpush.bf16.msra.mxu3 %v6585_v41  ;;  %4912 = vmatpush.bf16.msra.mxu1 %v6041_v43  ;;  %v5974_v5 = vld [vmem:[%s9415_s6 + $0x270] sm:$0xf0] }
 0x41f   : > { %v7855_v8 = vld [vmem:[%s9415_s6 + $0x454] sm:$0xf]  ;;  %v5977_v26 = vor.u32 %v7791_v3, %v5974_v5  ;;  %v5223_v5 = vrot.slane %v5222_v11, 4 }
 0x420   : > { %4925 = vmatpush.bf16.msra.mxu2 %v6297_v54  ;;  %v6230_v9 = vld [vmem:[%s9415_s6 + $0x470] sm:$0xf0]  ;;  %4900 = vmatpush.bf16.msra.mxu0 %v5753_v44  ;;  %v5281_v44 = vmul.f32 %v10339_v49, %v10339_v49 }
 0x421   : > { %v7919_v18 = vld [vmem:[%s9415_s6 + $0x654] sm:$0xf]  ;;  %v6233_v27 = vor.u32 %v7855_v8, %v6230_v9 }
 0x422   : > { %4938 = vmatpush.bf16.msra.mxu3 %v6553_v24  ;;  %v6486_v19 = vld [vmem:[%s9415_s6 + $0x670] sm:$0xf0]  ;;  %4913 = vmatpush.bf16.msra.mxu1 %v6009_v62 }
 0x423   : > { %v7719_v22 = vld [vmem:[%s9415_s6 + $0x14] sm:$0xf]  ;;  %v6489_v7 = vor.u32 %v7919_v18, %v6486_v19  ;;  %v5301_v19 = vsel %vm5207_vm0, %v5281_v44, 0.0 }
 0x424   : > { %v5686_v25 = vld [vmem:[%s9415_s6 + $0x30] sm:$0xf0]  ;;  %4926 = vmatpush.bf16.msra.mxu2 %v6265_v0  ;;  %4901 = vmatpush.bf16.msra.mxu0 %v5721_v21 }
 0x425   : > { %v7783_v31 = vld [vmem:[%s9415_s6 + $0x214] sm:$0xf]  ;;  %v5689_v41 = vor.u32 %v7719_v22, %v5686_v25 }
 0x426   : > { %v5942_v13 = vld [vmem:[%s9415_s6 + $0x230] sm:$0xf0]  ;;  %4939 = vmatpush.bf16.msra.mxu3 %v6521_v38  ;;  %4914 = vmatpush.bf16.msra.mxu1 %v5977_v26 }
 0x427   : > { %v7847_v32 = vld [vmem:[%s9415_s6 + $0x414] sm:$0xf]  ;;  %v5945_v50 = vor.u32 %v7783_v31, %v5942_v13 }
 0x428   : > { %v6198_v36 = vld [vmem:[%s9415_s6 + $0x430] sm:$0xf0]  ;;  %4927 = vmatpush.bf16.msra.mxu2 %v6233_v27  ;;  %4902 = vmatpush.bf16.msra.mxu0 %v5689_v41 }
 0x429   : > { %v7911_v16 = vld [vmem:[%s9415_s6 + $0x614] sm:$0xf]  ;;  %v6201_v1 = vor.u32 %v7847_v32, %v6198_v36 }
 0x42a   : > { %v6454_v17 = vld [vmem:[%s9415_s6 + $0x630] sm:$0xf0]  ;;  %4940 = vmatpush.bf16.msra.mxu3 %v6489_v7  ;;  %4915 = vmatpush.bf16.msra.mxu1 %v5945_v50 }
 0x42b   : > { %v8031_v37 = vld [vmem:[%s9415_s6 + $0x9d4] sm:$0xf]  ;;  %v6457_v54 = vor.u32 %v7911_v16, %v6454_v17  ;;  %4903 = vmatmul.bf16.vlgmr.msra.gmra.mxu0 %v10146_v20  ;;  %v5224_v20 = vadd.f32 %v5223_v5, %v5222_v11 }
 0x42c   : > { %v6934_v15 = vld [vmem:[%s9415_s6 + $0x9f0] sm:$0xf0]  ;;  %4928 = vmatpush.bf16.msra.mxu2 %v6201_v1 }
 0x42d   : > { %v8095_v40 = vld [vmem:[%s9415_s6 + $0xbd4] sm:$0xf]  ;;  %v6937_v55 = vor.u32 %v8031_v37, %v6934_v15  ;;  %4916 = vmatmul.bf16.vlgmr.msra.gmra.mxu1 %v10157_v48 }
 0x42e   : > { %v7190_v42 = vld [vmem:[%s9415_s6 + $0xbf0] sm:$0xf0]  ;;  %4941 = vmatpush.bf16.msra.mxu3 %v6457_v54 }
 0x42f   : > { %v8159_v46 = vld [vmem:[%s9415_s6 + $0xdd4] sm:$0xf]  ;;  %v7193_v56 = vor.u32 %v8095_v40, %v7190_v42  ;;  %4947 = vmatpush.bf16.msrb.mxu0 %v6937_v55  ;;  %4929 = vmatmul.bf16.vlgmr.msra.gmra.mxu2 %v10138_v39 }
 0x430   : > { %v7446_v47 = vld [vmem:[%s9415_s6 + $0xdf0] sm:$0xf0] }
 0x431   : > { %v8223_v51 = vld [vmem:[%s9415_s6 + $0xfd4] sm:$0xf]  ;;  %v7449_v10 = vor.u32 %v8159_v46, %v7446_v47  ;;  %4960 = vmatpush.bf16.msrb.mxu1 %v7193_v56  ;;  %4942 = vmatmul.bf16.vlgmr.msra.gmra.mxu3 %v10149_v45  ;;  %v5302_v45 = vrot.slane %v5301_v19, 4  ;;  %v10382_v46 = vpop.f32.mrf.mxu1  ;;  %v5225_v47 = vrot.slane %v5224_v20, 2 }
 0x432   : > { %v7702_v43 = vld [vmem:[%s9415_s6 + $0xff0] sm:$0xf0] }
 0x433   : > { %v8023_v29 = vld [vmem:[%s9415_s6 + $0x994] sm:$0xf]  ;;  %v7705_v58 = vor.u32 %v8223_v51, %v7702_v43  ;;  %4973 = vmatpush.bf16.msrb.mxu2 %v7449_v10  ;;  %v5303_v50 = vadd.f32 %v5302_v45, %v5301_v19 }
 0x434   : > { %v6902_v24 = vld [vmem:[%s9415_s6 + $0x9b0] sm:$0xf0] }
 0x435   : > { %v8087_v57 = vld [vmem:[%s9415_s6 + $0xb94] sm:$0xf]  ;;  %v6905_v62 = vor.u32 %v8023_v29, %v6902_v24  ;;  %4986 = vmatpush.bf16.msrb.mxu3 %v7705_v58  ;;  %v5304_v11 = vrot.slane %v5303_v50, 2 }
 0x436   : > { %v7158_v61 = vld [vmem:[%s9415_s6 + $0xbb0] sm:$0xf0] }
 0x437   : > { %v8151_v59 = vld [vmem:[%s9415_s6 + $0xd94] sm:$0xf]  ;;  %v7161_v33 = vor.u32 %v8087_v57, %v7158_v61  ;;  %4948 = vmatpush.bf16.msrb.mxu0 %v6905_v62  ;;  %v10396_v62 = vpop.f32.mrf.mxu3 }
 0x438   : > { %v7414_v60 = vld [vmem:[%s9415_s6 + $0xdb0] sm:$0xf0] }
 0x439   : > { %v8215_v53 = vld [vmem:[%s9415_s6 + $0xf94] sm:$0xf]  ;;  %v7417_v2 = vor.u32 %v8151_v59, %v7414_v60  ;;  %4961 = vmatpush.bf16.msrb.mxu1 %v7161_v33  ;;  %v10392_v59 = vpop.f32.mrf.mxu2  ;;  %v5226_v60 = vadd.f32 %v5225_v47, %v5224_v20  ;;  %v4711_v19 = vpop.f32.mrf.mxu1  ;;  %v5916_v47 = vld [vmem:[%s9415_s6 + $0x1d8] sm:$0xf] }
 0x43a   : > { %v7670_v23 = vld [vmem:[%s9415_s6 + $0xfb0] sm:$0xf0] }
 0x43b   : > { %v8015_v0 = vld [vmem:[%s9415_s6 + $0x954] sm:$0xf]  ;;  %v7673_v8 = vor.u32 %v8215_v53, %v7670_v23  ;;  %4974 = vmatpush.bf16.msrb.mxu2 %v7417_v2 }
 0x43c   : > { %v6870_v3 = vld [vmem:[%s9415_s6 + $0x970] sm:$0xf0] }
 0x43d   : > { %v8079_v4 = vld [vmem:[%s9415_s6 + $0xb54] sm:$0xf]  ;;  %v6873_v25 = vor.u32 %v8015_v0, %v6870_v3  ;;  %4987 = vmatpush.bf16.msrb.mxu3 %v7673_v8 }
 0x43e   : > { %v7126_v38 = vld [vmem:[%s9415_s6 + $0xb70] sm:$0xf0] }
 0x43f   : > { %v8143_v9 = vld [vmem:[%s9415_s6 + $0xd54] sm:$0xf]  ;;  %v7129_v39 = vor.u32 %v8079_v4, %v7126_v38  ;;  %4949 = vmatpush.bf16.msrb.mxu0 %v6873_v25  ;;  %v4698_v4 = vpop.f32.mrf.mxu0 }
 0x440   : > { %v7382_v18 = vld [vmem:[%s9415_s6 + $0xd70] sm:$0xf0]  ;;  %v6396_v4 = vld [vmem:[%s9415_s6 + $0x598] sm:$0xf] }
 0x441   : > { %v8207_v21 = vld [vmem:[%s9415_s6 + $0xf54] sm:$0xf]  ;;  %v7385_v26 = vor.u32 %v8143_v9, %v7382_v18  ;;  %4962 = vmatpush.bf16.msrb.mxu1 %v7129_v39 }
 0x442   : > { %v7638_v22 = vld [vmem:[%s9415_s6 + $0xf70] sm:$0xf0] }
 0x443   : > { %v8007_v28 = vld [vmem:[%s9415_s6 + $0x914] sm:$0xf]  ;;  %v7641_v32 = vor.u32 %v8207_v21, %v7638_v22  ;;  %4975 = vmatpush.bf16.msrb.mxu2 %v7385_v26  ;;  %v5227_v21 = vrot.slane %v5226_v60, 1  ;;  %v5305_v22 = vadd.f32 %v5304_v11, %v5303_v50  ;;  %v7780_v50 = vld [vmem:[%s9415_s6 + $0x1f4] sm:$0xf0]  ;;  %v4710_v11 = vadd.f32 %v10382_v46, %v10377_v12 }
 0x444   : > { %v6838_v27 = vld [vmem:[%s9415_s6 + $0x930] sm:$0xf0] }
 0x445   : > { %v8071_v31 = vld [vmem:[%s9415_s6 + $0xb14] sm:$0xf]  ;;  %v6841_v48 = vor.u32 %v8007_v28, %v6838_v27  ;;  %4988 = vmatpush.bf16.msrb.mxu3 %v7641_v32 }
 0x446   : > { %v7094_v13 = vld [vmem:[%s9415_s6 + $0xb30] sm:$0xf0] }
 0x447   : > { %v8135_v35 = vld [vmem:[%s9415_s6 + $0xd14] sm:$0xf]  ;;  %v7097_v37 = vor.u32 %v8071_v31, %v7094_v13  ;;  %4950 = vmatpush.bf16.msrb.mxu0 %v6841_v48  ;;  %v4724_v48 = vpop.f32.mrf.mxu2 }
 0x448   : > { %v7350_v7 = vld [vmem:[%s9415_s6 + $0xd30] sm:$0xf0]  ;;  %v6332_v48 = vld [vmem:[%s9415_s6 + $0x518] sm:$0xf] }
 0x449   : > { %v8199_v36 = vld [vmem:[%s9415_s6 + $0xf14] sm:$0xf]  ;;  %v7353_v15 = vor.u32 %v8135_v35, %v7350_v7  ;;  %4963 = vmatpush.bf16.msrb.mxu1 %v7097_v37  ;;  %v5306_v37 = vrot.slane %v5305_v22, 1 }
 0x44a   : > { %v7606_v16 = vld [vmem:[%s9415_s6 + $0xf30] sm:$0xf0] }
 0x44b   : > { %v7999_v17 = vld [vmem:[%s9415_s6 + $0x8d4] sm:$0xf]  ;;  %v7609_v1 = vor.u32 %v8199_v36, %v7606_v16  ;;  %4976 = vmatpush.bf16.msrb.mxu2 %v7353_v15 }
 0x44c   : > { %v6806_v40 = vld [vmem:[%s9415_s6 + $0x8f0] sm:$0xf0] }
 0x44d   : > { %v8063_v41 = vld [vmem:[%s9415_s6 + $0xad4] sm:$0xf]  ;;  %v6809_v56 = vor.u32 %v7999_v17, %v6806_v40  ;;  %4989 = vmatpush.bf16.msrb.mxu3 %v7609_v1  ;;  %v5228_v17 = vadd.f32 %v5227_v21, %v5226_v60  ;;  %v6172_v1 = vld [vmem:[%s9415_s6 + $0x3d8] sm:$0xf]  ;;  %v5917_v60 = vor.u32 %v7780_v50, %v5916_v47  ;;  %v4761_v50 = vpop.f32.mrf.mxu1 }
 0x44e   : > { %v7062_v42 = vld [vmem:[%s9415_s6 + $0xaf0] sm:$0xf0] }
 0x44f   : > { %v8127_v51 = vld [vmem:[%s9415_s6 + $0xcd4] sm:$0xf]  ;;  %v7065_v29 = vor.u32 %v8063_v41, %v7062_v42  ;;  %4951 = vmatpush.bf16.msrb.mxu0 %v6809_v56  ;;  %v4737_v42 = vpop.f32.mrf.mxu3 }
 0x450   : > { %v7318_v43 = vld [vmem:[%s9415_s6 + $0xcf0] sm:$0xf0] }
 0x451   : > { %v8191_v54 = vld [vmem:[%s9415_s6 + $0xed4] sm:$0xf]  ;;  %v7321_v24 = vor.u32 %v8127_v51, %v7318_v43  ;;  %4964 = vmatpush.bf16.msrb.mxu1 %v7065_v29  ;;  %v7844_v43 = vld [vmem:[%s9415_s6 + $0x3f4] sm:$0xf0] }
 0x452   : > { %v7574_v55 = vld [vmem:[%s9415_s6 + $0xef0] sm:$0xf0]  ;;  %v6684_v29 = vld [vmem:[%s9415_s6 + $0x7d8] sm:$0xf] }
 0x453   : > { %v7991_v10 = vld [vmem:[%s9415_s6 + $0x894] sm:$0xf]  ;;  %v7577_v44 = vor.u32 %v8191_v54, %v7574_v55  ;;  %4977 = vmatpush.bf16.msrb.mxu2 %v7321_v24  ;;  %v6428_v54 = vld [vmem:[%s9415_s6 + $0x5d8] sm:$0xf] }
 0x454   : > { %v6774_v57 = vld [vmem:[%s9415_s6 + $0x8b0] sm:$0xf0]  ;;  %v7908_v55 = vld [vmem:[%s9415_s6 + $0x5f4] sm:$0xf0] }
 0x455   : > { %v8055_v58 = vld [vmem:[%s9415_s6 + $0xa94] sm:$0xf]  ;;  %v6777_v2 = vor.u32 %v7991_v10, %v6774_v57  ;;  %4990 = vmatpush.bf16.msrb.mxu3 %v7577_v44  ;;  %v7972_v24 = vld [vmem:[%s9415_s6 + $0x7f4] sm:$0xf0]  ;;  %v10425_v57 = vmul.f32 %v10016_v52, %v5228_v17  ;;  %v6173_v44 = vor.u32 %v7844_v43, %v6172_v1 }
 0x456   : > { %v7030_v61 = vld [vmem:[%s9415_s6 + $0xab0] sm:$0xf0]  ;;  %v7884_v17 = vld [vmem:[%s9415_s6 + $0x534] sm:$0xf0] }
 0x457   : > { %v8119_v53 = vld [vmem:[%s9415_s6 + $0xc94] sm:$0xf]  ;;  %v7033_v38 = vor.u32 %v8055_v58, %v7030_v61  ;;  %4952 = vmatpush.bf16.msrb.mxu0 %v6777_v2  ;;  %v5307_v58 = vadd.f32 %v5306_v37, %v5305_v22  ;;  %v6685_v2 = vor.u32 %v7972_v24, %v6684_v29  ;;  %v5353_v12 = vmul.f32 %v10425_v57, %v10425_v57  ;;  %v5852_v22 = vld [vmem:[%s9415_s6 + $0x158] sm:$0xf] }
 0x458   : > { %v7286_v23 = vld [vmem:[%s9415_s6 + $0xcb0] sm:$0xf0]  ;;  %v7948_v37 = vld [vmem:[%s9415_s6 + $0x734] sm:$0xf0]  ;;  %v6333_v42 = vor.u32 %v7884_v17, %v6332_v48 }
 0x459   : > { %v8183_v0 = vld [vmem:[%s9415_s6 + $0xe94] sm:$0xf]  ;;  %v7289_v5 = vor.u32 %v8119_v53, %v7286_v23  ;;  %4965 = vmatpush.bf16.msrb.mxu1 %v7033_v38  ;;  %v6429_v53 = vor.u32 %v7908_v55, %v6428_v54  ;;  %v5884_v23 = vld [vmem:[%s9415_s6 + $0x198] sm:$0xf] }
 0x45a   : > { %v7542_v33 = vld [vmem:[%s9415_s6 + $0xeb0] sm:$0xf0]  ;;  %v7900_v38 = vld [vmem:[%s9415_s6 + $0x5b4] sm:$0xf0] }
 0x45b   : > { %v7983_v3 = vld [vmem:[%s9415_s6 + $0x854] sm:$0xf]  ;;  %v7545_v25 = vor.u32 %v8183_v0, %v7542_v33  ;;  %4978 = vmatpush.bf16.msrb.mxu2 %v7289_v5  ;;  %v7772_v0 = vld [vmem:[%s9415_s6 + $0x1b4] sm:$0xf0]  ;;  %v6397_v21 = vor.u32 %v7900_v38, %v6396_v4  ;;  %v4787_v4 = vpop.f32.mrf.mxu3 }
 0x45c   : > { %v6742_v8 = vld [vmem:[%s9415_s6 + $0x870] sm:$0xf0]  ;;  %v6140_v33 = vld [vmem:[%s9415_s6 + $0x398] sm:$0xf]  ;;  %v5885_v46 = vor.u32 %v7772_v0, %v5884_v23 }
 0x45d   : > { %v8047_v9 = vld [vmem:[%s9415_s6 + $0xa54] sm:$0xf]  ;;  %v6745_v31 = vor.u32 %v7983_v3, %v6742_v8  ;;  %4991 = vmatpush.bf16.msrb.mxu3 %v7545_v25  ;;  %v7836_v3 = vld [vmem:[%s9415_s6 + $0x3b4] sm:$0xf0] }
 0x45e   : > { %v6998_v18 = vld [vmem:[%s9415_s6 + $0xa70] sm:$0xf0]  ;;  %v6652_v5 = vld [vmem:[%s9415_s6 + $0x798] sm:$0xf]  ;;  %v6141_v19 = vor.u32 %v7836_v3, %v6140_v33 }
 0x45f   : > { %v8111_v28 = vld [vmem:[%s9415_s6 + $0xc54] sm:$0xf]  ;;  %v7001_v32 = vor.u32 %v8047_v9, %v6998_v18  ;;  %4953 = vmatpush.bf16.msrb.mxu0 %v6745_v31  ;;  %v7964_v8 = vld [vmem:[%s9415_s6 + $0x7b4] sm:$0xf0]  ;;  %v5345_v9 = vmul.f32 %v5307_v58, %v10016_v52  ;;  %v4723_v18 = vadd.f32 %v10392_v59, %v4710_v11 }
 0x460   : > { %v7254_v39 = vld [vmem:[%s9415_s6 + $0xc70] sm:$0xf0]  ;;  %v7764_v25 = vld [vmem:[%s9415_s6 + $0x174] sm:$0xf0] }
 0x461   : > { %v8175_v26 = vld [vmem:[%s9415_s6 + $0xe54] sm:$0xf]  ;;  %v7257_v35 = vor.u32 %v8111_v28, %v7254_v39  ;;  %4966 = vmatpush.bf16.msrb.mxu1 %v7001_v32  ;;  %v6108_v28 = vld [vmem:[%s9415_s6 + $0x358] sm:$0xf]  ;;  %v6653_v39 = vor.u32 %v7964_v8, %v6652_v5 }
 0x462   : > { %v7510_v27 = vld [vmem:[%s9415_s6 + $0xe70] sm:$0xf0]  ;;  %v7892_v31 = vld [vmem:[%s9415_s6 + $0x574] sm:$0xf0] }
 0x463   : > { %v7975_v13 = vld [vmem:[%s9415_s6 + $0x814] sm:$0xf]  ;;  %v7513_v15 = vor.u32 %v8175_v26, %v7510_v27  ;;  %4979 = vmatpush.bf16.msrb.mxu2 %v7257_v35  ;;  %v7828_v26 = vld [vmem:[%s9415_s6 + $0x374] sm:$0xf0] }
 0x464   : > { %v6710_v20 = vld [vmem:[%s9415_s6 + $0x830] sm:$0xf0]  ;;  %v6364_v27 = vld [vmem:[%s9415_s6 + $0x558] sm:$0xf]  ;;  %v6109_v32 = vor.u32 %v7828_v26, %v6108_v28 }
 0x465   : > { %v8039_v45 = vld [vmem:[%s9415_s6 + $0xa14] sm:$0xf]  ;;  %v6713_v51 = vor.u32 %v7975_v13, %v6710_v20  ;;  %4992 = vmatpush.bf16.msrb.mxu3 %v7513_v15  ;;  %v6620_v59 = vld [vmem:[%s9415_s6 + $0x758] sm:$0xf]  ;;  %v5361_v20 = vsub.f32 %v5345_v9, %v5353_v12 }
 0x466   : > { %v6966_v7 = vld [vmem:[%s9415_s6 + $0xa30] sm:$0xf0]  ;;  %v7956_v13 = vld [vmem:[%s9415_s6 + $0x774] sm:$0xf0] }
 0x467   : > { %v8103_v36 = vld [vmem:[%s9415_s6 + $0xc14] sm:$0xf]  ;;  %v6969_v56 = vor.u32 %v8039_v45, %v6966_v7  ;;  %4954 = vmatpush.bf16.msrb.mxu0 %v6713_v51  ;;  %v4736_v45 = vadd.f32 %v10396_v62, %v4723_v18  ;;  %v5820_v35 = vld [vmem:[%s9415_s6 + $0x118] sm:$0xf]  ;;  %v5369_v15 = vmax.f32 %v5361_v20, 0.0 }
 0x468   : > { %v7222_v16 = vld [vmem:[%s9415_s6 + $0xc30] sm:$0xf0]  ;;  %v6076_v7 = vld [vmem:[%s9415_s6 + $0x318] sm:$0xf] }
 0x469   : > { %v8167_v40 = vld [vmem:[%s9415_s6 + $0xe14] sm:$0xf]  ;;  %v7225_v10 = vor.u32 %v8103_v36, %v7222_v16  ;;  %4967 = vmatpush.bf16.msrb.mxu1 %v6969_v56  ;;  %v6621_v36 = vor.u32 %v7956_v13, %v6620_v59  ;;  %v7820_v16 = vld [vmem:[%s9415_s6 + $0x334] sm:$0xf0]  ;;  %v4763_v59 = vpop.f32.mrf.mxu1 }
 0x46a   : > { %v7478_v41 = vld [vmem:[%s9415_s6 + $0xe30] sm:$0xf0]  ;;  %4955 = vmatmul.bf16.vlgmr.msrb.gmra.mxu0 %v10279_v34  ;;  %v6365_v34 = vor.u32 %v7892_v31, %v6364_v27  ;;  %v5788_v1 = vld [vmem:[%s9415_s6 + $0xd8] sm:$0xf] }
 0x46b   : > { %v7481_v61 = vor.u32 %v8167_v40, %v7478_v41  ;;  %4980 = vmatpush.bf16.msrb.mxu2 %v7225_v10  ;;  %4999 = vmatpush.bf16.msra.mxu0 %v5917_v60  ;;  %v4748_v40 = vpop.f32.mrf.mxu0  ;;  %v6077_v41 = vor.u32 %v7820_v16, %v6076_v7  ;;  %v7748_v51 = vld [vmem:[%s9415_s6 + $0xf4] sm:$0xf0] }
 0x46c   : > { %4968 = vmatmul.bf16.vlgmr.msrb.gmra.mxu1 %v10287_v6  ;;  %v6588_v6 = vld [vmem:[%s9415_s6 + $0x718] sm:$0xf]  ;;  %v4749_v47 = vadd.f32 %v4748_v40, %v4736_v45  ;;  %v5789_v60 = vor.u32 %v7748_v51, %v5788_v1  ;;  %v4789_v51 = vpop.f32.mrf.mxu3 }
 0x46d   : > { %4993 = vmatpush.bf16.msrb.mxu3 %v7481_v61  ;;  %5012 = vmatpush.bf16.msra.mxu1 %v6173_v44  ;;  %v6044_v43 = vld [vmem:[%s9415_s6 + $0x2d8] sm:$0xf]  ;;  %v6589_v54 = vor.u32 %v7948_v37, %v6588_v6  ;;  %v10470_v61 = vadd.f32 1e-05, %v5369_v15 }
 0x46e   : > { %4981 = vmatmul.bf16.vlgmr.msrb.gmra.mxu2 %v10273_v63  ;;  %v5853_v63 = vor.u32 %v7764_v25, %v5852_v22  ;;  %v7812_v55 = vld [vmem:[%s9415_s6 + $0x2f4] sm:$0xf0]  ;;  %v4762_v29 = vadd.f32 %v4761_v50, %v4749_v47 }
 0x46f   : > { %5025 = vmatpush.bf16.msra.mxu2 %v6429_v53  ;;  %5000 = vmatpush.bf16.msra.mxu0 %v5885_v46  ;;  %v6300_v56 = vld [vmem:[%s9415_s6 + $0x4d8] sm:$0xf]  ;;  %v6045_v11 = vor.u32 %v7812_v55, %v6044_v43  ;;  %v4774_v53 = vpop.f32.mrf.mxu2  ;;  %8260 = vrsqrt.f32 %v10470_v61  ;;  %vm5417_vm9 = vweird.f32 %v10470_v61 }
 0x470   : > { %4994 = vmatmul.bf16.vlgmr.msrb.gmra.mxu3 %v10282_v30  ;;  %v7756_v30 = vld [vmem:[%s9415_s6 + $0x134] sm:$0xf0]  ;;  %v4775_v3 = vadd.f32 %v4774_v53, %v4762_v29 }
 0x471   : > { %5038 = vmatpush.bf16.msra.mxu3 %v6685_v2  ;;  %5013 = vmatpush.bf16.msra.mxu1 %v6141_v19  ;;  %v5821_v62 = vor.u32 %v7756_v30, %v5820_v35  ;;  %v7876_v10 = vld [vmem:[%s9415_s6 + $0x4f4] sm:$0xf0] }
 0x472   : > { %v6556_v24 = vld [vmem:[%s9415_s6 + $0x6d8] sm:$0xf]  ;;  %v6301_v44 = vor.u32 %v7876_v10, %v6300_v56  ;;  %v10480_v46 = vadd.f32 %v4787_v4, %v4775_v3 }
 0x473   : > { %5026 = vmatpush.bf16.msra.mxu2 %v6397_v21  ;;  %5001 = vmatpush.bf16.msra.mxu0 %v5853_v63  ;;  %v7940_v58 = vld [vmem:[%s9415_s6 + $0x6f4] sm:$0xf0]  ;;  %v4750_v25 = vpop.f32.mrf.mxu0 }
 0x474   : > { %v5756_v23 = vld [vmem:[%s9415_s6 + $0x98] sm:$0xf]  ;;  %v6557_v2 = vor.u32 %v7940_v58, %v6556_v24  ;;  %v5229_v13 = vsel %vm5207_vm0, %v10480_v46, 0.0  ;;  %v5282_v20 = vmul.f32 %v10480_v46, %v10480_v46 }
 0x475   : > { %5039 = vmatpush.bf16.msra.mxu3 %v6653_v39  ;;  %5014 = vmatpush.bf16.msra.mxu1 %v6109_v32  ;;  %v7740_v0 = vld [vmem:[%s9415_s6 + $0xb4] sm:$0xf0]  ;;  %v10505_v43 = vpop.eup %8260 }
 0x476   : > { %v6012_v33 = vld [vmem:[%s9415_s6 + $0x298] sm:$0xf]  ;;  %v5757_v18 = vor.u32 %v7740_v0, %v5756_v23  ;;  %v5308_v7 = vsel %vm5207_vm0, %v5282_v20, 0.0  ;;  %vm5418_vm8 = vweird.f32 %v10505_v43 }
 0x477   : > { %5027 = vmatpush.bf16.msra.mxu2 %v6365_v34  ;;  %5002 = vmatpush.bf16.msra.mxu0 %v5821_v62  ;;  %v7804_v38 = vld [vmem:[%s9415_s6 + $0x2b4] sm:$0xf0]  ;;  %v5230_v34 = vrot.slane %v5229_v13, 4  ;;  %v5309_v6 = vrot.slane %v5308_v7, 4  ;;  %vm10583_vm10 = vmor %vm5417_vm9, %vm5418_vm8 }
 0x478   : > { %v6268_v5 = vld [vmem:[%s9415_s6 + $0x498] sm:$0xf]  ;;  %v6013_v28 = vor.u32 %v7804_v38, %v6012_v33 }
 0x479   : > { %5040 = vmatpush.bf16.msra.mxu3 %v6621_v36  ;;  %5015 = vmatpush.bf16.msra.mxu1 %v6077_v41  ;;  %v7868_v8 = vld [vmem:[%s9415_s6 + $0x4b4] sm:$0xf0]  ;;  %v5231_v17 = vadd.f32 %v5230_v34, %v5229_v13  ;;  %v4776_v41 = vpop.f32.mrf.mxu2  ;;  %v5310_v55 = vadd.f32 %v5309_v6, %v5308_v7 }
 0x47a   : > { %v6524_v9 = vld [vmem:[%s9415_s6 + $0x698] sm:$0xf]  ;;  %v6269_v39 = vor.u32 %v7868_v8, %v6268_v5  ;;  %v10545_v41 = vld.sshfl [vmem:[#allocation1 + $0x18] sm:$0xff pattern:$0x73625140] }
 0x47b   : > { %5028 = vmatpush.bf16.msra.mxu2 %v6333_v42  ;;  %v7932_v12 = vld [vmem:[%s9415_s6 + $0x6b4] sm:$0xf0]  ;;  %5003 = vmatpush.bf16.msra.mxu0 %v5789_v60 }
 0x47c   : > { %v5724_v19 = vld [vmem:[%s9415_s6 + $0x58] sm:$0xf]  ;;  %v6525_v63 = vor.u32 %v7932_v12, %v6524_v9 }
 0x47d   : > { %5041 = vmatpush.bf16.msra.mxu3 %v6589_v54  ;;  %v7732_v21 = vld [vmem:[%s9415_s6 + $0x74] sm:$0xf0]  ;;  %5016 = vmatpush.bf16.msra.mxu1 %v6045_v11  ;;  %v5232_v54 = vrot.slane %v5231_v17, 2 }
 0x47e   : > { %v5980_v22 = vld [vmem:[%s9415_s6 + $0x258] sm:$0xf]  ;;  %v5725_v36 = vor.u32 %v7732_v21, %v5724_v19 }
 0x47f   : > { %5029 = vmatpush.bf16.msra.mxu2 %v6301_v44  ;;  %v7796_v26 = vld [vmem:[%s9415_s6 + $0x274] sm:$0xf0]  ;;  %5004 = vmatpush.bf16.msra.mxu0 %v5757_v18  ;;  %v5233_v11 = vadd.f32 %v5232_v54, %v5231_v17  ;;  %v5311_v44 = vrot.slane %v5310_v55, 2  ;;  %v10534_v17 = vld.sshfl [vmem:[#allocation1 + $0x10] sm:$0xff pattern:$0x73625140] }
 0x480   : > { %v6236_v27 = vld [vmem:[%s9415_s6 + $0x458] sm:$0xf]  ;;  %v5981_v37 = vor.u32 %v7796_v26, %v5980_v22 }
 0x481   : > { %v7860_v31 = vld [vmem:[%s9415_s6 + $0x474] sm:$0xf0]  ;;  %5042 = vmatpush.bf16.msra.mxu3 %v6557_v2  ;;  %5017 = vmatpush.bf16.msra.mxu1 %v6013_v28  ;;  %v5412_v2 = vmul.f32 %v10505_v43, %v10470_v61  ;;  %v5234_v8 = vrot.slane %v5233_v11, 1  ;;  %v5312_v9 = vadd.f32 %v5311_v44, %v5310_v55 }
 0x482   : > { %v6492_v45 = vld [vmem:[%s9415_s6 + $0x658] sm:$0xf]  ;;  %v6237_v15 = vor.u32 %v7860_v31, %v6236_v27 }
 0x483   : > { %v7924_v32 = vld [vmem:[%s9415_s6 + $0x674] sm:$0xf0]  ;;  %5030 = vmatpush.bf16.msra.mxu2 %v6269_v39  ;;  %5005 = vmatpush.bf16.msra.mxu0 %v5725_v36  ;;  %v5235_v39 = vadd.f32 %v5234_v8, %v5233_v11  ;;  %v5313_v26 = vrot.slane %v5312_v9, 1  ;;  %v5413_v59 = vmul.f32 %v10505_v43, %v5412_v2  ;;  %v4800_v2 = vpop.f32.mrf.mxu0 }
 0x484   : > { %v5692_v35 = vld [vmem:[%s9415_s6 + $0x18] sm:$0xf]  ;;  %v6493_v42 = vor.u32 %v7924_v32, %v6492_v45 }
 0x485   : > { %v7724_v30 = vld [vmem:[%s9415_s6 + $0x34] sm:$0xf0]  ;;  %5043 = vmatpush.bf16.msra.mxu3 %v6525_v63  ;;  %5018 = vmatpush.bf16.msra.mxu1 %v5981_v37  ;;  %v10526_v63 = vmul.f32 %v10016_v52, %v5235_v39  ;;  %v5314_v45 = vadd.f32 %v5313_v26, %v5312_v9  ;;  %v4813_v9 = vpop.f32.mrf.mxu1 }
 0x486   : > { %v5948_v16 = vld [vmem:[%s9415_s6 + $0x218] sm:$0xf]  ;;  %v5693_v29 = vor.u32 %v7724_v30, %v5692_v35 }
 0x487   : > { %v7788_v48 = vld [vmem:[%s9415_s6 + $0x234] sm:$0xf0]  ;;  %5031 = vmatpush.bf16.msra.mxu2 %v6237_v15  ;;  %v5346_v6 = vmul.f32 %v5314_v45, %v10016_v52  ;;  %v5354_v37 = vmul.f32 %v10526_v63, %v10526_v63 }
 0x488   : > { %v6204_v62 = vld [vmem:[%s9415_s6 + $0x418] sm:$0xf]  ;;  %v5949_v53 = vor.u32 %v7788_v48, %v5948_v16  ;;  %5006 = vmatpush.bf16.msra.mxu0 %v5693_v29 }
 0x489   : > { %v7852_v40 = vld [vmem:[%s9415_s6 + $0x434] sm:$0xf0]  ;;  %5044 = vmatpush.bf16.msra.mxu3 %v6493_v42  ;;  %v5414_v42 = vmul.f32 0.5, %v5413_v59 }
 0x48a   : > { %v6460_v47 = vld [vmem:[%s9415_s6 + $0x618] sm:$0xf]  ;;  %v6205_v23 = vor.u32 %v7852_v40, %v6204_v62  ;;  %5019 = vmatpush.bf16.msra.mxu1 %v5949_v53 }
 0x48b   : > { %v7916_v50 = vld [vmem:[%s9415_s6 + $0x634] sm:$0xf0]  ;;  %v4802_v61 = vpop.f32.mrf.mxu0 }
 0x48c   : > { %v6940_v1 = vld [vmem:[%s9415_s6 + $0x9d8] sm:$0xf]  ;;  %v6461_v3 = vor.u32 %v7916_v50, %v6460_v47  ;;  %5032 = vmatpush.bf16.msra.mxu2 %v6205_v23  ;;  %v10548_v50 = vld.sshfl [vmem:[#allocation1 + $0x8] sm:$0xff pattern:$0x73625140]  ;;  %v5415_v23 = vsub.f32 1.5, %v5414_v42  ;;  %v5378_v61 = vsub.f32 %v10480_v46, %v10526_v63 }
 0x48d   : > { %v8036_v56 = vld [vmem:[%s9415_s6 + $0x9f4] sm:$0xf0]  ;;  %5020 = vmatmul.bf16.vlgmr.msra.gmra.mxu1 %v10548_v50 }
 0x48e   : > { %v7196_v10 = vld [vmem:[%s9415_s6 + $0xbd8] sm:$0xf]  ;;  %v6941_v4 = vor.u32 %v8036_v56, %v6940_v1  ;;  %5045 = vmatpush.bf16.msra.mxu3 %v6461_v3  ;;  %v5362_v1 = vsub.f32 %v5346_v6, %v5354_v37  ;;  %v5416_v45 = vmul.f32 %v10505_v43, %v5415_v23 }
 0x48f   : > { %v8100_v24 = vld [vmem:[%s9415_s6 + $0xbf4] sm:$0xf0]  ;;  %5033 = vmatmul.bf16.vlgmr.msra.gmra.mxu2 %v10534_v17 }
 0x490   : > { %v7452_v58 = vld [vmem:[%s9415_s6 + $0xdd8] sm:$0xf]  ;;  %v7197_v12 = vor.u32 %v8100_v24, %v7196_v10  ;;  %5051 = vmatpush.bf16.msrb.mxu0 %v6941_v4  ;;  %v5370_v11 = vmax.f32 %v5362_v1, 0.0 }
 0x491   : > { %v8164_v60 = vld [vmem:[%s9415_s6 + $0xdf4] sm:$0xf0]  ;;  %5046 = vmatmul.bf16.vlgmr.msra.gmra.mxu3 %v10545_v41 }
 0x492   : > { %v7708_v0 = vld [vmem:[%s9415_s6 + $0xfd8] sm:$0xf]  ;;  %v7453_v18 = vor.u32 %v8164_v60, %v7452_v58  ;;  %5064 = vmatpush.bf16.msrb.mxu1 %v7197_v12  ;;  %v10560_v3 = vadd.f32 1e-05, %v5370_v11 }
 0x493   : > { %v8228_v33 = vld [vmem:[%s9415_s6 + $0xff4] sm:$0xf0] }
 0x494   : > { %v6908_v38 = vld [vmem:[%s9415_s6 + $0x998] sm:$0xf]  ;;  %v7709_v22 = vor.u32 %v8228_v33, %v7708_v0  ;;  %5077 = vmatpush.bf16.msrb.mxu2 %v7453_v18  ;;  %8262 = vrsqrt.f32 %v10560_v3  ;;  %vm5427_vm12 = vweird.f32 %v10560_v3 }
 0x495   : > { %v8028_v5 = vld [vmem:[%s9415_s6 + $0x9b4] sm:$0xf0] }
 0x496   : > { %v7164_v19 = vld [vmem:[%s9415_s6 + $0xb98] sm:$0xf]  ;;  %v6909_v13 = vor.u32 %v8028_v5, %v6908_v38  ;;  %5090 = vmatpush.bf16.msrb.mxu3 %v7709_v22  ;;  %v4814_v22 = vadd.f32 %v4813_v9, %v4800_v2 }
 0x497   : > { %v8092_v21 = vld [vmem:[%s9415_s6 + $0xbb4] sm:$0xf0] }
 0x498   : > { %v7420_v25 = vld [vmem:[%s9415_s6 + $0xd98] sm:$0xf]  ;;  %v7165_v20 = vor.u32 %v8092_v21, %v7164_v19  ;;  %5052 = vmatpush.bf16.msrb.mxu0 %v6909_v13 }
 0x499   : > { %v8156_v28 = vld [vmem:[%s9415_s6 + $0xdb4] sm:$0xf0] }
 0x49a   : > { %v7676_v27 = vld [vmem:[%s9415_s6 + $0xf98] sm:$0xf]  ;;  %v7421_v32 = vor.u32 %v8156_v28, %v7420_v25  ;;  %5065 = vmatpush.bf16.msrb.mxu1 %v7165_v20  ;;  %v4826_v20 = vpop.f32.mrf.mxu2 }
 0x49b   : > { %v8220_v31 = vld [vmem:[%s9415_s6 + $0xfb4] sm:$0xf0] }
 0x49c   : > { %v6876_v34 = vld [vmem:[%s9415_s6 + $0x958] sm:$0xf]  ;;  %v7677_v7 = vor.u32 %v8220_v31, %v7676_v27  ;;  %5078 = vmatpush.bf16.msrb.mxu2 %v7421_v32 }
 0x49d   : > { %v8020_v35 = vld [vmem:[%s9415_s6 + $0x974] sm:$0xf0] }
 0x49e   : > { %v7132_v30 = vld [vmem:[%s9415_s6 + $0xb58] sm:$0xf]  ;;  %v6877_v47 = vor.u32 %v8020_v35, %v6876_v34  ;;  %5091 = vmatpush.bf16.msrb.mxu3 %v7677_v7  ;;  %v4827_v7 = vadd.f32 %v4826_v20, %v4814_v22  ;;  %v7904_v20 = vld [vmem:[%s9415_s6 + $0x5dc] sm:$0xf] }
 0x49f   : > { %v8084_v36 = vld [vmem:[%s9415_s6 + $0xb74] sm:$0xf0] }
 0x4a0   : > { %v7388_v16 = vld [vmem:[%s9415_s6 + $0xd58] sm:$0xf]  ;;  %v7133_v51 = vor.u32 %v8084_v36, %v7132_v30  ;;  %5053 = vmatpush.bf16.msrb.mxu0 %v6877_v47  ;;  %v4839_v36 = vpop.f32.mrf.mxu3  ;;  %v10593_v47 = vpop.eup %8262 }
 0x4a1   : > { %v8148_v48 = vld [vmem:[%s9415_s6 + $0xd74] sm:$0xf0]  ;;  %v10591_v42 = vadd.f32 %v4839_v36, %v4827_v7  ;;  %vm5428_vm11 = vweird.f32 %v10593_v47  ;;  %v7968_v36 = vld [vmem:[%s9415_s6 + $0x7dc] sm:$0xf] }
 0x4a2   : > { %v7644_v15 = vld [vmem:[%s9415_s6 + $0xf58] sm:$0xf]  ;;  %v7389_v54 = vor.u32 %v8148_v48, %v7388_v16  ;;  %5066 = vmatpush.bf16.msrb.mxu1 %v7133_v51  ;;  %vm5429_vm13 = vmor %vm5427_vm12, %vm5428_vm11 }
 0x4a3   : > { %v8212_v62 = vld [vmem:[%s9415_s6 + $0xf74] sm:$0xf0] }
 0x4a4   : > { %v10542_v40 = vld.sshfl [vmem:[#allocation1] sm:$0xff pattern:$0x73625140]  ;;  %v7645_v29 = vor.u32 %v8212_v62, %v7644_v15  ;;  %5079 = vmatpush.bf16.msrb.mxu2 %v7389_v54 }
 0x4a5   : > { %5007 = vmatmul.bf16.vlgmr.msra.gmra.mxu0 %v10542_v40  ;;  %v6844_v55 = vld [vmem:[%s9415_s6 + $0x918] sm:$0xf] }
 0x4a6   : > { %v8012_v56 = vld [vmem:[%s9415_s6 + $0x934] sm:$0xf0]  ;;  %5092 = vmatpush.bf16.msrb.mxu3 %v7645_v29  ;;  %v5420_v29 = vsel %vm10583_vm10, %v10505_v43, %v5416_v45  ;;  %v6430_v45 = vld [vmem:[%s9415_s6 + $0x5f8] sm:$0xf0] }
 0x4a7   : > { %v7100_v10 = vld [vmem:[%s9415_s6 + $0xb18] sm:$0xf]  ;;  %v6845_v0 = vor.u32 %v8012_v56, %v6844_v55 }
 0x4a8   : > { %v8076_v24 = vld [vmem:[%s9415_s6 + $0xb34] sm:$0xf0] }
 0x4a9   : > { %v7356_v58 = vld [vmem:[%s9415_s6 + $0xd18] sm:$0xf]  ;;  %v7101_v4 = vor.u32 %v8076_v24, %v7100_v10  ;;  %5054 = vmatpush.bf16.msrb.mxu0 %v6845_v0  ;;  %v4815_v10 = vpop.f32.mrf.mxu1  ;;  %v5422_v24 = vmul.f32 %v10593_v47, %v10560_v3  ;;  %v7832_v3 = vld [vmem:[%s9415_s6 + $0x39c] sm:$0xf] }
 0x4aa   : > { %v8140_v60 = vld [vmem:[%s9415_s6 + $0xd34] sm:$0xf0] }
 0x4ab   : > { %v7612_v44 = vld [vmem:[%s9415_s6 + $0xf18] sm:$0xf]  ;;  %v7357_v38 = vor.u32 %v8140_v60, %v7356_v58  ;;  %5067 = vmatpush.bf16.msrb.mxu1 %v7101_v4  ;;  %v5423_v43 = vmul.f32 %v10593_v47, %v5422_v24  ;;  %v7896_v24 = vld [vmem:[%s9415_s6 + $0x59c] sm:$0xf] }
 0x4ac   : > { %v8204_v53 = vld [vmem:[%s9415_s6 + $0xf34] sm:$0xf0] }
 0x4ad   : > { %v6812_v33 = vld [vmem:[%s9415_s6 + $0x8d8] sm:$0xf]  ;;  %v7613_v12 = vor.u32 %v8204_v53, %v7612_v44  ;;  %5080 = vmatpush.bf16.msrb.mxu2 %v7357_v38  ;;  %v5377_v53 = vsub.f32 %v10339_v49, %v10425_v57 }
 0x4ae   : > { %v8004_v5 = vld [vmem:[%s9415_s6 + $0x8f4] sm:$0xf0] }
 0x4af   : > { %v7068_v8 = vld [vmem:[%s9415_s6 + $0xad8] sm:$0xf]  ;;  %v6813_v39 = vor.u32 %v8004_v5, %v6812_v33  ;;  %5093 = vmatpush.bf16.msrb.mxu3 %v7613_v12 }
 0x4b0   : > { %v8068_v18 = vld [vmem:[%s9415_s6 + $0xaf4] sm:$0xf0] }
 0x4b1   : > { %v7324_v19 = vld [vmem:[%s9415_s6 + $0xcd8] sm:$0xf]  ;;  %v7069_v26 = vor.u32 %v8068_v18, %v7068_v8  ;;  %5055 = vmatpush.bf16.msrb.mxu0 %v6813_v39  ;;  %v5473_v8 = vmul.f32 %v5420_v29, %v5377_v53  ;;  %v4841_v39 = vpop.f32.mrf.mxu3  ;;  %v6142_v29 = vld [vmem:[%s9415_s6 + $0x3b8] sm:$0xf0] }
 0x4b2   : > { %v8132_v21 = vld [vmem:[%s9415_s6 + $0xcf4] sm:$0xf0] }
 0x4b3   : > { %v7580_v25 = vld [vmem:[%s9415_s6 + $0xed8] sm:$0xf]  ;;  %v7325_v27 = vor.u32 %v8132_v21, %v7324_v19  ;;  %5068 = vmatpush.bf16.msrb.mxu1 %v7069_v26  ;;  %v4828_v19 = vpop.f32.mrf.mxu2  ;;  %v5424_v21 = vmul.f32 0.5, %v5423_v43  ;;  %v5918_v26 = vld [vmem:[%s9415_s6 + $0x1f8] sm:$0xf0] }
 0x4b4   : > { %v8196_v28 = vld [vmem:[%s9415_s6 + $0xef4] sm:$0xf0]  ;;  %v5854_v43 = vld [vmem:[%s9415_s6 + $0x178] sm:$0xf0] }
 0x4b5   : > { %v6780_v31 = vld [vmem:[%s9415_s6 + $0x898] sm:$0xf]  ;;  %v7581_v32 = vor.u32 %v8196_v28, %v7580_v25  ;;  %5081 = vmatpush.bf16.msrb.mxu2 %v7325_v27  ;;  %v7776_v28 = vld [vmem:[%s9415_s6 + $0x1dc] sm:$0xf] }
 0x4b6   : > { %v7996_v59 = vld [vmem:[%s9415_s6 + $0x8b4] sm:$0xf0]  ;;  %v7840_v27 = vld [vmem:[%s9415_s6 + $0x3dc] sm:$0xf] }
 0x4b7   : > { %v7036_v13 = vld [vmem:[%s9415_s6 + $0xa98] sm:$0xf]  ;;  %v6781_v62 = vor.u32 %v7996_v59, %v6780_v31  ;;  %5094 = vmatpush.bf16.msrb.mxu3 %v7581_v32  ;;  %v6174_v31 = vld [vmem:[%s9415_s6 + $0x3f8] sm:$0xf0]  ;;  %v5425_v59 = vsub.f32 1.5, %v5424_v21 }
 0x4b8   : > { %v8060_v34 = vld [vmem:[%s9415_s6 + $0xab4] sm:$0xf0]  ;;  %v6622_v19 = vld [vmem:[%s9415_s6 + $0x778] sm:$0xf0] }
 0x4b9   : > { %v7292_v35 = vld [vmem:[%s9415_s6 + $0xc98] sm:$0xf]  ;;  %v7037_v1 = vor.u32 %v8060_v34, %v7036_v13  ;;  %5056 = vmatpush.bf16.msrb.mxu0 %v6781_v62  ;;  %v7768_v62 = vld [vmem:[%s9415_s6 + $0x19c] sm:$0xf] }
 0x4ba   : > { %v8124_v30 = vld [vmem:[%s9415_s6 + $0xcb4] sm:$0xf0]  ;;  %v10666_v21 = vld.sshfl [vmem:[#allocation1 + $0x28] sm:$0xff pattern:$0x73625140] }
 0x4bb   : > { %v7548_v16 = vld [vmem:[%s9415_s6 + $0xe98] sm:$0xf]  ;;  %v7293_v51 = vor.u32 %v8124_v30, %v7292_v35  ;;  %5069 = vmatpush.bf16.msrb.mxu1 %v7037_v1 }
 0x4bc   : > { %v8188_v48 = vld [vmem:[%s9415_s6 + $0xeb4] sm:$0xf0] }
 0x4bd   : > { %v10588_v37 = vld [vmem:[%s10173_s14] sm:$0xff]  ;;  %v7549_v58 = vor.u32 %v8188_v48, %v7548_v16  ;;  %5082 = vmatpush.bf16.msrb.mxu2 %v7293_v51  ;;  %v5426_v48 = vmul.f32 %v10593_v47, %v5425_v59  ;;  %v6177_v51 = vor.u32 %v7840_v27, %v6174_v31 }
 0x4be   : > { %v5483_v15 = vperm.slane %v10588_v37, 2  ;;  %v6748_v54 = vld [vmem:[%s9415_s6 + $0x858] sm:$0xf]  ;;  %v6686_v16 = vld [vmem:[%s9415_s6 + $0x7f8] sm:$0xf0]  ;;  %v5484_v1 = vperm.slane %v10588_v37, 3 }
 0x4bf   : > { %v7988_v55 = vld [vmem:[%s9415_s6 + $0x874] sm:$0xf0]  ;;  %5095 = vmatpush.bf16.msrb.mxu3 %v7549_v58  ;;  %v6689_v10 = vor.u32 %v7968_v36, %v6686_v16  ;;  %v6398_v58 = vld [vmem:[%s9415_s6 + $0x5b8] sm:$0xf0] }
 0x4c0   : > { %v7004_v56 = vld [vmem:[%s9415_s6 + $0xa58] sm:$0xf]  ;;  %v6749_v2 = vor.u32 %v7988_v55, %v6748_v54  ;;  %v5499_v32 = vmul.f32 %v5483_v15, %v5473_v8  ;;  %v5921_v15 = vor.u32 %v7776_v28, %v5918_v26  ;;  %v6433_v54 = vor.u32 %v7904_v20, %v6430_v45  ;;  %v5886_v55 = vld [vmem:[%s9415_s6 + $0x1b8] sm:$0xf0] }
 0x4c1   : > { %v8052_v60 = vld [vmem:[%s9415_s6 + $0xa74] sm:$0xf0]  ;;  %v7888_v8 = vld [vmem:[%s9415_s6 + $0x55c] sm:$0xf] }
 0x4c2   : > { %v7260_v11 = vld [vmem:[%s9415_s6 + $0xc58] sm:$0xf]  ;;  %v7005_v49 = vor.u32 %v8052_v60, %v7004_v56  ;;  %5057 = vmatpush.bf16.msrb.mxu0 %v6749_v2  ;;  %v5430_v56 = vsel %vm5429_vm13, %v10593_v47, %v5426_v48  ;;  %v7960_v60 = vld [vmem:[%s9415_s6 + $0x79c] sm:$0xf]  ;;  %v5889_v47 = vor.u32 %v7768_v62, %v5886_v55 }
 0x4c3   : > { %v8116_v44 = vld [vmem:[%s9415_s6 + $0xc74] sm:$0xf0]  ;;  %v5474_v46 = vmul.f32 %v5430_v56, %v5378_v61  ;;  %v7824_v2 = vld [vmem:[%s9415_s6 + $0x35c] sm:$0xf] }
 0x4c4   : > { %v7516_v23 = vld [vmem:[%s9415_s6 + $0xe58] sm:$0xf]  ;;  %v7261_v57 = vor.u32 %v8116_v44, %v7260_v11  ;;  %5070 = vmatpush.bf16.msrb.mxu1 %v7005_v49  ;;  %v6654_v11 = vld [vmem:[%s9415_s6 + $0x7b8] sm:$0xf0] }
 0x4c5   : > { %v8180_v0 = vld [vmem:[%s9415_s6 + $0xe74] sm:$0xf0]  ;;  %v5500_v53 = vmul.f32 %v5484_v1, %v5474_v46  ;;  %v6366_v49 = vld [vmem:[%s9415_s6 + $0x578] sm:$0xf0] }
 0x4c6   : > { %v6716_v33 = vld [vmem:[%s9415_s6 + $0x818] sm:$0xf]  ;;  %v7517_v22 = vor.u32 %v8180_v0, %v7516_v23  ;;  %5083 = vmatpush.bf16.msrb.mxu2 %v7261_v57  ;;  %v6145_v23 = vor.u32 %v7832_v3, %v6142_v29  ;;  %v6401_v0 = vor.u32 %v7896_v24, %v6398_v58  ;;  %v5822_v28 = vld [vmem:[%s9415_s6 + $0x138] sm:$0xf0]  ;;  %v6369_v31 = vor.u32 %v7888_v8, %v6366_v49 }
 0x4c7   : > { %v7980_v4 = vld [vmem:[%s9415_s6 + $0x834] sm:$0xf0]  ;;  %v7816_v59 = vld [vmem:[%s9415_s6 + $0x31c] sm:$0xf] }
 0x4c8   : > { %v6972_v38 = vld [vmem:[%s9415_s6 + $0xa18] sm:$0xf]  ;;  %v6717_v13 = vor.u32 %v7980_v4, %v6716_v33  ;;  %5096 = vmatpush.bf16.msrb.mxu3 %v7517_v22  ;;  %v7760_v33 = vld [vmem:[%s9415_s6 + $0x15c] sm:$0xf] }
 0x4c9   : > { %v8044_v5 = vld [vmem:[%s9415_s6 + $0xa34] sm:$0xf0]  ;;  %v10652_v4 = vld.sshfl [vmem:[#allocation1 + $0x30] sm:$0xff pattern:$0x73625140]  ;;  %v5857_v22 = vor.u32 %v7760_v33, %v5854_v43 }
 0x4ca   : > { %v7228_v9 = vld [vmem:[%s9415_s6 + $0xc18] sm:$0xf]  ;;  %v6973_v30 = vor.u32 %v8044_v5, %v6972_v38  ;;  %5058 = vmatpush.bf16.msrb.mxu0 %v6717_v13  ;;  %v6657_v38 = vor.u32 %v7960_v60, %v6654_v11  ;;  %v6110_v5 = vld [vmem:[%s9415_s6 + $0x378] sm:$0xf0] }
 0x4cb   : > { %v8108_v12 = vld [vmem:[%s9415_s6 + $0xc34] sm:$0xf0]  ;;  %v6113_v27 = vor.u32 %v7824_v2, %v6110_v5  ;;  %v6078_v13 = vld [vmem:[%s9415_s6 + $0x338] sm:$0xf0] }
 0x4cc   : > { %v7484_v18 = vld [vmem:[%s9415_s6 + $0xe18] sm:$0xf]  ;;  %v7229_v7 = vor.u32 %v8108_v12, %v7228_v9  ;;  %5071 = vmatpush.bf16.msrb.mxu1 %v6973_v30  ;;  %v10661_v12 = vld.sshfl [vmem:[#allocation1 + $0x38] sm:$0xff pattern:$0x73625140]  ;;  %v6081_v48 = vor.u32 %v7816_v59, %v6078_v13 }
 0x4cd   : > { %v8172_v25 = vld [vmem:[%s9415_s6 + $0xe34] sm:$0xf0]  ;;  %v7880_v45 = vld [vmem:[%s9415_s6 + $0x51c] sm:$0xf] }
 0x4ce   : > { %v10627_v34 = vld [vmem:[%s10225_s18] sm:$0xff]  ;;  %v7485_v6 = vor.u32 %v8172_v25, %v7484_v18  ;;  %5084 = vmatpush.bf16.msrb.mxu2 %v7229_v7  ;;  %5103 = vmatpush.bf16.msra.mxu0 %v5921_v15 }
 0x4cf   : > { %v5509_v35 = vperm.slane %v10627_v34, 2  ;;  %v5510_v63 = vperm.slane %v10627_v34, 3  ;;  %v10658_v9 = vld.sshfl [vmem:[#allocation1 + $0x20] sm:$0xff pattern:$0x73625140]  ;;  %5072 = vmatmul.bf16.vlgmr.msrb.gmra.mxu1 %v10666_v21 }
 0x4d0   : > { %5097 = vmatpush.bf16.msrb.mxu3 %v7485_v6  ;;  %5116 = vmatpush.bf16.msra.mxu1 %v6177_v51  ;;  %v7952_v18 = vld [vmem:[%s9415_s6 + $0x75c] sm:$0xf]  ;;  %v4852_v6 = vpop.f32.mrf.mxu0 }
 0x4d1   : > { %v5525_v44 = vadd.f32 %v5509_v35, %v5499_v32  ;;  %5085 = vmatmul.bf16.vlgmr.msrb.gmra.mxu2 %v10652_v4  ;;  %v5526_v57 = vadd.f32 %v5510_v63, %v5500_v53  ;;  %5059 = vmatmul.bf16.vlgmr.msrb.gmra.mxu0 %v10658_v9  ;;  %v7752_v25 = vld [vmem:[%s9415_s6 + $0x11c] sm:$0xf]  ;;  %v6625_v20 = vor.u32 %v7952_v18, %v6622_v19  ;;  %v5547_v35 = vrot.slane %v10296_v14, 2  ;;  %v4878_v53 = vpop.f32.mrf.mxu2 }
 0x4d2   : > { %5129 = vmatpush.bf16.msra.mxu2 %v6433_v54  ;;  %5104 = vmatpush.bf16.msra.mxu0 %v5889_v47  ;;  %v6334_v32 = vld [vmem:[%s9415_s6 + $0x538] sm:$0xf0]  ;;  %v5825_v16 = vor.u32 %v7752_v25, %v5822_v28  ;;  %v4853_v51 = vadd.f32 %v4852_v6, %v10591_v42  ;;  %v4865_v54 = vpop.f32.mrf.mxu1 }
 0x4d3   : > { %5098 = vmatmul.bf16.vlgmr.msrb.gmra.mxu3 %v10661_v12  ;;  %v5533_v39 = vmax.f32 %v5525_v44, 0.0  ;;  %v5534_v26 = vmax.f32 %v5526_v57, 0.0  ;;  %v7944_v7 = vld [vmem:[%s9415_s6 + $0x71c] sm:$0xf]  ;;  %v6337_v1 = vor.u32 %v7880_v45, %v6334_v32  ;;  %v5556_v58 = vsel %vm5553_vm14, %v10296_v14, %v5547_v35 }
 0x4d4   : > { %5142 = vmatpush.bf16.msra.mxu3 %v6689_v10  ;;  %5117 = vmatpush.bf16.msra.mxu1 %v6145_v23  ;;  %v6590_v36 = vld [vmem:[%s9415_s6 + $0x738] sm:$0xf0]  ;;  %v4866_v46 = vadd.f32 %v4865_v54, %v4853_v51 }
 0x4d5   : > { %v5540_v30 = vpack.c.bf16 %v5534_v26, %v5533_v39  ;;  %v7744_v15 = vld [vmem:[%s9415_s6 + $0xdc] sm:$0xf]  ;;  %v6593_v56 = vor.u32 %v7944_v7, %v6590_v36 }
 0x4d6   : > { %5130 = vmatpush.bf16.msra.mxu2 %v6401_v0  ;;  %5105 = vmatpush.bf16.msra.mxu0 %v5857_v22  ;;  %v5790_v55 = vld [vmem:[%s9415_s6 + $0xf8] sm:$0xf0]  ;;  %v4879_v2 = vadd.f32 %v4878_v53, %v4866_v46 }
 0x4d7   : > { %v5548_v62 = vrot.slane %v5540_v30, 4  ;;  %v5549_v61 = vrot.slane %v5540_v30, 6  ;;  %v7808_v3 = vld [vmem:[%s9415_s6 + $0x2dc] sm:$0xf]  ;;  %v5793_v44 = vor.u32 %v7744_v15, %v5790_v55 }
 0x4d8   : > { %5143 = vmatpush.bf16.msra.mxu3 %v6657_v38  ;;  %5118 = vmatpush.bf16.msra.mxu1 %v6113_v27  ;;  %v6046_v10 = vld [vmem:[%s9415_s6 + $0x2f8] sm:$0xf0]  ;;  %v4891_v38 = vpop.f32.mrf.mxu3  ;;  %v4854_v25 = vpop.f32.mrf.mxu0 }
 0x4d9   : > { %v7872_v29 = vld [vmem:[%s9415_s6 + $0x4dc] sm:$0xf]  ;;  %v5560_v42 = vsel %vm5557_vm15, %v5548_v62, %v5549_v61  ;;  %v6049_v47 = vor.u32 %v7808_v3, %v6046_v10  ;;  %v10706_v19 = vadd.f32 %v4891_v38, %v4879_v2 }
 0x4da   : > { %5131 = vmatpush.bf16.msra.mxu2 %v6369_v31  ;;  %v6302_v24 = vld [vmem:[%s9415_s6 + $0x4f8] sm:$0xf0]  ;;  %v5561_v11 = vsel %vm5207_vm0, %v5556_v58, %v5560_v42  ;;  %5106 = vmatpush.bf16.msra.mxu0 %v5825_v16  ;;  %v4867_v59 = vpop.f32.mrf.mxu1 }
 0x4db   : > { %v7936_v63 = vld [vmem:[%s9415_s6 + $0x6dc] sm:$0xf]  ;;  %5571 = vst [vmem:[%s10686_s24] sm:$0xff] %v5561_v11  ;;  %v6305_v14 = vor.u32 %v7872_v29, %v6302_v24 }
 0x4dc   : > { %5144 = vmatpush.bf16.msra.mxu3 %v6625_v20  ;;  %v6558_v60 = vld [vmem:[%s9415_s6 + $0x6f8] sm:$0xf0]  ;;  %5119 = vmatpush.bf16.msra.mxu1 %v6081_v48 }
 0x4dd   : > { %v7736_v23 = vld [vmem:[%s9415_s6 + $0x9c] sm:$0xf]  ;;  %v6561_v43 = vor.u32 %v7936_v63, %v6558_v60 }
 0x4de   : > { %5132 = vmatpush.bf16.msra.mxu2 %v6337_v1  ;;  %v5758_v0 = vld [vmem:[%s9415_s6 + $0xb8] sm:$0xf0]  ;;  %5107 = vmatpush.bf16.msra.mxu0 %v5793_v44  ;;  %v4880_v1 = vpop.f32.mrf.mxu2 }
 0x4df   : > { %v7800_v33 = vld [vmem:[%s9415_s6 + $0x29c] sm:$0xf]  ;;  %v5761_v22 = vor.u32 %v7736_v23, %v5758_v0 }
 0x4e0   : > { %5145 = vmatpush.bf16.msra.mxu3 %v6593_v56  ;;  %v6014_v5 = vld [vmem:[%s9415_s6 + $0x2b8] sm:$0xf0]  ;;  %5120 = vmatpush.bf16.msra.mxu1 %v6049_v47  ;;  %v4893_v56 = vpop.f32.mrf.mxu3 }
 0x4e1   : > { %v7864_v8 = vld [vmem:[%s9415_s6 + $0x49c] sm:$0xf]  ;;  %v6017_v28 = vor.u32 %v7800_v33, %v6014_v5 }
 0x4e2   : > { %v6270_v49 = vld [vmem:[%s9415_s6 + $0x4b8] sm:$0xf0]  ;;  %5133 = vmatpush.bf16.msra.mxu2 %v6305_v14  ;;  %5108 = vmatpush.bf16.msra.mxu0 %v5761_v22 }
 0x4e3   : > { %v7928_v57 = vld [vmem:[%s9415_s6 + $0x69c] sm:$0xf]  ;;  %v6273_v39 = vor.u32 %v7864_v8, %v6270_v49 }
 0x4e4   : > { %v6526_v18 = vld [vmem:[%s9415_s6 + $0x6b8] sm:$0xf0]  ;;  %5146 = vmatpush.bf16.msra.mxu3 %v6561_v43  ;;  %5121 = vmatpush.bf16.msra.mxu1 %v6017_v28 }
 0x4e5   : > { %v7728_v26 = vld [vmem:[%s9415_s6 + $0x5c] sm:$0xf]  ;;  %v6529_v13 = vor.u32 %v7928_v57, %v6526_v18 }
 0x4e6   : > { %v5726_v27 = vld [vmem:[%s9415_s6 + $0x78] sm:$0xf0]  ;;  %5134 = vmatpush.bf16.msra.mxu2 %v6273_v39 }
 0x4e7   : > { %v7792_v31 = vld [vmem:[%s9415_s6 + $0x25c] sm:$0xf]  ;;  %v5729_v7 = vor.u32 %v7728_v26, %v5726_v27 }
 0x4e8   : > { %v5982_v20 = vld [vmem:[%s9415_s6 + $0x278] sm:$0xf0]  ;;  %5147 = vmatpush.bf16.msra.mxu3 %v6529_v13 }
 0x4e9   : > { %v7856_v45 = vld [vmem:[%s9415_s6 + $0x45c] sm:$0xf]  ;;  %v5985_v48 = vor.u32 %v7792_v31, %v5982_v20  ;;  %5109 = vmatpush.bf16.msra.mxu0 %v5729_v7 }
 0x4ea   : > { %v6238_v32 = vld [vmem:[%s9415_s6 + $0x478] sm:$0xf0] }
 0x4eb   : > { %v7920_v35 = vld [vmem:[%s9415_s6 + $0x65c] sm:$0xf]  ;;  %v6241_v6 = vor.u32 %v7856_v45, %v6238_v32  ;;  %5122 = vmatpush.bf16.msra.mxu1 %v5985_v48 }
 0x4ec   : > { %v6494_v30 = vld [vmem:[%s9415_s6 + $0x678] sm:$0xf0] }
 0x4ed   : > { %v7720_v36 = vld [vmem:[%s9415_s6 + $0x1c] sm:$0xf]  ;;  %v6497_v51 = vor.u32 %v7920_v35, %v6494_v30  ;;  %5135 = vmatpush.bf16.msra.mxu2 %v6241_v6  ;;  %v5236_v35 = vsel %vm5207_vm0, %v10706_v19, 0.0 }
 0x4ee   : > { %v5694_v16 = vld [vmem:[%s9415_s6 + $0x38] sm:$0xf0] }
 0x4ef   : > { %v7784_v15 = vld [vmem:[%s9415_s6 + $0x21c] sm:$0xf]  ;;  %v5697_v58 = vor.u32 %v7720_v36, %v5694_v16  ;;  %5148 = vmatpush.bf16.msra.mxu3 %v6497_v51 }
 0x4f0   : > { %v5950_v62 = vld [vmem:[%s9415_s6 + $0x238] sm:$0xf0] }
 0x4f1   : > { %v7848_v61 = vld [vmem:[%s9415_s6 + $0x41c] sm:$0xf]  ;;  %v5953_v60 = vor.u32 %v7784_v15, %v5950_v62  ;;  %5110 = vmatpush.bf16.msra.mxu0 %v5697_v58  ;;  %v4917_v58 = vpop.f32.mrf.mxu1 }
 0x4f2   : > { %v6206_v54 = vld [vmem:[%s9415_s6 + $0x438] sm:$0xf0] }
 0x4f3   : > { %v7912_v55 = vld [vmem:[%s9415_s6 + $0x61c] sm:$0xf]  ;;  %v6209_v11 = vor.u32 %v7848_v61, %v6206_v54  ;;  %5123 = vmatpush.bf16.msra.mxu1 %v5953_v60  ;;  %v5237_v61 = vrot.slane %v5236_v35, 4 }
 0x4f4   : > { %v6462_v3 = vld [vmem:[%s9415_s6 + $0x638] sm:$0xf0]  ;;  %5111 = vmatmul.bf16.vlgmr.msra.gmra.mxu0 %v10542_v40 }
 0x4f5   : > { %v8032_v10 = vld [vmem:[%s9415_s6 + $0x9dc] sm:$0xf]  ;;  %v6465_v14 = vor.u32 %v7912_v55, %v6462_v3  ;;  %5136 = vmatpush.bf16.msra.mxu2 %v6209_v11  ;;  %v4904_v55 = vpop.f32.mrf.mxu0 }
 0x4f6   : > { %v6942_v29 = vld [vmem:[%s9415_s6 + $0x9f8] sm:$0xf0]  ;;  %5124 = vmatmul.bf16.vlgmr.msra.gmra.mxu1 %v10548_v50  ;;  %v4918_v11 = vadd.f32 %v4917_v58, %v4904_v55 }
 0x4f7   : > { %v8096_v24 = vld [vmem:[%s9415_s6 + $0xbdc] sm:$0xf]  ;;  %v6945_v53 = vor.u32 %v8032_v10, %v6942_v29  ;;  %5149 = vmatpush.bf16.msra.mxu3 %v6465_v14 }
 0x4f8   : > { %v7198_v42 = vld [vmem:[%s9415_s6 + $0xbf8] sm:$0xf0]  ;;  %5137 = vmatmul.bf16.vlgmr.msra.gmra.mxu2 %v10534_v17  ;;  %v5283_v17 = vmul.f32 %v10706_v19, %v10706_v19 }
 0x4f9   : > { %v8160_v46 = vld [vmem:[%s9415_s6 + $0xddc] sm:$0xf]  ;;  %v7201_v23 = vor.u32 %v8096_v24, %v7198_v42  ;;  %5155 = vmatpush.bf16.msrb.mxu0 %v6945_v53 }
 0x4fa   : > { %v7454_v63 = vld [vmem:[%s9415_s6 + $0xdf8] sm:$0xf0]  ;;  %5150 = vmatmul.bf16.vlgmr.msra.gmra.mxu3 %v10545_v41  ;;  %v5315_v50 = vsel %vm5207_vm0, %v5283_v17, 0.0 }
 0x4fb   : > { %v8224_v44 = vld [vmem:[%s9415_s6 + $0xfdc] sm:$0xf]  ;;  %v7457_v0 = vor.u32 %v8160_v46, %v7454_v63  ;;  %5168 = vmatpush.bf16.msrb.mxu1 %v7201_v23 }
 0x4fc   : > { %v7710_v47 = vld [vmem:[%s9415_s6 + $0xff8] sm:$0xf0] }
 0x4fd   : > { %v8024_v33 = vld [vmem:[%s9415_s6 + $0x99c] sm:$0xf]  ;;  %v7713_v38 = vor.u32 %v8224_v44, %v7710_v47  ;;  %5181 = vmatpush.bf16.msrb.mxu2 %v7457_v0  ;;  %v5238_v44 = vadd.f32 %v5237_v61, %v5236_v35  ;;  %v5316_v47 = vrot.slane %v5315_v50, 4 }
 0x4fe   : > { %v6910_v43 = vld [vmem:[%s9415_s6 + $0x9b8] sm:$0xf0] }
 0x4ff   : > { %v8088_v2 = vld [vmem:[%s9415_s6 + $0xb9c] sm:$0xf]  ;;  %v6913_v22 = vor.u32 %v8024_v33, %v6910_v43  ;;  %5194 = vmatpush.bf16.msrb.mxu3 %v7713_v38 }
 0x500   : > { %v7166_v5 = vld [vmem:[%s9415_s6 + $0xbb8] sm:$0xf0] }
 0x501   : > { %v8152_v8 = vld [vmem:[%s9415_s6 + $0xd9c] sm:$0xf]  ;;  %v7169_v25 = vor.u32 %v8088_v2, %v7166_v5  ;;  %5156 = vmatpush.bf16.msrb.mxu0 %v6913_v22  ;;  %v4930_v5 = vpop.f32.mrf.mxu2 }
 0x502   : > { %v7422_v49 = vld [vmem:[%s9415_s6 + $0xdb8] sm:$0xf0]  ;;  %v4931_v22 = vadd.f32 %v4930_v5, %v4918_v11 }
 0x503   : > { %v8216_v57 = vld [vmem:[%s9415_s6 + $0xf9c] sm:$0xf]  ;;  %v7425_v28 = vor.u32 %v8152_v8, %v7422_v49  ;;  %5169 = vmatpush.bf16.msrb.mxu1 %v7169_v25  ;;  %v4943_v25 = vpop.f32.mrf.mxu3 }
 0x504   : > { %v7678_v18 = vld [vmem:[%s9415_s6 + $0xfb8] sm:$0xf0] }
 0x505   : > { %v8016_v39 = vld [vmem:[%s9415_s6 + $0x95c] sm:$0xf]  ;;  %v7681_v31 = vor.u32 %v8216_v57, %v7678_v18  ;;  %5182 = vmatpush.bf16.msrb.mxu2 %v7425_v28  ;;  %v5239_v28 = vrot.slane %v5238_v44, 2 }
 0x506   : > { %v6878_v26 = vld [vmem:[%s9415_s6 + $0x978] sm:$0xf0] }
 0x507   : > { %v8080_v27 = vld [vmem:[%s9415_s6 + $0xb5c] sm:$0xf]  ;;  %v6881_v30 = vor.u32 %v8016_v39, %v6878_v26  ;;  %5195 = vmatpush.bf16.msrb.mxu3 %v7681_v31  ;;  %v5317_v39 = vadd.f32 %v5316_v47, %v5315_v50 }
 0x508   : > { %v7134_v59 = vld [vmem:[%s9415_s6 + $0xb78] sm:$0xf0] }
 0x509   : > { %v8144_v13 = vld [vmem:[%s9415_s6 + $0xd5c] sm:$0xf]  ;;  %v7137_v40 = vor.u32 %v8080_v27, %v7134_v59  ;;  %5157 = vmatpush.bf16.msrb.mxu0 %v6881_v30  ;;  %v10781_v59 = vadd.f32 %v4943_v25, %v4931_v22  ;;  %v4919_v30 = vpop.f32.mrf.mxu1  ;;  %v4932_v55 = vpop.f32.mrf.mxu2 }
 0x50a   : > { %v7390_v20 = vld [vmem:[%s9415_s6 + $0xd78] sm:$0xf0] }
 0x50b   : > { %v8208_v45 = vld [vmem:[%s9415_s6 + $0xf5c] sm:$0xf]  ;;  %v7393_v7 = vor.u32 %v8144_v13, %v7390_v20  ;;  %5170 = vmatpush.bf16.msrb.mxu1 %v7137_v40  ;;  %v4906_v13 = vpop.f32.mrf.mxu0 }
 0x50c   : > { %v7646_v32 = vld [vmem:[%s9415_s6 + $0xf78] sm:$0xf0] }
 0x50d   : > { %v8008_v36 = vld [vmem:[%s9415_s6 + $0x91c] sm:$0xf]  ;;  %v7649_v48 = vor.u32 %v8208_v45, %v7646_v32  ;;  %5183 = vmatpush.bf16.msrb.mxu2 %v7393_v7 }
 0x50e   : > { %v6846_v41 = vld [vmem:[%s9415_s6 + $0x938] sm:$0xf0] }
 0x50f   : > { %v8072_v16 = vld [vmem:[%s9415_s6 + $0xb1c] sm:$0xf]  ;;  %v6849_v54 = vor.u32 %v8008_v36, %v6846_v41  ;;  %5196 = vmatpush.bf16.msrb.mxu3 %v7649_v48  ;;  %v5318_v48 = vrot.slane %v5317_v39, 2 }
 0x510   : > { %v7102_v6 = vld [vmem:[%s9415_s6 + $0xb38] sm:$0xf0] }
 0x511   : > { %v8136_v15 = vld [vmem:[%s9415_s6 + $0xd1c] sm:$0xf]  ;;  %v7105_v3 = vor.u32 %v8072_v16, %v7102_v6  ;;  %5158 = vmatpush.bf16.msrb.mxu0 %v6849_v54  ;;  %v5240_v16 = vadd.f32 %v5239_v28, %v5238_v44 }
 0x512   : > { %v7358_v62 = vld [vmem:[%s9415_s6 + $0xd38] sm:$0xf0] }
 0x513   : > { %v8200_v1 = vld [vmem:[%s9415_s6 + $0xf1c] sm:$0xf]  ;;  %v7361_v56 = vor.u32 %v8136_v15, %v7358_v62  ;;  %5171 = vmatpush.bf16.msrb.mxu1 %v7105_v3  ;;  %v5241_v58 = vrot.slane %v5240_v16, 1 }
 0x514   : > { %v7614_v51 = vld [vmem:[%s9415_s6 + $0xf38] sm:$0xf0] }
 0x515   : > { %v8000_v10 = vld [vmem:[%s9415_s6 + $0x8dc] sm:$0xf]  ;;  %v7617_v42 = vor.u32 %v8200_v1, %v7614_v51  ;;  %5184 = vmatpush.bf16.msrb.mxu2 %v7361_v56 }
 0x516   : > { %v6814_v29 = vld [vmem:[%s9415_s6 + $0x8f8] sm:$0xf0] }
 0x517   : > { %v8064_v24 = vld [vmem:[%s9415_s6 + $0xadc] sm:$0xf]  ;;  %v6817_v23 = vor.u32 %v8000_v10, %v6814_v29  ;;  %5197 = vmatpush.bf16.msrb.mxu3 %v7617_v42  ;;  %v5319_v42 = vadd.f32 %v5318_v48, %v5317_v39 }
 0x518   : > { %v7070_v46 = vld [vmem:[%s9415_s6 + $0xaf8] sm:$0xf0] }
 0x519   : > { %v8128_v63 = vld [vmem:[%s9415_s6 + $0xcdc] sm:$0xf]  ;;  %v7073_v0 = vor.u32 %v8064_v24, %v7070_v46  ;;  %5159 = vmatpush.bf16.msrb.mxu0 %v6817_v23  ;;  %v4945_v24 = vpop.f32.mrf.mxu3 }
 0x51a   : > { %v7326_v60 = vld [vmem:[%s9415_s6 + $0xcf8] sm:$0xf0] }
 0x51b   : > { %v8192_v14 = vld [vmem:[%s9415_s6 + $0xedc] sm:$0xf]  ;;  %v7329_v33 = vor.u32 %v8128_v63, %v7326_v60  ;;  %5172 = vmatpush.bf16.msrb.mxu1 %v7073_v0 }
 0x51c   : > { %v7582_v53 = vld [vmem:[%s9415_s6 + $0xef8] sm:$0xf0] }
 0x51d   : > { %v7992_v43 = vld [vmem:[%s9415_s6 + $0x89c] sm:$0xf]  ;;  %v7585_v8 = vor.u32 %v8192_v14, %v7582_v53  ;;  %5185 = vmatpush.bf16.msrb.mxu2 %v7329_v33  ;;  %v5242_v14 = vadd.f32 %v5241_v58, %v5240_v16  ;;  %v5320_v53 = vrot.slane %v5319_v42, 1 }
 0x51e   : > { %v6782_v2 = vld [vmem:[%s9415_s6 + $0x8b8] sm:$0xf0] }
 0x51f   : > { %v8056_v38 = vld [vmem:[%s9415_s6 + $0xa9c] sm:$0xf]  ;;  %v6785_v31 = vor.u32 %v7992_v43, %v6782_v2  ;;  %5198 = vmatpush.bf16.msrb.mxu3 %v7585_v8  ;;  %v10800_v23 = vmul.f32 %v10016_v52, %v5242_v14  ;;  %v5321_v0 = vadd.f32 %v5320_v53, %v5319_v42  ;;  %v4956_v2 = vpop.f32.mrf.mxu0  ;;  %v4969_v8 = vpop.f32.mrf.mxu1 }
 0x520   : > { %v7038_v49 = vld [vmem:[%s9415_s6 + $0xab8] sm:$0xf0]  ;;  %v4957_v5 = vadd.f32 %v4956_v2, %v10781_v59 }
 0x521   : > { %v8120_v57 = vld [vmem:[%s9415_s6 + $0xc9c] sm:$0xf]  ;;  %v7041_v20 = vor.u32 %v8056_v38, %v7038_v49  ;;  %5160 = vmatpush.bf16.msrb.mxu0 %v6785_v31  ;;  %v5347_v33 = vmul.f32 %v5321_v0, %v10016_v52  ;;  %v5355_v43 = vmul.f32 %v10800_v23, %v10800_v23  ;;  %v4995_v22 = vpop.f32.mrf.mxu3  ;;  %v5379_v53 = vsub.f32 %v10706_v19, %v10800_v23 }
 0x522   : > { %v7294_v18 = vld [vmem:[%s9415_s6 + $0xcb8] sm:$0xf0]  ;;  %v4970_v49 = vadd.f32 %v4969_v8, %v4957_v5  ;;  %v5512_v23 = vperm.slane %v10627_v34, 5 }
 0x523   : > { %v8184_v26 = vld [vmem:[%s9415_s6 + $0xe9c] sm:$0xf]  ;;  %v7297_v45 = vor.u32 %v8120_v57, %v7294_v18  ;;  %5173 = vmatpush.bf16.msrb.mxu1 %v7041_v20  ;;  %v5363_v38 = vsub.f32 %v5347_v33, %v5355_v43  ;;  %v4982_v18 = vpop.f32.mrf.mxu2 }
 0x524   : > { %v7550_v27 = vld [vmem:[%s9415_s6 + $0xeb8] sm:$0xf0] }
 0x525   : > { %v7984_v32 = vld [vmem:[%s9415_s6 + $0x85c] sm:$0xf]  ;;  %v7553_v40 = vor.u32 %v8184_v26, %v7550_v27  ;;  %5186 = vmatpush.bf16.msrb.mxu2 %v7297_v45  ;;  %v5371_v57 = vmax.f32 %v5363_v38, 0.0  ;;  %v5485_v38 = vperm.slane %v10588_v37, 4 }
 0x526   : > { %v6750_v35 = vld [vmem:[%s9415_s6 + $0x878] sm:$0xf0] }
 0x527   : > { %v8048_v17 = vld [vmem:[%s9415_s6 + $0xa5c] sm:$0xf]  ;;  %v6753_v62 = vor.u32 %v7984_v32, %v6750_v35  ;;  %5199 = vmatpush.bf16.msrb.mxu3 %v7553_v40  ;;  %v5387_v25 = vadd.f32 1e-05, %v5371_v57  ;;  %v5511_v57 = vperm.slane %v10627_v34, 4 }
 0x528   : > { %v7006_v7 = vld [vmem:[%s9415_s6 + $0xa78] sm:$0xf0] }
 0x529   : > { %v8112_v36 = vld [vmem:[%s9415_s6 + $0xc5c] sm:$0xf]  ;;  %v7009_v61 = vor.u32 %v8048_v17, %v7006_v7  ;;  %5161 = vmatpush.bf16.msrb.mxu0 %v6753_v62  ;;  %8264 = vrsqrt.f32 %v5387_v25  ;;  %v4997_v20 = vpop.f32.mrf.mxu3  ;;  %vm5437_vm2 = vweird.f32 %v5387_v25 }
 0x52a   : > { %v7262_v41 = vld [vmem:[%s9415_s6 + $0xc78] sm:$0xf0] }
 0x52b   : > { %v8176_v6 = vld [vmem:[%s9415_s6 + $0xe5c] sm:$0xf]  ;;  %v7265_v1 = vor.u32 %v8112_v36, %v7262_v41  ;;  %5174 = vmatpush.bf16.msrb.mxu1 %v7009_v61  ;;  %v4984_v13 = vpop.f32.mrf.mxu2 }
 0x52c   : > { %v7518_v15 = vld [vmem:[%s9415_s6 + $0xe78] sm:$0xf0] }
 0x52d   : > { %v7976_v51 = vld [vmem:[%s9415_s6 + $0x81c] sm:$0xf]  ;;  %v7521_v3 = vor.u32 %v8176_v6, %v7518_v15  ;;  %5187 = vmatpush.bf16.msrb.mxu2 %v7265_v1 }
 0x52e   : > { %v6718_v50 = vld [vmem:[%s9415_s6 + $0x838] sm:$0xf0] }
 0x52f   : > { %v8040_v54 = vld [vmem:[%s9415_s6 + $0xa1c] sm:$0xf]  ;;  %v6721_v60 = vor.u32 %v7976_v51, %v6718_v50  ;;  %5200 = vmatpush.bf16.msrb.mxu3 %v7521_v3  ;;  %v8265_v30 = vpop.eup %8264 }
 0x530   : > { %v6974_v56 = vld [vmem:[%s9415_s6 + $0xa38] sm:$0xf0]  ;;  %v5432_v16 = vmul.f32 %v8265_v30, %v5387_v25  ;;  %vm5438_vm1 = vweird.f32 %v8265_v30 }
 0x531   : > { %v8104_v10 = vld [vmem:[%s9415_s6 + $0xc1c] sm:$0xf]  ;;  %v6977_v11 = vor.u32 %v8040_v54, %v6974_v56  ;;  %5162 = vmatpush.bf16.msrb.mxu0 %v6721_v60  ;;  %v5047_v58 = vpop.f32.mrf.mxu3  ;;  %vm5439_vm3 = vmor %vm5437_vm2, %vm5438_vm1 }
 0x532   : > { %v7230_v29 = vld [vmem:[%s9415_s6 + $0xc38] sm:$0xf0]  ;;  %v5433_v61 = vmul.f32 %v8265_v30, %v5432_v16 }
 0x533   : > { %v8168_v46 = vld [vmem:[%s9415_s6 + $0xe1c] sm:$0xf]  ;;  %v7233_v44 = vor.u32 %v8104_v10, %v7230_v29  ;;  %5175 = vmatpush.bf16.msrb.mxu1 %v6977_v11  ;;  %v5034_v29 = vpop.f32.mrf.mxu2 }
 0x534   : > { %v7486_v63 = vld [vmem:[%s9415_s6 + $0xe38] sm:$0xf0]  ;;  %5163 = vmatmul.bf16.vlgmr.msrb.gmra.mxu0 %v10658_v9  ;;  %v4983_v9 = vadd.f32 %v4982_v18, %v4970_v49  ;;  %v5434_v50 = vmul.f32 0.5, %v5433_v61 }
 0x535   : > { %v7489_v47 = vor.u32 %v8168_v46, %v7486_v63  ;;  %5188 = vmatpush.bf16.msrb.mxu2 %v7233_v44 }
 0x536   : > { %5176 = vmatmul.bf16.vlgmr.msrb.gmra.mxu1 %v10666_v21  ;;  %v10810_v21 = vadd.f32 %v4995_v22, %v4983_v9  ;;  %v5435_v10 = vsub.f32 1.5, %v5434_v50  ;;  %v5486_v9 = vperm.slane %v10588_v37, 5 }
 0x537   : > { %5201 = vmatpush.bf16.msrb.mxu3 %v7489_v47 }
 0x538   : > { %5189 = vmatmul.bf16.vlgmr.msrb.gmra.mxu2 %v10652_v4  ;;  %v4958_v4 = vpop.f32.mrf.mxu0  ;;  %v5243_v28 = vsel %vm5207_vm0, %v10810_v21, 0.0  ;;  %v5284_v39 = vmul.f32 %v10810_v21, %v10810_v21  ;;  %v5436_v42 = vmul.f32 %v8265_v30, %v5435_v10 }
 0x539   : > { %v5244_v26 = vrot.slane %v5243_v28, 4  ;;  %v5049_v43 = vpop.f32.mrf.mxu3 }
 0x53a   : > { %5202 = vmatmul.bf16.vlgmr.msrb.gmra.mxu3 %v10661_v12  ;;  %v4971_v12 = vpop.f32.mrf.mxu1  ;;  %v5322_v27 = vsel %vm5207_vm0, %v5284_v39, 0.0  ;;  %v5440_v47 = vsel %vm5439_vm3, %v8265_v30, %v5436_v42 }
 0x53b   : > { %v5245_v31 = vadd.f32 %v5244_v26, %v5243_v28  ;;  %v5323_v59 = vrot.slane %v5322_v27, 4  ;;  %v5036_v0 = vpop.f32.mrf.mxu2  ;;  %v5475_v2 = vmul.f32 %v5440_v47, %v5379_v53 }
 0x53d   : > { %v5246_v45 = vrot.slane %v5245_v31, 2  ;;  %v5324_v32 = vadd.f32 %v5323_v59, %v5322_v27  ;;  %v5501_v49 = vmul.f32 %v5485_v38, %v5475_v2 }
 0x53f   : > { %v5247_v35 = vadd.f32 %v5246_v45, %v5245_v31  ;;  %v5325_v17 = vrot.slane %v5324_v32, 2  ;;  %v5527_v4 = vadd.f32 %v5511_v57, %v5501_v49 }
 0x540   : > { %v5008_v54 = vpop.f32.mrf.mxu0 }
 0x541   : > { %v5248_v40 = vrot.slane %v5247_v35, 1  ;;  %v5326_v7 = vadd.f32 %v5325_v17, %v5324_v32  ;;  %v5535_v28 = vmax.f32 %v5527_v4, 0.0 }
 0x542   : > { %v5021_v3 = vpop.f32.mrf.mxu1 }
 0x543   : > { %v5249_v36 = vadd.f32 %v5248_v40, %v5247_v35  ;;  %v5327_v41 = vrot.slane %v5326_v7, 1  ;;  %v5022_v56 = vadd.f32 %v5021_v3, %v5008_v54 }
 0x545   : > { %v5276_v48 = vmul.f32 %v10016_v52, %v5249_v36  ;;  %v5328_v6 = vadd.f32 %v5327_v41, %v5326_v7  ;;  %v5035_v24 = vadd.f32 %v5034_v29, %v5022_v56 }
 0x547   : > { %v5348_v15 = vmul.f32 %v5328_v6, %v10016_v52  ;;  %v5356_v62 = vmul.f32 %v5276_v48, %v5276_v48  ;;  %v5048_v46 = vadd.f32 %v5047_v58, %v5035_v24  ;;  %v5380_v18 = vsub.f32 %v10810_v21, %v5276_v48 }
 0x548   : > { %v5010_v63 = vpop.f32.mrf.mxu0 }
 0x549   : > { %v5364_v1 = vsub.f32 %v5348_v15, %v5356_v62 }
 0x54a   : > { %v5023_v11 = vpop.f32.mrf.mxu1 }
 0x54b   : > { %v5372_v51 = vmax.f32 %v5364_v1, 0.0 }
 0x54d   : > { %v5388_v55 = vadd.f32 1e-05, %v5372_v51 }
 0x54f   : > { %8266 = vrsqrt.f32 %v5388_v55  ;;  %vm5447_vm5 = vweird.f32 %v5388_v55 }
 0x550   : > { %v5060_v27 = vpop.f32.mrf.mxu0 }
 0x551   : > { %v5061_v45 = vadd.f32 %v5060_v27, %v5048_v46 }
 0x552   : > { %v5073_v31 = vpop.f32.mrf.mxu1 }
 0x553   : > { %v5074_v37 = vadd.f32 %v5073_v31, %v5061_v45 }
 0x554   : > { %v5086_v59 = vpop.f32.mrf.mxu2 }
 0x555   : > { %v8267_v60 = vpop.eup %8266  ;;  %v5087_v17 = vadd.f32 %v5086_v59, %v5074_v37 }
 0x556   : > { %v5442_v44 = vmul.f32 %v8267_v60, %v5388_v55  ;;  %vm5448_vm4 = vweird.f32 %v8267_v60  ;;  %v5099_v13 = vpop.f32.mrf.mxu3 }
 0x557   : > { %vm5449_vm6 = vmor %vm5447_vm5, %vm5448_vm4  ;;  %v10828_v30 = vadd.f32 %v5099_v13, %v5087_v17 }
 0x558   : > { %v5443_v14 = vmul.f32 %v8267_v60, %v5442_v44  ;;  %v5062_v20 = vpop.f32.mrf.mxu0 }
 0x559   : > { %v5250_v34 = vsel %vm5207_vm0, %v10828_v30, 0.0  ;;  %v5285_v40 = vmul.f32 %v10828_v30, %v10828_v30 }
 0x55a   : > { %v5444_v33 = vmul.f32 0.5, %v5443_v14  ;;  %v5075_v21 = vpop.f32.mrf.mxu1  ;;  %v5251_v7 = vrot.slane %v5250_v34, 4 }
 0x55b   : > { %v5329_v36 = vsel %vm5207_vm0, %v5285_v40, 0.0 }
 0x55c   : > { %v5445_v5 = vsub.f32 1.5, %v5444_v33  ;;  %v5088_v32 = vpop.f32.mrf.mxu2  ;;  %v5252_v48 = vadd.f32 %v5251_v7, %v5250_v34  ;;  %v5330_v6 = vrot.slane %v5329_v36, 4 }
 0x55e   : > { %v5446_v8 = vmul.f32 %v8267_v60, %v5445_v5  ;;  %v5101_v35 = vpop.f32.mrf.mxu3  ;;  %v5253_v61 = vrot.slane %v5252_v48, 2  ;;  %v5331_v1 = vadd.f32 %v5330_v6, %v5329_v36 }
 0x560   : > { %v5450_v22 = vsel %vm5449_vm6, %v8267_v60, %v5446_v8  ;;  %v5254_v54 = vadd.f32 %v5253_v61, %v5252_v48  ;;  %v5332_v55 = vrot.slane %v5331_v1, 2 }
 0x561   : > { %v5476_v19 = vmul.f32 %v5450_v22, %v5380_v18 }
 0x562   : > { %v5255_v10 = vrot.slane %v5254_v54, 1  ;;  %v5333_v29 = vadd.f32 %v5332_v55, %v5331_v1 }
 0x563   : > { %v5502_v25 = vmul.f32 %v5486_v9, %v5476_v19 }
 0x564   : > { %v5256_v24 = vadd.f32 %v5255_v10, %v5254_v54  ;;  %v5334_v58 = vrot.slane %v5333_v29, 1 }
 0x565   : > { %v5528_v12 = vadd.f32 %v5512_v23, %v5502_v25 }
 0x566   : > { %v5277_v46 = vmul.f32 %v10016_v52, %v5256_v24  ;;  %v5335_v63 = vadd.f32 %v5334_v58, %v5333_v29  ;;  %v8299_v58 = vld [vmem:[%s10225_s18] sm:$0xff] }
 0x567   : > { %v5536_v39 = vmax.f32 %v5528_v12, 0.0 }
 0x568   : > { %v5349_v11 = vmul.f32 %v5335_v63, %v10016_v52  ;;  %v5357_v44 = vmul.f32 %v5277_v46, %v5277_v46 }
 0x569   : > { %v10826_v26 = vpack.c.bf16 %v5536_v39, %v5535_v28 }
 0x56a   : > { %v5365_v33 = vsub.f32 %v5349_v11, %v5357_v44 }
 0x56c   : > { %v5373_v2 = vmax.f32 %v5365_v33, 0.0  ;;  %v5550_v33 = vrot.slane %v10826_v26, 2 }
 0x56e   : > { %v5389_v9 = vadd.f32 1e-05, %v5373_v2 }
 0x570   : > { %8268 = vrsqrt.f32 %v5389_v9  ;;  %vm5457_vm8 = vweird.f32 %v5389_v9 }
 0x571   : > { %v5112_v41 = vpop.f32.mrf.mxu0 }
 0x573   : > { %v5125_v16 = vpop.f32.mrf.mxu1 }
 0x574   : > { %v5126_v42 = vadd.f32 %v5125_v16, %v5112_v41 }
 0x576   : > { %v8269_v20 = vpop.eup %8268 }
 0x577   : > { %v5452_v35 = vmul.f32 %v8269_v20, %v5389_v9  ;;  %vm5458_vm7 = vweird.f32 %v8269_v20 }
 0x578   : > { %vm5459_vm9 = vmor %vm5457_vm8, %vm5458_vm7 }
 0x579   : > { %v5114_v51 = vpop.f32.mrf.mxu0  ;;  %v5453_v36 = vmul.f32 %v8269_v20, %v5452_v35 }
 0x57b   : > { %v5138_v15 = vpop.f32.mrf.mxu2  ;;  %v5127_v50 = vpop.f32.mrf.mxu1  ;;  %v5454_v48 = vmul.f32 0.5, %v5453_v36 }
 0x57c   : > { %v5139_v60 = vadd.f32 %v5138_v15, %v5126_v42  ;;  %v5513_v42 = vperm.slane %v8299_v58, 6 }
 0x57d   : > { %v5151_v62 = vpop.f32.mrf.mxu3  ;;  %v5455_v15 = vsub.f32 1.5, %v5454_v48 }
 0x57e   : > { %v5152_v47 = vadd.f32 %v5151_v62, %v5139_v60 }
 0x57f   : > { %v5456_v62 = vmul.f32 %v8269_v20, %v5455_v15 }
 0x581   : > { %v5460_v51 = vsel %vm5459_vm9, %v8269_v20, %v5456_v62 }
 0x583   : > { %v5140_v3 = vpop.f32.mrf.mxu2 }
 0x584   : > { %v8298_v3 = vld [vmem:[%s10173_s14] sm:$0xff] }
 0x585   : > { %v5153_v56 = vpop.f32.mrf.mxu3  ;;  %v5488_v60 = vperm.slane %v8298_v3, 7 }
 0x586   : > { %v5487_v56 = vperm.slane %v8298_v3, 6 }
 0x5b1   : > { %v5164_v14 = vpop.f32.mrf.mxu0 }
 0x5b2   : > { %v5165_v0 = vadd.f32 %v5164_v14, %v5152_v47  ;;  %v5514_v47 = vperm.slane %v8299_v58, 7 }
 0x5b3   : > { %v5177_v53 = vpop.f32.mrf.mxu1 }
 0x5b4   : > { %v5178_v43 = vadd.f32 %v5177_v53, %v5165_v0 }
 0x5b9   : > { %v5166_v49 = vpop.f32.mrf.mxu0 }
 0x5bb   : > { %v5190_v38 = vpop.f32.mrf.mxu2  ;;  %v5179_v57 = vpop.f32.mrf.mxu1 }
 0x5bc   : > { %v5191_v5 = vadd.f32 %v5190_v38, %v5178_v43 }
 0x5bd   : > { %v5203_v8 = vpop.f32.mrf.mxu3 }
 0x5be   : > { %v5204_v18 = vadd.f32 %v5203_v8, %v5191_v5  ;;  %v5564_v5 = vsel %vm5553_vm14, %v10826_v26, %v5550_v33 }
 0x5c0   : > { %v5257_v22 = vsel %vm5207_vm0, %v5204_v18, 0.0  ;;  %v5286_v19 = vmul.f32 %v5204_v18, %v5204_v18 }
 0x5c1   : > { %v5258_v23 = vrot.slane %v5257_v22, 4 }
 0x5c2   : > { %v5336_v4 = vsel %vm5207_vm0, %v5286_v19, 0.0 }
 0x5c3   : > { %v5259_v25 = vadd.f32 %v5258_v23, %v5257_v22  ;;  %v5337_v12 = vrot.slane %v5336_v4, 4  ;;  %v5192_v28 = vpop.f32.mrf.mxu2 }
 0x5c5   : > { %v5205_v39 = vpop.f32.mrf.mxu3  ;;  %v5260_v27 = vrot.slane %v5259_v25, 2  ;;  %v5338_v31 = vadd.f32 %v5337_v12, %v5336_v4 }
 0x5c7   : > { %v5261_v59 = vadd.f32 %v5260_v27, %v5259_v25  ;;  %v5339_v13 = vrot.slane %v5338_v31, 2 }
 0x5c9   : > { %v5262_v21 = vrot.slane %v5261_v59, 1  ;;  %v5340_v45 = vadd.f32 %v5339_v13, %v5338_v31 }
 0x5cb   : > { %v5263_v32 = vadd.f32 %v5262_v21, %v5261_v59  ;;  %v5341_v37 = vrot.slane %v5340_v45, 1 }
 0x5cd   : > { %v5278_v17 = vmul.f32 %v10016_v52, %v5263_v32  ;;  %v5342_v34 = vadd.f32 %v5341_v37, %v5340_v45 }
 0x5cf   : > { %v5350_v40 = vmul.f32 %v5342_v34, %v10016_v52  ;;  %v5358_v7 = vmul.f32 %v5278_v17, %v5278_v17  ;;  %v5381_v52 = vsub.f32 %v10828_v30, %v5277_v46  ;;  %v5382_v63 = vsub.f32 %v5204_v18, %v5278_v17 }
 0x5d1   : > { %v5366_v41 = vsub.f32 %v5350_v40, %v5358_v7  ;;  %v5477_v55 = vmul.f32 %v5460_v51, %v5381_v52 }
 0x5d3   : > { %v5374_v16 = vmax.f32 %v5366_v41, 0.0  ;;  %v5503_v24 = vmul.f32 %v5487_v56, %v5477_v55 }
 0x5d5   : > { %v5390_v6 = vadd.f32 1e-05, %v5374_v16  ;;  %v5529_v14 = vadd.f32 %v5513_v42, %v5503_v24 }
 0x5d7   : > { %8270 = vrsqrt.f32 %v5390_v6  ;;  %vm5467_vm11 = vweird.f32 %v5390_v6  ;;  %v5537_v53 = vmax.f32 %v5529_v14, 0.0 }
 0x5dd   : > { %v8271_v61 = vpop.eup %8270 }
 0x5de   : > { %v5462_v1 = vmul.f32 %v8271_v61, %v5390_v6  ;;  %vm5468_vm10 = vweird.f32 %v8271_v61 }
 0x5df   : > { %vm5469_vm12 = vmor %vm5467_vm11, %vm5468_vm10 }
 0x5e0   : > { %v5463_v50 = vmul.f32 %v8271_v61, %v5462_v1 }
 0x5e2   : > { %v5464_v54 = vmul.f32 0.5, %v5463_v50 }
 0x5e4   : > { %v5465_v10 = vsub.f32 1.5, %v5464_v54 }
 0x5e6   : > { %v5466_v29 = vmul.f32 %v8271_v61, %v5465_v10 }
 0x5e8   : > { %v5470_v11 = vsel %vm5469_vm12, %v8271_v61, %v5466_v29 }
 0x5e9   : > { %v5478_v44 = vmul.f32 %v5470_v11, %v5382_v63 }
 0x5eb   : > { %v5504_v30 = vmul.f32 %v5488_v60, %v5478_v44 }
 0x5ed   : > { %v5530_v46 = vadd.f32 %v5514_v47, %v5504_v30 }
 0x5ef   : > { %v5538_v0 = vmax.f32 %v5530_v46, 0.0 }
 0x5f1   : > { %v5542_v43 = vpack.c.bf16 %v5538_v0, %v5537_v53 }
 0x5f3   : > { %v5551_v2 = vrot.slane %v5542_v43, 4  ;;  %v5552_v38 = vrot.slane %v5542_v43, 6 }
 0x5f5   : > { %v5567_v8 = vsel %vm5557_vm15, %v5551_v2, %v5552_v38 }
 0x5f6   : > { %v5568_v49 = vsel %vm5207_vm0, %v5564_v5, %v5567_v8 }
 0x5f7   : > { %5572 = vst [vmem:[%s10686_s24 + $0x8] sm:$0xff] %v5568_v49 }
 0x5f8 PF: > { %p11_p9 = scmp.ge.s32.totalorder %s8367_s19, 4   ;;  %s10869_s15 = smov %s8318_s16 }
 0x5f9   : > { %s10870_s16 = smov %s8376_s22  ;;  %s10871_s17 = smov %s8367_s19 }
 0x5fa   :  { %13 = sbr.rel (!%p11_p9) target bundleno = 2 (0x2), region = 101 }

// kernel: generator_forward.9
= control target key start
LH: loop header
LB: loop body
LE: loop exit
PB: predicated region body
PF: predicated region fallthrough
CT: control target
= control target key end

     0   :  { %vm78_vm0 = vcmask 523264   ;;  %vm472_vm5 = vcmask 519168   ;;  %s1255_s0 = inlined_call_operand.vmem [shape: bf16[256,64], index: 0, kind: input, shape index: {}]   ;;  %s1256_s1 = inlined_call_operand.vmem [shape: f32[1,64], index: 1, kind: input, shape index: {}]   ;;  %s1257_s2 = inlined_call_operand.vmem [shape: f32[1,64], index: 2, kind: input, shape index: {}]   ;;  %s1258_s3 = inlined_call_operand.vmem [shape: bf16[256,64], index: 3, kind: output, shape index: {}]  }
   0x1   :  { %v510_v0 = vld [vmem:[%s1255_s0] sm:$0xff]   ;;  %v573_v1 = vld [vmem:[%s1255_s0 + $0x8] sm:$0xff]   ;;  %v574_v5 = vld [vmem:[%s1255_s0 + $0x10] sm:$0xff]  }
   0x2   :  { %v622_v2 = vunpack.c.l.bf16 %v510_v0  ;;  %v624_v3 = vunpack.c.h.bf16 %v510_v0  ;;  %v626_v4 = vunpack.c.l.bf16 %v573_v1  ;;  %v631_v6 = vunpack.c.h.bf16 %v573_v1  ;;  %v575_v11 = vld [vmem:[%s1255_s0 + $0x18] sm:$0xff]   ;;  %v576_v18 = vld [vmem:[%s1255_s0 + $0x20] sm:$0xff]   ;;  %v577_v26 = vld [vmem:[%s1255_s0 + $0x28] sm:$0xff]  }
   0x3   :  { %v633_v7 = vunpack.c.l.bf16 %v574_v5  ;;  %v644_v13 = vunpack.c.h.bf16 %v574_v5  ;;  %v648_v16 = vunpack.c.l.bf16 %v575_v11  ;;  %v655_v20 = vunpack.c.h.bf16 %v575_v11  ;;  %v578_v37 = vld [vmem:[%s1255_s0 + $0x30] sm:$0xff]   ;;  %v579_v51 = vld [vmem:[%s1255_s0 + $0x38] sm:$0xff]   ;;  %v580_v0 = vld [vmem:[%s1255_s0 + $0x40] sm:$0xff]  }
   0x4   :  { %v79_v8 = vsel %vm78_vm0, %v622_v2, 0.0  ;;  %v80_v9 = vsel %vm78_vm0, %v624_v3, 0.0  ;;  %v82_v10 = vsel %vm78_vm0, %v626_v4, 0.0  ;;  %v84_v14 = vsel %vm78_vm0, %v631_v6, 0.0 }
   0x5   :  { %v81_v12 = vadd.f32 %v80_v9, %v79_v8  ;;  %v86_v17 = vsel %vm78_vm0, %v633_v7, 0.0  ;;  %v88_v21 = vsel %vm78_vm0, %v644_v13, 0.0  ;;  %v659_v23 = vunpack.c.l.bf16 %v576_v18 }
   0x6   :  { %v90_v24 = vsel %vm78_vm0, %v648_v16, 0.0  ;;  %v156_v25 = vmul.f32 %v622_v2, %v622_v2  ;;  %v157_v28 = vmul.f32 %v624_v3, %v624_v3  ;;  %v158_v29 = vmul.f32 %v626_v4, %v626_v4 }
   0x7   :  { %v83_v15 = vadd.f32 %v82_v10, %v81_v12  ;;  %v672_v30 = vunpack.c.h.bf16 %v576_v18  ;;  %v92_v31 = vsel %vm78_vm0, %v655_v20, 0.0  ;;  %v159_v33 = vmul.f32 %v631_v6, %v631_v6 }
   0x8   :  { %v678_v34 = vunpack.c.l.bf16 %v577_v26  ;;  %v94_v35 = vsel %vm78_vm0, %v659_v23, 0.0  ;;  %v188_v36 = vsel %vm78_vm0, %v156_v25, 0.0  ;;  %v160_v39 = vmul.f32 %v633_v7, %v633_v7 }
   0x9   :  { %v85_v19 = vadd.f32 %v84_v14, %v83_v15  ;;  %v189_v40 = vsel %vm78_vm0, %v157_v28, 0.0  ;;  %v191_v41 = vsel %vm78_vm0, %v158_v29, 0.0  ;;  %v690_v42 = vunpack.c.h.bf16 %v577_v26 }
   0xa   :  { %v96_v43 = vsel %vm78_vm0, %v672_v30, 0.0  ;;  %v190_v44 = vadd.f32 %v189_v40, %v188_v36  ;;  %v161_v46 = vmul.f32 %v644_v13, %v644_v13  ;;  %v193_v47 = vsel %vm78_vm0, %v159_v33, 0.0 }
   0xb   :  { %v87_v22 = vadd.f32 %v86_v17, %v85_v19  ;;  %v697_v48 = vunpack.c.l.bf16 %v578_v37  ;;  %v98_v49 = vsel %vm78_vm0, %v678_v34, 0.0  ;;  %v162_v53 = vmul.f32 %v648_v16, %v648_v16 }
   0xc   :  { %v192_v50 = vadd.f32 %v191_v41, %v190_v44  ;;  %v195_v54 = vsel %vm78_vm0, %v160_v39, 0.0  ;;  %v707_v55 = vunpack.c.h.bf16 %v578_v37  ;;  %v100_v56 = vsel %vm78_vm0, %v690_v42, 0.0  ;;  %v582_v37 = vld [vmem:[%s1255_s0 + $0x50] sm:$0xff]  }
   0xd   :  { %v89_v27 = vadd.f32 %v88_v21, %v87_v22  ;;  %v163_v59 = vmul.f32 %v655_v20, %v655_v20  ;;  %v197_v60 = vsel %vm78_vm0, %v161_v46, 0.0  ;;  %v714_v61 = vunpack.c.l.bf16 %v579_v51  ;;  %v581_v21 = vld [vmem:[%s1255_s0 + $0x48] sm:$0xff]  }
   0xe   :  { %v194_v57 = vadd.f32 %v193_v47, %v192_v50  ;;  %v102_v62 = vsel %vm78_vm0, %v697_v48, 0.0  ;;  %v164_v5 = vmul.f32 %v659_v23, %v659_v23  ;;  %v199_v8 = vsel %vm78_vm0, %v162_v53, 0.0 }
   0xf   :  { %v91_v32 = vadd.f32 %v90_v24, %v89_v27  ;;  %v724_v9 = vunpack.c.h.bf16 %v579_v51  ;;  %v104_v10 = vsel %vm78_vm0, %v707_v55, 0.0  ;;  %v165_v14 = vmul.f32 %v672_v30, %v672_v30 }
  0x10   :  { %v196_v63 = vadd.f32 %v195_v54, %v194_v57  ;;  %v201_v15 = vsel %vm78_vm0, %v163_v59, 0.0  ;;  %v731_v17 = vunpack.c.l.bf16 %v580_v0  ;;  %v106_v18 = vsel %vm78_vm0, %v714_v61, 0.0 }
  0x11   :  { %v93_v38 = vadd.f32 %v92_v31, %v91_v32  ;;  %v166_v24 = vmul.f32 %v678_v34, %v678_v34  ;;  %v203_v25 = vsel %vm78_vm0, %v164_v5, 0.0  ;;  %v741_v26 = vunpack.c.h.bf16 %v580_v0 }
  0x12   :  { %v198_v11 = vadd.f32 %v197_v60, %v196_v63  ;;  %v108_v27 = vsel %vm78_vm0, %v724_v9, 0.0  ;;  %v167_v31 = vmul.f32 %v690_v42, %v690_v42  ;;  %v205_v32 = vsel %vm78_vm0, %v165_v14, 0.0 }
  0x13   :  { %v95_v45 = vadd.f32 %v94_v35, %v93_v38  ;;  %v748_v33 = vunpack.c.l.bf16 %v581_v21  ;;  %v110_v35 = vsel %vm78_vm0, %v731_v17, 0.0  ;;  %v168_v39 = vmul.f32 %v697_v48, %v697_v48 }
  0x14   :  { %v200_v19 = vadd.f32 %v199_v8, %v198_v11  ;;  %v207_v40 = vsel %vm78_vm0, %v166_v24, 0.0  ;;  %v758_v41 = vunpack.c.h.bf16 %v581_v21  ;;  %v169_v46 = vmul.f32 %v707_v55, %v707_v55  ;;  %v584_v8 = vld [vmem:[%s1255_s0 + $0x60] sm:$0xff]  }
  0x15   :  { %v97_v52 = vadd.f32 %v96_v43, %v95_v45  ;;  %v112_v43 = vsel %vm78_vm0, %v741_v26, 0.0  ;;  %v209_v47 = vsel %vm78_vm0, %v167_v31, 0.0  ;;  %v114_v50 = vsel %vm78_vm0, %v748_v33, 0.0 }
  0x16   :  { %v202_v28 = vadd.f32 %v201_v15, %v200_v19  ;;  %v170_v54 = vmul.f32 %v714_v61, %v714_v61  ;;  %v775_v57 = vunpack.c.h.bf16 %v582_v37  ;;  %v213_v63 = vsel %vm78_vm0, %v169_v46, 0.0  ;;  %v586_v46 = vld [vmem:[%s1255_s0 + $0x70] sm:$0xff]  }
  0x17   :  { %v99_v58 = vadd.f32 %v98_v49, %v97_v52  ;;  %v765_v49 = vunpack.c.l.bf16 %v582_v37  ;;  %v583_v52 = vld [vmem:[%s1255_s0 + $0x58] sm:$0xff]   ;;  %v172_v11 = vmul.f32 %v731_v17, %v731_v17  ;;  %v173_v21 = vmul.f32 %v741_v26, %v741_v26 }
  0x18   :  { %v204_v36 = vadd.f32 %v203_v25, %v202_v28  ;;  %v782_v0 = vunpack.c.l.bf16 %v583_v52  ;;  %v792_v14 = vunpack.c.h.bf16 %v583_v52  ;;  %v120_v15 = vsel %vm78_vm0, %v775_v57, 0.0  ;;  %v585_v28 = vld [vmem:[%s1255_s0 + $0x68] sm:$0xff]  }
  0x19   :  { %v101_v1 = vadd.f32 %v100_v56, %v99_v58  ;;  %v211_v56 = vsel %vm78_vm0, %v168_v39, 0.0  ;;  %v116_v58 = vsel %vm78_vm0, %v758_v41, 0.0  ;;  %v799_v24 = vunpack.c.l.bf16 %v584_v8 }
  0x1a   :  { %v206_v44 = vadd.f32 %v205_v32, %v204_v36  ;;  %v122_v25 = vsel %vm78_vm0, %v782_v0, 0.0  ;;  %v174_v31 = vmul.f32 %v748_v33, %v748_v33  ;;  %v219_v32 = vsel %vm78_vm0, %v172_v11, 0.0 }
  0x1b   :  { %v103_v12 = vadd.f32 %v102_v62, %v101_v1  ;;  %v171_v62 = vmul.f32 %v724_v9, %v724_v9  ;;  %v118_v1 = vsel %vm78_vm0, %v765_v49, 0.0  ;;  %v124_v36 = vsel %vm78_vm0, %v792_v14, 0.0 }
  0x1c   :  { %v208_v51 = vadd.f32 %v207_v40, %v206_v44  ;;  %v175_v39 = vmul.f32 %v758_v41, %v758_v41  ;;  %v221_v40 = vsel %vm78_vm0, %v173_v21, 0.0  ;;  %v126_v44 = vsel %vm78_vm0, %v799_v24, 0.0 }
  0x1d   :  { %v105_v22 = vadd.f32 %v104_v10, %v103_v12  ;;  %v215_v12 = vsel %vm78_vm0, %v170_v54, 0.0  ;;  %v826_v52 = vunpack.c.h.bf16 %v585_v28  ;;  %v843_v11 = vunpack.c.h.bf16 %v586_v46 }
  0x1e   :  { %v210_v59 = vadd.f32 %v209_v47, %v208_v51  ;;  %v223_v51 = vsel %vm78_vm0, %v174_v31, 0.0 }
  0x1f   :  { %v107_v29 = vadd.f32 %v106_v18, %v105_v22  ;;  %v217_v22 = vsel %vm78_vm0, %v171_v62, 0.0 }
  0x20   :  { %v212_v5 = vadd.f32 %v211_v56, %v210_v59  ;;  %v225_v59 = vsel %vm78_vm0, %v175_v39, 0.0 }
  0x21   :  { %v109_v38 = vadd.f32 %v108_v27, %v107_v29 }
  0x22   :  { %v214_v18 = vadd.f32 %v213_v63, %v212_v5 }
  0x23   :  { %v111_v45 = vadd.f32 %v110_v35, %v109_v38  ;;  %v809_v35 = vunpack.c.h.bf16 %v584_v8  ;;  %v178_v8 = vmul.f32 %v782_v0, %v782_v0 }
  0x24   :  { %v216_v27 = vadd.f32 %v215_v12, %v214_v18  ;;  %v132_v12 = vsel %vm78_vm0, %v826_v52, 0.0 }
  0x25   :  { %v113_v53 = vadd.f32 %v112_v43, %v111_v45  ;;  %v816_v43 = vunpack.c.l.bf16 %v585_v28  ;;  %v231_v31 = vsel %vm78_vm0, %v178_v8, 0.0 }
  0x26   :  { %v218_v37 = vadd.f32 %v217_v22, %v216_v27 }
  0x27   :  { %v115_v60 = vadd.f32 %v114_v50, %v113_v53  ;;  %v176_v50 = vmul.f32 %v765_v49, %v765_v49  ;;  %v128_v53 = vsel %vm78_vm0, %v809_v35, 0.0  ;;  %v130_v62 = vsel %vm78_vm0, %v816_v43, 0.0 }
  0x28   :  { %v220_v45 = vadd.f32 %v219_v32, %v218_v37  ;;  %v595_v37 = vmov 256.0  }
  0x29   :  { %v117_v10 = vadd.f32 %v116_v58, %v115_v60  ;;  %v177_v58 = vmul.f32 %v775_v57, %v775_v57  ;;  %v833_v60 = vunpack.c.l.bf16 %v586_v46  ;;  %591 = vrcp.f32 %v595_v37 }
  0x2a   :  { %v222_v54 = vadd.f32 %v221_v40, %v220_v45  ;;  %v181_v40 = vmul.f32 %v809_v35, %v809_v35 }
  0x2b   :  { %v119_v19 = vadd.f32 %v118_v1, %v117_v10  ;;  %v587_v1 = vld [vmem:[%s1255_s0 + $0x78] sm:$0xff]   ;;  %v227_v10 = vsel %vm78_vm0, %v176_v50, 0.0  ;;  %v229_v21 = vsel %vm78_vm0, %v177_v58, 0.0  ;;  %v182_v50 = vmul.f32 %v816_v43, %v816_v43 }
  0x2c   :  { %v224_v63 = vadd.f32 %v223_v51, %v222_v54  ;;  %v850_v22 = vunpack.c.l.bf16 %v587_v1  ;;  %v857_v32 = vunpack.c.h.bf16 %v587_v1  ;;  %v183_v58 = vmul.f32 %v826_v52, %v826_v52 }
  0x2d   :  { %v121_v29 = vadd.f32 %v120_v15, %v119_v19  ;;  %v179_v19 = vmul.f32 %v792_v14, %v792_v14  ;;  %v239_v8 = vsel %vm78_vm0, %v182_v50, 0.0 }
  0x2e   :  { %v226_v15 = vadd.f32 %v225_v59, %v224_v63  ;;  %v138_v45 = vsel %vm78_vm0, %v850_v22, 0.0  ;;  %v237_v59 = vsel %vm78_vm0, %v181_v40, 0.0  ;;  %v187_v37 = vmul.f32 %v857_v32, %v857_v32 }
  0x2f   :  { %v123_v38 = vadd.f32 %v122_v25, %v121_v29  ;;  %v134_v25 = vsel %vm78_vm0, %v833_v60, 0.0  ;;  %v180_v29 = vmul.f32 %v799_v24, %v799_v24 }
  0x30   :  { %v228_v27 = vadd.f32 %v227_v10, %v226_v15 }
  0x31   :  { %v125_v47 = vadd.f32 %v124_v36, %v123_v38  ;;  %v136_v36 = vsel %vm78_vm0, %v843_v11, 0.0  ;;  %v235_v51 = vsel %vm78_vm0, %v180_v29, 0.0 }
  0x32   :  { %v230_v38 = vadd.f32 %v229_v21, %v228_v27  ;;  %v186_v27 = vmul.f32 %v850_v22, %v850_v22 }
  0x33   :  { %v127_v56 = vadd.f32 %v126_v44, %v125_v47  ;;  %v233_v44 = vsel %vm78_vm0, %v179_v19, 0.0  ;;  %v241_v19 = vsel %vm78_vm0, %v183_v58, 0.0 }
  0x34   :  { %v232_v46 = vadd.f32 %v231_v31, %v230_v38  ;;  %v247_v40 = vsel %vm78_vm0, %v186_v27, 0.0 }
  0x35   :  { %v129_v5 = vadd.f32 %v128_v53, %v127_v56  ;;  %v140_v53 = vsel %vm78_vm0, %v857_v32, 0.0 }
  0x36   :  { %v234_v54 = vadd.f32 %v233_v44, %v232_v46 }
  0x37   :  { %v131_v18 = vadd.f32 %v130_v62, %v129_v5  ;;  %v592_v62 = vpop.eup %591  ;;  %v184_v5 = vmul.f32 %v833_v60, %v833_v60 }
  0x38   :  { %v236_v63 = vadd.f32 %v235_v51, %v234_v54  ;;  %v149_v15 = vmul.f32 256.0, %v592_v62  ;;  %vm153_vm1 = vweird.f32 %v592_v62 }
  0x39   :  { %v133_v28 = vadd.f32 %v132_v12, %v131_v18  ;;  %v185_v18 = vmul.f32 %v843_v11, %v843_v11 }
  0x3a   :  { %v238_v10 = vadd.f32 %v237_v59, %v236_v63 }
  0x3b   :  { %v135_v39 = vadd.f32 %v134_v25, %v133_v28  ;;  %v243_v28 = vsel %vm78_vm0, %v184_v5, 0.0  ;;  %v245_v38 = vsel %vm78_vm0, %v185_v18, 0.0 }
  0x3c   :  { %v240_v21 = vadd.f32 %v239_v8, %v238_v10 }
  0x3d   :  { %v137_v47 = vadd.f32 %v136_v36, %v135_v39  ;;  %v150_v36 = vsub.f32 1.0, %v149_v15 }
  0x3e   :  { %v242_v29 = vadd.f32 %v241_v19, %v240_v21 }
  0x3f   :  { %v139_v56 = vadd.f32 %v138_v45, %v137_v47  ;;  %v151_v46 = vmul.f32 %v592_v62, %v150_v36  ;;  %v249_v47 = vsel %vm78_vm0, %v187_v37, 0.0 }
  0x40   :  { %v244_v39 = vadd.f32 %v243_v28, %v242_v29 }
  0x41   :  { %v141_v1 = vadd.f32 %v140_v53, %v139_v56  ;;  %v152_v54 = vadd.f32 %v592_v62, %v151_v46 }
  0x42   :  { %v246_v45 = vadd.f32 %v245_v38, %v244_v39 }
  0x43   :  { %v142_v12 = vrot.slane %v141_v1, 4  ;;  %v154_v63 = vsel %vm153_vm1, %v592_v62, %v152_v54 }
  0x44   :  { %v248_v50 = vadd.f32 %v247_v40, %v246_v45 }
  0x45   :  { %v143_v25 = vadd.f32 %v142_v12, %v141_v1 }
  0x46   :  { %v250_v53 = vadd.f32 %v249_v47, %v248_v50 }
  0x47   :  { %v144_v31 = vrot.slane %v143_v25, 2 }
  0x48   :  { %v251_v56 = vrot.slane %v250_v53, 4 }
  0x49   :  { %v145_v44 = vadd.f32 %v144_v31, %v143_v25 }
  0x4a   :  { %v252_v59 = vadd.f32 %v251_v56, %v250_v53 }
  0x4b   :  { %v146_v51 = vrot.slane %v145_v44, 1 }
  0x4c   :  { %v253_v1 = vrot.slane %v252_v59, 2 }
  0x4d   :  { %v147_v58 = vadd.f32 %v146_v51, %v145_v44 }
  0x4e   :  { %v254_v8 = vadd.f32 %v253_v1, %v252_v59  ;;  %v939_v59 = vld [vmem:[%s1256_s1] ss:$0 sm:$0xff] }
  0x4f   :  { %v888_v5 = vmul.f32 %v154_v63, %v147_v58 }
  0x50   :  { %v255_v10 = vrot.slane %v254_v8, 1 }
  0x51   :  { %v258_v15 = vmul.f32 %v888_v5, %v888_v5  ;;  %v261_v29 = vsub.f32 %v622_v2, %v888_v5  ;;  %v262_v31 = vsub.f32 %v624_v3, %v888_v5  ;;  %v263_v36 = vsub.f32 %v626_v4, %v888_v5 }
  0x52   :  { %v256_v12 = vadd.f32 %v255_v10, %v254_v8  ;;  %v264_v37 = vsub.f32 %v631_v6, %v888_v5  ;;  %v265_v38 = vsub.f32 %v633_v7, %v888_v5  ;;  %v266_v39 = vsub.f32 %v644_v13, %v888_v5 }
  0x53   :  { %v267_v40 = vsub.f32 %v648_v16, %v888_v5  ;;  %v268_v3 = vsub.f32 %v655_v20, %v888_v5  ;;  %v269_v4 = vsub.f32 %v659_v23, %v888_v5  ;;  %v270_v6 = vsub.f32 %v672_v30, %v888_v5 }
  0x54   :  { %v257_v18 = vmul.f32 %v256_v12, %v154_v63  ;;  %v271_v7 = vsub.f32 %v678_v34, %v888_v5  ;;  %v272_v13 = vsub.f32 %v690_v42, %v888_v5  ;;  %v273_v16 = vsub.f32 %v697_v48, %v888_v5 }
  0x55   :  { %v274_v45 = vsub.f32 %v707_v55, %v888_v5  ;;  %v275_v20 = vsub.f32 %v714_v61, %v888_v5  ;;  %v276_v46 = vsub.f32 %v724_v9, %v888_v5  ;;  %v277_v47 = vsub.f32 %v731_v17, %v888_v5 }
  0x56   :  { %v259_v19 = vsub.f32 %v257_v18, %v258_v15  ;;  %v278_v50 = vsub.f32 %v741_v26, %v888_v5  ;;  %v1261_v17 = vsub.f32 %v765_v49, %v888_v5 }
  0x58   :  { %v260_v21 = vmax.f32 %v259_v19, 0.0 }
  0x5a   :  { %v293_v25 = vadd.f32 1e-05, %v260_v21 }
  0x5c   :  { %593 = vrsqrt.f32 %v293_v25  ;;  %vm300_vm2 = vweird.f32 %v293_v25 }
  0x62   :  { %v594_v27 = vpop.eup %593 }
  0x63   :  { %v295_v28 = vmul.f32 %v594_v27, %v293_v25  ;;  %vm301_vm3 = vweird.f32 %v594_v27  ;;  %v961_v25 = vld [vmem:[%s1257_s2] ss:$0 sm:$0xff] }
  0x64   :  { %vm302_vm4 = vmor %vm300_vm2, %vm301_vm3 }
  0x65   :  { %v296_v62 = vmul.f32 %v594_v27, %v295_v28 }
  0x67   :  { %v297_v2 = vmul.f32 0.5, %v296_v62 }
  0x69   :  { %v298_v44 = vsub.f32 1.5, %v297_v2 }
  0x6b   :  { %v299_v53 = vmul.f32 %v594_v27, %v298_v44 }
  0x6d   :  { %v949_v12 = vsel %vm302_vm4, %v594_v27, %v299_v53 }
  0x6e   :  { %v304_v21 = vmul.f32 %v949_v12, %v261_v29  ;;  %v305_v27 = vmul.f32 %v949_v12, %v262_v31  ;;  %v306_v28 = vmul.f32 %v949_v12, %v263_v36  ;;  %v307_v62 = vmul.f32 %v949_v12, %v264_v37 }
  0x6f   :  { %v308_v2 = vmul.f32 %v949_v12, %v265_v38  ;;  %v309_v44 = vmul.f32 %v949_v12, %v266_v39  ;;  %v310_v53 = vmul.f32 %v949_v12, %v267_v40  ;;  %v311_v19 = vmul.f32 %v949_v12, %v268_v3 }
  0x70   :  { %v340_v29 = vmul.f32 %v939_v59, %v304_v21  ;;  %v341_v18 = vmul.f32 %v939_v59, %v305_v27  ;;  %v342_v15 = vmul.f32 %v939_v59, %v306_v28  ;;  %v343_v31 = vmul.f32 %v939_v59, %v307_v62 }
  0x71   :  { %v344_v36 = vmul.f32 %v939_v59, %v308_v2  ;;  %v345_v37 = vmul.f32 %v939_v59, %v309_v44  ;;  %v346_v38 = vmul.f32 %v939_v59, %v310_v53  ;;  %v347_v39 = vmul.f32 %v939_v59, %v311_v19 }
  0x72   :  { %v376_v40 = vadd.f32 %v961_v25, %v340_v29  ;;  %v377_v3 = vadd.f32 %v961_v25, %v341_v18  ;;  %v378_v21 = vadd.f32 %v961_v25, %v342_v15  ;;  %v379_v27 = vadd.f32 %v961_v25, %v343_v31 }
  0x73   :  { %v380_v28 = vadd.f32 %v961_v25, %v344_v36  ;;  %v381_v62 = vadd.f32 %v961_v25, %v345_v37  ;;  %v382_v2 = vadd.f32 %v961_v25, %v346_v38  ;;  %v383_v44 = vadd.f32 %v961_v25, %v347_v39 }
  0x74   :  { %v408_v10 = vmax.f32 %v376_v40, 0.0  ;;  %v409_v53 = vmax.f32 %v377_v3, 0.0  ;;  %v410_v8 = vmax.f32 %v378_v21, 0.0  ;;  %v411_v19 = vmax.f32 %v379_v27, 0.0 }
  0x75   :  { %v412_v1 = vmax.f32 %v380_v28, 0.0  ;;  %v413_v29 = vmax.f32 %v381_v62, 0.0  ;;  %v414_v63 = vmax.f32 %v382_v2, 0.0  ;;  %v415_v18 = vmax.f32 %v383_v44, 0.0 }
  0x76   :  { %v440_v58 = vpack.c.bf16 %v408_v10, %v408_v10  ;;  %v441_v15 = vpack.c.bf16 %v409_v53, %v409_v53  ;;  %v442_v56 = vpack.c.bf16 %v410_v8, %v410_v8  ;;  %v443_v31 = vpack.c.bf16 %v411_v19, %v411_v19 }
  0x77   :  { %v444_v54 = vpack.c.bf16 %v412_v1, %v412_v1  ;;  %v445_v36 = vpack.c.bf16 %v413_v29, %v413_v29  ;;  %v446_v51 = vpack.c.bf16 %v414_v63, %v414_v63  ;;  %v447_v37 = vpack.c.bf16 %v415_v18, %v415_v18 }
  0x78   :  { %473 = vst.msk [vmem:[%s1258_s3] sm:$0xf] %vm472_vm5, %v440_v58  ;;  %v312_v38 = vmul.f32 %v949_v12, %v269_v4  ;;  %v313_v8 = vmul.f32 %v949_v12, %v270_v6  ;;  %v314_v63 = vmul.f32 %v949_v12, %v271_v7  ;;  %v315_v58 = vmul.f32 %v949_v12, %v272_v13 }
  0x79   :  { %474 = vst.msk [vmem:[%s1258_s3 + $0x4] sm:$0xf] %vm472_vm5, %v441_v15  ;;  %v316_v23 = vmul.f32 %v949_v12, %v273_v16  ;;  %v317_v30 = vmul.f32 %v949_v12, %v274_v45  ;;  %v318_v34 = vmul.f32 %v949_v12, %v275_v20  ;;  %v319_v42 = vmul.f32 %v949_v12, %v276_v46 }
  0x7a   :  { %475 = vst.msk [vmem:[%s1258_s3 + $0x8] sm:$0xf] %vm472_vm5, %v442_v56  ;;  %v348_v48 = vmul.f32 %v939_v59, %v312_v38  ;;  %v349_v55 = vmul.f32 %v939_v59, %v313_v8  ;;  %v350_v4 = vmul.f32 %v939_v59, %v314_v63  ;;  %v351_v61 = vmul.f32 %v939_v59, %v315_v58 }
  0x7b   :  { %476 = vst.msk [vmem:[%s1258_s3 + $0xc] sm:$0xf] %vm472_vm5, %v443_v31  ;;  %v352_v9 = vmul.f32 %v939_v59, %v316_v23  ;;  %v353_v6 = vmul.f32 %v939_v59, %v317_v30  ;;  %v354_v7 = vmul.f32 %v939_v59, %v318_v34  ;;  %v355_v13 = vmul.f32 %v939_v59, %v319_v42 }
  0x7c   :  { %477 = vst.msk [vmem:[%s1258_s3 + $0x10] sm:$0xf] %vm472_vm5, %v444_v54  ;;  %v384_v16 = vadd.f32 %v961_v25, %v348_v48  ;;  %v385_v45 = vadd.f32 %v961_v25, %v349_v55  ;;  %v386_v20 = vadd.f32 %v961_v25, %v350_v4  ;;  %v387_v46 = vadd.f32 %v961_v25, %v351_v61 }
  0x7d   :  { %478 = vst.msk [vmem:[%s1258_s3 + $0x14] sm:$0xf] %vm472_vm5, %v445_v36  ;;  %v388_v56 = vadd.f32 %v961_v25, %v352_v9  ;;  %v389_v1 = vadd.f32 %v961_v25, %v353_v6  ;;  %v390_v10 = vadd.f32 %v961_v25, %v354_v7  ;;  %v391_v54 = vadd.f32 %v961_v25, %v355_v13 }
  0x7e   :  { %479 = vst.msk [vmem:[%s1258_s3 + $0x18] sm:$0xf] %vm472_vm5, %v446_v51  ;;  %v416_v39 = vmax.f32 %v384_v16, 0.0  ;;  %v417_v40 = vmax.f32 %v385_v45, 0.0  ;;  %v418_v3 = vmax.f32 %v386_v20, 0.0  ;;  %v419_v21 = vmax.f32 %v387_v46, 0.0 }
  0x7f   :  { %480 = vst.msk [vmem:[%s1258_s3 + $0x1c] sm:$0xf] %vm472_vm5, %v447_v37  ;;  %v420_v27 = vmax.f32 %v388_v56, 0.0  ;;  %v421_v28 = vmax.f32 %v389_v1, 0.0  ;;  %v422_v62 = vmax.f32 %v390_v10, 0.0  ;;  %v423_v2 = vmax.f32 %v391_v54, 0.0 }
  0x80   :  { %v448_v44 = vpack.c.bf16 %v416_v39, %v416_v39  ;;  %v449_v53 = vpack.c.bf16 %v417_v40, %v417_v40  ;;  %v450_v19 = vpack.c.bf16 %v418_v3, %v418_v3  ;;  %v451_v29 = vpack.c.bf16 %v419_v21, %v419_v21 }
  0x81   :  { %v452_v18 = vpack.c.bf16 %v420_v27, %v420_v27  ;;  %v453_v15 = vpack.c.bf16 %v421_v28, %v421_v28  ;;  %v454_v51 = vpack.c.bf16 %v422_v62, %v422_v62  ;;  %v455_v31 = vpack.c.bf16 %v423_v2, %v423_v2 }
  0x82   :  { %481 = vst.msk [vmem:[%s1258_s3 + $0x20] sm:$0xf] %vm472_vm5, %v448_v44  ;;  %v320_v36 = vmul.f32 %v949_v12, %v277_v47  ;;  %v321_v37 = vmul.f32 %v949_v12, %v278_v50  ;;  %v1259_v38 = vsub.f32 %v748_v33, %v888_v5  ;;  %v1260_v63 = vsub.f32 %v758_v41, %v888_v5 }
  0x83   :  { %482 = vst.msk [vmem:[%s1258_s3 + $0x24] sm:$0xf] %vm472_vm5, %v449_v53  ;;  %v324_v26 = vmul.f32 %v949_v12, %v1261_v17  ;;  %v1262_v33 = vsub.f32 %v775_v57, %v888_v5  ;;  %v1263_v41 = vsub.f32 %v782_v0, %v888_v5  ;;  %v1264_v23 = vsub.f32 %v792_v14, %v888_v5 }
  0x84   :  { %v322_v8 = vmul.f32 %v949_v12, %v1259_v38  ;;  %v323_v58 = vmul.f32 %v949_v12, %v1260_v63  ;;  %483 = vst.msk [vmem:[%s1258_s3 + $0x28] sm:$0xf] %vm472_vm5, %v450_v19  ;;  %v356_v49 = vmul.f32 %v939_v59, %v320_v36  ;;  %v357_v57 = vmul.f32 %v939_v59, %v321_v37 }
  0x85   :  { %v325_v47 = vmul.f32 %v949_v12, %v1262_v33  ;;  %v326_v50 = vmul.f32 %v949_v12, %v1263_v41  ;;  %v327_v30 = vmul.f32 %v949_v12, %v1264_v23  ;;  %484 = vst.msk [vmem:[%s1258_s3 + $0x2c] sm:$0xf] %vm472_vm5, %v451_v29  ;;  %v360_v14 = vmul.f32 %v939_v59, %v324_v26 }
  0x86   :  { %v358_v34 = vmul.f32 %v939_v59, %v322_v8  ;;  %v359_v0 = vmul.f32 %v939_v59, %v323_v58  ;;  %485 = vst.msk [vmem:[%s1258_s3 + $0x30] sm:$0xf] %vm472_vm5, %v452_v18  ;;  %v392_v4 = vadd.f32 %v961_v25, %v356_v49  ;;  %v393_v61 = vadd.f32 %v961_v25, %v357_v57 }
  0x87   :  { %v361_v42 = vmul.f32 %v939_v59, %v325_v47  ;;  %v362_v48 = vmul.f32 %v939_v59, %v326_v50  ;;  %v363_v55 = vmul.f32 %v939_v59, %v327_v30  ;;  %486 = vst.msk [vmem:[%s1258_s3 + $0x34] sm:$0xf] %vm472_vm5, %v453_v15  ;;  %v396_v7 = vadd.f32 %v961_v25, %v360_v14 }
  0x88   :  { %v394_v9 = vadd.f32 %v961_v25, %v358_v34  ;;  %v395_v6 = vadd.f32 %v961_v25, %v359_v0  ;;  %487 = vst.msk [vmem:[%s1258_s3 + $0x38] sm:$0xf] %vm472_vm5, %v454_v51  ;;  %v424_v20 = vmax.f32 %v392_v4, 0.0  ;;  %v425_v46 = vmax.f32 %v393_v61, 0.0 }
  0x89   :  { %v397_v13 = vadd.f32 %v961_v25, %v361_v42  ;;  %v398_v16 = vadd.f32 %v961_v25, %v362_v48  ;;  %v399_v45 = vadd.f32 %v961_v25, %v363_v55  ;;  %488 = vst.msk [vmem:[%s1258_s3 + $0x3c] sm:$0xf] %vm472_vm5, %v455_v31  ;;  %v428_v10 = vmax.f32 %v396_v7, 0.0 }
  0x8a   :  { %v426_v56 = vmax.f32 %v394_v9, 0.0  ;;  %v427_v1 = vmax.f32 %v395_v6, 0.0  ;;  %v456_v3 = vpack.c.bf16 %v424_v20, %v424_v20  ;;  %v457_v21 = vpack.c.bf16 %v425_v46, %v425_v46 }
  0x8b   :  { %v429_v54 = vmax.f32 %v397_v13, 0.0  ;;  %v430_v39 = vmax.f32 %v398_v16, 0.0  ;;  %v431_v40 = vmax.f32 %v399_v45, 0.0  ;;  %v460_v62 = vpack.c.bf16 %v428_v10, %v428_v10 }
  0x8c   :  { %v458_v27 = vpack.c.bf16 %v426_v56, %v426_v56  ;;  %v459_v28 = vpack.c.bf16 %v427_v1, %v427_v1  ;;  %489 = vst.msk [vmem:[%s1258_s3 + $0x40] sm:$0xf] %vm472_vm5, %v456_v3  ;;  %v1265_v19 = vsub.f32 %v799_v24, %v888_v5  ;;  %v1266_v18 = vsub.f32 %v809_v35, %v888_v5 }
  0x8d   :  { %v461_v2 = vpack.c.bf16 %v429_v54, %v429_v54  ;;  %v462_v44 = vpack.c.bf16 %v430_v39, %v430_v39  ;;  %v463_v53 = vpack.c.bf16 %v431_v40, %v431_v40  ;;  %v1267_v51 = vsub.f32 %v816_v43, %v888_v5  ;;  %490 = vst.msk [vmem:[%s1258_s3 + $0x44] sm:$0xf] %vm472_vm5, %v457_v21 }
  0x8e   :  { %v328_v29 = vmul.f32 %v949_v12, %v1265_v19  ;;  %v329_v15 = vmul.f32 %v949_v12, %v1266_v18  ;;  %v1268_v36 = vsub.f32 %v826_v52, %v888_v5  ;;  %v1269_v24 = vsub.f32 %v833_v60, %v888_v5  ;;  %491 = vst.msk [vmem:[%s1258_s3 + $0x48] sm:$0xf] %vm472_vm5, %v458_v27 }
  0x8f   :  { %v330_v31 = vmul.f32 %v949_v12, %v1267_v51  ;;  %v290_v43 = vsub.f32 %v843_v11, %v888_v5  ;;  %v291_v38 = vsub.f32 %v850_v22, %v888_v5  ;;  %v292_v52 = vsub.f32 %v857_v32, %v888_v5  ;;  %492 = vst.msk [vmem:[%s1258_s3 + $0x4c] sm:$0xf] %vm472_vm5, %v459_v28 }
  0x90   :  { %v331_v37 = vmul.f32 %v949_v12, %v1268_v36  ;;  %v332_v35 = vmul.f32 %v949_v12, %v1269_v24  ;;  %v364_v8 = vmul.f32 %v939_v59, %v328_v29  ;;  %v365_v60 = vmul.f32 %v939_v59, %v329_v15  ;;  %493 = vst.msk [vmem:[%s1258_s3 + $0x50] sm:$0xf] %vm472_vm5, %v460_v62 }
  0x91   :  { %v366_v63 = vmul.f32 %v939_v59, %v330_v31  ;;  %v333_v22 = vmul.f32 %v949_v12, %v290_v43  ;;  %v334_v32 = vmul.f32 %v949_v12, %v291_v38  ;;  %v335_v5 = vmul.f32 %v949_v12, %v292_v52  ;;  %494 = vst.msk [vmem:[%s1258_s3 + $0x54] sm:$0xf] %vm472_vm5, %v461_v2 }
  0x92   :  { %v367_v58 = vmul.f32 %v939_v59, %v331_v37  ;;  %v368_v11 = vmul.f32 %v939_v59, %v332_v35  ;;  %v400_v17 = vadd.f32 %v961_v25, %v364_v8  ;;  %v401_v26 = vadd.f32 %v961_v25, %v365_v60  ;;  %495 = vst.msk [vmem:[%s1258_s3 + $0x58] sm:$0xf] %vm472_vm5, %v462_v44 }
  0x93   :  { %v402_v33 = vadd.f32 %v961_v25, %v366_v63  ;;  %v369_v41 = vmul.f32 %v939_v59, %v333_v22  ;;  %v370_v50 = vmul.f32 %v939_v59, %v334_v32  ;;  %v371_v23 = vmul.f32 %v939_v59, %v335_v5  ;;  %496 = vst.msk [vmem:[%s1258_s3 + $0x5c] sm:$0xf] %vm472_vm5, %v463_v53 }
  0x94   :  { %v403_v47 = vadd.f32 %v961_v25, %v367_v58  ;;  %v404_v12 = vadd.f32 %v961_v25, %v368_v11  ;;  %v432_v30 = vmax.f32 %v400_v17, 0.0  ;;  %v433_v49 = vmax.f32 %v401_v26, 0.0 }
  0x95   :  { %v434_v57 = vmax.f32 %v402_v33, 0.0  ;;  %v405_v14 = vadd.f32 %v961_v25, %v369_v41  ;;  %v406_v42 = vadd.f32 %v961_v25, %v370_v50  ;;  %v407_v59 = vadd.f32 %v961_v25, %v371_v23 }
  0x96   :  { %v435_v34 = vmax.f32 %v403_v47, 0.0  ;;  %v436_v0 = vmax.f32 %v404_v12, 0.0  ;;  %v464_v48 = vpack.c.bf16 %v432_v30, %v432_v30  ;;  %v465_v55 = vpack.c.bf16 %v433_v49, %v433_v49 }
  0x97   :  { %v466_v4 = vpack.c.bf16 %v434_v57, %v434_v57  ;;  %v437_v9 = vmax.f32 %v405_v14, 0.0  ;;  %v438_v6 = vmax.f32 %v406_v42, 0.0  ;;  %v439_v7 = vmax.f32 %v407_v59, 0.0 }
  0x98   :  { %v467_v61 = vpack.c.bf16 %v435_v34, %v435_v34  ;;  %497 = vst.msk [vmem:[%s1258_s3 + $0x60] sm:$0xf] %vm472_vm5, %v464_v48  ;;  %v468_v13 = vpack.c.bf16 %v436_v0, %v436_v0 }
  0x99   :  { %498 = vst.msk [vmem:[%s1258_s3 + $0x64] sm:$0xf] %vm472_vm5, %v465_v55  ;;  %v469_v16 = vpack.c.bf16 %v437_v9, %v437_v9  ;;  %v470_v25 = vpack.c.bf16 %v438_v6, %v438_v6  ;;  %v471_v45 = vpack.c.bf16 %v439_v7, %v439_v7 }
  0x9a   :  { %499 = vst.msk [vmem:[%s1258_s3 + $0x68] sm:$0xf] %vm472_vm5, %v466_v4 }
  0x9b   :  { %500 = vst.msk [vmem:[%s1258_s3 + $0x6c] sm:$0xf] %vm472_vm5, %v467_v61 }
  0x9c   :  { %501 = vst.msk [vmem:[%s1258_s3 + $0x70] sm:$0xf] %vm472_vm5, %v468_v13 }
  0x9d   :  { %502 = vst.msk [vmem:[%s1258_s3 + $0x74] sm:$0xf] %vm472_vm5, %v469_v16 }
  0x9e   :  { %503 = vst.msk [vmem:[%s1258_s3 + $0x78] sm:$0xf] %vm472_vm5, %v470_v25 }
  0x9f   :  { %504 = vst.msk [vmem:[%s1258_s3 + $0x7c] sm:$0xf] %vm472_vm5, %v471_v45 }

// kernel: generator_forward.10
= control target key start
LH: loop header
LB: loop body
LE: loop exit
PB: predicated region body
PF: predicated region fallthrough
CT: control target
= control target key end

     0   :  { %vm156_vm0 = vcmask 523264   ;;  %vm326_vm1 = vcmask 125952   ;;  %s710_s1 = inlined_call_operand.vmem [shape: bf16[64,16], index: 1, kind: input, shape index: {}]   ;;  %s711_s0 = inlined_call_operand.vmem [shape: bf16[256,64], index: 0, kind: input, shape index: {}]   ;;  %s712_s2 = inlined_call_operand.vmem [shape: bf16[256,16], index: 2, kind: output, shape index: {}]  }
   0x1   :  { %v478_v0 = vld [vmem:[%s710_s1 + $0x18] sm:$0xff]  ;;  %v477_v1 = vld [vmem:[%s710_s1 + $0x10] sm:$0xff]  ;;  %v476_v2 = vld [vmem:[%s710_s1 + $0x8] sm:$0xff] }
   0x2   :  { %209 = vmatpush.bf16.msra.mxu0 %v478_v0  ;;  %479 = vmatpush.bf16.msra.mxu1 %v478_v0  ;;  %v475_v3 = vld [vmem:[%s710_s1] sm:$0xff]  ;;  %v460_v8 = vld [vmem:[%s711_s0 + $0x8] sm:$0xff]  ;;  %v461_v12 = vld [vmem:[%s711_s0 + $0x10] sm:$0xff] }
   0x3   :  { %480 = vmatpush.bf16.msra.mxu2 %v478_v0  ;;  %481 = vmatpush.bf16.msra.mxu3 %v478_v0  ;;  %v459_v4 = vld [vmem:[%s711_s0] sm:$0xff]  ;;  %v464_v9 = vld [vmem:[%s711_s0 + $0x28] sm:$0xff]  ;;  %v465_v13 = vld [vmem:[%s711_s0 + $0x30] sm:$0xff] }
   0x4   :  { %v463_v5 = vld [vmem:[%s711_s0 + $0x20] sm:$0xff]  ;;  %v468_v10 = vld [vmem:[%s711_s0 + $0x48] sm:$0xff]  ;;  %v469_v14 = vld [vmem:[%s711_s0 + $0x50] sm:$0xff] }
   0x5   :  { %v467_v6 = vld [vmem:[%s711_s0 + $0x40] sm:$0xff]  ;;  %v472_v11 = vld [vmem:[%s711_s0 + $0x68] sm:$0xff]  ;;  %v473_v15 = vld [vmem:[%s711_s0 + $0x70] sm:$0xff] }
   0x6   :  { %210 = vmatpush.bf16.msra.mxu0 %v477_v1  ;;  %482 = vmatpush.bf16.msra.mxu1 %v477_v1  ;;  %v471_v7 = vld [vmem:[%s711_s0 + $0x60] sm:$0xff]  ;;  %v462_v16 = vld [vmem:[%s711_s0 + $0x18] sm:$0xff] }
   0x7   :  { %483 = vmatpush.bf16.msra.mxu2 %v477_v1  ;;  %484 = vmatpush.bf16.msra.mxu3 %v477_v1  ;;  %v466_v17 = vld [vmem:[%s711_s0 + $0x38] sm:$0xff] }
   0x8   :  { %v470_v18 = vld [vmem:[%s711_s0 + $0x58] sm:$0xff] }
   0x9   :  { %v474_v19 = vld [vmem:[%s711_s0 + $0x78] sm:$0xff] }
   0xa   :  { %211 = vmatpush.bf16.msra.mxu0 %v476_v2  ;;  %485 = vmatpush.bf16.msra.mxu1 %v476_v2 }
   0xb   :  { %486 = vmatpush.bf16.msra.mxu2 %v476_v2  ;;  %487 = vmatpush.bf16.msra.mxu3 %v476_v2 }
   0xe   :  { %212 = vmatpush.bf16.msra.mxu0 %v475_v3  ;;  %488 = vmatpush.bf16.msra.mxu1 %v475_v3 }
   0xf   :  { %489 = vmatpush.bf16.msra.mxu2 %v475_v3  ;;  %490 = vmatpush.bf16.msra.mxu3 %v475_v3 }
  0x11   :  { %443 = vmatmul.msk.bf16.vlgmr.msra.gmra.mxu0 %vm156_vm0, %v459_v4  ;;  %447 = vmatmul.msk.bf16.vlgmr.msra.gmra.mxu1 %vm156_vm0, %v463_v5 }
  0x12   :  { %451 = vmatmul.msk.bf16.vlgmr.msra.gmra.mxu2 %vm156_vm0, %v467_v6  ;;  %455 = vmatmul.msk.bf16.vlgmr.msra.gmra.mxu3 %vm156_vm0, %v471_v7 }
  0x21   :  { %444 = vmatmul.msk.bf16.gmra.mxu0 %vm156_vm0, %v460_v8  ;;  %448 = vmatmul.msk.bf16.gmra.mxu1 %vm156_vm0, %v464_v9 }
  0x22   :  { %452 = vmatmul.msk.bf16.gmra.mxu2 %vm156_vm0, %v468_v10  ;;  %456 = vmatmul.msk.bf16.gmra.mxu3 %vm156_vm0, %v472_v11 }
  0x31   :  { %445 = vmatmul.msk.bf16.gmra.mxu0 %vm156_vm0, %v461_v12  ;;  %449 = vmatmul.msk.bf16.gmra.mxu1 %vm156_vm0, %v465_v13 }
  0x32   :  { %453 = vmatmul.msk.bf16.gmra.mxu2 %vm156_vm0, %v469_v14  ;;  %457 = vmatmul.msk.bf16.gmra.mxu3 %vm156_vm0, %v473_v15 }
  0x41   :  { %446 = vmatmul.msk.bf16.gmra.mxu0 %vm156_vm0, %v462_v16  ;;  %450 = vmatmul.msk.bf16.gmra.mxu1 %vm156_vm0, %v466_v17 }
  0x42   :  { %454 = vmatmul.msk.bf16.gmra.mxu2 %vm156_vm0, %v470_v18  ;;  %458 = vmatmul.msk.bf16.gmra.mxu3 %vm156_vm0, %v474_v19 }
  0x8e   :  { %v214_v20 = vpop.f32.mrf.mxu0  ;;  %v234_v21 = vpop.f32.mrf.mxu1 }
  0x8f   :  { %v294_v22 = vpack.c.bf16 %v214_v20, %v214_v20  ;;  %v302_v23 = vpack.c.bf16 %v234_v21, %v234_v21 }
  0x91   :  { %327 = vst.msk [vmem:[%s712_s2] sm:$0xf] %vm326_vm1, %v294_v22 }
  0x92   :  { %335 = vst.msk [vmem:[%s712_s2 + $0x20] sm:$0xf] %vm326_vm1, %v302_v23 }
  0x95   :  { %v254_v24 = vpop.f32.mrf.mxu2  ;;  %v274_v25 = vpop.f32.mrf.mxu3 }
  0x96   :  { %v310_v26 = vpack.c.bf16 %v254_v24, %v254_v24  ;;  %v318_v27 = vpack.c.bf16 %v274_v25, %v274_v25  ;;  %v216_v28 = vpop.f32.mrf.mxu0  ;;  %v236_v29 = vpop.f32.mrf.mxu1 }
  0x97   :  { %v295_v30 = vpack.c.bf16 %v216_v28, %v216_v28  ;;  %v303_v31 = vpack.c.bf16 %v236_v29, %v236_v29 }
  0x98   :  { %343 = vst.msk [vmem:[%s712_s2 + $0x40] sm:$0xf] %vm326_vm1, %v310_v26 }
  0x99   :  { %351 = vst.msk [vmem:[%s712_s2 + $0x60] sm:$0xf] %vm326_vm1, %v318_v27 }
  0x9a   :  { %328 = vst.msk [vmem:[%s712_s2 + $0x4] sm:$0xf] %vm326_vm1, %v295_v30 }
  0x9b   :  { %336 = vst.msk [vmem:[%s712_s2 + $0x24] sm:$0xf] %vm326_vm1, %v303_v31 }
  0x9d   :  { %v256_v32 = vpop.f32.mrf.mxu2  ;;  %v276_v33 = vpop.f32.mrf.mxu3 }
  0x9e   :  { %v311_v34 = vpack.c.bf16 %v256_v32, %v256_v32  ;;  %v319_v35 = vpack.c.bf16 %v276_v33, %v276_v33  ;;  %v219_v36 = vpop.f32.mrf.mxu0  ;;  %v239_v37 = vpop.f32.mrf.mxu1 }
  0x9f   :  { %v296_v38 = vpack.c.bf16 %v219_v36, %v219_v36  ;;  %v304_v39 = vpack.c.bf16 %v239_v37, %v239_v37 }
  0xa0   :  { %344 = vst.msk [vmem:[%s712_s2 + $0x44] sm:$0xf] %vm326_vm1, %v311_v34 }
  0xa1   :  { %352 = vst.msk [vmem:[%s712_s2 + $0x64] sm:$0xf] %vm326_vm1, %v319_v35 }
  0xa2   :  { %329 = vst.msk [vmem:[%s712_s2 + $0x8] sm:$0xf] %vm326_vm1, %v296_v38 }
  0xa3   :  { %337 = vst.msk [vmem:[%s712_s2 + $0x28] sm:$0xf] %vm326_vm1, %v304_v39 }
  0xa5   :  { %v259_v40 = vpop.f32.mrf.mxu2  ;;  %v279_v41 = vpop.f32.mrf.mxu3 }
  0xa6   :  { %v312_v42 = vpack.c.bf16 %v259_v40, %v259_v40  ;;  %v320_v43 = vpack.c.bf16 %v279_v41, %v279_v41  ;;  %v221_v44 = vpop.f32.mrf.mxu0  ;;  %v241_v45 = vpop.f32.mrf.mxu1 }
  0xa7   :  { %v297_v46 = vpack.c.bf16 %v221_v44, %v221_v44  ;;  %v305_v47 = vpack.c.bf16 %v241_v45, %v241_v45 }
  0xa8   :  { %345 = vst.msk [vmem:[%s712_s2 + $0x48] sm:$0xf] %vm326_vm1, %v312_v42 }
  0xa9   :  { %353 = vst.msk [vmem:[%s712_s2 + $0x68] sm:$0xf] %vm326_vm1, %v320_v43 }
  0xaa   :  { %330 = vst.msk [vmem:[%s712_s2 + $0xc] sm:$0xf] %vm326_vm1, %v297_v46 }
  0xab   :  { %338 = vst.msk [vmem:[%s712_s2 + $0x2c] sm:$0xf] %vm326_vm1, %v305_v47 }
  0xad   :  { %v261_v48 = vpop.f32.mrf.mxu2  ;;  %v281_v49 = vpop.f32.mrf.mxu3 }
  0xae   :  { %v313_v50 = vpack.c.bf16 %v261_v48, %v261_v48  ;;  %v321_v51 = vpack.c.bf16 %v281_v49, %v281_v49  ;;  %v224_v52 = vpop.f32.mrf.mxu0  ;;  %v244_v53 = vpop.f32.mrf.mxu1 }
  0xaf   :  { %v298_v54 = vpack.c.bf16 %v224_v52, %v224_v52  ;;  %v306_v55 = vpack.c.bf16 %v244_v53, %v244_v53 }
  0xb0   :  { %346 = vst.msk [vmem:[%s712_s2 + $0x4c] sm:$0xf] %vm326_vm1, %v313_v50 }
  0xb1   :  { %354 = vst.msk [vmem:[%s712_s2 + $0x6c] sm:$0xf] %vm326_vm1, %v321_v51 }
  0xb2   :  { %331 = vst.msk [vmem:[%s712_s2 + $0x10] sm:$0xf] %vm326_vm1, %v298_v54 }
  0xb3   :  { %339 = vst.msk [vmem:[%s712_s2 + $0x30] sm:$0xf] %vm326_vm1, %v306_v55 }
  0xb5   :  { %v264_v56 = vpop.f32.mrf.mxu2  ;;  %v284_v57 = vpop.f32.mrf.mxu3 }
  0xb6   :  { %v314_v58 = vpack.c.bf16 %v264_v56, %v264_v56  ;;  %v322_v59 = vpack.c.bf16 %v284_v57, %v284_v57  ;;  %v226_v60 = vpop.f32.mrf.mxu0  ;;  %v246_v61 = vpop.f32.mrf.mxu1 }
  0xb7   :  { %v299_v62 = vpack.c.bf16 %v226_v60, %v226_v60  ;;  %v307_v63 = vpack.c.bf16 %v246_v61, %v246_v61 }
  0xb8   :  { %347 = vst.msk [vmem:[%s712_s2 + $0x50] sm:$0xf] %vm326_vm1, %v314_v58 }
  0xb9   :  { %355 = vst.msk [vmem:[%s712_s2 + $0x70] sm:$0xf] %vm326_vm1, %v322_v59 }
  0xba   :  { %332 = vst.msk [vmem:[%s712_s2 + $0x14] sm:$0xf] %vm326_vm1, %v299_v62 }
  0xbb   :  { %340 = vst.msk [vmem:[%s712_s2 + $0x34] sm:$0xf] %vm326_vm1, %v307_v63 }
  0xbd   :  { %v266_v0 = vpop.f32.mrf.mxu2  ;;  %v286_v1 = vpop.f32.mrf.mxu3 }
  0xbe   :  { %v315_v2 = vpack.c.bf16 %v266_v0, %v266_v0  ;;  %v323_v3 = vpack.c.bf16 %v286_v1, %v286_v1  ;;  %v229_v4 = vpop.f32.mrf.mxu0  ;;  %v249_v5 = vpop.f32.mrf.mxu1 }
  0xbf   :  { %v300_v6 = vpack.c.bf16 %v229_v4, %v229_v4  ;;  %v308_v7 = vpack.c.bf16 %v249_v5, %v249_v5 }
  0xc0   :  { %348 = vst.msk [vmem:[%s712_s2 + $0x54] sm:$0xf] %vm326_vm1, %v315_v2 }
  0xc1   :  { %356 = vst.msk [vmem:[%s712_s2 + $0x74] sm:$0xf] %vm326_vm1, %v323_v3 }
  0xc2   :  { %333 = vst.msk [vmem:[%s712_s2 + $0x18] sm:$0xf] %vm326_vm1, %v300_v6 }
  0xc3   :  { %341 = vst.msk [vmem:[%s712_s2 + $0x38] sm:$0xf] %vm326_vm1, %v308_v7 }
  0xc5   :  { %v269_v8 = vpop.f32.mrf.mxu2  ;;  %v289_v9 = vpop.f32.mrf.mxu3 }
  0xc6   :  { %v316_v10 = vpack.c.bf16 %v269_v8, %v269_v8  ;;  %v324_v11 = vpack.c.bf16 %v289_v9, %v289_v9  ;;  %v231_v12 = vpop.f32.mrf.mxu0  ;;  %v251_v13 = vpop.f32.mrf.mxu1 }
  0xc7   :  { %v301_v14 = vpack.c.bf16 %v231_v12, %v231_v12  ;;  %v309_v15 = vpack.c.bf16 %v251_v13, %v251_v13 }
  0xc8   :  { %349 = vst.msk [vmem:[%s712_s2 + $0x58] sm:$0xf] %vm326_vm1, %v316_v10 }
  0xc9   :  { %357 = vst.msk [vmem:[%s712_s2 + $0x78] sm:$0xf] %vm326_vm1, %v324_v11 }
  0xca   :  { %334 = vst.msk [vmem:[%s712_s2 + $0x1c] sm:$0xf] %vm326_vm1, %v301_v14 }
  0xcb   :  { %342 = vst.msk [vmem:[%s712_s2 + $0x3c] sm:$0xf] %vm326_vm1, %v309_v15 }
  0xcd   :  { %v271_v16 = vpop.f32.mrf.mxu2  ;;  %v291_v17 = vpop.f32.mrf.mxu3 }
  0xce   :  { %v317_v18 = vpack.c.bf16 %v271_v16, %v271_v16  ;;  %v325_v19 = vpack.c.bf16 %v291_v17, %v291_v17 }
  0xd0   :  { %350 = vst.msk [vmem:[%s712_s2 + $0x5c] sm:$0xf] %vm326_vm1, %v317_v18 }
  0xd1   :  { %358 = vst.msk [vmem:[%s712_s2 + $0x7c] sm:$0xf] %vm326_vm1, %v325_v19 }

// kernel: generator_forward.11
= control target key start
LH: loop header
LB: loop body
LE: loop exit
PB: predicated region body
PF: predicated region fallthrough
CT: control target
= control target key end

     0   :  { %s184_s0 = inlined_call_operand.vmem [shape: bf16[64,16], index: 0, kind: input, shape index: {}]   ;;  %s185_s1 = inlined_call_operand.vmem [shape: f32[1,16], index: 1, kind: input, shape index: {}]   ;;  %s186_s2 = inlined_call_operand.hbm [shape: f32[64,16], index: 2, kind: output, shape index: {}]  }
   0x1   :  { %v76_v0 = vld [vmem:[%s184_s0] sm:$0xff]   ;;  %v91_v4 = vld [vmem:[%s184_s0 + $0x8] sm:$0xff]   ;;  %v92_v5 = vld [vmem:[%s184_s0 + $0x10] sm:$0xff]  }
   0x2   :  { %v97_v1 = vld [vmem:[%s185_s1] ss:$0 sm:$0xff]  ;;  %v77_v2 = vunpack.c.l.bf16 %v76_v0  ;;  %v78_v3 = vunpack.c.h.bf16 %v76_v0  ;;  %v93_v6 = vld [vmem:[%s184_s0 + $0x18] sm:$0xff]   ;;  %v81_v7 = vunpack.c.l.bf16 %v91_v4  ;;  %v82_v8 = vunpack.c.h.bf16 %v91_v4 }
   0x3   :  { %v85_v9 = vunpack.c.l.bf16 %v92_v5  ;;  %v86_v10 = vunpack.c.h.bf16 %v92_v5 }
   0x4   :  { %7 = vsyncpa [#allocation3], 0  ;;  %v32_v11 = vadd.f32 %v97_v1, %v77_v2  ;;  %v33_v12 = vadd.f32 %v97_v1, %v78_v3  ;;  %v89_v13 = vunpack.c.l.bf16 %v93_v6  ;;  %v34_v14 = vadd.f32 %v97_v1, %v81_v7  ;;  %s140_s0 = smov [#allocation2]   ;;  %s63_s21 = sshll.u32 %s186_s2, 4  ;;  %s64_s21 = int_to_ptr.hbm [resolvable:$true] %s63_s21 }
   0x5   :  { %v35_v15 = vadd.f32 %v97_v1, %v82_v8  ;;  %v90_v16 = vunpack.c.h.bf16 %v93_v6  ;;  %v36_v17 = vadd.f32 %v97_v1, %v85_v9  ;;  %v37_v18 = vadd.f32 %v97_v1, %v86_v10  ;;  %s61_s1 = sshll.u32 %s140_s0, 4  ;;  %s141_s2 = smov 128   ;;  %s62_s1 = int_to_ptr.vmem [resolvable:$true] %s61_s1 }
   0x6   :  { %98 = vtanh.f32 %v32_v11  ;;  %v38_v19 = vadd.f32 %v97_v1, %v89_v13  ;;  %vm48_vm0 = vcmask 130048   ;;  %s142_s22 = smov 8  }
   0x7   :  { %100 = vtanh.f32 %v33_v12  ;;  %v39_v20 = vadd.f32 %v97_v1, %v90_v16 }
   0x8   :  { %102 = vtanh.f32 %v34_v14 }
   0x9   :  { %104 = vtanh.f32 %v35_v15 }
   0xa   :  { %106 = vtanh.f32 %v36_v17 }
   0xb   :  { %108 = vtanh.f32 %v37_v18 }
   0xc   :  { %v99_v21 = vpop.eup %98  ;;  %110 = vtanh.f32 %v38_v19 }
   0xd   :  { %v101_v22 = vpop.eup %100  ;;  %49 = vst.msk [vmem:[#allocation2] sm:$0xff] %vm48_vm0, %v99_v21  ;;  %112 = vtanh.f32 %v39_v20 }
   0xe   :  { %v103_v23 = vpop.eup %102  ;;  %50 = vst.msk [vmem:[#allocation2 + $0x8] sm:$0xff] %vm48_vm0, %v101_v22 }
   0xf   :  { %v105_v24 = vpop.eup %104  ;;  %51 = vst.msk [vmem:[#allocation2 + $0x10] sm:$0xff] %vm48_vm0, %v103_v23 }
  0x10   :  { %v107_v25 = vpop.eup %106  ;;  %52 = vst.msk [vmem:[#allocation2 + $0x18] sm:$0xff] %vm48_vm0, %v105_v24 }
  0x11   :  { %v109_v26 = vpop.eup %108  ;;  %53 = vst.msk [vmem:[#allocation2 + $0x20] sm:$0xff] %vm48_vm0, %v107_v25 }
  0x12   :  { %v111_v27 = vpop.eup %110  ;;  %54 = vst.msk [vmem:[#allocation2 + $0x28] sm:$0xff] %vm48_vm0, %v109_v26 }
  0x13   :  { %v113_v28 = vpop.eup %112  ;;  %55 = vst.msk [vmem:[#allocation2 + $0x30] sm:$0xff] %vm48_vm0, %v111_v27 }
  0x14   :  { %56 = vst.msk [vmem:[#allocation2 + $0x38] sm:$0xff] %vm48_vm0, %v113_v28 }
  0x15   :  { %69 = dma.vmem_to_hbm [thread:$0]  %s62_s1, 1024, %s64_s21, [#allocation3], %s141_s2, %s141_s2, %s142_s22  }
  0x16   :  { %138 = dma.done.wait [#allocation3], 1024  }
  0x17   :  { %139 = vsyncadd [#allocation3], 4294966272 }
  0x18   :  { %74 = vsyncpa [#allocation3], 1 }

</bundles_post_ra>
